<compile_context>
chip_gen: v7x
topology: tpu7x:2x2x1
jax: 0.10.0
libtpu: 0.0.40
codegen_flags: <defaults>
</compile_context>

<pallas_src>
import functools
import numpy as np
import jax
import jax.numpy as jnp
from jax.experimental import pallas as pl
from jax.experimental.pallas import tpu as pltpu

V_THRESHOLD = 1.0
V_RESET = 0.0
TAU = 2.0
B_TILE = 8   # samples per grid step; conv1 M = 28*B_TILE = 224, conv2 M = 112


# ------------------------------ Pallas kernel ------------------------------

def _fused_kernel(xcat_ref, a_ref, b1_ref, ph1_ref, pw1_ref,
                  bb_ref, b2_ref, ph2_ref, pw2_ref,
                  w1c_ref, fb1_ref, w4_ref, fb2_ref,
                  out_ref, *, tau, v_threshold, v_reset):
    f32 = jnp.float32
    bf16 = jnp.bfloat16
    B = B_TILE

    # ---- conv1 (1->32, k3, s1, p1): one bf16 matmul, row taps pre-stacked in K
    # xcat: (28B, 90), rows interleaved as h*B + b; a: (90, 896=28*32)
    y1 = jnp.dot(xcat_ref[...], a_ref[...],
                 preferred_element_type=f32) + b1_ref[...]          # (28B, 896) f32

    # ---- avg_pool2d(2) #1 (+ zero border ring for conv2), bf16 matmuls ----
    y1b = y1.astype(bf16)
    t1 = jnp.dot(ph1_ref[...], y1b,
                 preferred_element_type=f32).astype(bf16)           # (16B, 896)
    p1 = jnp.dot(t1, pw1_ref[...], preferred_element_type=f32)      # (16B, 512) f32

    # ---- conv2 (32->32, k3, s1, p1): 3 row taps = aligned static row slices,
    #      concatenated along K -> single bf16 matmul with K = 1536 ----
    p1c = jnp.concatenate(
        [p1[0:14 * B], p1[B:15 * B], p1[2 * B:16 * B]],
        axis=1).astype(bf16)                                        # (14B, 1536)
    y2 = jnp.dot(p1c, bb_ref[...],
                 preferred_element_type=f32) + b2_ref[...]          # (14B, 448) f32

    # ---- avg_pool2d(2) #2 ----
    y2b = y2.astype(bf16)
    t2 = jnp.dot(ph2_ref[...], y2b,
                 preferred_element_type=f32).astype(bf16)           # (7B, 448)
    p2 = jnp.dot(t2, pw2_ref[...],
                 preferred_element_type=f32).astype(bf16)           # (7B, 224)

    # ---- fc1: per pooled row h, an M=B_TILE matmul against the pre-permuted
    #      weight slab (rows already in the kernel's (h, w, c) flatten order)
    h1 = fb1_ref[...]                                               # (1, 128) f32
    for h in range(7):
        h1 = h1 + jnp.dot(p2[h * B:(h + 1) * B, :], w1c_ref[h],
                          preferred_element_type=f32)               # (B, 128) f32

    # ---- fc2 (zero-padded to a lane-dense 128-wide output) + single-step LIF
    h2 = jnp.dot(h1, w4_ref[...],
                 preferred_element_type=f32) + fb2_ref[...]         # (B, 128) f32
    v = v_reset + h2 * (1.0 / tau)
    out_ref[...] = jnp.where(v >= v_threshold, 1.0, 0.0).astype(out_ref.dtype)


# --------------------------- constant preparation --------------------------

def _build_constants(params):
    f32 = jnp.float32
    bf16 = jnp.bfloat16
    B = B_TILE

    w1 = params["conv1_w"].astype(f32)            # (32, 1, 3, 3)
    b1 = params["conv1_b"].reshape(-1)            # (32,)
    w2 = params["conv2_w"].astype(f32)            # (32, 32, 3, 3)
    b2 = params["conv2_b"].reshape(-1)            # (32,)
    fw1 = params["fc1_w"].astype(f32)             # (128, 1568) torch (out, in)
    fb1 = params["fc1_b"].reshape(1, -1).astype(f32)
    fw2 = params["fc2_w"].astype(f32)             # (10, 128)
    fb2 = params["fc2_b"].reshape(1, -1).astype(f32)

    # column-tap selection matrices (static 0/1)
    s1 = np.zeros((3, 30, 28), np.float32)
    for dx in range(3):
        for w in range(28):
            s1[dx, w + dx, w] = 1.0
    s2 = np.zeros((3, 16, 14), np.float32)
    for dx in range(3):
        for w in range(14):
            s2[dx, w + dx, w] = 1.0

    # conv1 banded weight, row taps stacked along K: (90, 896)
    a = jnp.einsum("xpw,oyx->ypwo", jnp.asarray(s1), w1[:, 0, :, :])
    a = a.reshape(3 * 30, 28 * 32).astype(bf16)
    # conv2 banded weight, row taps stacked along K: (1536, 448)
    bb = jnp.einsum("xpw,oiyx->ypiwo", jnp.asarray(s2), w2)
    bb = bb.reshape(3 * 16 * 32, 14 * 32).astype(bf16)

    # row-pool matrices (entries 0/0.5 -> exact in bf16); pool-1 also emits the
    # zero border rows conv2 needs.  kron(., I_B) matches the interleaved
    # (row, sample) stacking of the M dimension.
    ph1 = np.zeros((16, 28), np.float32)
    for hp in range(1, 15):
        ph1[hp, 2 * (hp - 1)] = 0.5
        ph1[hp, 2 * (hp - 1) + 1] = 0.5
    ph2 = np.zeros((7, 14), np.float32)
    for ho in range(7):
        ph2[ho, 2 * ho] = 0.5
        ph2[ho, 2 * ho + 1] = 0.5
    eye_b = np.eye(B, dtype=np.float32)
    ph1b = np.kron(ph1, eye_b)                    # (16B, 28B)
    ph2b = np.kron(ph2, eye_b)                    # (7B, 14B)

    # column-pool matrices (channel preserving); pool-1 emits zero border cols.
    wsel1 = np.zeros((28, 16), np.float32)
    for wp in range(1, 15):
        wsel1[2 * (wp - 1), wp] = 0.5
        wsel1[2 * (wp - 1) + 1, wp] = 0.5
    pw1 = np.einsum("wv,ij->wivj", wsel1,
                    np.eye(32, dtype=np.float32)).reshape(28 * 32, 16 * 32)
    wsel2 = np.zeros((14, 7), np.float32)
    for wo in range(7):
        wsel2[2 * wo, wo] = 0.5
        wsel2[2 * wo + 1, wo] = 0.5
    pw2 = np.einsum("wv,ij->wivj", wsel2,
                    np.eye(32, dtype=np.float32)).reshape(14 * 32, 7 * 32)

    # biases tiled to the fused (w, c) lane layout
    b1row = jnp.tile(b1, 28).reshape(1, 28 * 32).astype(f32)
    b2row = jnp.tile(b2, 14).reshape(1, 14 * 32).astype(f32)

    # fc1 weight: torch flatten order is (c, h, w); permute to (h, w, c) and
    # split per pooled row h -> (7, 224, 128)
    w1c = fw1.reshape(128, 32, 7, 7).transpose(2, 3, 1, 0)
    w1c = w1c.reshape(7, 224, 128).astype(bf16)

    # fc2 zero-padded to a lane-dense 128-wide output (kept f32; tiny matmul)
    w4 = jnp.zeros((128, 128), f32).at[:, :10].set(fw2.T)
    fb2p = jnp.zeros((1, 128), f32).at[:, :10].set(fb2)

    return dict(a=a, b1row=b1row,
                ph1b=jnp.asarray(ph1b, bf16), pw1=jnp.asarray(pw1, bf16),
                bb=bb, b2row=b2row,
                ph2b=jnp.asarray(ph2b, bf16), pw2=jnp.asarray(pw2, bf16),
                w1c=w1c, fb1=fb1, w4=w4, fb2=fb2p)


# ------------------------------- forward glue -------------------------------

def img_linear_forward(params, x_nchw, *, tau=TAU,
                       v_threshold=V_THRESHOLD, v_reset=V_RESET):
    B = x_nchw.shape[0]
    c = _build_constants(params)

    G = (B + B_TILE - 1) // B_TILE
    Bp = G * B_TILE

    # pad batch to a multiple of B_TILE, zero-pad spatially (conv1 padding=1)
    x = x_nchw[:, 0].astype(jnp.float32)
    x = jnp.pad(x, ((0, Bp - B), (1, 1), (1, 1)))                 # (Bp, 30, 30)

    # conv1 input: 3 row taps concatenated along K, rows interleaved as
    # (group, out_row, sample):  row = g*28*B_TILE + h*B_TILE + b, col = dy*30+w
    xr = x.reshape(G, B_TILE, 30, 30)
    taps = jnp.stack([xr[:, :, dy:dy + 28, :] for dy in range(3)],
                     axis=3)                                      # (G,Bt,28,3,30)
    xcat = taps.transpose(0, 2, 1, 3, 4).reshape(G * 28 * B_TILE, 90)
    xcat = xcat.astype(jnp.bfloat16)

    kernel = functools.partial(_fused_kernel, tau=tau,
                               v_threshold=v_threshold, v_reset=v_reset)

    def const_spec(shape):
        nd = len(shape)
        return pl.BlockSpec(shape, lambda g, _n=nd: (0,) * _n)

    grid_spec = pltpu.PrefetchScalarGridSpec(
        num_scalar_prefetch=0,
        grid=(G,),
        in_specs=[
            pl.BlockSpec((28 * B_TILE, 90), lambda g: (g, 0)),    # per-step images
            const_spec(c["a"].shape),
            const_spec(c["b1row"].shape),
            const_spec(c["ph1b"].shape),
            const_spec(c["pw1"].shape),
            const_spec(c["bb"].shape),
            const_spec(c["b2row"].shape),
            const_spec(c["ph2b"].shape),
            const_spec(c["pw2"].shape),
            const_spec(c["w1c"].shape),
            const_spec(c["fb1"].shape),
            const_spec(c["w4"].shape),
            const_spec(c["fb2"].shape),
        ],
        out_specs=pl.BlockSpec((B_TILE, 128), lambda g: (g, 0)),
    )

    out = pl.pallas_call(
        kernel,
        out_shape=jax.ShapeDtypeStruct((Bp, 128), jnp.float32),
        grid_spec=grid_spec,
        compiler_params=pltpu.CompilerParams(
            dimension_semantics=("parallel",),
            vmem_limit_bytes=32 * 1024 * 1024),
    )(xcat, c["a"], c["b1row"], c["ph1b"], c["pw1"],
      c["bb"], c["b2row"], c["ph2b"], c["pw2"],
      c["w1c"], c["fb1"], c["w4"], c["fb2"])

    # drop batch padding and the lane padding of the 10-class head
    return out[:B, :10]


# ------------------------------ synthetic init ------------------------------

def init_params(key):
    # deterministic synthetic init, PyTorch-style uniform(-1/sqrt(fan_in), +)
    def uniform(k, shape, fan_in):
        s = 1.0 / np.sqrt(fan_in)
        return jax.random.uniform(k, shape, jnp.float32, minval=-s, maxval=s)
    ks = jax.random.split(key, 8)
    return {
        "conv1_w": uniform(ks[0], (32, 1, 3, 3), 1 * 9),
        "conv1_b": uniform(ks[1], (1, 32), 1 * 9),
        "conv2_w": uniform(ks[2], (32, 32, 3, 3), 32 * 9),
        "conv2_b": uniform(ks[3], (1, 32), 32 * 9),
        "fc1_w": uniform(ks[4], (128, 32 * 7 * 7), 32 * 7 * 7),  # torch (out, in)
        "fc1_b": uniform(ks[5], (1, 128), 32 * 7 * 7),
        "fc2_w": uniform(ks[6], (10, 128), 128),
        "fc2_b": uniform(ks[7], (1, 10), 128),
    }


if __name__ == "__main__":
    key = jax.random.PRNGKey(0)
    kp, kx = jax.random.split(key)
    params = init_params(kp)

    batch_size = 2
    # module hardcodes MNIST geometry: kernel=(28,14,7), conv1 in_channels=1
    x = jax.random.normal(kx, (batch_size, 1, 28, 28), jnp.float32)

    out = jax.jit(img_linear_forward)(params, x)
    out = jax.block_until_ready(out)

    assert out.shape == (batch_size, 10)
    assert out.dtype == jnp.float32
    assert bool(jnp.all((out == 0.0) | (out == 1.0)))  # binary spikes
    print("KERNEL_OK")
</pallas_src>

<mosaic_0001>
module attributes {stable_mosaic.version = 11 : i64} {
  func.func @_fused_kernel(%arg0: i32, %arg1: memref<224x90xbf16, #tpu.memory_space<vmem>>, %arg2: memref<90x896xbf16, #tpu.memory_space<vmem>>, %arg3: memref<1x896xf32, #tpu.memory_space<vmem>>, %arg4: memref<128x224xbf16, #tpu.memory_space<vmem>>, %arg5: memref<896x512xbf16, #tpu.memory_space<vmem>>, %arg6: memref<1536x448xbf16, #tpu.memory_space<vmem>>, %arg7: memref<1x448xf32, #tpu.memory_space<vmem>>, %arg8: memref<56x112xbf16, #tpu.memory_space<vmem>>, %arg9: memref<448x224xbf16, #tpu.memory_space<vmem>>, %arg10: memref<7x224x128xbf16, #tpu.memory_space<vmem>>, %arg11: memref<1x128xf32, #tpu.memory_space<vmem>>, %arg12: memref<128x128xf32, #tpu.memory_space<vmem>>, %arg13: memref<1x128xf32, #tpu.memory_space<vmem>>, %arg14: memref<8x128xf32, #tpu.memory_space<vmem>>) attributes {dimension_semantics = [#tpu.dimension_semantics<parallel>], iteration_bounds = array<i64: 1>, scalar_prefetch = 0 : i64, scratch_operands = 0 : i64, tpu.core_type = #tpu.core_type<tc>, window_params = [{transform_indices = @transform_0, window_bounds = array<i64: 224, 90>}, {pipeline_mode = #tpu.pipeline_mode<synchronous>, transform_indices = @transform_1, window_bounds = array<i64: 90, 896>}, {pipeline_mode = #tpu.pipeline_mode<synchronous>, transform_indices = @transform_2, window_bounds = array<i64: 1, 896>}, {pipeline_mode = #tpu.pipeline_mode<synchronous>, transform_indices = @transform_3, window_bounds = array<i64: 128, 224>}, {pipeline_mode = #tpu.pipeline_mode<synchronous>, transform_indices = @transform_4, window_bounds = array<i64: 896, 512>}, {pipeline_mode = #tpu.pipeline_mode<synchronous>, transform_indices = @transform_5, window_bounds = array<i64: 1536, 448>}, {pipeline_mode = #tpu.pipeline_mode<synchronous>, transform_indices = @transform_6, window_bounds = array<i64: 1, 448>}, {pipeline_mode = #tpu.pipeline_mode<synchronous>, transform_indices = @transform_7, window_bounds = array<i64: 56, 112>}, {pipeline_mode = #tpu.pipeline_mode<synchronous>, transform_indices = @transform_8, window_bounds = array<i64: 448, 224>}, {pipeline_mode = #tpu.pipeline_mode<synchronous>, transform_indices = @transform_9, window_bounds = array<i64: 7, 224, 128>}, {pipeline_mode = #tpu.pipeline_mode<synchronous>, transform_indices = @transform_10, window_bounds = array<i64: 1, 128>}, {pipeline_mode = #tpu.pipeline_mode<synchronous>, transform_indices = @transform_11, window_bounds = array<i64: 128, 128>}, {pipeline_mode = #tpu.pipeline_mode<synchronous>, transform_indices = @transform_12, window_bounds = array<i64: 1, 128>}, {transform_indices = @transform_13, window_bounds = array<i64: 8, 128>}]} {
    %c0 = arith.constant 0 : index
    %c0_0 = arith.constant 0 : index
    %0 = vector.load %arg1[%c0, %c0_0] : memref<224x90xbf16, #tpu.memory_space<vmem>>, vector<224x90xbf16>
    %c0_1 = arith.constant 0 : index
    %c0_2 = arith.constant 0 : index
    %1 = vector.load %arg2[%c0_1, %c0_2] : memref<90x896xbf16, #tpu.memory_space<vmem>>, vector<90x896xbf16>
    %cst = arith.constant dense<0.000000e+00> : vector<224x896xf32>
    %2 = tpu.matmul %0, %1, %cst {dimension_numbers = #tpu.dot_dimension_numbers<[1], [0], [0], [1], [0, 0, 1, 1], [], []>} : vector<224x90xbf16>, vector<90x896xbf16>, vector<224x896xf32> -> vector<224x896xf32>
    %c0_3 = arith.constant 0 : index
    %c0_4 = arith.constant 0 : index
    %3 = vector.load %arg3[%c0_3, %c0_4] : memref<1x896xf32, #tpu.memory_space<vmem>>, vector<1x896xf32>
    %4 = vector.broadcast %3 : vector<1x896xf32> to vector<224x896xf32>
    %5 = arith.addf %2, %4 : vector<224x896xf32>
    %6 = arith.truncf %5 : vector<224x896xf32> to vector<224x896xbf16>
    %c0_5 = arith.constant 0 : index
    %c0_6 = arith.constant 0 : index
    %7 = vector.load %arg4[%c0_5, %c0_6] : memref<128x224xbf16, #tpu.memory_space<vmem>>, vector<128x224xbf16>
    %cst_7 = arith.constant dense<0.000000e+00> : vector<128x896xf32>
    %8 = tpu.matmul %7, %6, %cst_7 {dimension_numbers = #tpu.dot_dimension_numbers<[1], [0], [0], [1], [0, 0, 1, 1], [], []>} : vector<128x224xbf16>, vector<224x896xbf16>, vector<128x896xf32> -> vector<128x896xf32>
    %9 = arith.truncf %8 : vector<128x896xf32> to vector<128x896xbf16>
    %c0_8 = arith.constant 0 : index
    %c0_9 = arith.constant 0 : index
    %10 = vector.load %arg5[%c0_8, %c0_9] : memref<896x512xbf16, #tpu.memory_space<vmem>>, vector<896x512xbf16>
    %cst_10 = arith.constant dense<0.000000e+00> : vector<128x512xf32>
    %11 = tpu.matmul %9, %10, %cst_10 {dimension_numbers = #tpu.dot_dimension_numbers<[1], [0], [0], [1], [0, 0, 1, 1], [], []>} : vector<128x896xbf16>, vector<896x512xbf16>, vector<128x512xf32> -> vector<128x512xf32>
    %12 = vector.extract_strided_slice %11 {offsets = [0, 0], sizes = [112, 512], strides = [1, 1]} : vector<128x512xf32> to vector<112x512xf32>
    %13 = vector.extract_strided_slice %11 {offsets = [8, 0], sizes = [112, 512], strides = [1, 1]} : vector<128x512xf32> to vector<112x512xf32>
    %14 = vector.extract_strided_slice %11 {offsets = [16, 0], sizes = [112, 512], strides = [1, 1]} : vector<128x512xf32> to vector<112x512xf32>
    %15 = tpu.concatenate %12, %13, %14 in 1 : vector<112x512xf32>, vector<112x512xf32>, vector<112x512xf32> -> vector<112x1536xf32>
    %16 = arith.truncf %15 : vector<112x1536xf32> to vector<112x1536xbf16>
    %c0_11 = arith.constant 0 : index
    %c0_12 = arith.constant 0 : index
    %17 = vector.load %arg6[%c0_11, %c0_12] : memref<1536x448xbf16, #tpu.memory_space<vmem>>, vector<1536x448xbf16>
    %cst_13 = arith.constant dense<0.000000e+00> : vector<112x448xf32>
    %18 = tpu.matmul %16, %17, %cst_13 {dimension_numbers = #tpu.dot_dimension_numbers<[1], [0], [0], [1], [0, 0, 1, 1], [], []>} : vector<112x1536xbf16>, vector<1536x448xbf16>, vector<112x448xf32> -> vector<112x448xf32>
    %c0_14 = arith.constant 0 : index
    %c0_15 = arith.constant 0 : index
    %19 = vector.load %arg7[%c0_14, %c0_15] : memref<1x448xf32, #tpu.memory_space<vmem>>, vector<1x448xf32>
    %20 = vector.broadcast %19 : vector<1x448xf32> to vector<112x448xf32>
    %21 = arith.addf %18, %20 : vector<112x448xf32>
    %22 = arith.truncf %21 : vector<112x448xf32> to vector<112x448xbf16>
    %c0_16 = arith.constant 0 : index
    %c0_17 = arith.constant 0 : index
    %23 = vector.load %arg8[%c0_16, %c0_17] : memref<56x112xbf16, #tpu.memory_space<vmem>>, vector<56x112xbf16>
    %cst_18 = arith.constant dense<0.000000e+00> : vector<56x448xf32>
    %24 = tpu.matmul %23, %22, %cst_18 {dimension_numbers = #tpu.dot_dimension_numbers<[1], [0], [0], [1], [0, 0, 1, 1], [], []>} : vector<56x112xbf16>, vector<112x448xbf16>, vector<56x448xf32> -> vector<56x448xf32>
    %25 = arith.truncf %24 : vector<56x448xf32> to vector<56x448xbf16>
    %c0_19 = arith.constant 0 : index
    %c0_20 = arith.constant 0 : index
    %26 = vector.load %arg9[%c0_19, %c0_20] : memref<448x224xbf16, #tpu.memory_space<vmem>>, vector<448x224xbf16>
    %cst_21 = arith.constant dense<0.000000e+00> : vector<56x224xf32>
    %27 = tpu.matmul %25, %26, %cst_21 {dimension_numbers = #tpu.dot_dimension_numbers<[1], [0], [0], [1], [0, 0, 1, 1], [], []>} : vector<56x448xbf16>, vector<448x224xbf16>, vector<56x224xf32> -> vector<56x224xf32>
    %28 = arith.truncf %27 : vector<56x224xf32> to vector<56x224xbf16>
    %c0_22 = arith.constant 0 : index
    %c0_23 = arith.constant 0 : index
    %29 = vector.load %arg11[%c0_22, %c0_23] : memref<1x128xf32, #tpu.memory_space<vmem>>, vector<1x128xf32>
    %30 = vector.extract_strided_slice %28 {offsets = [0, 0], sizes = [8, 224], strides = [1, 1]} : vector<56x224xbf16> to vector<8x224xbf16>
    %c0_24 = arith.constant 0 : index
    %c0_25 = arith.constant 0 : index
    %c0_26 = arith.constant 0 : index
    %31 = vector.load %arg10[%c0_24, %c0_25, %c0_26] : memref<7x224x128xbf16, #tpu.memory_space<vmem>>, vector<1x224x128xbf16>
    %32 = vector.shape_cast %31 : vector<1x224x128xbf16> to vector<224x128xbf16>
    %cst_27 = arith.constant dense<0.000000e+00> : vector<8x128xf32>
    %33 = tpu.matmul %30, %32, %cst_27 {dimension_numbers = #tpu.dot_dimension_numbers<[1], [0], [0], [1], [0, 0, 1, 1], [], []>} : vector<8x224xbf16>, vector<224x128xbf16>, vector<8x128xf32> -> vector<8x128xf32>
    %34 = vector.broadcast %29 : vector<1x128xf32> to vector<8x128xf32>
    %35 = arith.addf %34, %33 : vector<8x128xf32>
    %36 = vector.extract_strided_slice %28 {offsets = [8, 0], sizes = [8, 224], strides = [1, 1]} : vector<56x224xbf16> to vector<8x224xbf16>
    %c1 = arith.constant 1 : index
    %c0_28 = arith.constant 0 : index
    %c0_29 = arith.constant 0 : index
    %37 = vector.load %arg10[%c1, %c0_28, %c0_29] : memref<7x224x128xbf16, #tpu.memory_space<vmem>>, vector<1x224x128xbf16>
    %38 = vector.shape_cast %37 : vector<1x224x128xbf16> to vector<224x128xbf16>
    %cst_30 = arith.constant dense<0.000000e+00> : vector<8x128xf32>
    %39 = tpu.matmul %36, %38, %cst_30 {dimension_numbers = #tpu.dot_dimension_numbers<[1], [0], [0], [1], [0, 0, 1, 1], [], []>} : vector<8x224xbf16>, vector<224x128xbf16>, vector<8x128xf32> -> vector<8x128xf32>
    %40 = arith.addf %35, %39 : vector<8x128xf32>
    %41 = vector.extract_strided_slice %28 {offsets = [16, 0], sizes = [8, 224], strides = [1, 1]} : vector<56x224xbf16> to vector<8x224xbf16>
    %c2 = arith.constant 2 : index
    %c0_31 = arith.constant 0 : index
    %c0_32 = arith.constant 0 : index
    %42 = vector.load %arg10[%c2, %c0_31, %c0_32] : memref<7x224x128xbf16, #tpu.memory_space<vmem>>, vector<1x224x128xbf16>
    %43 = vector.shape_cast %42 : vector<1x224x128xbf16> to vector<224x128xbf16>
    %cst_33 = arith.constant dense<0.000000e+00> : vector<8x128xf32>
    %44 = tpu.matmul %41, %43, %cst_33 {dimension_numbers = #tpu.dot_dimension_numbers<[1], [0], [0], [1], [0, 0, 1, 1], [], []>} : vector<8x224xbf16>, vector<224x128xbf16>, vector<8x128xf32> -> vector<8x128xf32>
    %45 = arith.addf %40, %44 : vector<8x128xf32>
    %46 = vector.extract_strided_slice %28 {offsets = [24, 0], sizes = [8, 224], strides = [1, 1]} : vector<56x224xbf16> to vector<8x224xbf16>
    %c3 = arith.constant 3 : index
    %c0_34 = arith.constant 0 : index
    %c0_35 = arith.constant 0 : index
    %47 = vector.load %arg10[%c3, %c0_34, %c0_35] : memref<7x224x128xbf16, #tpu.memory_space<vmem>>, vector<1x224x128xbf16>
    %48 = vector.shape_cast %47 : vector<1x224x128xbf16> to vector<224x128xbf16>
    %cst_36 = arith.constant dense<0.000000e+00> : vector<8x128xf32>
    %49 = tpu.matmul %46, %48, %cst_36 {dimension_numbers = #tpu.dot_dimension_numbers<[1], [0], [0], [1], [0, 0, 1, 1], [], []>} : vector<8x224xbf16>, vector<224x128xbf16>, vector<8x128xf32> -> vector<8x128xf32>
    %50 = arith.addf %45, %49 : vector<8x128xf32>
    %51 = vector.extract_strided_slice %28 {offsets = [32, 0], sizes = [8, 224], strides = [1, 1]} : vector<56x224xbf16> to vector<8x224xbf16>
    %c4 = arith.constant 4 : index
    %c0_37 = arith.constant 0 : index
    %c0_38 = arith.constant 0 : index
    %52 = vector.load %arg10[%c4, %c0_37, %c0_38] : memref<7x224x128xbf16, #tpu.memory_space<vmem>>, vector<1x224x128xbf16>
    %53 = vector.shape_cast %52 : vector<1x224x128xbf16> to vector<224x128xbf16>
    %cst_39 = arith.constant dense<0.000000e+00> : vector<8x128xf32>
    %54 = tpu.matmul %51, %53, %cst_39 {dimension_numbers = #tpu.dot_dimension_numbers<[1], [0], [0], [1], [0, 0, 1, 1], [], []>} : vector<8x224xbf16>, vector<224x128xbf16>, vector<8x128xf32> -> vector<8x128xf32>
    %55 = arith.addf %50, %54 : vector<8x128xf32>
    %56 = vector.extract_strided_slice %28 {offsets = [40, 0], sizes = [8, 224], strides = [1, 1]} : vector<56x224xbf16> to vector<8x224xbf16>
    %c5 = arith.constant 5 : index
    %c0_40 = arith.constant 0 : index
    %c0_41 = arith.constant 0 : index
    %57 = vector.load %arg10[%c5, %c0_40, %c0_41] : memref<7x224x128xbf16, #tpu.memory_space<vmem>>, vector<1x224x128xbf16>
    %58 = vector.shape_cast %57 : vector<1x224x128xbf16> to vector<224x128xbf16>
    %cst_42 = arith.constant dense<0.000000e+00> : vector<8x128xf32>
    %59 = tpu.matmul %56, %58, %cst_42 {dimension_numbers = #tpu.dot_dimension_numbers<[1], [0], [0], [1], [0, 0, 1, 1], [], []>} : vector<8x224xbf16>, vector<224x128xbf16>, vector<8x128xf32> -> vector<8x128xf32>
    %60 = arith.addf %55, %59 : vector<8x128xf32>
    %61 = vector.extract_strided_slice %28 {offsets = [48, 0], sizes = [8, 224], strides = [1, 1]} : vector<56x224xbf16> to vector<8x224xbf16>
    %c6 = arith.constant 6 : index
    %c0_43 = arith.constant 0 : index
    %c0_44 = arith.constant 0 : index
    %62 = vector.load %arg10[%c6, %c0_43, %c0_44] : memref<7x224x128xbf16, #tpu.memory_space<vmem>>, vector<1x224x128xbf16>
    %63 = vector.shape_cast %62 : vector<1x224x128xbf16> to vector<224x128xbf16>
    %cst_45 = arith.constant dense<0.000000e+00> : vector<8x128xf32>
    %64 = tpu.matmul %61, %63, %cst_45 {dimension_numbers = #tpu.dot_dimension_numbers<[1], [0], [0], [1], [0, 0, 1, 1], [], []>} : vector<8x224xbf16>, vector<224x128xbf16>, vector<8x128xf32> -> vector<8x128xf32>
    %65 = arith.addf %60, %64 : vector<8x128xf32>
    %c0_46 = arith.constant 0 : index
    %c0_47 = arith.constant 0 : index
    %66 = vector.load %arg12[%c0_46, %c0_47] : memref<128x128xf32, #tpu.memory_space<vmem>>, vector<128x128xf32>
    %cst_48 = arith.constant dense<0.000000e+00> : vector<8x128xf32>
    %67 = tpu.matmul %65, %66, %cst_48 {dimension_numbers = #tpu.dot_dimension_numbers<[1], [0], [0], [1], [0, 0, 1, 1], [], []>} : vector<8x128xf32>, vector<128x128xf32>, vector<8x128xf32> -> vector<8x128xf32>
    %c0_49 = arith.constant 0 : index
    %c0_50 = arith.constant 0 : index
    %68 = vector.load %arg13[%c0_49, %c0_50] : memref<1x128xf32, #tpu.memory_space<vmem>>, vector<1x128xf32>
    %69 = vector.broadcast %68 : vector<1x128xf32> to vector<8x128xf32>
    %70 = arith.addf %67, %69 : vector<8x128xf32>
    %cst_51 = arith.constant 5.000000e-01 : f32
    %71 = vector.broadcast %cst_51 : f32 to vector<8x128xf32>
    %72 = arith.mulf %70, %71 : vector<8x128xf32>
    %cst_52 = arith.constant 0.000000e+00 : f32
    %73 = vector.broadcast %cst_52 : f32 to vector<8x128xf32>
    %74 = arith.addf %73, %72 : vector<8x128xf32>
    %cst_53 = arith.constant 1.000000e+00 : f32
    %75 = vector.broadcast %cst_53 : f32 to vector<8x128xf32>
    %76 = arith.cmpf oge, %74, %75 : vector<8x128xf32>
    %cst_54 = arith.constant 1.000000e+00 : f32
    %cst_55 = arith.constant 0.000000e+00 : f32
    %77 = vector.broadcast %cst_54 : f32 to vector<8x128xf32>
    %78 = vector.broadcast %cst_55 : f32 to vector<8x128xf32>
    %79 = arith.select %76, %77, %78 : vector<8x128xi1>, vector<8x128xf32>
    %c0_56 = arith.constant 0 : index
    %c0_57 = arith.constant 0 : index
    %80 = vector.load %arg14[%c0_56, %c0_57] : memref<8x128xf32, #tpu.memory_space<vmem>>, vector<8x128xf32>
    tpu.vector_store %arg14[%c0_56, %c0_57], %79 {strides = array<i32>} : memref<8x128xf32, #tpu.memory_space<vmem>>, vector<8x128xf32>,
    return
  }
  func.func @transform_0(%arg0: i32) -> (i32, i32) {
    %c0_i32 = arith.constant 0 : i32
    %c0_i32_0 = arith.constant 0 : i32
    return %arg0, %c0_i32 : i32, i32
  }
  func.func @transform_1(%arg0: i32) -> (i32, i32) {
    %c0_i32 = arith.constant 0 : i32
    %c0_i32_0 = arith.constant 0 : i32
    %c0_i32_1 = arith.constant 0 : i32
    return %c0_i32, %c0_i32_0 : i32, i32
  }
  func.func @transform_2(%arg0: i32) -> (i32, i32) {
    %c0_i32 = arith.constant 0 : i32
    %c0_i32_0 = arith.constant 0 : i32
    %c0_i32_1 = arith.constant 0 : i32
    return %c0_i32, %c0_i32_0 : i32, i32
  }
  func.func @transform_3(%arg0: i32) -> (i32, i32) {
    %c0_i32 = arith.constant 0 : i32
    %c0_i32_0 = arith.constant 0 : i32
    %c0_i32_1 = arith.constant 0 : i32
    return %c0_i32, %c0_i32_0 : i32, i32
  }
  func.func @transform_4(%arg0: i32) -> (i32, i32) {
    %c0_i32 = arith.constant 0 : i32
    %c0_i32_0 = arith.constant 0 : i32
    %c0_i32_1 = arith.constant 0 : i32
    return %c0_i32, %c0_i32_0 : i32, i32
  }
  func.func @transform_5(%arg0: i32) -> (i32, i32) {
    %c0_i32 = arith.constant 0 : i32
    %c0_i32_0 = arith.constant 0 : i32
    %c0_i32_1 = arith.constant 0 : i32
    return %c0_i32, %c0_i32_0 : i32, i32
  }
  func.func @transform_6(%arg0: i32) -> (i32, i32) {
    %c0_i32 = arith.constant 0 : i32
    %c0_i32_0 = arith.constant 0 : i32
    %c0_i32_1 = arith.constant 0 : i32
    return %c0_i32, %c0_i32_0 : i32, i32
  }
  func.func @transform_7(%arg0: i32) -> (i32, i32) {
    %c0_i32 = arith.constant 0 : i32
    %c0_i32_0 = arith.constant 0 : i32
    %c0_i32_1 = arith.constant 0 : i32
    return %c0_i32, %c0_i32_0 : i32, i32
  }
  func.func @transform_8(%arg0: i32) -> (i32, i32) {
    %c0_i32 = arith.constant 0 : i32
    %c0_i32_0 = arith.constant 0 : i32
    %c0_i32_1 = arith.constant 0 : i32
    return %c0_i32, %c0_i32_0 : i32, i32
  }
  func.func @transform_9(%arg0: i32) -> (i32, i32, i32) {
    %c0_i32 = arith.constant 0 : i32
    %c0_i32_0 = arith.constant 0 : i32
    %c0_i32_1 = arith.constant 0 : i32
    %c0_i32_2 = arith.constant 0 : i32
    return %c0_i32, %c0_i32_0, %c0_i32_1 : i32, i32, i32
  }
  func.func @transform_10(%arg0: i32) -> (i32, i32) {
    %c0_i32 = arith.constant 0 : i32
    %c0_i32_0 = arith.constant 0 : i32
    %c0_i32_1 = arith.constant 0 : i32
    return %c0_i32, %c0_i32_0 : i32, i32
  }
  func.func @transform_11(%arg0: i32) -> (i32, i32) {
    %c0_i32 = arith.constant 0 : i32
    %c0_i32_0 = arith.constant 0 : i32
    %c0_i32_1 = arith.constant 0 : i32
    return %c0_i32, %c0_i32_0 : i32, i32
  }
  func.func @transform_12(%arg0: i32) -> (i32, i32) {
    %c0_i32 = arith.constant 0 : i32
    %c0_i32_0 = arith.constant 0 : i32
    %c0_i32_1 = arith.constant 0 : i32
    return %c0_i32, %c0_i32_0 : i32, i32
  }
  func.func @transform_13(%arg0: i32) -> (i32, i32) {
    %c0_i32 = arith.constant 0 : i32
    %c0_i32_0 = arith.constant 0 : i32
    return %arg0, %c0_i32 : i32, i32
  }
}

</mosaic_0001>

<bundles_post_ra>
// kernel: tile.10
= control target key start
LH: loop header
LB: loop body
LE: loop exit
PB: predicated region body
PF: predicated region fallthrough
CT: control target
= control target key end

     0   :  { %s40_s0 = inlined_call_operand.vmem [shape: f32[32], index: 0, kind: input, shape index: {}]   ;;  %s41_s1 = inlined_call_operand.vmem [shape: f32[28,32], index: 1, kind: output, shape index: {}]  }
   0x1   :  { %v4_v0 = vld [vmem:[%s40_s0] ss:$0 sm:$0xff] }
   0x2   :  { %5 = vst [vmem:[%s41_s1] sm:$0xff] %v4_v0  ;;  %12 = vst [vmem:[%s41_s1 + $0x8] sm:$0xff] %v4_v0 }
   0x3   :  { %13 = vst [vmem:[%s41_s1 + $0x10] sm:$0xff] %v4_v0  ;;  %14 = vst [vmem:[%s41_s1 + $0x18] sm:$0xff] %v4_v0 }

// kernel: tile.11
= control target key start
LH: loop header
LB: loop body
LE: loop exit
PB: predicated region body
PF: predicated region fallthrough
CT: control target
= control target key end

     0   :  { %s85_s8 = smov 96   ;;  %vm3_vm0 = vcmask 261120   ;;  %s87_s15 = smov 64   ;;  %vm10_vm1 = vcmask 1048320   ;;  %vm17_vm2 = vcmask 785920   ;;  %vm24_vm3 = vcmask 523520   ;;  %s131_s0 = inlined_call_operand.vmem [shape: f32[28,32], index: 0, kind: input, shape index: {}]   ;;  %s132_s1 = inlined_call_operand.vmem [shape: f32[1,896], index: 1, kind: output, shape index: {}]  }
   0x1   :  { %v73_v0 = vld [vmem:[%s131_s0 + $0x3] ss:$4 sm:$0x7f]   ;;  %v74_v1 = vld [vmem:[%s131_s0 + $0x2] ss:$4 sm:$0x7f]  }
   0x2   :  { %8 = vrot.lane.b32.xlu0 %v73_v0, %s85_s8  ;;  %v75_v2 = vld [vmem:[%s131_s0 + $0x1] ss:$4 sm:$0x7f]   ;;  %v2_v3 = vld [vmem:[%s131_s0] ss:$4 sm:$0x7f]  }
   0x3   :  { %s86_s0 = smov 32   ;;  %4 = vst.msk [vmem:[#allocation0] ss:$8 sm:$0xf] %vm3_vm0, %v2_v3  }
   0x4   :  { %22 = vrot.lane.b32.xlu1 %v75_v2, %s86_s0  ;;  %5 = vst.msk [vmem:[#allocation0] ss:$8 sm:$0x70] %vm3_vm0, %v2_v3  }
   0x6   :  { %15 = vrot.lane.b32.xlu0 %v74_v1, %s87_s15 }
  0x74   :  { %v9_v4 = vpop.permute.xlu0 %8  }
  0x75   :  { %11 = vst.msk [vmem:[#allocation0] ss:$8 sm:$0xf] %vm10_vm1, %v9_v4   ;;  %12 = vst.msk [vmem:[#allocation0] ss:$8 sm:$0x70] %vm10_vm1, %v9_v4  }
  0x76   :  { %v23_v5 = vpop.permute.xlu1 %22  }
  0x78   :  { %v16_v6 = vpop.permute.xlu0 %15  }
  0x79   :  { %18 = vst.msk [vmem:[#allocation0] ss:$8 sm:$0xf] %vm17_vm2, %v16_v6   ;;  %19 = vst.msk [vmem:[#allocation0] ss:$8 sm:$0x70] %vm17_vm2, %v16_v6  }
  0x7a   :  { %25 = vst.msk [vmem:[#allocation0] ss:$8 sm:$0xf] %vm24_vm3, %v23_v5   ;;  %26 = vst.msk [vmem:[#allocation0] ss:$8 sm:$0x70] %vm24_vm3, %v23_v5  }
  0x81   :  { %v30_v7 = vld [vmem:[#allocation0] sm:$0x1]  ;;  %v34_v8 = vld [vmem:[#allocation0 + $0x8] sm:$0x1]  ;;  %v39_v9 = vld [vmem:[#allocation0 + $0x10] sm:$0x1] }
  0x82   :  { %32 = vst [vmem:[%s132_s1] sm:$0x1] %v30_v7  ;;  %76 = vst [vmem:[%s132_s1 + $0x1] sm:$0x1] %v34_v8  ;;  %v45_v10 = vld [vmem:[#allocation0 + $0x18] sm:$0x1] }
  0x83   :  { %77 = vst [vmem:[%s132_s1 + $0x2] sm:$0x1] %v39_v9  ;;  %v51_v11 = vld [vmem:[#allocation0 + $0x20] sm:$0x1]  ;;  %v57_v12 = vld [vmem:[#allocation0 + $0x28] sm:$0x1] }
  0x84   :  { %78 = vst [vmem:[%s132_s1 + $0x3] sm:$0x1] %v45_v10  ;;  %79 = vst [vmem:[%s132_s1 + $0x4] sm:$0x1] %v51_v11  ;;  %v63_v13 = vld [vmem:[#allocation0 + $0x30] sm:$0x1] }
  0x85   :  { %80 = vst [vmem:[%s132_s1 + $0x5] sm:$0x1] %v57_v12  ;;  %81 = vst [vmem:[%s132_s1 + $0x6] sm:$0x1] %v63_v13 }

// kernel: tile.14
= control target key start
LH: loop header
LB: loop body
LE: loop exit
PB: predicated region body
PF: predicated region fallthrough
CT: control target
= control target key end

     0   :  { %s28_s0 = inlined_call_operand.vmem [shape: f32[32], index: 0, kind: input, shape index: {}]   ;;  %s29_s1 = inlined_call_operand.vmem [shape: f32[14,32], index: 1, kind: output, shape index: {}]  }
   0x1   :  { %v4_v0 = vld [vmem:[%s28_s0] ss:$0 sm:$0xff] }
   0x2   :  { %5 = vst [vmem:[%s29_s1] sm:$0xff] %v4_v0  ;;  %8 = vst [vmem:[%s29_s1 + $0x8] sm:$0xff] %v4_v0 }

// kernel: tile.15
= control target key start
LH: loop header
LB: loop body
LE: loop exit
PB: predicated region body
PF: predicated region fallthrough
CT: control target
= control target key end

     0   :  { %s57_s8 = smov 96   ;;  %vm3_vm0 = vcmask 261120   ;;  %s59_s15 = smov 64   ;;  %vm9_vm1 = vcmask 1048320   ;;  %vm15_vm2 = vcmask 785920   ;;  %vm21_vm3 = vcmask 523520   ;;  %s94_s0 = inlined_call_operand.vmem [shape: f32[14,32], index: 0, kind: input, shape index: {}]   ;;  %s95_s1 = inlined_call_operand.vmem [shape: f32[1,448], index: 1, kind: output, shape index: {}]  }
   0x1   :  { %v48_v0 = vld [vmem:[%s94_s0 + $0x3] ss:$4 sm:$0x7]   ;;  %v49_v1 = vld [vmem:[%s94_s0 + $0x2] ss:$4 sm:$0x7]  }
   0x2   :  { %7 = vrot.lane.b32.xlu0 %v48_v0, %s57_s8  ;;  %v50_v2 = vld [vmem:[%s94_s0 + $0x1] ss:$4 sm:$0xf]   ;;  %v2_v3 = vld [vmem:[%s94_s0] ss:$4 sm:$0xf]  }
   0x3   :  { %s58_s0 = smov 32   ;;  %4 = vst.msk [vmem:[#allocation0] ss:$8 sm:$0xf] %vm3_vm0, %v2_v3  }
   0x4   :  { %19 = vrot.lane.b32.xlu1 %v50_v2, %s58_s0 }
   0x6   :  { %13 = vrot.lane.b32.xlu0 %v49_v1, %s59_s15 }
  0x74   :  { %v8_v4 = vpop.permute.xlu0 %7  }
  0x75   :  { %10 = vst.msk [vmem:[#allocation0] ss:$8 sm:$0x7] %vm9_vm1, %v8_v4  }
  0x76   :  { %v20_v5 = vpop.permute.xlu1 %19  }
  0x78   :  { %v14_v6 = vpop.permute.xlu0 %13  }
  0x79   :  { %16 = vst.msk [vmem:[#allocation0] ss:$8 sm:$0x7] %vm15_vm2, %v14_v6  }
  0x7a   :  { %22 = vst.msk [vmem:[#allocation0] ss:$8 sm:$0xf] %vm21_vm3, %v20_v5  }
  0x81   :  { %v26_v7 = vld [vmem:[#allocation0] sm:$0x1]  ;;  %v30_v8 = vld [vmem:[#allocation0 + $0x8] sm:$0x1]  ;;  %v35_v9 = vld [vmem:[#allocation0 + $0x10] sm:$0x1] }
  0x82   :  { %28 = vst [vmem:[%s95_s1] sm:$0x1] %v26_v7  ;;  %51 = vst [vmem:[%s95_s1 + $0x1] sm:$0x1] %v30_v8  ;;  %v41_v10 = vld [vmem:[#allocation0 + $0x18] sm:$0x1] }
  0x83   :  { %52 = vst [vmem:[%s95_s1 + $0x2] sm:$0x1] %v35_v9  ;;  %53 = vst [vmem:[%s95_s1 + $0x3] sm:$0x1] %v41_v10 }

// kernel: img_linear_forward.1
= control target key start
LH: loop header
LB: loop body
LE: loop exit
PB: predicated region body
PF: predicated region fallthrough
CT: control target
= control target key end

     0   :  { %v16876_v1 = vmov 0   ;;  %vm480_vm0 = vcmask 1044480   ;;  %vm437_vm1 = vcmask 736256   ;;  %v123_v55 = vlaneseq  ;;  %s16858_s1 = inlined_call_operand.vmem [shape: bf16[90,896], index: 1, kind: input, shape index: {}]   ;;  %s16859_s0 = inlined_call_operand.vmem [shape: bf16[224,90], index: 0, kind: input, shape index: {}]   ;;  %s16860_s2 = inlined_call_operand.vmem [shape: f32[1,896], index: 2, kind: input, shape index: {}]   ;;  %s16861_s3 = inlined_call_operand.vmem [shape: bf16[128,224], index: 3, kind: input, shape index: {}]   ;;  %s16862_s4 = inlined_call_operand.vmem [shape: bf16[896,512], index: 4, kind: input, shape index: {}]   ;;  %s16863_s5 = inlined_call_operand.vmem [shape: bf16[1536,448], index: 5, kind: input, shape index: {}]   ;;  %s16864_s7 = inlined_call_operand.vmem [shape: bf16[56,112], index: 7, kind: input, shape index: {}]   ;;  %s16865_s8 = inlined_call_operand.vmem [shape: bf16[448,224], index: 8, kind: input, shape index: {}]   ;;  %s16866_s6 = inlined_call_operand.vmem [shape: f32[1,448], index: 6, kind: input, shape index: {}]   ;;  %s16867_s9 = inlined_call_operand.vmem [shape: bf16[7,224,128], index: 9, kind: input, shape index: {}]   ;;  %s16868_s11 = inlined_call_operand.vmem [shape: f32[128,128], index: 11, kind: input, shape index: {}]   ;;  %s16869_s10 = inlined_call_operand.vmem [shape: f32[1,128], index: 10, kind: input, shape index: {}]   ;;  %s16870_s12 = inlined_call_operand.vmem [shape: f32[1,128], index: 12, kind: input, shape index: {}]   ;;  %s16871_s13 = inlined_call_operand.vmem [shape: f32[8,128], index: 13, kind: output, shape index: {}]  }
   0x1   :  { %v11512_v0 = vld [vmem:[%s16858_s1 + $0x4] ss:$28 sps:$4 sm:$0xff]   ;;  %534 = vmatprep.mubr.bf16.mxu0 %v16876_v1  ;;  %v11515_v3 = vld [vmem:[%s16858_s1 + $0x3c] ss:$28 sps:$4 sm:$0xff]   ;;  %v11518_v5 = vld [vmem:[%s16858_s1 + $0x74] ss:$28 sps:$4 sm:$0xff]  }
   0x2   :  { %v11514_v2 = vld [vmem:[%s16858_s1] ss:$28 sps:$4 sm:$0xff]   ;;  %502 = vmatprep.subr.bf16.mxu0 %v11512_v0  ;;  %v11517_v4 = vld [vmem:[%s16858_s1 + $0x38] ss:$28 sps:$4 sm:$0xff]   ;;  %v11520_v6 = vld [vmem:[%s16858_s1 + $0x70] ss:$28 sps:$4 sm:$0xff]  }
   0x3   :  { %503 = vmatpush1.bf16.msra.mxu0 %v11514_v2  ;;  %v11521_v7 = vld [vmem:[%s16858_s1 + $0xac] ss:$28 sps:$4 sm:$0xff]   ;;  %v11524_v9 = vld [vmem:[%s16858_s1 + $0xe4] ss:$28 sps:$4 sm:$0xff]   ;;  %v11544_v19 = vld [vmem:[%s16858_s1 + $0x7c] ss:$28 sps:$4 sm:$0xff]  }
   0x4   :  { %504 = vmatprep.subr.bf16.mxu0 %v11515_v3  ;;  %v11523_v8 = vld [vmem:[%s16858_s1 + $0xa8] ss:$28 sps:$4 sm:$0xff]   ;;  %v11527_v10 = vld [vmem:[%s16858_s1 + $0x11c] ss:$28 sps:$4 sm:$0x1f]   ;;  %v12884_v25 = vld [vmem:[%s16859_s0 + $0x10] sm:$0xff]  }
   0x5   :  { %v11526_v11 = vld [vmem:[%s16858_s1 + $0xe0] ss:$28 sps:$4 sm:$0xff]   ;;  %v11529_v12 = vld [vmem:[%s16858_s1 + $0x118] ss:$28 sps:$4 sm:$0x1f]   ;;  %v12864_v20 = vld [vmem:[%s16859_s0 + $0x8] sm:$0xff]  }
   0x6   :  { %v482_v13 = vsel %vm480_vm0, %v11529_v12, 0  ;;  %v11533_v14 = vld [vmem:[%s16858_s1 + $0xc] ss:$28 sps:$4 sm:$0xff]   ;;  %v12844_v15 = vld [vmem:[%s16859_s0] sm:$0xff]   ;;  %v11542_v21 = vld [vmem:[%s16858_s1 + $0x78] ss:$28 sps:$4 sm:$0xff]  }
   0x7   :  { %505 = vmatpush1.bf16.msra.mxu0 %v11517_v4  ;;  %v11531_v16 = vld [vmem:[%s16858_s1 + $0x8] ss:$28 sps:$4 sm:$0xff]   ;;  %v11536_v18 = vld [vmem:[%s16858_s1 + $0x40] ss:$28 sps:$4 sm:$0xff]   ;;  %v11549_v22 = vld [vmem:[%s16858_s1 + $0xb4] ss:$28 sps:$4 sm:$0xff]  }
   0x8   :  { %506 = vmatprep.subr.bf16.mxu0 %v11518_v5  ;;  %v11538_v17 = vld [vmem:[%s16858_s1 + $0x44] ss:$28 sps:$4 sm:$0xff]   ;;  %v11547_v23 = vld [vmem:[%s16858_s1 + $0xb0] ss:$28 sps:$4 sm:$0xff]   ;;  %v12906_v31 = vld [vmem:[%s16859_s0 + $0x18] sm:$0xff]   ;;  %v13065_v56 = vshrl.u32 %v123_v55, 7 }
   0x9   :  { %v11554_v24 = vld [vmem:[%s16858_s1 + $0xec] ss:$28 sps:$4 sm:$0xff]   ;;  %v11558_v27 = vld [vmem:[%s16858_s1 + $0x124] ss:$28 sps:$4 sm:$0x1f]   ;;  %v12930_v34 = vld [vmem:[%s16859_s0 + $0x30] sm:$0xff]  }
   0xa   :  { %v11552_v26 = vld [vmem:[%s16858_s1 + $0xe8] ss:$28 sps:$4 sm:$0xff]   ;;  %v11560_v28 = vld [vmem:[%s16858_s1 + $0x120] ss:$28 sps:$4 sm:$0x1f]   ;;  %v12962_v38 = vld [vmem:[%s16859_s0 + $0x50] sm:$0xff]  }
   0xb   :  { %507 = vmatpush1.bf16.msra.mxu0 %v11520_v6  ;;  %v488_v29 = vsel %vm480_vm0, %v11560_v28, 0  ;;  %v11564_v30 = vld [vmem:[%s16858_s1 + $0x14] ss:$28 sps:$4 sm:$0xff]   ;;  %v12914_v32 = vld [vmem:[%s16859_s0 + $0x20] sm:$0xff]   ;;  %v12922_v33 = vld [vmem:[%s16859_s0 + $0x28] sm:$0xff]   ;;  %16888 = vst [vmem:[#allocation2_spill] sm:$0xff] %v13065_v56 }
   0xc   :  { %508 = vmatprep.subr.bf16.mxu0 %v11521_v7  ;;  %v12938_v35 = vld [vmem:[%s16859_s0 + $0x38] sm:$0xff]   ;;  %v12946_v36 = vld [vmem:[%s16859_s0 + $0x40] sm:$0xff]   ;;  %v12954_v37 = vld [vmem:[%s16859_s0 + $0x48] sm:$0xff]   ;;  %v16875_v57 = vsub.s32 0, %v13065_v56  ;;  %v16873_v59 = vsub.s32 1, %v13065_v56  ;;  %vm1352_vm2 = vcmask 785408  }
   0xd   :  { %v12970_v39 = vld [vmem:[%s16859_s0 + $0x58] sm:$0xff]   ;;  %v12978_v40 = vld [vmem:[%s16859_s0 + $0x60] sm:$0xff]   ;;  %v12986_v41 = vld [vmem:[%s16859_s0 + $0x68] sm:$0xff]   ;;  %vm7792_vm3 = vcmask 916480   ;;  %vm8299_vm4 = vcmask 523264   ;;  %vm12727_vm5 = vmmov 0  }
   0xe   :  { %v11562_v42 = vld [vmem:[%s16858_s1 + $0x10] ss:$28 sps:$4 sm:$0xff]   ;;  %v11565_v44 = vld [vmem:[%s16858_s1 + $0x48] ss:$28 sps:$4 sm:$0xff]   ;;  %v11568_v46 = vld [vmem:[%s16858_s1 + $0x80] ss:$28 sps:$4 sm:$0xff]  }
   0xf   :  { %509 = vmatpush1.bf16.msra.mxu0 %v11523_v8  ;;  %v11567_v43 = vld [vmem:[%s16858_s1 + $0x4c] ss:$28 sps:$4 sm:$0xff]   ;;  %v11570_v45 = vld [vmem:[%s16858_s1 + $0x84] ss:$28 sps:$4 sm:$0xff]   ;;  %v11573_v47 = vld [vmem:[%s16858_s1 + $0xbc] ss:$28 sps:$4 sm:$0xff]  }
  0x10   :  { %510 = vmatprep.subr.bf16.mxu0 %v11524_v9  ;;  %v11571_v48 = vld [vmem:[%s16858_s1 + $0xb8] ss:$28 sps:$4 sm:$0xff]   ;;  %v11574_v50 = vld [vmem:[%s16858_s1 + $0xf0] ss:$28 sps:$4 sm:$0xff]   ;;  %v13071_v58 = vld [vmem:[%s16860_s2] sm:$0xff] }
  0x11   :  { %v11576_v49 = vld [vmem:[%s16858_s1 + $0xf4] ss:$28 sps:$4 sm:$0xff]   ;;  %v11577_v51 = vld [vmem:[%s16858_s1 + $0x12c] ss:$28 sps:$4 sm:$0x1f]   ;;  %v13080_v60 = vrot.slane %v13071_v58, %v16875_v57  ;;  %v13085_v62 = vrot.slane %v13071_v58, %v16873_v59 }
  0x12   :  { %v11579_v52 = vld [vmem:[%s16858_s1 + $0x128] ss:$28 sps:$4 sm:$0x1f]   ;;  %v11580_v54 = vld [vmem:[%s16858_s1 + $0x18] ss:$28 sps:$4 sm:$0xff]  }
  0x13   :  { %511 = vmatpush1.bf16.msra.mxu0 %v11526_v11  ;;  %v494_v53 = vsel %vm480_vm0, %v11579_v52, 0  ;;  %v12150_v59 = vld [vmem:[%s16863_s5 + $0x440] ss:$16 sps:$4 sm:$0xff]  }
  0x14   :  { %9740 = vmatprep.subr.msk.bf16.mxu0 %vm480_vm0, %v11527_v10 }
  0x17   :  { %513 = vmatpush1.bf16.msra.mxu0 %v482_v13 }
  0x18   :  { %675 = vmatprep.subr.bf16.mxu0 %v11533_v14 }
  0x1a   :  { %9741 = vmatmul.mubr.msk.bf16.vlgmr.msra.gmra.mrb[0].mxu0 %vm437_vm1, %v12844_v15 }
  0x1b   :  { %676 = vmatpush1.bf16.msra.mxu0 %v11531_v16  ;;  %544 = vmatprep.mubr.bf16.mxu0 %v16876_v1  ;;  %v11581_v16 = vld [vmem:[%s16858_s1 + $0x50] ss:$28 sps:$4 sm:$0xff]  }
  0x1c   :  { %677 = vmatprep.subr.bf16.mxu0 %v11538_v17 }
  0x1f   :  { %678 = vmatpush1.bf16.msra.mxu0 %v11536_v18 }
  0x20   :  { %679 = vmatprep.subr.bf16.mxu0 %v11544_v19 }
  0x22   :  { %9742 = vmatmul.mubr.msk.bf16.gmra.mrb[4].mxu0 %vm437_vm1, %v12864_v20 }
  0x23   :  { %554 = vmatprep.mubr.bf16.mxu0 %v16876_v1  ;;  %680 = vmatpush1.bf16.msra.mxu0 %v11542_v21 }
  0x24   :  { %681 = vmatprep.subr.bf16.mxu0 %v11549_v22  ;;  %v11582_v22 = vld [vmem:[%s16858_s1 + $0x88] ss:$28 sps:$4 sm:$0xff]  }
  0x27   :  { %682 = vmatpush1.bf16.msra.mxu0 %v11547_v23 }
  0x28   :  { %683 = vmatprep.subr.bf16.mxu0 %v11554_v24 }
  0x2a   :  { %9743 = vmatmul.mubr.msk.bf16.gmra.mrb[8].mxu0 %vm437_vm1, %v12884_v25 }
  0x2b   :  { %564 = vmatprep.mubr.bf16.mxu0 %v16876_v1  ;;  %684 = vmatpush1.bf16.msra.mxu0 %v11552_v26 }
  0x2c   :  { %9755 = vmatprep.subr.msk.bf16.mxu0 %vm480_vm0, %v11558_v27 }
  0x2f   :  { %686 = vmatpush1.bf16.msra.mxu0 %v488_v29 }
  0x30   :  { %848 = vmatprep.subr.bf16.mxu0 %v11564_v30  ;;  %v11583_v30 = vld [vmem:[%s16858_s1 + $0xc0] ss:$28 sps:$4 sm:$0xff]  }
  0x32   :  { %9744 = vmatmul.mubr.msk.bf16.gmra.mrb[12].mxu0 %vm437_vm1, %v12906_v31 }
  0x33   :  { %574 = vmatprep.mubr.bf16.mxu0 %v16876_v1 }
  0x3a   :  { %9745 = vmatmul.mubr.msk.bf16.gmra.mrb[16].mxu0 %vm437_vm1, %v12914_v32 }
  0x3b   :  { %584 = vmatprep.mubr.bf16.mxu0 %v16876_v1 }
  0x42   :  { %9746 = vmatmul.mubr.msk.bf16.gmra.mrb[20].mxu0 %vm437_vm1, %v12922_v33 }
  0x43   :  { %594 = vmatprep.mubr.bf16.mxu0 %v16876_v1 }
  0x4a   :  { %9747 = vmatmul.mubr.msk.bf16.gmra.mrb[24].mxu0 %vm437_vm1, %v12930_v34 }
  0x4b   :  { %604 = vmatprep.mubr.bf16.mxu0 %v16876_v1 }
  0x52   :  { %9748 = vmatmul.mubr.msk.bf16.gmra.mrb[28].mxu0 %vm437_vm1, %v12938_v35 }
  0x53   :  { %614 = vmatprep.mubr.bf16.mxu0 %v16876_v1 }
  0x5a   :  { %9749 = vmatmul.mubr.msk.bf16.gmra.mrb[32].mxu0 %vm437_vm1, %v12946_v36 }
  0x5b   :  { %624 = vmatprep.mubr.bf16.mxu0 %v16876_v1 }
  0x62   :  { %9750 = vmatmul.mubr.msk.bf16.gmra.mrb[36].mxu0 %vm437_vm1, %v12954_v37 }
  0x63   :  { %634 = vmatprep.mubr.bf16.mxu0 %v16876_v1 }
  0x6a   :  { %9751 = vmatmul.mubr.msk.bf16.gmra.mrb[40].mxu0 %vm437_vm1, %v12962_v38 }
  0x6b   :  { %644 = vmatprep.mubr.bf16.mxu0 %v16876_v1 }
  0x72   :  { %9752 = vmatmul.mubr.msk.bf16.gmra.mrb[44].mxu0 %vm437_vm1, %v12970_v39 }
  0x73   :  { %654 = vmatprep.mubr.bf16.mxu0 %v16876_v1 }
  0x7a   :  { %9753 = vmatmul.mubr.msk.bf16.gmra.mrb[48].mxu0 %vm437_vm1, %v12978_v40 }
  0x7b   :  { %664 = vmatprep.mubr.bf16.mxu0 %v16876_v1 }
  0x82   :  { %9754 = vmatmul.mubr.msk.bf16.gmra.mrb[52].mxu0 %vm437_vm1, %v12986_v41 }
  0x83   :  { %707 = vmatprep.mubr.bf16.mxu0 %v16876_v1 }
  0x8a   :  { %9756 = vmatmul.mubr.msk.bf16.vlgmr.msra.gmra.mrb[56].mxu0 %vm437_vm1, %v12844_v15 }
  0x8b   :  { %849 = vmatpush1.bf16.msra.mxu0 %v11562_v42  ;;  %717 = vmatprep.mubr.bf16.mxu0 %v16876_v1 }
  0x8c   :  { %850 = vmatprep.subr.bf16.mxu0 %v11567_v43 }
  0x8f   :  { %851 = vmatpush1.bf16.msra.mxu0 %v11565_v44 }
  0x90   :  { %852 = vmatprep.subr.bf16.mxu0 %v11570_v45 }
  0x92   :  { %9757 = vmatmul.mubr.msk.bf16.gmra.mrb[60].mxu0 %vm437_vm1, %v12864_v20 }
  0x93   :  { %727 = vmatprep.mubr.bf16.mxu0 %v16876_v1  ;;  %853 = vmatpush1.bf16.msra.mxu0 %v11568_v46  ;;  %v11584_v46 = vld [vmem:[%s16858_s1 + $0xf8] ss:$28 sps:$4 sm:$0xff]  }
  0x94   :  { %854 = vmatprep.subr.bf16.mxu0 %v11573_v47 }
  0x97   :  { %855 = vmatpush1.bf16.msra.mxu0 %v11571_v48 }
  0x98   :  { %856 = vmatprep.subr.bf16.mxu0 %v11576_v49 }
  0x9a   :  { %9758 = vmatmul.mubr.msk.bf16.gmra.mrb[64].mxu0 %vm437_vm1, %v12884_v25 }
  0x9b   :  { %737 = vmatprep.mubr.bf16.mxu0 %v16876_v1  ;;  %857 = vmatpush1.bf16.msra.mxu0 %v11574_v50 }
  0x9c   :  { %9770 = vmatprep.subr.msk.bf16.mxu0 %vm480_vm0, %v11577_v51 }
  0x9f   :  { %859 = vmatpush1.bf16.msra.mxu0 %v494_v53  ;;  %v11585_v53 = vld [vmem:[%s16858_s1 + $0x130] ss:$28 sps:$4 sm:$0x1f]  }
  0xa0   :  { %10839 = vmatprep.subr.bf16.mxu0 %v11580_v54 }
  0xa2   :  { %9759 = vmatmul.mubr.msk.bf16.gmra.mrb[68].mxu0 %vm437_vm1, %v12906_v31 }
  0xa3   :  { %747 = vmatprep.mubr.bf16.mxu0 %v16876_v1 }
  0xaa   :  { %9760 = vmatmul.mubr.msk.bf16.gmra.mrb[72].mxu0 %vm437_vm1, %v12914_v32 }
  0xab   :  { %757 = vmatprep.mubr.bf16.mxu0 %v16876_v1 }
  0xb2   :  { %9761 = vmatmul.mubr.msk.bf16.gmra.mrb[76].mxu0 %vm437_vm1, %v12922_v33 }
  0xb3   :  { %767 = vmatprep.mubr.bf16.mxu0 %v16876_v1 }
  0xba   :  { %9762 = vmatmul.mubr.msk.bf16.gmra.mrb[80].mxu0 %vm437_vm1, %v12930_v34 }
  0xbb   :  { %777 = vmatprep.mubr.bf16.mxu0 %v16876_v1 }
  0xc2   :  { %9763 = vmatmul.mubr.msk.bf16.gmra.mrb[84].mxu0 %vm437_vm1, %v12938_v35 }
  0xc3   :  { %787 = vmatprep.mubr.bf16.mxu0 %v16876_v1 }
  0xca   :  { %9764 = vmatmul.mubr.msk.bf16.gmra.mrb[88].mxu0 %vm437_vm1, %v12946_v36 }
  0xcb   :  { %797 = vmatprep.mubr.bf16.mxu0 %v16876_v1 }
  0xd2   :  { %9765 = vmatmul.mubr.msk.bf16.gmra.mrb[92].mxu0 %vm437_vm1, %v12954_v37 }
  0xd3   :  { %807 = vmatprep.mubr.bf16.mxu0 %v16876_v1 }
  0xda   :  { %9766 = vmatmul.mubr.msk.bf16.gmra.mrb[96].mxu0 %vm437_vm1, %v12962_v38 }
  0xdb   :  { %817 = vmatprep.mubr.bf16.mxu0 %v16876_v1 }
  0xe2   :  { %9767 = vmatmul.mubr.msk.bf16.gmra.mrb[100].mxu0 %vm437_vm1, %v12970_v39 }
  0xe3   :  { %827 = vmatprep.mubr.bf16.mxu0 %v16876_v1 }
  0xea   :  { %9768 = vmatmul.mubr.msk.bf16.gmra.mrb[104].mxu0 %vm437_vm1, %v12978_v40 }
  0xeb   :  { %837 = vmatprep.mubr.bf16.mxu0 %v16876_v1 }
  0xed   :  { %v536_v61 = vpop.f32.mrb[0].mxu0 }
  0xee   :  { %v538_v63 = vpop.f32.mrb[1].mxu0  ;;  %v537_v3 = vadd.f32 %v536_v61, %v13080_v60 }
  0xef   :  { %v540_v0 = vpop.f32.mrb[2].mxu0  ;;  %v539_v5 = vadd.f32 %v538_v63, %v13085_v62 }
  0xf0   :  { %v542_v2 = vpop.f32.mrb[3].mxu0  ;;  %v541_v4 = vadd.f32 %v540_v0, %v13080_v60  ;;  %v500_v0 = vsel %vm480_vm0, %v11585_v53, 0 }
  0xf1   :  { %v543_v6 = vadd.f32 %v542_v2, %v13085_v62 }
  0xf2   :  { %9769 = vmatmul.mubr.msk.bf16.gmra.mrb[108].mxu0 %vm437_vm1, %v12986_v41  ;;  %v1166_v7 = vpack.c.bf16 %v541_v4, %v537_v3 }
  0xf3   :  { %v1167_v8 = vpack.c.bf16 %v543_v6, %v539_v5  ;;  %880 = vmatprep.mubr.bf16.mxu0 %v16876_v1 }
  0xf5   :  { %v546_v9 = vpop.f32.mrb[4].mxu0  ;;  %1377 = vmatprep.subr.bf16.mxu1 %v1167_v8 }
  0xf6   :  { %v548_v10 = vpop.f32.mrb[5].mxu0  ;;  %1378 = vmatpush1.bf16.msra.mxu1 %v1166_v7  ;;  %v547_v13 = vadd.f32 %v546_v9, %v13080_v60 }
  0xf7   :  { %v550_v11 = vpop.f32.mrb[6].mxu0  ;;  %v549_v17 = vadd.f32 %v548_v10, %v13085_v62 }
  0xf8   :  { %v552_v12 = vpop.f32.mrb[7].mxu0  ;;  %v551_v14 = vadd.f32 %v550_v11, %v13080_v60 }
  0xf9   :  { %v553_v18 = vadd.f32 %v552_v12, %v13085_v62 }
  0xfa   :  { %9771 = vmatmul.mubr.msk.bf16.vlgmr.msra.gmra.mrb[112].mxu0 %vm437_vm1, %v12844_v15  ;;  %v1173_v19 = vpack.c.bf16 %v551_v14, %v547_v13 }
  0xfb   :  { %v1174_v21 = vpack.c.bf16 %v553_v18, %v549_v17  ;;  %890 = vmatprep.mubr.bf16.mxu0 %v16876_v1  ;;  %10840 = vmatpush3.bf16.msra.mxu0 %v11580_v54 }
  0xfc   :  { %10841 = vmatprep.subr.bf16.mxu0 %v11581_v16 }
  0xfd   :  { %v556_v23 = vpop.f32.mrb[8].mxu0  ;;  %1379 = vmatprep.subr.bf16.mxu1 %v1174_v21 }
  0xfe   :  { %v558_v24 = vpop.f32.mrb[9].mxu0  ;;  %1380 = vmatpush1.bf16.msra.mxu1 %v1173_v19  ;;  %v557_v28 = vadd.f32 %v556_v23, %v13080_v60 }
  0xff   :  { %v560_v26 = vpop.f32.mrb[10].mxu0  ;;  %10842 = vmatpush3.bf16.msra.mxu0 %v11581_v16  ;;  %v559_v42 = vadd.f32 %v558_v24, %v13085_v62 }
 0x100   :  { %v562_v27 = vpop.f32.mrb[11].mxu0  ;;  %v561_v29 = vadd.f32 %v560_v26, %v13080_v60  ;;  %10843 = vmatprep.subr.bf16.mxu0 %v11582_v22 }
 0x101   :  { %v563_v43 = vadd.f32 %v562_v27, %v13085_v62 }
 0x102   :  { %9772 = vmatmul.mubr.msk.bf16.gmra.mrb[116].mxu0 %vm437_vm1, %v12864_v20  ;;  %v1180_v44 = vpack.c.bf16 %v561_v29, %v557_v28 }
 0x103   :  { %v1181_v45 = vpack.c.bf16 %v563_v43, %v559_v42  ;;  %900 = vmatprep.mubr.bf16.mxu0 %v16876_v1  ;;  %10844 = vmatpush3.bf16.msra.mxu0 %v11582_v22 }
 0x104   :  { %10845 = vmatprep.subr.bf16.mxu0 %v11583_v30 }
 0x105   :  { %v566_v47 = vpop.f32.mrb[12].mxu0  ;;  %1381 = vmatprep.subr.bf16.mxu1 %v1181_v45 }
 0x106   :  { %v568_v48 = vpop.f32.mrb[13].mxu0  ;;  %1382 = vmatpush1.bf16.msra.mxu1 %v1180_v44  ;;  %v567_v51 = vadd.f32 %v566_v47, %v13080_v60 }
 0x107   :  { %v570_v49 = vpop.f32.mrb[14].mxu0  ;;  %10846 = vmatpush3.bf16.msra.mxu0 %v11583_v30  ;;  %v569_v54 = vadd.f32 %v568_v48, %v13085_v62 }
 0x108   :  { %v572_v50 = vpop.f32.mrb[15].mxu0  ;;  %v571_v52 = vadd.f32 %v570_v49, %v13080_v60  ;;  %10847 = vmatprep.subr.bf16.mxu0 %v11584_v46 }
 0x109   :  { %v573_v55 = vadd.f32 %v572_v50, %v13085_v62 }
 0x10a   :  { %9773 = vmatmul.mubr.msk.bf16.gmra.mrb[120].mxu0 %vm437_vm1, %v12884_v25  ;;  %v1187_v61 = vpack.c.bf16 %v571_v52, %v567_v51 }
 0x10b   :  { %v1188_v63 = vpack.c.bf16 %v573_v55, %v569_v54  ;;  %910 = vmatprep.mubr.bf16.mxu0 %v16876_v1  ;;  %10848 = vmatpush3.bf16.msra.mxu0 %v11584_v46 }
 0x10c   :  { %11507 = vmatprep.subr.msk.bf16.mxu0 %vm480_vm0, %v11585_v53 }
 0x10d   :  { %v576_v2 = vpop.f32.mrb[16].mxu0  ;;  %1383 = vmatprep.subr.bf16.mxu1 %v1188_v63 }
 0x10e   :  { %v578_v3 = vpop.f32.mrb[17].mxu0  ;;  %1384 = vmatpush1.bf16.msra.mxu1 %v1187_v61  ;;  %v577_v6 = vadd.f32 %v576_v2, %v13080_v60 }
 0x10f   :  { %v580_v4 = vpop.f32.mrb[18].mxu0  ;;  %10850 = vmatpush3.bf16.msra.mxu0 %v500_v0  ;;  %v579_v8 = vadd.f32 %v578_v3, %v13085_v62 }
 0x110   :  { %v582_v5 = vpop.f32.mrb[19].mxu0  ;;  %v581_v7 = vadd.f32 %v580_v4, %v13080_v60 }
 0x111   :  { %v583_v9 = vadd.f32 %v582_v5, %v13085_v62 }
 0x112   :  { %9774 = vmatmul.mubr.msk.bf16.gmra.mrb[124].mxu0 %vm437_vm1, %v12906_v31  ;;  %v1194_v10 = vpack.c.bf16 %v581_v7, %v577_v6 }
 0x113   :  { %v1195_v11 = vpack.c.bf16 %v583_v9, %v579_v8  ;;  %920 = vmatprep.mubr.bf16.mxu0 %v16876_v1 }
 0x115   :  { %v586_v12 = vpop.f32.mrb[20].mxu0  ;;  %1385 = vmatprep.subr.bf16.mxu1 %v1195_v11 }
 0x116   :  { %v588_v13 = vpop.f32.mrb[21].mxu0  ;;  %1386 = vmatpush1.bf16.msra.mxu1 %v1194_v10  ;;  %v587_v17 = vadd.f32 %v586_v12, %v13080_v60 }
 0x117   :  { %v590_v14 = vpop.f32.mrb[22].mxu0  ;;  %v589_v19 = vadd.f32 %v588_v13, %v13085_v62 }
 0x118   :  { %v592_v16 = vpop.f32.mrb[23].mxu0  ;;  %v591_v18 = vadd.f32 %v590_v14, %v13080_v60 }
 0x119   :  { %v593_v21 = vadd.f32 %v592_v16, %v13085_v62 }
 0x11a   :  { %9775 = vmatmul.mubr.msk.bf16.gmra.mrb[128].mxu0 %vm437_vm1, %v12914_v32  ;;  %v1201_v22 = vpack.c.bf16 %v591_v18, %v587_v17 }
 0x11b   :  { %v1202_v23 = vpack.c.bf16 %v593_v21, %v589_v19  ;;  %930 = vmatprep.mubr.bf16.mxu0 %v16876_v1  ;;  %v13177_v21 = vld [vmem:[%s16861_s3 + $0x4] ss:$8 sps:$4 sm:$0xff]  }
 0x11c   :  { %9815 = vmatprep.mubr.msk.bf16.mxu1 %vm1352_vm2, %v13177_v21 }
 0x11d   :  { %v596_v24 = vpop.f32.mrb[24].mxu0  ;;  %1387 = vmatprep.subr.bf16.mxu1 %v1202_v23 }
 0x11e   :  { %v598_v26 = vpop.f32.mrb[25].mxu0  ;;  %1388 = vmatpush1.bf16.msra.mxu1 %v1201_v22  ;;  %v597_v29 = vadd.f32 %v596_v24, %v13080_v60 }
 0x11f   :  { %v600_v27 = vpop.f32.mrb[26].mxu0  ;;  %v599_v42 = vadd.f32 %v598_v26, %v13085_v62 }
 0x120   :  { %v602_v28 = vpop.f32.mrb[27].mxu0  ;;  %v601_v30 = vadd.f32 %v600_v27, %v13080_v60 }
 0x121   :  { %v603_v43 = vadd.f32 %v602_v28, %v13085_v62 }
 0x122   :  { %9776 = vmatmul.mubr.msk.bf16.gmra.mrb[132].mxu0 %vm437_vm1, %v12922_v33  ;;  %v1208_v44 = vpack.c.bf16 %v601_v30, %v597_v29 }
 0x123   :  { %v1209_v45 = vpack.c.bf16 %v603_v43, %v599_v42  ;;  %940 = vmatprep.mubr.bf16.mxu0 %v16876_v1 }
 0x125   :  { %v606_v46 = vpop.f32.mrb[28].mxu0  ;;  %1389 = vmatprep.subr.bf16.mxu1 %v1209_v45 }
 0x126   :  { %v608_v47 = vpop.f32.mrb[29].mxu0  ;;  %1390 = vmatpush1.bf16.msra.mxu1 %v1208_v44  ;;  %v607_v50 = vadd.f32 %v606_v46, %v13080_v60 }
 0x127   :  { %v610_v48 = vpop.f32.mrb[30].mxu0  ;;  %v609_v52 = vadd.f32 %v608_v47, %v13085_v62 }
 0x128   :  { %v612_v49 = vpop.f32.mrb[31].mxu0  ;;  %v611_v51 = vadd.f32 %v610_v48, %v13080_v60 }
 0x129   :  { %v613_v53 = vadd.f32 %v612_v49, %v13085_v62 }
 0x12a   :  { %9777 = vmatmul.mubr.msk.bf16.gmra.mrb[136].mxu0 %vm437_vm1, %v12930_v34  ;;  %v1215_v54 = vpack.c.bf16 %v611_v51, %v607_v50 }
 0x12b   :  { %v1216_v55 = vpack.c.bf16 %v613_v53, %v609_v52  ;;  %950 = vmatprep.mubr.bf16.mxu0 %v16876_v1 }
 0x12d   :  { %v616_v61 = vpop.f32.mrb[32].mxu0  ;;  %1391 = vmatprep.subr.bf16.mxu1 %v1216_v55 }
 0x12e   :  { %v618_v63 = vpop.f32.mrb[33].mxu0  ;;  %1392 = vmatpush1.bf16.msra.mxu1 %v1215_v54  ;;  %v617_v3 = vadd.f32 %v616_v61, %v13080_v60 }
 0x12f   :  { %v620_v0 = vpop.f32.mrb[34].mxu0  ;;  %v619_v5 = vadd.f32 %v618_v63, %v13085_v62 }
 0x130   :  { %v622_v2 = vpop.f32.mrb[35].mxu0  ;;  %v621_v4 = vadd.f32 %v620_v0, %v13080_v60 }
 0x131   :  { %v623_v6 = vadd.f32 %v622_v2, %v13085_v62 }
 0x132   :  { %9778 = vmatmul.mubr.msk.bf16.gmra.mrb[140].mxu0 %vm437_vm1, %v12938_v35  ;;  %v1222_v7 = vpack.c.bf16 %v621_v4, %v617_v3 }
 0x133   :  { %v1223_v8 = vpack.c.bf16 %v623_v6, %v619_v5  ;;  %960 = vmatprep.mubr.bf16.mxu0 %v16876_v1 }
 0x135   :  { %v626_v9 = vpop.f32.mrb[36].mxu0  ;;  %1393 = vmatprep.subr.bf16.mxu1 %v1223_v8 }
 0x136   :  { %v628_v10 = vpop.f32.mrb[37].mxu0  ;;  %1394 = vmatpush1.bf16.msra.mxu1 %v1222_v7  ;;  %v627_v13 = vadd.f32 %v626_v9, %v13080_v60 }
 0x137   :  { %v630_v11 = vpop.f32.mrb[38].mxu0  ;;  %v629_v16 = vadd.f32 %v628_v10, %v13085_v62 }
 0x138   :  { %v632_v12 = vpop.f32.mrb[39].mxu0  ;;  %v631_v14 = vadd.f32 %v630_v11, %v13080_v60 }
 0x139   :  { %v633_v17 = vadd.f32 %v632_v12, %v13085_v62 }
 0x13a   :  { %9779 = vmatmul.mubr.msk.bf16.gmra.mrb[144].mxu0 %vm437_vm1, %v12946_v36  ;;  %v1229_v18 = vpack.c.bf16 %v631_v14, %v627_v13  ;;  %v16874_v13 = vsub.s32 2, %v13065_v56 }
 0x13b   :  { %v1230_v19 = vpack.c.bf16 %v633_v17, %v629_v16  ;;  %970 = vmatprep.mubr.bf16.mxu0 %v16876_v1  ;;  %v16872_v17 = vsub.s32 3, %v13065_v56 }
 0x13d   :  { %v636_v22 = vpop.f32.mrb[40].mxu0  ;;  %1395 = vmatprep.subr.bf16.mxu1 %v1230_v19 }
 0x13e   :  { %v638_v23 = vpop.f32.mrb[41].mxu0  ;;  %1396 = vmatpush1.bf16.msra.mxu1 %v1229_v18  ;;  %v637_v27 = vadd.f32 %v636_v22, %v13080_v60  ;;  %v13214_v22 = vrot.slane %v13071_v58, %v16874_v13 }
 0x13f   :  { %v640_v24 = vpop.f32.mrb[42].mxu0  ;;  %v639_v29 = vadd.f32 %v638_v23, %v13085_v62  ;;  %v13224_v23 = vld [vmem:[%s16861_s3] ss:$8 sps:$4 sm:$0xff]  }
 0x140   :  { %v642_v26 = vpop.f32.mrb[43].mxu0  ;;  %v641_v28 = vadd.f32 %v640_v24, %v13080_v60 }
 0x141   :  { %v643_v30 = vadd.f32 %v642_v26, %v13085_v62  ;;  %v13229_v26 = vld [vmem:[%s16861_s3 + $0x14] ss:$8 sps:$4 sm:$0xff]  }
 0x142   :  { %9780 = vmatmul.mubr.msk.bf16.gmra.mrb[148].mxu0 %vm437_vm1, %v12954_v37  ;;  %v1236_v42 = vpack.c.bf16 %v641_v28, %v637_v27 }
 0x143   :  { %v1237_v43 = vpack.c.bf16 %v643_v30, %v639_v29  ;;  %980 = vmatprep.mubr.bf16.mxu0 %v16876_v1 }
 0x145   :  { %v646_v44 = vpop.f32.mrb[44].mxu0  ;;  %1397 = vmatprep.subr.bf16.mxu1 %v1237_v43 }
 0x146   :  { %v648_v45 = vpop.f32.mrb[45].mxu0  ;;  %1398 = vmatpush1.bf16.msra.mxu1 %v1236_v42  ;;  %v647_v48 = vadd.f32 %v646_v44, %v13080_v60 }
 0x147   :  { %v650_v46 = vpop.f32.mrb[46].mxu0  ;;  %v649_v50 = vadd.f32 %v648_v45, %v13085_v62 }
 0x148   :  { %v652_v47 = vpop.f32.mrb[47].mxu0  ;;  %v651_v49 = vadd.f32 %v650_v46, %v13080_v60 }
 0x149   :  { %v653_v51 = vadd.f32 %v652_v47, %v13085_v62  ;;  %v13245_v47 = vld [vmem:[%s16861_s3 + $0x10] ss:$8 sps:$4 sm:$0xff]  }
 0x14a   :  { %9781 = vmatmul.mubr.msk.bf16.gmra.mrb[152].mxu0 %vm437_vm1, %v12962_v38  ;;  %v1243_v52 = vpack.c.bf16 %v651_v49, %v647_v48  ;;  %v13250_v49 = vld [vmem:[%s16861_s3 + $0x24] ss:$8 sps:$4 sm:$0xff]  }
 0x14b   :  { %v1244_v53 = vpack.c.bf16 %v653_v51, %v649_v50  ;;  %990 = vmatprep.mubr.bf16.mxu0 %v16876_v1 }
 0x14d   :  { %v656_v54 = vpop.f32.mrb[48].mxu0  ;;  %1399 = vmatprep.subr.bf16.mxu1 %v1244_v53 }
 0x14e   :  { %v658_v55 = vpop.f32.mrb[49].mxu0  ;;  %1400 = vmatpush1.bf16.msra.mxu1 %v1243_v52  ;;  %v657_v0 = vadd.f32 %v656_v54, %v13080_v60 }
 0x14f   :  { %v660_v61 = vpop.f32.mrb[50].mxu0  ;;  %v659_v3 = vadd.f32 %v658_v55, %v13085_v62 }
 0x150   :  { %v662_v63 = vpop.f32.mrb[51].mxu0  ;;  %v661_v2 = vadd.f32 %v660_v61, %v13080_v60 }
 0x151   :  { %v663_v4 = vadd.f32 %v662_v63, %v13085_v62 }
 0x152   :  { %9782 = vmatmul.mubr.msk.bf16.gmra.mrb[156].mxu0 %vm437_vm1, %v12970_v39  ;;  %v1250_v5 = vpack.c.bf16 %v661_v2, %v657_v0  ;;  %v13266_v0 = vld [vmem:[%s16861_s3 + $0x20] ss:$8 sps:$4 sm:$0xff]  }
 0x153   :  { %v1251_v6 = vpack.c.bf16 %v663_v4, %v659_v3  ;;  %1000 = vmatprep.mubr.bf16.mxu0 %v16876_v1 }
 0x155   :  { %v666_v7 = vpop.f32.mrb[52].mxu0  ;;  %1401 = vmatprep.subr.bf16.mxu1 %v1251_v6 }
 0x156   :  { %v668_v8 = vpop.f32.mrb[53].mxu0  ;;  %1402 = vmatpush1.bf16.msra.mxu1 %v1250_v5  ;;  %v667_v11 = vadd.f32 %v666_v7, %v13080_v60 }
 0x157   :  { %v670_v9 = vpop.f32.mrb[54].mxu0  ;;  %v669_v14 = vadd.f32 %v668_v8, %v13085_v62 }
 0x158   :  { %v672_v10 = vpop.f32.mrb[55].mxu0  ;;  %v671_v12 = vadd.f32 %v670_v9, %v13080_v60 }
 0x159   :  { %v673_v16 = vadd.f32 %v672_v10, %v13085_v62  ;;  %v13219_v62 = vrot.slane %v13071_v58, %v16872_v17 }
 0x15a   :  { %9783 = vmatmul.mubr.msk.bf16.gmra.mrb[160].mxu0 %vm437_vm1, %v12978_v40  ;;  %v1257_v18 = vpack.c.bf16 %v671_v12, %v667_v11  ;;  %v13287_v11 = vld [vmem:[%s16861_s3 + $0x30] ss:$8 sps:$4 sm:$0xff]  }
 0x15b   :  { %v1258_v19 = vpack.c.bf16 %v673_v16, %v669_v14  ;;  %1010 = vmatprep.mubr.bf16.mxu0 %v16876_v1 }
 0x15d   :  { %v709_v60 = vpop.f32.mrb[56].mxu0  ;;  %1403 = vmatprep.subr.bf16.mxu1 %v1258_v19 }
 0x15e   :  { %v711_v24 = vpop.f32.mrb[57].mxu0  ;;  %1404 = vmatpush1.bf16.msra.mxu1 %v1257_v18  ;;  %v710_v29 = vadd.f32 %v709_v60, %v13214_v22 }
 0x15f   :  { %v713_v27 = vpop.f32.mrb[58].mxu0  ;;  %v712_v42 = vadd.f32 %v711_v24, %v13219_v62 }
 0x160   :  { %v715_v28 = vpop.f32.mrb[59].mxu0  ;;  %v714_v30 = vadd.f32 %v713_v27, %v13214_v22 }
 0x161   :  { %v716_v43 = vadd.f32 %v715_v28, %v13219_v62  ;;  %1410 = vmatmul.mubr.bf16.vlgmr.msra.gmra.mrb[0].mxu1 %v13224_v23 }
 0x162   :  { %9784 = vmatmul.mubr.msk.bf16.gmra.mrb[164].mxu0 %vm437_vm1, %v12986_v41  ;;  %v1168_v44 = vpack.c.bf16 %v714_v30, %v710_v29  ;;  %9816 = vmatprep.mubr.msk.bf16.mxu1 %vm1352_vm2, %v13229_v26  ;;  %v13308_v29 = vld [vmem:[%s16861_s3 + $0x40] ss:$8 sps:$4 sm:$0xff]  }
 0x163   :  { %v1169_v45 = vpack.c.bf16 %v716_v43, %v712_v42  ;;  %10851 = vmatprep.mubr.msk.bf16.mxu0 %vm437_vm1, %v12844_v15 }
 0x165   :  { %v719_v46 = vpop.f32.mrb[60].mxu0  ;;  %1490 = vmatprep.subr.bf16.mxu0 %v1169_v45 }
 0x166   :  { %v721_v48 = vpop.f32.mrb[61].mxu0  ;;  %v720_v52 = vadd.f32 %v719_v46, %v13214_v22 }
 0x167   :  { %v723_v50 = vpop.f32.mrb[62].mxu0  ;;  %v722_v15 = vadd.f32 %v721_v48, %v13219_v62 }
 0x168   :  { %v725_v51 = vpop.f32.mrb[63].mxu0  ;;  %v724_v53 = vadd.f32 %v723_v50, %v13214_v22 }
 0x169   :  { %v726_v54 = vadd.f32 %v725_v51, %v13219_v62  ;;  %1420 = vmatmul.mubr.bf16.gmra.mrb[4].mxu1 %v13245_v47 }
 0x16a   :  { %10852 = vmatmul.mubr.msk.bf16.vlgmr.msra.gmra.mrb[168].mxu0 %vm437_vm1, %v12864_v20  ;;  %v1175_v55 = vpack.c.bf16 %v724_v53, %v720_v52  ;;  %9817 = vmatprep.mubr.msk.bf16.mxu1 %vm1352_vm2, %v13250_v49  ;;  %v13271_v20 = vld [vmem:[%s16861_s3 + $0x34] ss:$8 sps:$4 sm:$0xff]   ;;  %v13329_v52 = vld [vmem:[%s16861_s3 + $0x50] ss:$8 sps:$4 sm:$0xff]  }
 0x16b   :  { %1491 = vmatpush1.bf16.msra.mxu0 %v1168_v44  ;;  %v1176_v61 = vpack.c.bf16 %v726_v54, %v722_v15  ;;  %10855 = vmatprep.mubr.msk.bf16.mxu0 %vm437_vm1, %v12884_v25 }
 0x16d   :  { %v729_v63 = vpop.f32.mrb[64].mxu0  ;;  %1492 = vmatprep.subr.bf16.mxu0 %v1176_v61 }
 0x16e   :  { %v731_v2 = vpop.f32.mrb[65].mxu0  ;;  %v730_v4 = vadd.f32 %v729_v63, %v13214_v22 }
 0x16f   :  { %1493 = vmatpush1.bf16.msra.mxu0 %v1175_v55  ;;  %v733_v3 = vpop.f32.mrb[66].mxu0  ;;  %v732_v6 = vadd.f32 %v731_v2, %v13219_v62 }
 0x170   :  { %v734_v5 = vadd.f32 %v733_v3, %v13214_v22  ;;  %v735_v25 = vpop.f32.mrb[67].mxu0 }
 0x171   :  { %v736_v7 = vadd.f32 %v735_v25, %v13219_v62  ;;  %1430 = vmatmul.mubr.bf16.gmra.mrb[8].mxu1 %v13266_v0 }
 0x172   :  { %10856 = vmatmul.mubr.msk.bf16.gmra.mrb[172].mxu0 %vm437_vm1, %v12906_v31  ;;  %v1182_v8 = vpack.c.bf16 %v734_v5, %v730_v4  ;;  %9818 = vmatprep.mubr.msk.bf16.mxu1 %vm1352_vm2, %v13271_v20  ;;  %v13292_v31 = vld [vmem:[%s16861_s3 + $0x44] ss:$8 sps:$4 sm:$0xff]   ;;  %v13350_v5 = vld [vmem:[%s16861_s3 + $0x60] ss:$8 sps:$4 sm:$0xff]  }
 0x173   :  { %v1183_v9 = vpack.c.bf16 %v736_v7, %v732_v6  ;;  %10859 = vmatprep.mubr.msk.bf16.mxu0 %vm437_vm1, %v12914_v32 }
 0x175   :  { %v739_v10 = vpop.f32.mrb[68].mxu0  ;;  %1494 = vmatprep.subr.bf16.mxu0 %v1183_v9 }
 0x176   :  { %v741_v12 = vpop.f32.mrb[69].mxu0  ;;  %1495 = vmatpush1.bf16.msra.mxu0 %v1182_v8  ;;  %v740_v16 = vadd.f32 %v739_v10, %v13214_v22 }
 0x177   :  { %v743_v14 = vpop.f32.mrb[70].mxu0  ;;  %v742_v19 = vadd.f32 %v741_v12, %v13219_v62 }
 0x178   :  { %v744_v18 = vadd.f32 %v743_v14, %v13214_v22  ;;  %v745_v32 = vpop.f32.mrb[71].mxu0 }
 0x179   :  { %v746_v60 = vadd.f32 %v745_v32, %v13219_v62  ;;  %1440 = vmatmul.mubr.bf16.gmra.mrb[12].mxu1 %v13287_v11 }
 0x17a   :  { %10860 = vmatmul.mubr.msk.bf16.gmra.mrb[176].mxu0 %vm437_vm1, %v12922_v33  ;;  %v1189_v24 = vpack.c.bf16 %v744_v18, %v740_v16  ;;  %9819 = vmatprep.mubr.msk.bf16.mxu1 %vm1352_vm2, %v13292_v31  ;;  %v13313_v33 = vld [vmem:[%s16861_s3 + $0x54] ss:$8 sps:$4 sm:$0xff]   ;;  %v13371_v18 = vld [vmem:[%s16861_s3 + $0x70] ss:$8 sps:$4 sm:$0xff]  }
 0x17b   :  { %v1190_v27 = vpack.c.bf16 %v746_v60, %v742_v19  ;;  %10863 = vmatprep.mubr.msk.bf16.mxu0 %vm437_vm1, %v12930_v34 }
 0x17d   :  { %v749_v28 = vpop.f32.mrb[72].mxu0  ;;  %1496 = vmatprep.subr.bf16.mxu0 %v1190_v27 }
 0x17e   :  { %v751_v30 = vpop.f32.mrb[73].mxu0  ;;  %1497 = vmatpush1.bf16.msra.mxu0 %v1189_v24  ;;  %v750_v43 = vadd.f32 %v749_v28, %v13214_v22 }
 0x17f   :  { %v753_v42 = vpop.f32.mrb[74].mxu0  ;;  %v752_v45 = vadd.f32 %v751_v30, %v13219_v62 }
 0x180   :  { %v754_v44 = vadd.f32 %v753_v42, %v13214_v22  ;;  %v755_v34 = vpop.f32.mrb[75].mxu0 }
 0x181   :  { %v756_v46 = vadd.f32 %v755_v34, %v13219_v62  ;;  %1450 = vmatmul.mubr.bf16.gmra.mrb[16].mxu1 %v13308_v29 }
 0x182   :  { %10864 = vmatmul.mubr.msk.bf16.gmra.mrb[180].mxu0 %vm437_vm1, %v12938_v35  ;;  %v1196_v48 = vpack.c.bf16 %v754_v44, %v750_v43  ;;  %9820 = vmatprep.mubr.msk.bf16.mxu1 %vm1352_vm2, %v13313_v33  ;;  %v13334_v35 = vld [vmem:[%s16861_s3 + $0x64] ss:$8 sps:$4 sm:$0xff]  }
 0x183   :  { %v1197_v50 = vpack.c.bf16 %v756_v46, %v752_v45  ;;  %10867 = vmatprep.mubr.msk.bf16.mxu0 %vm437_vm1, %v12946_v36 }
 0x185   :  { %v759_v51 = vpop.f32.mrb[76].mxu0  ;;  %1498 = vmatprep.subr.bf16.mxu0 %v1197_v50 }
 0x186   :  { %v761_v53 = vpop.f32.mrb[77].mxu0  ;;  %1499 = vmatpush1.bf16.msra.mxu0 %v1196_v48  ;;  %v760_v54 = vadd.f32 %v759_v51, %v13214_v22 }
 0x187   :  { %v763_v15 = vpop.f32.mrb[78].mxu0  ;;  %v762_v61 = vadd.f32 %v761_v53, %v13219_v62 }
 0x188   :  { %v764_v55 = vadd.f32 %v763_v15, %v13214_v22  ;;  %v765_v36 = vpop.f32.mrb[79].mxu0 }
 0x189   :  { %v766_v63 = vadd.f32 %v765_v36, %v13219_v62  ;;  %1460 = vmatmul.mubr.bf16.gmra.mrb[20].mxu1 %v13329_v52 }
 0x18a   :  { %10868 = vmatmul.mubr.msk.bf16.gmra.mrb[184].mxu0 %vm437_vm1, %v12954_v37  ;;  %v1203_v2 = vpack.c.bf16 %v764_v55, %v760_v54  ;;  %9821 = vmatprep.mubr.msk.bf16.mxu1 %vm1352_vm2, %v13334_v35  ;;  %v13355_v37 = vld [vmem:[%s16861_s3 + $0x74] ss:$8 sps:$4 sm:$0xff]  }
 0x18b   :  { %v1204_v3 = vpack.c.bf16 %v766_v63, %v762_v61  ;;  %10871 = vmatprep.mubr.msk.bf16.mxu0 %vm437_vm1, %v12962_v38 }
 0x18d   :  { %v769_v4 = vpop.f32.mrb[80].mxu0  ;;  %1500 = vmatprep.subr.bf16.mxu0 %v1204_v3 }
 0x18e   :  { %v771_v25 = vpop.f32.mrb[81].mxu0  ;;  %1501 = vmatpush1.bf16.msra.mxu0 %v1203_v2  ;;  %v770_v7 = vadd.f32 %v769_v4, %v13214_v22 }
 0x18f   :  { %v773_v6 = vpop.f32.mrb[82].mxu0  ;;  %v772_v9 = vadd.f32 %v771_v25, %v13219_v62 }
 0x190   :  { %v774_v8 = vadd.f32 %v773_v6, %v13214_v22  ;;  %v775_v38 = vpop.f32.mrb[83].mxu0 }
 0x191   :  { %v776_v10 = vadd.f32 %v775_v38, %v13219_v62  ;;  %1470 = vmatmul.mubr.bf16.gmra.mrb[24].mxu1 %v13350_v5 }
 0x192   :  { %v1210_v12 = vpack.c.bf16 %v774_v8, %v770_v7  ;;  %10872 = vmatmul.mubr.msk.bf16.gmra.mrb[188].mxu0 %vm437_vm1, %v12970_v39  ;;  %9822 = vmatprep.mubr.msk.bf16.mxu1 %vm1352_vm2, %v13355_v37 }
 0x193   :  { %v1211_v14 = vpack.c.bf16 %v776_v10, %v772_v9  ;;  %10875 = vmatprep.mubr.msk.bf16.mxu0 %vm437_vm1, %v12978_v40 }
 0x195   :  { %v779_v16 = vpop.f32.mrb[84].mxu0  ;;  %1502 = vmatprep.subr.bf16.mxu0 %v1211_v14 }
 0x196   :  { %v781_v32 = vpop.f32.mrb[85].mxu0  ;;  %1503 = vmatpush1.bf16.msra.mxu0 %v1210_v12  ;;  %v780_v60 = vadd.f32 %v779_v16, %v13214_v22 }
 0x197   :  { %v783_v19 = vpop.f32.mrb[86].mxu0  ;;  %v782_v27 = vadd.f32 %v781_v32, %v13219_v62 }
 0x198   :  { %v784_v39 = vadd.f32 %v783_v19, %v13214_v22  ;;  %v785_v24 = vpop.f32.mrb[87].mxu0 }
 0x199   :  { %v786_v28 = vadd.f32 %v785_v24, %v13219_v62  ;;  %1480 = vmatmul.mubr.bf16.gmra.mrb[28].mxu1 %v13371_v18 }
 0x19a   :  { %v1217_v40 = vpack.c.bf16 %v784_v39, %v780_v60  ;;  %10876 = vmatmul.mubr.msk.bf16.gmra.mrb[192].mxu0 %vm437_vm1, %v12986_v41  ;;  %9831 = vmatprep.mubr.msk.bf16.mxu1 %vm1352_vm2, %v13177_v21 }
 0x19b   :  { %v1218_v30 = vpack.c.bf16 %v786_v28, %v782_v27  ;;  %9823 = vmatprep.mubr.msk.bf16.mxu0 %vm1352_vm2, %v13177_v21 }
 0x19d   :  { %v789_v42 = vpop.f32.mrb[88].mxu0  ;;  %1504 = vmatprep.subr.bf16.mxu0 %v1218_v30 }
 0x19e   :  { %v791_v43 = vpop.f32.mrb[89].mxu0  ;;  %1505 = vmatpush1.bf16.msra.mxu0 %v1217_v40  ;;  %v790_v34 = vadd.f32 %v789_v42, %v13214_v22 }
 0x19f   :  { %v793_v44 = vpop.f32.mrb[90].mxu0  ;;  %v792_v48 = vadd.f32 %v791_v43, %v13219_v62 }
 0x1a0   :  { %v794_v45 = vadd.f32 %v793_v44, %v13214_v22  ;;  %v795_v46 = vpop.f32.mrb[91].mxu0 }
 0x1a1   :  { %v796_v41 = vadd.f32 %v795_v46, %v13219_v62 }
 0x1a2   :  { %v1224_v50 = vpack.c.bf16 %v794_v45, %v790_v34 }
 0x1a3   :  { %v1225_v51 = vpack.c.bf16 %v796_v41, %v792_v48 }
 0x1a5   :  { %v799_v53 = vpop.f32.mrb[92].mxu0  ;;  %1506 = vmatprep.subr.bf16.mxu0 %v1225_v51 }
 0x1a6   :  { %v801_v15 = vpop.f32.mrb[93].mxu0  ;;  %1507 = vmatpush1.bf16.msra.mxu0 %v1224_v50  ;;  %v800_v54 = vadd.f32 %v799_v53, %v13214_v22 }
 0x1a7   :  { %v803_v21 = vpop.f32.mrb[94].mxu0  ;;  %v802_v61 = vadd.f32 %v801_v15, %v13219_v62 }
 0x1a8   :  { %v804_v55 = vadd.f32 %v803_v21, %v13214_v22  ;;  %v805_v36 = vpop.f32.mrb[95].mxu0 }
 0x1a9   :  { %v806_v63 = vadd.f32 %v805_v36, %v13219_v62 }
 0x1aa   :  { %v1231_v2 = vpack.c.bf16 %v804_v55, %v800_v54 }
 0x1ab   :  { %v1232_v3 = vpack.c.bf16 %v806_v63, %v802_v61  ;;  %v141_v61 = vsub.s32 4, %v13065_v56 }
 0x1ad   :  { %v809_v4 = vpop.f32.mrb[96].mxu0  ;;  %1508 = vmatprep.subr.bf16.mxu0 %v1232_v3  ;;  %v145_v3 = vsub.s32 5, %v13065_v56 }
 0x1ae   :  { %v811_v25 = vpop.f32.mrb[97].mxu0  ;;  %1509 = vmatpush1.bf16.msra.mxu0 %v1231_v2  ;;  %v810_v7 = vadd.f32 %v809_v4, %v13214_v22 }
 0x1af   :  { %v813_v6 = vpop.f32.mrb[98].mxu0  ;;  %v812_v9 = vadd.f32 %v811_v25, %v13219_v62 }
 0x1b0   :  { %v814_v8 = vadd.f32 %v813_v6, %v13214_v22  ;;  %v815_v38 = vpop.f32.mrb[99].mxu0  ;;  %v13411_v6 = vrot.slane %v13071_v58, %v141_v61 }
 0x1b1   :  { %v816_v10 = vadd.f32 %v815_v38, %v13219_v62 }
 0x1b2   :  { %v1238_v12 = vpack.c.bf16 %v814_v8, %v810_v7  ;;  %v13414_v8 = vrot.slane %v13071_v58, %v145_v3 }
 0x1b3   :  { %v1239_v14 = vpack.c.bf16 %v816_v10, %v812_v9 }
 0x1b5   :  { %v819_v16 = vpop.f32.mrb[100].mxu0  ;;  %1510 = vmatprep.subr.bf16.mxu0 %v1239_v14 }
 0x1b6   :  { %v821_v32 = vpop.f32.mrb[101].mxu0  ;;  %1511 = vmatpush1.bf16.msra.mxu0 %v1238_v12  ;;  %v820_v60 = vadd.f32 %v819_v16, %v13214_v22 }
 0x1b7   :  { %v823_v19 = vpop.f32.mrb[102].mxu0  ;;  %v822_v27 = vadd.f32 %v821_v32, %v13219_v62 }
 0x1b8   :  { %v824_v39 = vadd.f32 %v823_v19, %v13214_v22  ;;  %v825_v24 = vpop.f32.mrb[103].mxu0 }
 0x1b9   :  { %v826_v28 = vadd.f32 %v825_v24, %v13219_v62 }
 0x1ba   :  { %v1245_v40 = vpack.c.bf16 %v824_v39, %v820_v60 }
 0x1bb   :  { %v1246_v30 = vpack.c.bf16 %v826_v28, %v822_v27 }
 0x1bd   :  { %v829_v42 = vpop.f32.mrb[104].mxu0  ;;  %1512 = vmatprep.subr.bf16.mxu0 %v1246_v30 }
 0x1be   :  { %v831_v43 = vpop.f32.mrb[105].mxu0  ;;  %1513 = vmatpush1.bf16.msra.mxu0 %v1245_v40  ;;  %v830_v34 = vadd.f32 %v829_v42, %v13214_v22 }
 0x1bf   :  { %v833_v44 = vpop.f32.mrb[106].mxu0  ;;  %v832_v48 = vadd.f32 %v831_v43, %v13219_v62 }
 0x1c0   :  { %v834_v45 = vadd.f32 %v833_v44, %v13214_v22  ;;  %v835_v46 = vpop.f32.mrb[107].mxu0 }
 0x1c1   :  { %v836_v41 = vadd.f32 %v835_v46, %v13219_v62 }
 0x1c2   :  { %v1252_v50 = vpack.c.bf16 %v834_v45, %v830_v34 }
 0x1c3   :  { %v1253_v51 = vpack.c.bf16 %v836_v41, %v832_v48 }
 0x1c5   :  { %v839_v53 = vpop.f32.mrb[108].mxu0  ;;  %1514 = vmatprep.subr.bf16.mxu0 %v1253_v51 }
 0x1c6   :  { %v841_v15 = vpop.f32.mrb[109].mxu0  ;;  %1515 = vmatpush1.bf16.msra.mxu0 %v1252_v50  ;;  %v840_v54 = vadd.f32 %v839_v53, %v13214_v22 }
 0x1c7   :  { %v843_v21 = vpop.f32.mrb[110].mxu0  ;;  %v842_v63 = vadd.f32 %v841_v15, %v13219_v62 }
 0x1c8   :  { %v844_v55 = vadd.f32 %v843_v21, %v13214_v22  ;;  %v845_v36 = vpop.f32.mrb[111].mxu0 }
 0x1c9   :  { %v846_v2 = vadd.f32 %v845_v36, %v13219_v62 }
 0x1ca   :  { %v1259_v4 = vpack.c.bf16 %v844_v55, %v840_v54 }
 0x1cb   :  { %v1260_v25 = vpack.c.bf16 %v846_v2, %v842_v63 }
 0x1cd   :  { %v882_v7 = vpop.f32.mrb[112].mxu0  ;;  %1516 = vmatprep.subr.bf16.mxu0 %v1260_v25 }
 0x1ce   :  { %v884_v22 = vpop.f32.mrb[113].mxu0  ;;  %1517 = vmatpush1.bf16.msra.mxu0 %v1259_v4  ;;  %v883_v9 = vadd.f32 %v882_v7, %v13411_v6 }
 0x1cf   :  { %v886_v38 = vpop.f32.mrb[114].mxu0  ;;  %1716 = vmatprep.subr.bf16.mxu0 %v16876_v1  ;;  %v885_v12 = vadd.f32 %v884_v22, %v13414_v8 }
 0x1d0   :  { %v887_v62 = vadd.f32 %v886_v38, %v13411_v6  ;;  %v888_v10 = vpop.f32.mrb[115].mxu0 }
 0x1d1   :  { %v889_v14 = vadd.f32 %v888_v10, %v13414_v8  ;;  %1523 = vmatmul.mubr.bf16.vlgmr.msra.gmra.mrb[196].mxu0 %v13224_v23 }
 0x1d2   :  { %v1170_v16 = vpack.c.bf16 %v887_v62, %v883_v9  ;;  %9824 = vmatprep.mubr.msk.bf16.mxu0 %vm1352_vm2, %v13229_v26 }
 0x1d3   :  { %v1171_v58 = vpack.c.bf16 %v889_v14, %v885_v12 }
 0x1d5   :  { %v892_v32 = vpop.f32.mrb[116].mxu0  ;;  %1603 = vmatprep.subr.bf16.mxu1 %v1171_v58 }
 0x1d6   :  { %v894_v19 = vpop.f32.mrb[117].mxu0  ;;  %1604 = vmatpush1.bf16.msra.mxu1 %v1170_v16  ;;  %v893_v39 = vadd.f32 %v892_v32, %v13411_v6 }
 0x1d7   :  { %v896_v60 = vpop.f32.mrb[118].mxu0  ;;  %v895_v28 = vadd.f32 %v894_v19, %v13414_v8 }
 0x1d8   :  { %v897_v24 = vadd.f32 %v896_v60, %v13411_v6  ;;  %v898_v27 = vpop.f32.mrb[119].mxu0 }
 0x1d9   :  { %v899_v40 = vadd.f32 %v898_v27, %v13414_v8  ;;  %1533 = vmatmul.mubr.bf16.gmra.mrb[200].mxu0 %v13245_v47 }
 0x1da   :  { %v1177_v23 = vpack.c.bf16 %v897_v24, %v893_v39  ;;  %9825 = vmatprep.mubr.msk.bf16.mxu0 %vm1352_vm2, %v13250_v49 }
 0x1db   :  { %v1178_v26 = vpack.c.bf16 %v899_v40, %v895_v28 }
 0x1dd   :  { %v902_v30 = vpop.f32.mrb[120].mxu0  ;;  %1605 = vmatprep.subr.bf16.mxu1 %v1178_v26 }
 0x1de   :  { %v904_v42 = vpop.f32.mrb[121].mxu0  ;;  %1606 = vmatpush1.bf16.msra.mxu1 %v1177_v23  ;;  %v903_v44 = vadd.f32 %v902_v30, %v13411_v6 }
 0x1df   :  { %v906_v43 = vpop.f32.mrb[122].mxu0  ;;  %v905_v46 = vadd.f32 %v904_v42, %v13414_v8 }
 0x1e0   :  { %v907_v34 = vadd.f32 %v906_v43, %v13411_v6  ;;  %v908_v45 = vpop.f32.mrb[123].mxu0 }
 0x1e1   :  { %v909_v48 = vadd.f32 %v908_v45, %v13414_v8  ;;  %1543 = vmatmul.mubr.bf16.gmra.mrb[204].mxu0 %v13266_v0 }
 0x1e2   :  { %v1184_v47 = vpack.c.bf16 %v907_v34, %v903_v44  ;;  %9826 = vmatprep.mubr.msk.bf16.mxu0 %vm1352_vm2, %v13271_v20 }
 0x1e3   :  { %v1185_v49 = vpack.c.bf16 %v909_v48, %v905_v46 }
 0x1e5   :  { %v912_v41 = vpop.f32.mrb[124].mxu0  ;;  %1607 = vmatprep.subr.bf16.mxu1 %v1185_v49 }
 0x1e6   :  { %v914_v50 = vpop.f32.mrb[125].mxu0  ;;  %1608 = vmatpush1.bf16.msra.mxu1 %v1184_v47  ;;  %v913_v53 = vadd.f32 %v912_v41, %v13411_v6 }
 0x1e7   :  { %v916_v51 = vpop.f32.mrb[126].mxu0  ;;  %v915_v54 = vadd.f32 %v914_v50, %v13414_v8 }
 0x1e8   :  { %v917_v15 = vadd.f32 %v916_v51, %v13411_v6  ;;  %v918_v21 = vpop.f32.mrb[127].mxu0 }
 0x1e9   :  { %v919_v55 = vadd.f32 %v918_v21, %v13414_v8  ;;  %1553 = vmatmul.mubr.bf16.gmra.mrb[208].mxu0 %v13287_v11 }
 0x1ea   :  { %v1191_v0 = vpack.c.bf16 %v917_v15, %v913_v53  ;;  %9827 = vmatprep.mubr.msk.bf16.mxu0 %vm1352_vm2, %v13292_v31 }
 0x1eb   :  { %v1192_v20 = vpack.c.bf16 %v919_v55, %v915_v54 }
 0x1ed   :  { %v922_v36 = vpop.f32.mrb[128].mxu0  ;;  %1609 = vmatprep.subr.bf16.mxu1 %v1192_v20 }
 0x1ee   :  { %v924_v61 = vpop.f32.mrb[129].mxu0  ;;  %1610 = vmatpush1.bf16.msra.mxu1 %v1191_v0  ;;  %v923_v2 = vadd.f32 %v922_v36, %v13411_v6 }
 0x1ef   :  { %v926_v63 = vpop.f32.mrb[130].mxu0  ;;  %v925_v25 = vadd.f32 %v924_v61, %v13414_v8 }
 0x1f0   :  { %v927_v3 = vadd.f32 %v926_v63, %v13411_v6  ;;  %v928_v4 = vpop.f32.mrb[131].mxu0 }
 0x1f1   :  { %v929_v7 = vadd.f32 %v928_v4, %v13414_v8  ;;  %1563 = vmatmul.mubr.bf16.gmra.mrb[212].mxu0 %v13308_v29 }
 0x1f2   :  { %v1198_v11 = vpack.c.bf16 %v927_v3, %v923_v2  ;;  %9828 = vmatprep.mubr.msk.bf16.mxu0 %vm1352_vm2, %v13313_v33 }
 0x1f3   :  { %v1199_v31 = vpack.c.bf16 %v929_v7, %v925_v25 }
 0x1f5   :  { %v932_v22 = vpop.f32.mrb[132].mxu0  ;;  %1611 = vmatprep.subr.bf16.mxu1 %v1199_v31 }
 0x1f6   :  { %v934_v38 = vpop.f32.mrb[133].mxu0  ;;  %1612 = vmatpush1.bf16.msra.mxu1 %v1198_v11  ;;  %v933_v62 = vadd.f32 %v932_v22, %v13411_v6 }
 0x1f7   :  { %v936_v9 = vpop.f32.mrb[134].mxu0  ;;  %v935_v14 = vadd.f32 %v934_v38, %v13414_v8 }
 0x1f8   :  { %v937_v10 = vadd.f32 %v936_v9, %v13411_v6  ;;  %v938_v12 = vpop.f32.mrb[135].mxu0 }
 0x1f9   :  { %v939_v16 = vadd.f32 %v938_v12, %v13414_v8  ;;  %1573 = vmatmul.mubr.bf16.gmra.mrb[216].mxu0 %v13329_v52 }
 0x1fa   :  { %v1205_v29 = vpack.c.bf16 %v937_v10, %v933_v62  ;;  %9829 = vmatprep.mubr.msk.bf16.mxu0 %vm1352_vm2, %v13334_v35 }
 0x1fb   :  { %v1206_v33 = vpack.c.bf16 %v939_v16, %v935_v14 }
 0x1fd   :  { %v942_v58 = vpop.f32.mrb[136].mxu0  ;;  %1613 = vmatprep.subr.bf16.mxu1 %v1206_v33 }
 0x1fe   :  { %v944_v32 = vpop.f32.mrb[137].mxu0  ;;  %1614 = vmatpush1.bf16.msra.mxu1 %v1205_v29  ;;  %v943_v60 = vadd.f32 %v942_v58, %v13411_v6 }
 0x1ff   :  { %v946_v19 = vpop.f32.mrb[138].mxu0  ;;  %v945_v27 = vadd.f32 %v944_v32, %v13414_v8 }
 0x200   :  { %v947_v39 = vadd.f32 %v946_v19, %v13411_v6  ;;  %v948_v24 = vpop.f32.mrb[139].mxu0 }
 0x201   :  { %v949_v28 = vadd.f32 %v948_v24, %v13414_v8  ;;  %1583 = vmatmul.mubr.bf16.gmra.mrb[220].mxu0 %v13350_v5 }
 0x202   :  { %v1212_v52 = vpack.c.bf16 %v947_v39, %v943_v60  ;;  %9830 = vmatprep.mubr.msk.bf16.mxu0 %vm1352_vm2, %v13355_v37  ;;  %v12708_v37 = vld [vmem:[%s16861_s3 + $0x4] ss:$8 sps:$4 sm:$0xff]  }
 0x203   :  { %v1213_v35 = vpack.c.bf16 %v949_v28, %v945_v27 }
 0x205   :  { %v952_v40 = vpop.f32.mrb[140].mxu0  ;;  %1615 = vmatprep.subr.bf16.mxu1 %v1213_v35 }
 0x206   :  { %v954_v23 = vpop.f32.mrb[141].mxu0  ;;  %1616 = vmatpush1.bf16.msra.mxu1 %v1212_v52  ;;  %v953_v30 = vadd.f32 %v952_v40, %v13411_v6 }
 0x207   :  { %v956_v26 = vpop.f32.mrb[142].mxu0  ;;  %v955_v44 = vadd.f32 %v954_v23, %v13414_v8 }
 0x208   :  { %v957_v42 = vadd.f32 %v956_v26, %v13411_v6  ;;  %v958_v43 = vpop.f32.mrb[143].mxu0 }
 0x209   :  { %v959_v34 = vadd.f32 %v958_v43, %v13414_v8  ;;  %1593 = vmatmul.mubr.bf16.gmra.mrb[224].mxu0 %v13371_v18 }
 0x20a   :  { %v1219_v5 = vpack.c.bf16 %v957_v42, %v953_v30  ;;  %9839 = vmatprep.mubr.msk.bf16.mxu0 %vm1352_vm2, %v12708_v37 }
 0x20b   :  { %v1220_v45 = vpack.c.bf16 %v959_v34, %v955_v44 }
 0x20d   :  { %v962_v46 = vpop.f32.mrb[144].mxu0  ;;  %1617 = vmatprep.subr.bf16.mxu1 %v1220_v45 }
 0x20e   :  { %v964_v48 = vpop.f32.mrb[145].mxu0  ;;  %1618 = vmatpush1.bf16.msra.mxu1 %v1219_v5  ;;  %v963_v49 = vadd.f32 %v962_v46, %v13411_v6  ;;  %v149_v46 = vsub.s32 6, %v13065_v56  ;;  %v12162_v56 = vld [vmem:[%s16863_s5 + $0x480] ss:$16 sps:$4 sm:$0xff]  }
 0x20f   :  { %v966_v47 = vpop.f32.mrb[146].mxu0  ;;  %v965_v18 = vadd.f32 %v964_v48, %v13414_v8 }
 0x210   :  { %v967_v41 = vadd.f32 %v966_v47, %v13411_v6  ;;  %v968_v50 = vpop.f32.mrb[147].mxu0 }
 0x211   :  { %v969_v51 = vadd.f32 %v968_v50, %v13414_v8 }
 0x212   :  { %v1226_v53 = vpack.c.bf16 %v967_v41, %v963_v49 }
 0x213   :  { %v1227_v15 = vpack.c.bf16 %v969_v51, %v965_v18 }
 0x215   :  { %v972_v21 = vpop.f32.mrb[148].mxu0  ;;  %1619 = vmatprep.subr.bf16.mxu1 %v1227_v15 }
 0x216   :  { %v974_v54 = vpop.f32.mrb[149].mxu0  ;;  %1620 = vmatpush1.bf16.msra.mxu1 %v1226_v53  ;;  %v973_v0 = vadd.f32 %v972_v21, %v13411_v6 }
 0x217   :  { %v976_v55 = vpop.f32.mrb[150].mxu0  ;;  %v975_v61 = vadd.f32 %v974_v54, %v13414_v8  ;;  %v12709_v54 = vld [vmem:[%s16860_s2] sm:$0xff] }
 0x218   :  { %v977_v20 = vadd.f32 %v976_v55, %v13411_v6  ;;  %v978_v36 = vpop.f32.mrb[151].mxu0  ;;  %v13507_v55 = vrot.slane %v12709_v54, %v149_v46 }
 0x219   :  { %v979_v63 = vadd.f32 %v978_v36, %v13414_v8 }
 0x21a   :  { %v1233_v2 = vpack.c.bf16 %v977_v20, %v973_v0  ;;  %v11612_v0 = vld [vmem:[%s16862_s4 + $0x4] ss:$16 sps:$4 sm:$0xff]  }
 0x21b   :  { %v1234_v3 = vpack.c.bf16 %v979_v63, %v975_v61 }
 0x21d   :  { %v982_v4 = vpop.f32.mrb[152].mxu0  ;;  %1621 = vmatprep.subr.bf16.mxu1 %v1234_v3 }
 0x21e   :  { %v984_v25 = vpop.f32.mrb[153].mxu0  ;;  %1622 = vmatpush1.bf16.msra.mxu1 %v1233_v2  ;;  %v983_v11 = vadd.f32 %v982_v4, %v13411_v6  ;;  %v11615_v2 = vld [vmem:[%s16862_s4 + $0x24] ss:$16 sps:$4 sm:$0xff]  }
 0x21f   :  { %v986_v7 = vpop.f32.mrb[154].mxu0  ;;  %v985_v38 = vadd.f32 %v984_v25, %v13414_v8 }
 0x220   :  { %v987_v31 = vadd.f32 %v986_v7, %v13411_v6  ;;  %v988_v22 = vpop.f32.mrb[155].mxu0 }
 0x221   :  { %v989_v9 = vadd.f32 %v988_v22, %v13414_v8 }
 0x222   :  { %v1240_v62 = vpack.c.bf16 %v987_v31, %v983_v11 }
 0x223   :  { %v1241_v10 = vpack.c.bf16 %v989_v9, %v985_v38 }
 0x225   :  { %v992_v12 = vpop.f32.mrb[156].mxu0  ;;  %1623 = vmatprep.subr.bf16.mxu1 %v1241_v10 }
 0x226   :  { %v994_v14 = vpop.f32.mrb[157].mxu0  ;;  %1624 = vmatpush1.bf16.msra.mxu1 %v1240_v62  ;;  %v993_v29 = vadd.f32 %v992_v12, %v13411_v6  ;;  %v13529_v62 = vld [vmem:[%s16861_s3] ss:$8 sps:$4 sm:$0xff]   ;;  %v13535_v12 = vld [vmem:[%s16861_s3 + $0x14] ss:$8 sps:$4 sm:$0xff]  }
 0x227   :  { %v996_v16 = vpop.f32.mrb[158].mxu0  ;;  %v995_v32 = vadd.f32 %v994_v14, %v13414_v8  ;;  %v11613_v14 = vld [vmem:[%s16862_s4 + $0x20] ss:$16 sps:$4 sm:$0xff]  }
 0x228   :  { %v997_v33 = vadd.f32 %v996_v16, %v13411_v6  ;;  %v998_v58 = vpop.f32.mrb[159].mxu0 }
 0x229   :  { %v999_v19 = vadd.f32 %v998_v58, %v13414_v8 }
 0x22a   :  { %v1247_v60 = vpack.c.bf16 %v997_v33, %v993_v29  ;;  %v11618_v29 = vld [vmem:[%s16862_s4 + $0x44] ss:$16 sps:$4 sm:$0xff]  }
 0x22b   :  { %v1248_v39 = vpack.c.bf16 %v999_v19, %v995_v32 }
 0x22d   :  { %v1002_v24 = vpop.f32.mrb[160].mxu0  ;;  %1625 = vmatprep.subr.bf16.mxu1 %v1248_v39 }
 0x22e   :  { %v1004_v27 = vpop.f32.mrb[161].mxu0  ;;  %1626 = vmatpush1.bf16.msra.mxu1 %v1247_v60  ;;  %v1003_v52 = vadd.f32 %v1002_v24, %v13411_v6 }
 0x22f   :  { %v1006_v28 = vpop.f32.mrb[162].mxu0  ;;  %v1005_v23 = vadd.f32 %v1004_v27, %v13414_v8 }
 0x230   :  { %v1007_v35 = vadd.f32 %v1006_v28, %v13411_v6  ;;  %v1008_v40 = vpop.f32.mrb[163].mxu0  ;;  %v11616_v28 = vld [vmem:[%s16862_s4 + $0x40] ss:$16 sps:$4 sm:$0xff]  }
 0x231   :  { %v1009_v26 = vadd.f32 %v1008_v40, %v13414_v8 }
 0x232   :  { %v1254_v30 = vpack.c.bf16 %v1007_v35, %v1003_v52 }
 0x233   :  { %v1255_v42 = vpack.c.bf16 %v1009_v26, %v1005_v23  ;;  %v11621_v26 = vld [vmem:[%s16862_s4 + $0x64] ss:$16 sps:$4 sm:$0xff]  }
 0x234   :  { %v1411_v43 = vpop.f32.mrb[0].mxu1 }
 0x235   :  { %v1012_v44 = vpop.f32.mrb[164].mxu0  ;;  %1627 = vmatprep.subr.bf16.mxu1 %v1255_v42  ;;  %v1413_v34 = vpop.f32.mrb[1].mxu1 }
 0x236   :  { %v1014_v5 = vpop.f32.mrb[165].mxu0  ;;  %1628 = vmatpush1.bf16.msra.mxu1 %v1254_v30  ;;  %v1415_v37 = vpop.f32.mrb[2].mxu1  ;;  %v1013_v49 = vadd.f32 %v1012_v44, %v13411_v6 }
 0x237   :  { %v1016_v45 = vpop.f32.mrb[166].mxu0  ;;  %v13496_v48 = vpack.c.bf16 %v1415_v37, %v1411_v43  ;;  %v1417_v47 = vpop.f32.mrb[3].mxu1  ;;  %v1015_v51 = vadd.f32 %v1014_v5, %v13414_v8  ;;  %v13563_v43 = vld [vmem:[%s16861_s3 + $0x10] ss:$8 sps:$4 sm:$0xff]  }
 0x238   :  { %v1017_v41 = vadd.f32 %v1016_v45, %v13411_v6  ;;  %v1018_v50 = vpop.f32.mrb[167].mxu0  ;;  %v13500_v18 = vpack.c.bf16 %v1417_v47, %v1413_v34  ;;  %v13570_v34 = vld [vmem:[%s16861_s3 + $0x24] ss:$8 sps:$4 sm:$0xff]   ;;  %v11619_v37 = vld [vmem:[%s16862_s4 + $0x60] ss:$16 sps:$4 sm:$0xff]  }
 0x239   :  { %v1019_v53 = vadd.f32 %v1018_v50, %v13414_v8  ;;  %v11610_v8 = vld [vmem:[%s16862_s4] ss:$16 sps:$4 sm:$0xff]   ;;  %v11624_v45 = vld [vmem:[%s16862_s4 + $0x84] ss:$16 sps:$4 sm:$0xff]  }
 0x23a   :  { %v1261_v15 = vpack.c.bf16 %v1017_v41, %v1013_v49 }
 0x23b   :  { %v1262_v21 = vpack.c.bf16 %v1019_v53, %v1015_v51 }
 0x23c   :  { %v1421_v6 = vpop.f32.mrb[4].mxu1 }
 0x23d   :  { %v10853_v20 = vpop.f32.mrb[168].mxu0  ;;  %1629 = vmatprep.subr.bf16.mxu1 %v1262_v21  ;;  %v1423_v36 = vpop.f32.mrb[5].mxu1  ;;  %v11622_v21 = vld [vmem:[%s16862_s4 + $0x80] ss:$16 sps:$4 sm:$0xff]  }
 0x23e   :  { %v1064_v61 = vadd.f32 %v10853_v20, %v13507_v55  ;;  %v1055_v63 = vpop.f32.mrb[169].mxu0  ;;  %1630 = vmatpush1.bf16.msra.mxu1 %v1261_v15  ;;  %v1425_v3 = vpop.f32.mrb[6].mxu1 }
 0x23f   :  { %v1056_v4 = vadd.f32 %v1055_v63, %v13507_v55  ;;  %v10854_v25 = vpop.f32.mrb[170].mxu0  ;;  %3213 = vmatprep.subr.bf16.mxu1 %v11612_v0  ;;  %v13520_v7 = vpack.c.bf16 %v1425_v3, %v1421_v6  ;;  %v1427_v11 = vpop.f32.mrb[7].mxu1  ;;  %v13605_v3 = vld [vmem:[%s16861_s3 + $0x34] ss:$8 sps:$4 sm:$0xff]  }
 0x240   :  { %v1067_v31 = vadd.f32 %v10854_v25, %v13507_v55  ;;  %v1058_v22 = vpop.f32.mrb[171].mxu0  ;;  %v13523_v38 = vpack.c.bf16 %v1427_v11, %v1423_v36  ;;  %v11627_v36 = vld [vmem:[%s16862_s4 + $0xa4] ss:$16 sps:$4 sm:$0xff]   ;;  %v11625_v25 = vld [vmem:[%s16862_s4 + $0xa0] ss:$16 sps:$4 sm:$0xff]  }
 0x241   :  { %v1059_v9 = vadd.f32 %v1058_v22, %v13507_v55  ;;  %1636 = vmatmul.mubr.bf16.vlgmr.msra.gmra.mrb[32].mxu1 %v13529_v62  ;;  %v11630_v11 = vld [vmem:[%s16862_s4 + $0xc4] ss:$16 sps:$4 sm:$0xff]  }
 0x242   :  { %v1179_v10 = vpack.c.bf16 %v1067_v31, %v1064_v61  ;;  %9832 = vmatprep.mubr.msk.bf16.mxu1 %vm1352_vm2, %v13535_v12  ;;  %3214 = vmatpush1.bf16.msra.mxu1 %v11610_v8  ;;  %v13598_v8 = vld [vmem:[%s16861_s3 + $0x20] ss:$8 sps:$4 sm:$0xff]  }
 0x243   :  { %v1172_v16 = vpack.c.bf16 %v1059_v9, %v1056_v4  ;;  %3215 = vmatprep.subr.bf16.mxu1 %v11615_v2 }
 0x244   :  { %v1431_v33 = vpop.f32.mrb[8].mxu1 }
 0x245   :  { %v10857_v58 = vpop.f32.mrb[172].mxu0  ;;  %1717 = vmatpush1.bf16.msra.mxu0 %v1172_v16  ;;  %v1433_v32 = vpop.f32.mrb[9].mxu1 }
 0x246   :  { %v1080_v19 = vadd.f32 %v10857_v58, %v13507_v55  ;;  %v1071_v60 = vpop.f32.mrb[173].mxu0  ;;  %1718 = vmatprep.subr.bf16.mxu0 %v16876_v1  ;;  %3216 = vmatpush1.bf16.msra.mxu1 %v11613_v14  ;;  %v1435_v39 = vpop.f32.mrb[10].mxu1  ;;  %v11628_v58 = vld [vmem:[%s16862_s4 + $0xc0] ss:$16 sps:$4 sm:$0xff]  }
 0x247   :  { %v1072_v24 = vadd.f32 %v1071_v60, %v13507_v55  ;;  %v10858_v27 = vpop.f32.mrb[174].mxu0  ;;  %3217 = vmatprep.subr.bf16.mxu1 %v11618_v29  ;;  %v13551_v52 = vpack.c.bf16 %v1435_v39, %v1431_v33  ;;  %v1437_v35 = vpop.f32.mrb[11].mxu1 }
 0x248   :  { %v1083_v40 = vadd.f32 %v10858_v27, %v13507_v55  ;;  %v1074_v23 = vpop.f32.mrb[175].mxu0  ;;  %v13557_v30 = vpack.c.bf16 %v1437_v35, %v1433_v32  ;;  %v13633_v35 = vld [vmem:[%s16861_s3 + $0x30] ss:$8 sps:$4 sm:$0xff]  }
 0x249   :  { %v1075_v42 = vadd.f32 %v1074_v23, %v13507_v55  ;;  %1646 = vmatmul.mubr.bf16.gmra.mrb[36].mxu1 %v13563_v43  ;;  %1719 = vmatpush1.bf16.msra.mxu0 %v1179_v10  ;;  %v13640_v23 = vld [vmem:[%s16861_s3 + $0x44] ss:$8 sps:$4 sm:$0xff]  }
 0x24a   :  { %v1193_v44 = vpack.c.bf16 %v1083_v40, %v1080_v19  ;;  %1720 = vmatprep.subr.bf16.mxu0 %v16876_v1  ;;  %9833 = vmatprep.mubr.msk.bf16.mxu1 %vm1352_vm2, %v13570_v34 }
 0x24b   :  { %v1186_v5 = vpack.c.bf16 %v1075_v42, %v1072_v24  ;;  %3218 = vmatpush1.bf16.msra.mxu1 %v11616_v28  ;;  %v11633_v24 = vld [vmem:[%s16862_s4 + $0xe4] ss:$16 sps:$4 sm:$0xff]   ;;  %v11631_v42 = vld [vmem:[%s16862_s4 + $0xe0] ss:$16 sps:$4 sm:$0xff]  }
 0x24c   :  { %3219 = vmatprep.subr.bf16.mxu1 %v11621_v26  ;;  %v1441_v46 = vpop.f32.mrb[12].mxu1 }
 0x24d   :  { %v10861_v47 = vpop.f32.mrb[176].mxu0  ;;  %1721 = vmatpush1.bf16.msra.mxu0 %v1186_v5  ;;  %v1443_v49 = vpop.f32.mrb[13].mxu1 }
 0x24e   :  { %v1096_v41 = vadd.f32 %v10861_v47, %v13507_v55  ;;  %v1087_v50 = vpop.f32.mrb[177].mxu0  ;;  %1722 = vmatprep.subr.bf16.mxu0 %v16876_v1  ;;  %v1445_v51 = vpop.f32.mrb[14].mxu1 }
 0x24f   :  { %v1088_v53 = vadd.f32 %v1087_v50, %v13507_v55  ;;  %v10862_v15 = vpop.f32.mrb[178].mxu0  ;;  %3220 = vmatpush1.bf16.msra.mxu1 %v11619_v37  ;;  %v13586_v54 = vpack.c.bf16 %v1445_v51, %v1441_v46  ;;  %v1447_v0 = vpop.f32.mrb[15].mxu1  ;;  %v11634_v51 = vld [vmem:[%s16862_s4 + $0x100] ss:$16 sps:$4 sm:$0xff]  }
 0x250   :  { %v1099_v6 = vadd.f32 %v10862_v15, %v13507_v55  ;;  %v1090_v20 = vpop.f32.mrb[179].mxu0  ;;  %3221 = vmatprep.subr.bf16.mxu1 %v11624_v45  ;;  %v13592_v61 = vpack.c.bf16 %v1447_v0, %v1443_v49 }
 0x251   :  { %v1091_v63 = vadd.f32 %v1090_v20, %v13507_v55  ;;  %1656 = vmatmul.mubr.bf16.gmra.mrb[40].mxu1 %v13598_v8  ;;  %1723 = vmatpush1.bf16.msra.mxu0 %v1193_v44  ;;  %v11636_v44 = vld [vmem:[%s16862_s4 + $0x104] ss:$16 sps:$4 sm:$0xff]  }
 0x252   :  { %v1207_v2 = vpack.c.bf16 %v1099_v6, %v1096_v41  ;;  %1724 = vmatprep.subr.bf16.mxu0 %v16876_v1  ;;  %9834 = vmatprep.mubr.msk.bf16.mxu1 %vm1352_vm2, %v13605_v3  ;;  %v11639_v6 = vld [vmem:[%s16862_s4 + $0x124] ss:$16 sps:$4 sm:$0xff]  }
 0x253   :  { %v1200_v4 = vpack.c.bf16 %v1091_v63, %v1088_v53  ;;  %3222 = vmatpush1.bf16.msra.mxu1 %v11622_v21  ;;  %v13668_v63 = vld [vmem:[%s16861_s3 + $0x40] ss:$8 sps:$4 sm:$0xff]  }
 0x254   :  { %3223 = vmatprep.subr.bf16.mxu1 %v11627_v36  ;;  %v1451_v31 = vpop.f32.mrb[16].mxu1 }
 0x255   :  { %v10865_v22 = vpop.f32.mrb[180].mxu0  ;;  %1725 = vmatpush1.bf16.msra.mxu0 %v1200_v4  ;;  %v1453_v9 = vpop.f32.mrb[17].mxu1  ;;  %v13675_v4 = vld [vmem:[%s16861_s3 + $0x54] ss:$8 sps:$4 sm:$0xff]  }
 0x256   :  { %v1112_v10 = vadd.f32 %v10865_v22, %v13507_v55  ;;  %v1103_v14 = vpop.f32.mrb[181].mxu0  ;;  %1726 = vmatprep.subr.bf16.mxu0 %v16876_v1  ;;  %v1455_v16 = vpop.f32.mrb[18].mxu1 }
 0x257   :  { %v1104_v29 = vadd.f32 %v1103_v14, %v13507_v55  ;;  %v10866_v33 = vpop.f32.mrb[182].mxu0  ;;  %3224 = vmatpush1.bf16.msra.mxu1 %v11625_v25  ;;  %v13621_v32 = vpack.c.bf16 %v1455_v16, %v1451_v31  ;;  %v1457_v19 = vpop.f32.mrb[19].mxu1  ;;  %v11645_v31 = vld [vmem:[%s16862_s4 + $0x144] ss:$16 sps:$4 sm:$0xff]  }
 0x258   :  { %v1115_v60 = vadd.f32 %v10866_v33, %v13507_v55  ;;  %v1106_v39 = vpop.f32.mrb[183].mxu0  ;;  %3225 = vmatprep.subr.bf16.mxu1 %v11630_v11  ;;  %v13627_v27 = vpack.c.bf16 %v1457_v19, %v1453_v9  ;;  %v11637_v11 = vld [vmem:[%s16862_s4 + $0x120] ss:$16 sps:$4 sm:$0xff]  }
 0x259   :  { %v1107_v28 = vadd.f32 %v1106_v39, %v13507_v55  ;;  %1666 = vmatmul.mubr.bf16.gmra.mrb[44].mxu1 %v13633_v35  ;;  %1727 = vmatpush1.bf16.msra.mxu0 %v1207_v2  ;;  %v11643_v19 = vld [vmem:[%s16862_s4 + $0x140] ss:$16 sps:$4 sm:$0xff]  }
 0x25a   :  { %v1221_v40 = vpack.c.bf16 %v1115_v60, %v1112_v10  ;;  %1728 = vmatprep.subr.bf16.mxu0 %v16876_v1  ;;  %9835 = vmatprep.mubr.msk.bf16.mxu1 %vm1352_vm2, %v13640_v23 }
 0x25b   :  { %v1214_v26 = vpack.c.bf16 %v1107_v28, %v1104_v29  ;;  %3226 = vmatpush1.bf16.msra.mxu1 %v11628_v58 }
 0x25c   :  { %3227 = vmatprep.subr.bf16.mxu1 %v11633_v24  ;;  %v1461_v5 = vpop.f32.mrb[20].mxu1 }
 0x25d   :  { %v10869_v37 = vpop.f32.mrb[184].mxu0  ;;  %1729 = vmatpush1.bf16.msra.mxu0 %v1214_v26  ;;  %v1463_v45 = vpop.f32.mrb[21].mxu1 }
 0x25e   :  { %v1128_v46 = vadd.f32 %v10869_v37, %v13507_v55  ;;  %v1119_v47 = vpop.f32.mrb[185].mxu0  ;;  %1730 = vmatprep.subr.bf16.mxu0 %v16876_v1  ;;  %v1465_v49 = vpop.f32.mrb[22].mxu1  ;;  %v13710_v37 = vld [vmem:[%s16861_s3 + $0x64] ss:$8 sps:$4 sm:$0xff]  }
 0x25f   :  { %v1120_v41 = vadd.f32 %v1119_v47, %v13507_v55  ;;  %v10870_v50 = vpop.f32.mrb[186].mxu0  ;;  %3228 = vmatpush1.bf16.msra.mxu1 %v11631_v42  ;;  %v13656_v53 = vpack.c.bf16 %v1465_v49, %v1461_v5  ;;  %v1467_v15 = vpop.f32.mrb[23].mxu1  ;;  %v11657_v47 = vld [vmem:[%s16862_s4 + $0x184] ss:$16 sps:$4 sm:$0xff]  }
 0x260   :  { %v1131_v21 = vadd.f32 %v10870_v50, %v13507_v55  ;;  %v1122_v0 = vpop.f32.mrb[187].mxu0  ;;  %3229 = vmatprep.subr.bf16.mxu1 %v11636_v44  ;;  %v13662_v20 = vpack.c.bf16 %v1467_v15, %v1463_v45  ;;  %v13703_v44 = vld [vmem:[%s16861_s3 + $0x50] ss:$8 sps:$4 sm:$0xff]  }
 0x261   :  { %v1123_v36 = vadd.f32 %v1122_v0, %v13507_v55  ;;  %1676 = vmatmul.mubr.bf16.gmra.mrb[48].mxu1 %v13668_v63  ;;  %1731 = vmatpush1.bf16.msra.mxu0 %v1221_v40  ;;  %v11651_v40 = vld [vmem:[%s16862_s4 + $0x164] ss:$16 sps:$4 sm:$0xff]  }
 0x262   :  { %v1235_v2 = vpack.c.bf16 %v1131_v21, %v1128_v46  ;;  %1732 = vmatprep.subr.bf16.mxu0 %v16876_v1  ;;  %9836 = vmatprep.mubr.msk.bf16.mxu1 %vm1352_vm2, %v13675_v4  ;;  %v11649_v46 = vld [vmem:[%s16862_s4 + $0x160] ss:$16 sps:$4 sm:$0xff]  }
 0x263   :  { %v1228_v25 = vpack.c.bf16 %v1123_v36, %v1120_v41  ;;  %3230 = vmatpush1.bf16.msra.mxu1 %v11634_v51  ;;  %v11655_v36 = vld [vmem:[%s16862_s4 + $0x180] ss:$16 sps:$4 sm:$0xff]  }
 0x264   :  { %3231 = vmatprep.subr.bf16.mxu1 %v11639_v6  ;;  %v1471_v22 = vpop.f32.mrb[24].mxu1 }
 0x265   :  { %v10873_v9 = vpop.f32.mrb[188].mxu0  ;;  %1733 = vmatpush1.bf16.msra.mxu0 %v1228_v25  ;;  %v1473_v10 = vpop.f32.mrb[25].mxu1 }
 0x266   :  { %v1144_v14 = vadd.f32 %v10873_v9, %v13507_v55  ;;  %v1135_v16 = vpop.f32.mrb[189].mxu0  ;;  %1734 = vmatprep.subr.bf16.mxu0 %v16876_v1  ;;  %v1475_v29 = vpop.f32.mrb[26].mxu1 }
 0x267   :  { %v1136_v33 = vadd.f32 %v1135_v16, %v13507_v55  ;;  %v10874_v58 = vpop.f32.mrb[190].mxu0  ;;  %3232 = vmatpush1.bf16.msra.mxu1 %v11637_v11  ;;  %v13691_v60 = vpack.c.bf16 %v1475_v29, %v1471_v22  ;;  %v1477_v39 = vpop.f32.mrb[27].mxu1  ;;  %v11663_v22 = vld [vmem:[%s16862_s4 + $0x1a4] ss:$16 sps:$4 sm:$0xff]  }
 0x268   :  { %v1147_v24 = vadd.f32 %v10874_v58, %v13507_v55  ;;  %v1138_v28 = vpop.f32.mrb[191].mxu0  ;;  %3233 = vmatprep.subr.bf16.mxu1 %v11645_v31  ;;  %v13697_v26 = vpack.c.bf16 %v1477_v39, %v1473_v10  ;;  %v13745_v29 = vld [vmem:[%s16861_s3 + $0x74] ss:$8 sps:$4 sm:$0xff]   ;;  %v11667_v39 = vld [vmem:[%s16862_s4 + $0x1c0] ss:$16 sps:$4 sm:$0xff]  }
 0x269   :  { %v1139_v42 = vadd.f32 %v1138_v28, %v13507_v55  ;;  %1686 = vmatmul.mubr.bf16.gmra.mrb[52].mxu1 %v13703_v44  ;;  %1735 = vmatpush1.bf16.msra.mxu0 %v1235_v2  ;;  %v11669_v58 = vld [vmem:[%s16862_s4 + $0x1c4] ss:$16 sps:$4 sm:$0xff]   ;;  %v13768_v28 = vld [vmem:[%s16861_s3 + $0x70] ss:$8 sps:$4 sm:$0xff]  }
 0x26a   :  { %v1249_v5 = vpack.c.bf16 %v1147_v24, %v1144_v14  ;;  %1736 = vmatprep.subr.bf16.mxu0 %v16876_v1  ;;  %9837 = vmatprep.mubr.msk.bf16.mxu1 %vm1352_vm2, %v13710_v37  ;;  %v13738_v14 = vld [vmem:[%s16861_s3 + $0x60] ss:$8 sps:$4 sm:$0xff]   ;;  %v11675_v24 = vld [vmem:[%s16862_s4 + $0x1e4] ss:$16 sps:$4 sm:$0xff]  }
 0x26b   :  { %v1242_v45 = vpack.c.bf16 %v1139_v42, %v1136_v33  ;;  %3234 = vmatpush1.bf16.msra.mxu1 %v11643_v19  ;;  %v11661_v33 = vld [vmem:[%s16862_s4 + $0x1a0] ss:$16 sps:$4 sm:$0xff]   ;;  %v11642_v19 = vld [vmem:[%s16862_s4 + $0xc] ss:$16 sps:$4 sm:$0xff]  }
 0x26c   :  { %3235 = vmatprep.subr.bf16.mxu1 %v11651_v40  ;;  %v1481_v49 = vpop.f32.mrb[28].mxu1  ;;  %v11640_v40 = vld [vmem:[%s16862_s4 + $0x8] ss:$16 sps:$4 sm:$0xff]   ;;  %v11648_v42 = vld [vmem:[%s16862_s4 + $0x2c] ss:$16 sps:$4 sm:$0xff]  }
 0x26d   :  { %v10877_v41 = vpop.f32.mrb[192].mxu0  ;;  %1737 = vmatpush1.bf16.msra.mxu0 %v1242_v45  ;;  %v1483_v50 = vpop.f32.mrb[29].mxu1  ;;  %v11681_v45 = vld [vmem:[%s16862_s4 + $0x204] ss:$16 sps:$4 sm:$0xff]  }
 0x26e   :  { %v1160_v51 = vadd.f32 %v10877_v41, %v13507_v55  ;;  %v1151_v15 = vpop.f32.mrb[193].mxu0  ;;  %1738 = vmatprep.subr.bf16.mxu0 %v16876_v1  ;;  %v1485_v21 = vpop.f32.mrb[30].mxu1  ;;  %v11660_v41 = vld [vmem:[%s16862_s4 + $0x6c] ss:$16 sps:$4 sm:$0xff]  }
 0x26f   :  { %v1152_v0 = vadd.f32 %v1151_v15, %v13507_v55  ;;  %v10878_v6 = vpop.f32.mrb[194].mxu0  ;;  %3236 = vmatpush1.bf16.msra.mxu1 %v11649_v46  ;;  %v13726_v2 = vpack.c.bf16 %v1485_v21, %v1481_v49  ;;  %v1487_v25 = vpop.f32.mrb[31].mxu1  ;;  %v11646_v46 = vld [vmem:[%s16862_s4 + $0x28] ss:$16 sps:$4 sm:$0xff]   ;;  %v11687_v49 = vld [vmem:[%s16862_s4 + $0x224] ss:$16 sps:$4 sm:$0xff]  }
 0x270   :  { %v1163_v11 = vadd.f32 %v10878_v6, %v13507_v55  ;;  %v1154_v31 = vpop.f32.mrb[195].mxu0  ;;  %3237 = vmatprep.subr.bf16.mxu1 %v11657_v47  ;;  %v13732_v9 = vpack.c.bf16 %v1487_v25, %v1483_v50  ;;  %v11654_v47 = vld [vmem:[%s16862_s4 + $0x4c] ss:$16 sps:$4 sm:$0xff]   ;;  %v11685_v50 = vld [vmem:[%s16862_s4 + $0x220] ss:$16 sps:$4 sm:$0xff]  }
 0x271   :  { %v1155_v10 = vadd.f32 %v1154_v31, %v13507_v55  ;;  %1696 = vmatmul.mubr.bf16.gmra.mrb[56].mxu1 %v13738_v14  ;;  %1739 = vmatpush1.bf16.msra.mxu0 %v1249_v5  ;;  %v11673_v5 = vld [vmem:[%s16862_s4 + $0x1e0] ss:$16 sps:$4 sm:$0xff]   ;;  %v11658_v15 = vld [vmem:[%s16862_s4 + $0x68] ss:$16 sps:$4 sm:$0xff]   ;;  %v11666_v21 = vld [vmem:[%s16862_s4 + $0x8c] ss:$16 sps:$4 sm:$0xff]  }
 0x272   :  { %v1263_v16 = vpack.c.bf16 %v1163_v11, %v1160_v51  ;;  %1740 = vmatprep.subr.bf16.mxu0 %v16876_v1  ;;  %9838 = vmatprep.mubr.msk.bf16.mxu1 %vm1352_vm2, %v13745_v29  ;;  %v11693_v51 = vld [vmem:[%s16862_s4 + $0x244] ss:$16 sps:$4 sm:$0xff]   ;;  %v11672_v6 = vld [vmem:[%s16862_s4 + $0xac] ss:$16 sps:$4 sm:$0xff]   ;;  %v11670_v11 = vld [vmem:[%s16862_s4 + $0xa8] ss:$16 sps:$4 sm:$0xff]  }
 0x273   :  { %v1256_v55 = vpack.c.bf16 %v1155_v10, %v1152_v0  ;;  %3238 = vmatpush1.bf16.msra.mxu1 %v11655_v36  ;;  %v11699_v0 = vld [vmem:[%s16862_s4 + $0x264] ss:$16 sps:$4 sm:$0xff]   ;;  %v11697_v36 = vld [vmem:[%s16862_s4 + $0x260] ss:$16 sps:$4 sm:$0xff]   ;;  %v11678_v31 = vld [vmem:[%s16862_s4 + $0xcc] ss:$16 sps:$4 sm:$0xff]  }
 0x274   :  { %3239 = vmatprep.subr.bf16.mxu1 %v11663_v22  ;;  %v11705_v25 = vld [vmem:[%s16862_s4 + $0x284] ss:$16 sps:$4 sm:$0xff]   ;;  %v11684_v10 = vld [vmem:[%s16862_s4 + $0xec] ss:$16 sps:$4 sm:$0xff]  }
 0x275   :  { %1741 = vmatpush1.bf16.msra.mxu0 %v1256_v55  ;;  %v11711_v22 = vld [vmem:[%s16862_s4 + $0x2a4] ss:$16 sps:$4 sm:$0xff]  }
 0x276   :  { %1742 = vmatprep.subr.bf16.mxu0 %v16876_v1  ;;  %v11717_v55 = vld [vmem:[%s16862_s4 + $0x2c4] ss:$16 sps:$4 sm:$0xff]  }
 0x277   :  { %3240 = vmatpush1.bf16.msra.mxu1 %v11661_v33  ;;  %v11682_v33 = vld [vmem:[%s16862_s4 + $0xe8] ss:$16 sps:$4 sm:$0xff]  }
 0x278   :  { %3241 = vmatprep.subr.bf16.mxu1 %v11669_v58  ;;  %v11690_v58 = vld [vmem:[%s16862_s4 + $0x10c] ss:$16 sps:$4 sm:$0xff]  }
 0x279   :  { %1706 = vmatmul.mubr.bf16.gmra.mrb[60].mxu1 %v13768_v28  ;;  %1743 = vmatpush1.bf16.msra.mxu0 %v1263_v16  ;;  %v11709_v16 = vld [vmem:[%s16862_s4 + $0x2a0] ss:$16 sps:$4 sm:$0xff]  }
 0x27a   :  { %3665 = vmatprep.subr.bf16.mxu0 %v11642_v19  ;;  %3245 = vmatprep.mubr.bf16.mxu1 %v13500_v18  ;;  %v11723_v19 = vld [vmem:[%s16862_s4 + $0x2e4] ss:$16 sps:$4 sm:$0xff]  }
 0x27b   :  { %3242 = vmatpush1.bf16.msra.mxu1 %v11667_v39  ;;  %v11696_v39 = vld [vmem:[%s16862_s4 + $0x12c] ss:$16 sps:$4 sm:$0xff]  }
 0x27c   :  { %1749 = vmatmul.mubr.bf16.vlgmr.msra.gmra.mrb[228].mxu0 %v13529_v62  ;;  %3243 = vmatprep.subr.bf16.mxu1 %v11675_v24  ;;  %v11679_v62 = vld [vmem:[%s16862_s4 + $0x200] ss:$16 sps:$4 sm:$0xff]  }
 0x27d   :  { %3666 = vmatpush1.bf16.msra.mxu0 %v11640_v40  ;;  %9840 = vmatprep.mubr.msk.bf16.mxu0 %vm1352_vm2, %v13535_v12  ;;  %v11652_v12 = vld [vmem:[%s16862_s4 + $0x48] ss:$16 sps:$4 sm:$0xff]   ;;  %v11721_v24 = vld [vmem:[%s16862_s4 + $0x2e0] ss:$16 sps:$4 sm:$0xff]   ;;  %v11729_v40 = vld [vmem:[%s16862_s4 + $0x304] ss:$16 sps:$4 sm:$0xff]  }
 0x27e   :  { %3667 = vmatprep.subr.bf16.mxu0 %v11648_v42  ;;  %v11694_v42 = vld [vmem:[%s16862_s4 + $0x128] ss:$16 sps:$4 sm:$0xff]  }
 0x27f   :  { %3244 = vmatpush1.bf16.msra.mxu1 %v11673_v5  ;;  %v11702_v5 = vld [vmem:[%s16862_s4 + $0x14c] ss:$16 sps:$4 sm:$0xff]  }
 0x280   :  { %3326 = vmatprep.subr.bf16.mxu1 %v11681_v45  ;;  %v11735_v45 = vld [vmem:[%s16862_s4 + $0x324] ss:$16 sps:$4 sm:$0xff]  }
 0x281   :  { %3668 = vmatpush1.bf16.msra.mxu0 %v11646_v46  ;;  %v11708_v46 = vld [vmem:[%s16862_s4 + $0x16c] ss:$16 sps:$4 sm:$0xff]  }
 0x282   :  { %3669 = vmatprep.subr.bf16.mxu0 %v11654_v47  ;;  %3246 = vmatmul.mubr.bf16.vlgmr.msra.gmra.mrb[64].mxu1 %v13496_v48  ;;  %v11733_v47 = vld [vmem:[%s16862_s4 + $0x320] ss:$16 sps:$4 sm:$0xff]  }
 0x283   :  { %3327 = vmatpush1.bf16.msra.mxu1 %v11679_v62  ;;  %3255 = vmatprep.mubr.bf16.mxu1 %v13523_v38  ;;  %v11741_v62 = vld [vmem:[%s16862_s4 + $0x344] ss:$16 sps:$4 sm:$0xff]  }
 0x284   :  { %1757 = vmatmul.mubr.bf16.gmra.mrb[232].mxu0 %v13563_v43  ;;  %3328 = vmatprep.subr.bf16.mxu1 %v11687_v49  ;;  %v11691_v43 = vld [vmem:[%s16862_s4 + $0x240] ss:$16 sps:$4 sm:$0xff]  }
 0x285   :  { %3670 = vmatpush1.bf16.msra.mxu0 %v11652_v12  ;;  %9841 = vmatprep.mubr.msk.bf16.mxu0 %vm1352_vm2, %v13570_v34  ;;  %v11664_v34 = vld [vmem:[%s16862_s4 + $0x88] ss:$16 sps:$4 sm:$0xff]  }
 0x286   :  { %3671 = vmatprep.subr.bf16.mxu0 %v11660_v41  ;;  %v11706_v12 = vld [vmem:[%s16862_s4 + $0x168] ss:$16 sps:$4 sm:$0xff]  }
 0x287   :  { %3329 = vmatpush1.bf16.msra.mxu1 %v11685_v50 }
 0x288   :  { %3330 = vmatprep.subr.bf16.mxu1 %v11693_v51  ;;  %v11739_v51 = vld [vmem:[%s16862_s4 + $0x340] ss:$16 sps:$4 sm:$0xff]  }
 0x289   :  { %3672 = vmatpush1.bf16.msra.mxu0 %v11658_v15 }
 0x28a   :  { %3673 = vmatprep.subr.bf16.mxu0 %v11666_v21  ;;  %3256 = vmatmul.mubr.bf16.gmra.mrb[68].mxu1 %v13520_v7 }
 0x28b   :  { %3331 = vmatpush1.bf16.msra.mxu1 %v11691_v43  ;;  %3265 = vmatprep.mubr.bf16.mxu1 %v13557_v30 }
 0x28c   :  { %1765 = vmatmul.mubr.bf16.gmra.mrb[236].mxu0 %v13598_v8  ;;  %3332 = vmatprep.subr.bf16.mxu1 %v11699_v0  ;;  %v11703_v8 = vld [vmem:[%s16862_s4 + $0x280] ss:$16 sps:$4 sm:$0xff]   ;;  %v11712_v0 = vld [vmem:[%s16862_s4 + $0x188] ss:$16 sps:$4 sm:$0xff]  }
 0x28d   :  { %3674 = vmatpush1.bf16.msra.mxu0 %v11664_v34  ;;  %9842 = vmatprep.mubr.msk.bf16.mxu0 %vm1352_vm2, %v13605_v3  ;;  %v11676_v3 = vld [vmem:[%s16862_s4 + $0xc8] ss:$16 sps:$4 sm:$0xff]   ;;  %v11720_v34 = vld [vmem:[%s16862_s4 + $0x1ac] ss:$16 sps:$4 sm:$0xff]  }
 0x28e   :  { %3675 = vmatprep.subr.bf16.mxu0 %v11672_v6  ;;  %v11745_v6 = vld [vmem:[%s16862_s4 + $0x360] ss:$16 sps:$4 sm:$0xff]  }
 0x28f   :  { %3333 = vmatpush1.bf16.msra.mxu1 %v11697_v36  ;;  %v11753_v36 = vld [vmem:[%s16862_s4 + $0x384] ss:$16 sps:$4 sm:$0xff]  }
 0x290   :  { %3334 = vmatprep.subr.bf16.mxu1 %v11705_v25 }
 0x291   :  { %3676 = vmatpush1.bf16.msra.mxu0 %v11670_v11  ;;  %v11718_v11 = vld [vmem:[%s16862_s4 + $0x1a8] ss:$16 sps:$4 sm:$0xff]  }
 0x292   :  { %3677 = vmatprep.subr.bf16.mxu0 %v11678_v31  ;;  %3266 = vmatmul.mubr.bf16.gmra.mrb[72].mxu1 %v13551_v52 }
 0x293   :  { %3335 = vmatpush1.bf16.msra.mxu1 %v11703_v8  ;;  %3275 = vmatprep.mubr.bf16.mxu1 %v13592_v61 }
 0x294   :  { %1773 = vmatmul.mubr.bf16.gmra.mrb[240].mxu0 %v13633_v35  ;;  %3336 = vmatprep.subr.bf16.mxu1 %v11711_v22  ;;  %v11715_v35 = vld [vmem:[%s16862_s4 + $0x2c0] ss:$16 sps:$4 sm:$0xff]  }
 0x295   :  { %3678 = vmatpush1.bf16.msra.mxu0 %v11676_v3  ;;  %9843 = vmatprep.mubr.msk.bf16.mxu0 %vm1352_vm2, %v13640_v23  ;;  %v11688_v23 = vld [vmem:[%s16862_s4 + $0x108] ss:$16 sps:$4 sm:$0xff]   ;;  %v11751_v22 = vld [vmem:[%s16862_s4 + $0x380] ss:$16 sps:$4 sm:$0xff]  }
 0x296   :  { %3679 = vmatprep.subr.bf16.mxu0 %v11684_v10 }
 0x297   :  { %3337 = vmatpush1.bf16.msra.mxu1 %v11709_v16 }
 0x298   :  { %3338 = vmatprep.subr.bf16.mxu1 %v11717_v55  ;;  %v11724_v55 = vld [vmem:[%s16862_s4 + $0x1c8] ss:$16 sps:$4 sm:$0xff]  }
 0x299   :  { %3680 = vmatpush1.bf16.msra.mxu0 %v11682_v33  ;;  %v11732_v33 = vld [vmem:[%s16862_s4 + $0x1ec] ss:$16 sps:$4 sm:$0xff]  }
 0x29a   :  { %3681 = vmatprep.subr.bf16.mxu0 %v11690_v58  ;;  %3276 = vmatmul.mubr.bf16.gmra.mrb[76].mxu1 %v13586_v54  ;;  %v11757_v58 = vld [vmem:[%s16862_s4 + $0x3a0] ss:$16 sps:$4 sm:$0xff]  }
 0x29b   :  { %3339 = vmatpush1.bf16.msra.mxu1 %v11715_v35  ;;  %3285 = vmatprep.mubr.bf16.mxu1 %v13627_v27  ;;  %v11765_v35 = vld [vmem:[%s16862_s4 + $0x3c4] ss:$16 sps:$4 sm:$0xff]  }
 0x29c   :  { %1781 = vmatmul.mubr.bf16.gmra.mrb[244].mxu0 %v13668_v63  ;;  %3340 = vmatprep.subr.bf16.mxu1 %v11723_v19  ;;  %v11727_v63 = vld [vmem:[%s16862_s4 + $0x300] ss:$16 sps:$4 sm:$0xff]  }
 0x29d   :  { %3682 = vmatpush1.bf16.msra.mxu0 %v11688_v23  ;;  %9844 = vmatprep.mubr.msk.bf16.mxu0 %vm1352_vm2, %v13675_v4  ;;  %v11700_v4 = vld [vmem:[%s16862_s4 + $0x148] ss:$16 sps:$4 sm:$0xff]  }
 0x29e   :  { %3683 = vmatprep.subr.bf16.mxu0 %v11696_v39  ;;  %v11730_v23 = vld [vmem:[%s16862_s4 + $0x1e8] ss:$16 sps:$4 sm:$0xff]  }
 0x29f   :  { %3341 = vmatpush1.bf16.msra.mxu1 %v11721_v24  ;;  %v11738_v24 = vld [vmem:[%s16862_s4 + $0x20c] ss:$16 sps:$4 sm:$0xff]  }
 0x2a0   :  { %3342 = vmatprep.subr.bf16.mxu1 %v11729_v40  ;;  %v11763_v40 = vld [vmem:[%s16862_s4 + $0x3c0] ss:$16 sps:$4 sm:$0xff]  }
 0x2a1   :  { %3684 = vmatpush1.bf16.msra.mxu0 %v11694_v42 }
 0x2a2   :  { %3685 = vmatprep.subr.bf16.mxu0 %v11702_v5  ;;  %3286 = vmatmul.mubr.bf16.gmra.mrb[80].mxu1 %v13621_v32 }
 0x2a3   :  { %3343 = vmatpush1.bf16.msra.mxu1 %v11727_v63  ;;  %3295 = vmatprep.mubr.bf16.mxu1 %v13662_v20 }
 0x2a4   :  { %1789 = vmatmul.mubr.bf16.gmra.mrb[248].mxu0 %v13703_v44  ;;  %3344 = vmatprep.subr.bf16.mxu1 %v11735_v45  ;;  %v1524_v49 = vpop.f32.mrb[196].mxu0  ;;  %v11714_v44 = vld [vmem:[%s16862_s4 + $0x18c] ss:$16 sps:$4 sm:$0xff]   ;;  %v11736_v45 = vld [vmem:[%s16862_s4 + $0x208] ss:$16 sps:$4 sm:$0xff]  }
 0x2a5   :  { %3686 = vmatpush1.bf16.msra.mxu0 %v11700_v4  ;;  %9845 = vmatprep.mubr.msk.bf16.mxu0 %vm1352_vm2, %v13710_v37  ;;  %v1526_v41 = vpop.f32.mrb[197].mxu0  ;;  %v11747_v37 = vld [vmem:[%s16862_s4 + $0x364] ss:$16 sps:$4 sm:$0xff]   ;;  %v11744_v4 = vld [vmem:[%s16862_s4 + $0x22c] ss:$16 sps:$4 sm:$0xff]  }
 0x2a6   :  { %3687 = vmatprep.subr.bf16.mxu0 %v11708_v46  ;;  %v1528_v50 = vpop.f32.mrb[198].mxu0  ;;  %v11769_v46 = vld [vmem:[%s16862_s4 + $0x3e0] ss:$16 sps:$4 sm:$0xff]  }
 0x2a7   :  { %3345 = vmatpush1.bf16.msra.mxu1 %v11733_v47  ;;  %v13941_v15 = vpack.c.bf16 %v1528_v50, %v1524_v49  ;;  %v1530_v21 = vpop.f32.mrb[199].mxu0  ;;  %v11780_v47 = vld [vmem:[%s16862_s4 + $0x404] ss:$16 sps:$4 sm:$0xff]   ;;  %v11742_v49 = vld [vmem:[%s16862_s4 + $0x228] ss:$16 sps:$4 sm:$0xff]  }
 0x2a8   :  { %3346 = vmatprep.subr.bf16.mxu1 %v11741_v62  ;;  %v13946_v43 = vpack.c.bf16 %v1530_v21, %v1526_v41  ;;  %v11750_v41 = vld [vmem:[%s16862_s4 + $0x24c] ss:$16 sps:$4 sm:$0xff]  }
 0x2a9   :  { %3688 = vmatpush1.bf16.msra.mxu0 %v11706_v12 }
 0x2aa   :  { %3689 = vmatprep.subr.bf16.mxu0 %v11714_v44  ;;  %3296 = vmatmul.mubr.bf16.gmra.mrb[84].mxu1 %v13656_v53  ;;  %v11778_v44 = vld [vmem:[%s16862_s4 + $0x400] ss:$16 sps:$4 sm:$0xff]  }
 0x2ab   :  { %3347 = vmatpush1.bf16.msra.mxu1 %v11739_v51  ;;  %3305 = vmatprep.mubr.bf16.mxu1 %v13697_v26  ;;  %v11786_v51 = vld [vmem:[%s16862_s4 + $0x424] ss:$16 sps:$4 sm:$0xff]  }
 0x2ac   :  { %1797 = vmatmul.mubr.bf16.gmra.mrb[252].mxu0 %v13738_v14  ;;  %3348 = vmatprep.subr.bf16.mxu1 %v11747_v37  ;;  %v1534_v25 = vpop.f32.mrb[200].mxu0  ;;  %v11726_v14 = vld [vmem:[%s16862_s4 + $0x1cc] ss:$16 sps:$4 sm:$0xff]   ;;  %v11748_v37 = vld [vmem:[%s16862_s4 + $0x248] ss:$16 sps:$4 sm:$0xff]  }
 0x2ad   :  { %3690 = vmatpush1.bf16.msra.mxu0 %v11712_v0  ;;  %9846 = vmatprep.mubr.msk.bf16.mxu0 %vm1352_vm2, %v13745_v29  ;;  %v1536_v31 = vpop.f32.mrb[201].mxu0  ;;  %v11759_v29 = vld [vmem:[%s16862_s4 + $0x3a4] ss:$16 sps:$4 sm:$0xff]   ;;  %v11756_v0 = vld [vmem:[%s16862_s4 + $0x26c] ss:$16 sps:$4 sm:$0xff]  }
 0x2ae   :  { %3691 = vmatprep.subr.bf16.mxu0 %v11720_v34  ;;  %v1538_v8 = vpop.f32.mrb[202].mxu0  ;;  %v11784_v34 = vld [vmem:[%s16862_s4 + $0x420] ss:$16 sps:$4 sm:$0xff]  }
 0x2af   :  { %3349 = vmatpush1.bf16.msra.mxu1 %v11745_v6  ;;  %v13974_v3 = vpack.c.bf16 %v1538_v8, %v1534_v25  ;;  %v1540_v10 = vpop.f32.mrb[203].mxu0  ;;  %v11792_v6 = vld [vmem:[%s16862_s4 + $0x444] ss:$16 sps:$4 sm:$0xff]   ;;  %v11754_v25 = vld [vmem:[%s16862_s4 + $0x268] ss:$16 sps:$4 sm:$0xff]  }
 0x2b0   :  { %3350 = vmatprep.subr.bf16.mxu1 %v11753_v36  ;;  %v13979_v16 = vpack.c.bf16 %v1540_v10, %v1536_v31  ;;  %v11762_v31 = vld [vmem:[%s16862_s4 + $0x28c] ss:$16 sps:$4 sm:$0xff]  }
 0x2b1   :  { %3692 = vmatpush1.bf16.msra.mxu0 %v11718_v11 }
 0x2b2   :  { %3693 = vmatprep.subr.bf16.mxu0 %v11726_v14  ;;  %3306 = vmatmul.mubr.bf16.gmra.mrb[88].mxu1 %v13691_v60  ;;  %v11790_v14 = vld [vmem:[%s16862_s4 + $0x440] ss:$16 sps:$4 sm:$0xff]  }
 0x2b3   :  { %3351 = vmatpush1.bf16.msra.mxu1 %v11751_v22  ;;  %3315 = vmatprep.mubr.bf16.mxu1 %v13732_v9  ;;  %v11798_v22 = vld [vmem:[%s16862_s4 + $0x464] ss:$16 sps:$4 sm:$0xff]  }
 0x2b4   :  { %1805 = vmatmul.mubr.bf16.gmra.mrb[0].mxu0 %v13768_v28  ;;  %3352 = vmatprep.subr.bf16.mxu1 %v11759_v29  ;;  %v1544_v19 = vpop.f32.mrb[204].mxu0  ;;  %v11760_v29 = vld [vmem:[%s16862_s4 + $0x288] ss:$16 sps:$4 sm:$0xff]  }
 0x2b5   :  { %3694 = vmatpush1.bf16.msra.mxu0 %v11724_v55  ;;  %3697 = vmatprep.mubr.bf16.mxu0 %v13500_v18  ;;  %v1546_v39 = vpop.f32.mrb[205].mxu0  ;;  %v11771_v18 = vld [vmem:[%s16862_s4 + $0x3e4] ss:$16 sps:$4 sm:$0xff]   ;;  %v11768_v55 = vld [vmem:[%s16862_s4 + $0x2ac] ss:$16 sps:$4 sm:$0xff]  }
 0x2b6   :  { %3695 = vmatprep.subr.bf16.mxu0 %v11732_v33  ;;  %v1548_v28 = vpop.f32.mrb[206].mxu0  ;;  %v11796_v33 = vld [vmem:[%s16862_s4 + $0x460] ss:$16 sps:$4 sm:$0xff]  }
 0x2b7   :  { %3353 = vmatpush1.bf16.msra.mxu1 %v11757_v58  ;;  %v14006_v42 = vpack.c.bf16 %v1548_v28, %v1544_v19  ;;  %v1550_v5 = vpop.f32.mrb[207].mxu0  ;;  %v11804_v58 = vld [vmem:[%s16862_s4 + $0x484] ss:$16 sps:$4 sm:$0xff]   ;;  %v11766_v19 = vld [vmem:[%s16862_s4 + $0x2a8] ss:$16 sps:$4 sm:$0xff]  }
 0x2b8   :  { %3354 = vmatprep.subr.bf16.mxu1 %v11765_v35  ;;  %v14011_v63 = vpack.c.bf16 %v1550_v5, %v1546_v39  ;;  %v11774_v39 = vld [vmem:[%s16862_s4 + $0x2cc] ss:$16 sps:$4 sm:$0xff]  }
 0x2b9   :  { %3696 = vmatpush1.bf16.msra.mxu0 %v11730_v23 }
 0x2ba   :  { %3778 = vmatprep.subr.bf16.mxu0 %v11738_v24  ;;  %3316 = vmatmul.mubr.bf16.gmra.mrb[92].mxu1 %v13726_v2  ;;  %v11802_v24 = vld [vmem:[%s16862_s4 + $0x480] ss:$16 sps:$4 sm:$0xff]  }
 0x2bb   :  { %3355 = vmatpush1.bf16.msra.mxu1 %v11763_v40  ;;  %3358 = vmatprep.mubr.bf16.mxu1 %v13946_v43  ;;  %v11810_v40 = vld [vmem:[%s16862_s4 + $0x4a4] ss:$16 sps:$4 sm:$0xff]  }
 0x2bc   :  { %3698 = vmatmul.mubr.bf16.vlgmr.msra.gmra.mrb[4].mxu0 %v13496_v48  ;;  %3356 = vmatprep.subr.bf16.mxu1 %v11771_v18  ;;  %v1554_v62 = vpop.f32.mrb[208].mxu0  ;;  %v11772_v18 = vld [vmem:[%s16862_s4 + $0x2c8] ss:$16 sps:$4 sm:$0xff]  }
 0x2bd   :  { %3707 = vmatprep.mubr.bf16.mxu0 %v13523_v38  ;;  %3779 = vmatpush1.bf16.msra.mxu0 %v11736_v45  ;;  %v1556_v12 = vpop.f32.mrb[209].mxu0  ;;  %v11777_v45 = vld [vmem:[%s16862_s4 + $0x2ec] ss:$16 sps:$4 sm:$0xff]  }
 0x2be   :  { %3780 = vmatprep.subr.bf16.mxu0 %v11744_v4  ;;  %v1558_v48 = vpop.f32.mrb[210].mxu0  ;;  %v11808_v4 = vld [vmem:[%s16862_s4 + $0x4a0] ss:$16 sps:$4 sm:$0xff]  }
 0x2bf   :  { %3357 = vmatpush1.bf16.msra.mxu1 %v11769_v46  ;;  %v14038_v50 = vpack.c.bf16 %v1558_v48, %v1554_v62  ;;  %v1560_v38 = vpop.f32.mrb[211].mxu0  ;;  %v11816_v46 = vld [vmem:[%s16862_s4 + $0x4c4] ss:$16 sps:$4 sm:$0xff]   ;;  %v11775_v62 = vld [vmem:[%s16862_s4 + $0x2e8] ss:$16 sps:$4 sm:$0xff]  }
 0x2c0   :  { %3439 = vmatprep.subr.bf16.mxu1 %v11780_v47  ;;  %v14043_v21 = vpack.c.bf16 %v1560_v38, %v1556_v12  ;;  %v11783_v12 = vld [vmem:[%s16862_s4 + $0x30c] ss:$16 sps:$4 sm:$0xff]  }
 0x2c1   :  { %3781 = vmatpush1.bf16.msra.mxu0 %v11742_v49 }
 0x2c2   :  { %3782 = vmatprep.subr.bf16.mxu0 %v11750_v41  ;;  %3359 = vmatmul.mubr.bf16.vlgmr.msra.gmra.mrb[64].mxu1 %v13941_v15  ;;  %v11814_v41 = vld [vmem:[%s16862_s4 + $0x4c0] ss:$16 sps:$4 sm:$0xff]  }
 0x2c3   :  { %3440 = vmatpush1.bf16.msra.mxu1 %v11778_v44  ;;  %3368 = vmatprep.mubr.bf16.mxu1 %v13979_v16  ;;  %v11822_v44 = vld [vmem:[%s16862_s4 + $0x4e4] ss:$16 sps:$4 sm:$0xff]  }
 0x2c4   :  { %3708 = vmatmul.mubr.bf16.gmra.mrb[8].mxu0 %v13520_v7  ;;  %3441 = vmatprep.subr.bf16.mxu1 %v11786_v51  ;;  %v1564_v36 = vpop.f32.mrb[212].mxu0  ;;  %v11781_v51 = vld [vmem:[%s16862_s4 + $0x308] ss:$16 sps:$4 sm:$0xff]  }
 0x2c5   :  { %3717 = vmatprep.mubr.bf16.mxu0 %v13557_v30  ;;  %3783 = vmatpush1.bf16.msra.mxu0 %v11748_v37  ;;  %v1566_v11 = vpop.f32.mrb[213].mxu0  ;;  %v11789_v37 = vld [vmem:[%s16862_s4 + $0x32c] ss:$16 sps:$4 sm:$0xff]  }
 0x2c6   :  { %3784 = vmatprep.subr.bf16.mxu0 %v11756_v0  ;;  %v1568_v7 = vpop.f32.mrb[214].mxu0  ;;  %v11820_v0 = vld [vmem:[%s16862_s4 + $0x4e0] ss:$16 sps:$4 sm:$0xff]  }
 0x2c7   :  { %3442 = vmatpush1.bf16.msra.mxu1 %v11784_v34  ;;  %v14070_v8 = vpack.c.bf16 %v1568_v7, %v1564_v36  ;;  %v1570_v30 = vpop.f32.mrb[215].mxu0  ;;  %v11828_v34 = vld [vmem:[%s16862_s4 + $0x504] ss:$16 sps:$4 sm:$0xff]   ;;  %v11787_v36 = vld [vmem:[%s16862_s4 + $0x328] ss:$16 sps:$4 sm:$0xff]  }
 0x2c8   :  { %3443 = vmatprep.subr.bf16.mxu1 %v11792_v6  ;;  %v14075_v10 = vpack.c.bf16 %v1570_v30, %v1566_v11  ;;  %v11795_v11 = vld [vmem:[%s16862_s4 + $0x34c] ss:$16 sps:$4 sm:$0xff]  }
 0x2c9   :  { %3785 = vmatpush1.bf16.msra.mxu0 %v11754_v25 }
 0x2ca   :  { %3786 = vmatprep.subr.bf16.mxu0 %v11762_v31  ;;  %3369 = vmatmul.mubr.bf16.gmra.mrb[68].mxu1 %v13974_v3  ;;  %v11826_v31 = vld [vmem:[%s16862_s4 + $0x500] ss:$16 sps:$4 sm:$0xff]  }
 0x2cb   :  { %3444 = vmatpush1.bf16.msra.mxu1 %v11790_v14  ;;  %3378 = vmatprep.mubr.bf16.mxu1 %v14011_v63  ;;  %v11834_v14 = vld [vmem:[%s16862_s4 + $0x524] ss:$16 sps:$4 sm:$0xff]  }
 0x2cc   :  { %3718 = vmatmul.mubr.bf16.gmra.mrb[12].mxu0 %v13551_v52  ;;  %3445 = vmatprep.subr.bf16.mxu1 %v11798_v22  ;;  %v1574_v35 = vpop.f32.mrb[216].mxu0  ;;  %v11793_v22 = vld [vmem:[%s16862_s4 + $0x348] ss:$16 sps:$4 sm:$0xff]  }
 0x2cd   :  { %3727 = vmatprep.mubr.bf16.mxu0 %v13592_v61  ;;  %3787 = vmatpush1.bf16.msra.mxu0 %v11760_v29  ;;  %v1576_v23 = vpop.f32.mrb[217].mxu0  ;;  %v11801_v29 = vld [vmem:[%s16862_s4 + $0x36c] ss:$16 sps:$4 sm:$0xff]  }
 0x2ce   :  { %3788 = vmatprep.subr.bf16.mxu0 %v11768_v55  ;;  %v1578_v52 = vpop.f32.mrb[218].mxu0  ;;  %v11832_v55 = vld [vmem:[%s16862_s4 + $0x520] ss:$16 sps:$4 sm:$0xff]  }
 0x2cf   :  { %3446 = vmatpush1.bf16.msra.mxu1 %v11796_v33  ;;  %v14102_v28 = vpack.c.bf16 %v1578_v52, %v1574_v35  ;;  %v1580_v61 = vpop.f32.mrb[219].mxu0  ;;  %v11840_v33 = vld [vmem:[%s16862_s4 + $0x544] ss:$16 sps:$4 sm:$0xff]   ;;  %v11807_v35 = vld [vmem:[%s16862_s4 + $0x38c] ss:$16 sps:$4 sm:$0xff]  }
 0x2d0   :  { %3447 = vmatprep.subr.bf16.mxu1 %v11804_v58  ;;  %v14107_v5 = vpack.c.bf16 %v1580_v61, %v1576_v23  ;;  %v11799_v58 = vld [vmem:[%s16862_s4 + $0x368] ss:$16 sps:$4 sm:$0xff]   ;;  %v11813_v23 = vld [vmem:[%s16862_s4 + $0x3ac] ss:$16 sps:$4 sm:$0xff]   ;;  %v11852_v52 = vld [vmem:[%s16862_s4 + $0x584] ss:$16 sps:$4 sm:$0xff]  }
 0x2d1   :  { %3789 = vmatpush1.bf16.msra.mxu0 %v11766_v19  ;;  %v11805_v19 = vld [vmem:[%s16862_s4 + $0x388] ss:$16 sps:$4 sm:$0xff]   ;;  %v11819_v61 = vld [vmem:[%s16862_s4 + $0x3cc] ss:$16 sps:$4 sm:$0xff]  }
 0x2d2   :  { %3790 = vmatprep.subr.bf16.mxu0 %v11774_v39  ;;  %3379 = vmatmul.mubr.bf16.gmra.mrb[72].mxu1 %v14006_v42  ;;  %v11844_v39 = vld [vmem:[%s16862_s4 + $0x560] ss:$16 sps:$4 sm:$0xff]  }
 0x2d3   :  { %3448 = vmatpush1.bf16.msra.mxu1 %v11802_v24  ;;  %3388 = vmatprep.mubr.bf16.mxu1 %v14043_v21  ;;  %v11811_v24 = vld [vmem:[%s16862_s4 + $0x3a8] ss:$16 sps:$4 sm:$0xff]  }
 0x2d4   :  { %3728 = vmatmul.mubr.bf16.gmra.mrb[16].mxu0 %v13586_v54  ;;  %3449 = vmatprep.subr.bf16.mxu1 %v11810_v40  ;;  %v1584_v47 = vpop.f32.mrb[220].mxu0  ;;  %v11817_v40 = vld [vmem:[%s16862_s4 + $0x3c8] ss:$16 sps:$4 sm:$0xff]  }
 0x2d5   :  { %3737 = vmatprep.mubr.bf16.mxu0 %v13627_v27  ;;  %3791 = vmatpush1.bf16.msra.mxu0 %v11772_v18  ;;  %v1586_v49 = vpop.f32.mrb[221].mxu0  ;;  %v11825_v18 = vld [vmem:[%s16862_s4 + $0x3ec] ss:$16 sps:$4 sm:$0xff]  }
 0x2d6   :  { %3792 = vmatprep.subr.bf16.mxu0 %v11777_v45  ;;  %v1588_v54 = vpop.f32.mrb[222].mxu0  ;;  %v11856_v45 = vld [vmem:[%s16862_s4 + $0x5a0] ss:$16 sps:$4 sm:$0xff]  }
 0x2d7   :  { %3450 = vmatpush1.bf16.msra.mxu1 %v11808_v4  ;;  %v14134_v48 = vpack.c.bf16 %v1588_v54, %v1584_v47  ;;  %v1590_v27 = vpop.f32.mrb[223].mxu0  ;;  %v11864_v4 = vld [vmem:[%s16862_s4 + $0x5c4] ss:$16 sps:$4 sm:$0xff]   ;;  %v11831_v47 = vld [vmem:[%s16862_s4 + $0x40c] ss:$16 sps:$4 sm:$0xff]  }
 0x2d8   :  { %3451 = vmatprep.subr.bf16.mxu1 %v11816_v46  ;;  %v14139_v38 = vpack.c.bf16 %v1590_v27, %v1586_v49  ;;  %v11823_v46 = vld [vmem:[%s16862_s4 + $0x3e8] ss:$16 sps:$4 sm:$0xff]   ;;  %v11837_v49 = vld [vmem:[%s16862_s4 + $0x42c] ss:$16 sps:$4 sm:$0xff]   ;;  %v11879_v54 = vld [vmem:[%s16862_s4 + $0x604] ss:$16 sps:$4 sm:$0xff]  }
 0x2d9   :  { %3793 = vmatpush1.bf16.msra.mxu0 %v11775_v62  ;;  %v11870_v62 = vld [vmem:[%s16862_s4 + $0x5e4] ss:$16 sps:$4 sm:$0xff]   ;;  %v11843_v27 = vld [vmem:[%s16862_s4 + $0x44c] ss:$16 sps:$4 sm:$0xff]  }
 0x2da   :  { %3794 = vmatprep.subr.bf16.mxu0 %v11783_v12  ;;  %3389 = vmatmul.mubr.bf16.gmra.mrb[76].mxu1 %v14038_v50  ;;  %v11868_v12 = vld [vmem:[%s16862_s4 + $0x5e0] ss:$16 sps:$4 sm:$0xff]  }
 0x2db   :  { %3452 = vmatpush1.bf16.msra.mxu1 %v11814_v41  ;;  %3398 = vmatprep.mubr.bf16.mxu1 %v14075_v10  ;;  %v11835_v41 = vld [vmem:[%s16862_s4 + $0x428] ss:$16 sps:$4 sm:$0xff]  }
 0x2dc   :  { %3738 = vmatmul.mubr.bf16.gmra.mrb[20].mxu0 %v13621_v32  ;;  %3453 = vmatprep.subr.bf16.mxu1 %v11822_v44  ;;  %v1594_v6 = vpop.f32.mrb[224].mxu0  ;;  %v11847_v44 = vld [vmem:[%s16862_s4 + $0x468] ss:$16 sps:$4 sm:$0xff]  }
 0x2dd   :  { %3747 = vmatprep.mubr.bf16.mxu0 %v13662_v20  ;;  %3795 = vmatpush1.bf16.msra.mxu0 %v11781_v51  ;;  %v1596_v25 = vpop.f32.mrb[225].mxu0  ;;  %v11855_v51 = vld [vmem:[%s16862_s4 + $0x48c] ss:$16 sps:$4 sm:$0xff]  }
 0x2de   :  { %3796 = vmatprep.subr.bf16.mxu0 %v11789_v37  ;;  %v1598_v32 = vpop.f32.mrb[226].mxu0  ;;  %v11853_v37 = vld [vmem:[%s16862_s4 + $0x488] ss:$16 sps:$4 sm:$0xff]  }
 0x2df   :  { %3454 = vmatpush1.bf16.msra.mxu1 %v11820_v0  ;;  %v14166_v7 = vpack.c.bf16 %v1598_v32, %v1594_v6  ;;  %v1600_v20 = vpop.f32.mrb[227].mxu0  ;;  %v11867_v0 = vld [vmem:[%s16862_s4 + $0x4cc] ss:$16 sps:$4 sm:$0xff]  }
 0x2e0   :  { %3455 = vmatprep.subr.bf16.mxu1 %v11828_v34  ;;  %v14171_v30 = vpack.c.bf16 %v1600_v20, %v1596_v25  ;;  %v11865_v34 = vld [vmem:[%s16862_s4 + $0x4c8] ss:$16 sps:$4 sm:$0xff]  }
 0x2e1   :  { %3797 = vmatpush1.bf16.msra.mxu0 %v11787_v36  ;;  %v11871_v36 = vld [vmem:[%s16862_s4 + $0x4e8] ss:$16 sps:$4 sm:$0xff]  }
 0x2e2   :  { %3798 = vmatprep.subr.bf16.mxu0 %v11795_v11  ;;  %3399 = vmatmul.mubr.bf16.gmra.mrb[80].mxu1 %v14070_v8  ;;  %v11876_v11 = vld [vmem:[%s16862_s4 + $0x50c] ss:$16 sps:$4 sm:$0xff]  }
 0x2e3   :  { %3456 = vmatpush1.bf16.msra.mxu1 %v11826_v31  ;;  %3408 = vmatprep.mubr.bf16.mxu1 %v14107_v5 }
 0x2e4   :  { %3748 = vmatmul.mubr.bf16.gmra.mrb[24].mxu0 %v13656_v53  ;;  %3457 = vmatprep.subr.bf16.mxu1 %v11834_v14  ;;  %v11838_v53 = vld [vmem:[%s16862_s4 + $0x540] ss:$16 sps:$4 sm:$0xff]   ;;  %v11882_v14 = vld [vmem:[%s16862_s4 + $0x52c] ss:$16 sps:$4 sm:$0xff]  }
 0x2e5   :  { %3757 = vmatprep.mubr.bf16.mxu0 %v13697_v26  ;;  %3799 = vmatpush1.bf16.msra.mxu0 %v11793_v22  ;;  %v11846_v26 = vld [vmem:[%s16862_s4 + $0x564] ss:$16 sps:$4 sm:$0xff]  }
 0x2e6   :  { %3800 = vmatprep.subr.bf16.mxu0 %v11801_v29  ;;  %v11888_v22 = vld [vmem:[%s16862_s4 + $0x624] ss:$16 sps:$4 sm:$0xff]  }
 0x2e7   :  { %3458 = vmatpush1.bf16.msra.mxu1 %v11832_v55  ;;  %v11886_v55 = vld [vmem:[%s16862_s4 + $0x620] ss:$16 sps:$4 sm:$0xff]  }
 0x2e8   :  { %3459 = vmatprep.subr.bf16.mxu1 %v11840_v33 }
 0x2e9   :  { %3801 = vmatpush1.bf16.msra.mxu0 %v11799_v58  ;;  %v11880_v58 = vld [vmem:[%s16862_s4 + $0x528] ss:$16 sps:$4 sm:$0xff]  }
 0x2ea   :  { %3802 = vmatprep.subr.bf16.mxu0 %v11807_v35  ;;  %3409 = vmatmul.mubr.bf16.gmra.mrb[84].mxu1 %v14102_v28  ;;  %v11897_v35 = vld [vmem:[%s16862_s4 + $0x644] ss:$16 sps:$4 sm:$0xff]  }
 0x2eb   :  { %3460 = vmatpush1.bf16.msra.mxu1 %v11838_v53  ;;  %3418 = vmatprep.mubr.bf16.mxu1 %v14139_v38 }
 0x2ec   :  { %3758 = vmatmul.mubr.bf16.gmra.mrb[28].mxu0 %v13691_v60  ;;  %3461 = vmatprep.subr.bf16.mxu1 %v11846_v26  ;;  %v11850_v60 = vld [vmem:[%s16862_s4 + $0x580] ss:$16 sps:$4 sm:$0xff]  }
 0x2ed   :  { %3767 = vmatprep.mubr.bf16.mxu0 %v13732_v9  ;;  %3803 = vmatpush1.bf16.msra.mxu0 %v11805_v19  ;;  %v11858_v9 = vld [vmem:[%s16862_s4 + $0x5a4] ss:$16 sps:$4 sm:$0xff]  }
 0x2ee   :  { %3804 = vmatprep.subr.bf16.mxu0 %v11813_v23  ;;  %v11895_v23 = vld [vmem:[%s16862_s4 + $0x640] ss:$16 sps:$4 sm:$0xff]  }
 0x2ef   :  { %3462 = vmatpush1.bf16.msra.mxu1 %v11844_v39  ;;  %v11883_v39 = vld [vmem:[%s16862_s4 + $0x548] ss:$16 sps:$4 sm:$0xff]  }
 0x2f0   :  { %3463 = vmatprep.subr.bf16.mxu1 %v11852_v52  ;;  %v11891_v52 = vld [vmem:[%s16862_s4 + $0x56c] ss:$16 sps:$4 sm:$0xff]  }
 0x2f1   :  { %3805 = vmatpush1.bf16.msra.mxu0 %v11811_v24  ;;  %v11906_v24 = vld [vmem:[%s16862_s4 + $0x664] ss:$16 sps:$4 sm:$0xff]  }
 0x2f2   :  { %3806 = vmatprep.subr.bf16.mxu0 %v11819_v61  ;;  %3419 = vmatmul.mubr.bf16.gmra.mrb[88].mxu1 %v14134_v48 }
 0x2f3   :  { %3464 = vmatpush1.bf16.msra.mxu1 %v11850_v60  ;;  %3428 = vmatprep.mubr.bf16.mxu1 %v14171_v30  ;;  %v11904_v60 = vld [vmem:[%s16862_s4 + $0x660] ss:$16 sps:$4 sm:$0xff]  }
 0x2f4   :  { %3768 = vmatmul.mubr.bf16.gmra.mrb[32].mxu0 %v13726_v2  ;;  %3465 = vmatprep.subr.bf16.mxu1 %v11858_v9  ;;  %v11862_v2 = vld [vmem:[%s16862_s4 + $0x5c0] ss:$16 sps:$4 sm:$0xff]  }
 0x2f5   :  { %3807 = vmatpush1.bf16.msra.mxu0 %v11817_v40  ;;  %3810 = vmatprep.mubr.bf16.mxu0 %v13946_v43  ;;  %v11829_v43 = vld [vmem:[%s16862_s4 + $0x408] ss:$16 sps:$4 sm:$0xff]  }
 0x2f6   :  { %3808 = vmatprep.subr.bf16.mxu0 %v11825_v18  ;;  %v11889_v40 = vld [vmem:[%s16862_s4 + $0x568] ss:$16 sps:$4 sm:$0xff]   ;;  %v11912_v18 = vld [vmem:[%s16862_s4 + $0x684] ss:$16 sps:$4 sm:$0xff]  }
 0x2f7   :  { %3466 = vmatpush1.bf16.msra.mxu1 %v11856_v45 }
 0x2f8   :  { %3467 = vmatprep.subr.bf16.mxu1 %v11864_v4 }
 0x2f9   :  { %3809 = vmatpush1.bf16.msra.mxu0 %v11823_v46 }
 0x2fa   :  { %3891 = vmatprep.subr.bf16.mxu0 %v11831_v47  ;;  %3429 = vmatmul.mubr.bf16.gmra.mrb[92].mxu1 %v14166_v7  ;;  %v11910_v47 = vld [vmem:[%s16862_s4 + $0x680] ss:$16 sps:$4 sm:$0xff]  }
 0x2fb   :  { %3468 = vmatpush1.bf16.msra.mxu1 %v11862_v2  ;;  %v11892_v2 = vld [vmem:[%s16862_s4 + $0x588] ss:$16 sps:$4 sm:$0xff]  }
 0x2fc   :  { %3811 = vmatmul.mubr.bf16.vlgmr.msra.gmra.mrb[4].mxu0 %v13941_v15  ;;  %3469 = vmatprep.subr.bf16.mxu1 %v11870_v62  ;;  %v11841_v15 = vld [vmem:[%s16862_s4 + $0x448] ss:$16 sps:$4 sm:$0xff]   ;;  %v11900_v62 = vld [vmem:[%s16862_s4 + $0x5ac] ss:$16 sps:$4 sm:$0xff]  }
 0x2fd   :  { %3820 = vmatprep.mubr.bf16.mxu0 %v13979_v16  ;;  %3892 = vmatpush1.bf16.msra.mxu0 %v11829_v43  ;;  %v11849_v16 = vld [vmem:[%s16862_s4 + $0x46c] ss:$16 sps:$4 sm:$0xff]   ;;  %v11915_v43 = vld [vmem:[%s16862_s4 + $0x6a4] ss:$16 sps:$4 sm:$0xff]  }
 0x2fe   :  { %3893 = vmatprep.subr.bf16.mxu0 %v11837_v49 }
 0x2ff   :  { %3470 = vmatpush1.bf16.msra.mxu1 %v11868_v12  ;;  %v11913_v12 = vld [vmem:[%s16862_s4 + $0x6a0] ss:$16 sps:$4 sm:$0xff]  }
 0x300   :  { %3552 = vmatprep.subr.bf16.mxu1 %v11879_v54 }
 0x301   :  { %3894 = vmatpush1.bf16.msra.mxu0 %v11835_v41  ;;  %v11898_v41 = vld [vmem:[%s16862_s4 + $0x5a8] ss:$16 sps:$4 sm:$0xff]  }
 0x302   :  { %3895 = vmatprep.subr.bf16.mxu0 %v11843_v27  ;;  %v11918_v27 = vld [vmem:[%s16862_s4 + $0x6c4] ss:$16 sps:$4 sm:$0xff]  }
 0x304   :  { %3821 = vmatmul.mubr.bf16.gmra.mrb[8].mxu0 %v13974_v3  ;;  %v11861_v3 = vld [vmem:[%s16862_s4 + $0x4ac] ss:$16 sps:$4 sm:$0xff]  }
 0x305   :  { %3830 = vmatprep.mubr.bf16.mxu0 %v14011_v63  ;;  %3896 = vmatpush1.bf16.msra.mxu0 %v11841_v15  ;;  %v11859_v63 = vld [vmem:[%s16862_s4 + $0x4a8] ss:$16 sps:$4 sm:$0xff]  }
 0x306   :  { %3897 = vmatprep.subr.bf16.mxu0 %v11849_v16 }
 0x309   :  { %3898 = vmatpush1.bf16.msra.mxu0 %v11847_v44 }
 0x30a   :  { %3899 = vmatprep.subr.bf16.mxu0 %v11855_v51  ;;  %v11916_v51 = vld [vmem:[%s16862_s4 + $0x6c0] ss:$16 sps:$4 sm:$0xff]  }
 0x30c   :  { %3831 = vmatmul.mubr.bf16.gmra.mrb[12].mxu0 %v14006_v42  ;;  %v11873_v42 = vld [vmem:[%s16862_s4 + $0x4ec] ss:$16 sps:$4 sm:$0xff]  }
 0x30d   :  { %3840 = vmatprep.mubr.bf16.mxu0 %v14043_v21  ;;  %3900 = vmatpush1.bf16.msra.mxu0 %v11853_v37  ;;  %v11901_v37 = vld [vmem:[%s16862_s4 + $0x5c8] ss:$16 sps:$4 sm:$0xff]  }
 0x30e   :  { %3901 = vmatprep.subr.bf16.mxu0 %v11861_v3  ;;  %v11909_v3 = vld [vmem:[%s16862_s4 + $0x5ec] ss:$16 sps:$4 sm:$0xff]  }
 0x311   :  { %3902 = vmatpush1.bf16.msra.mxu0 %v11859_v63  ;;  %v11921_v63 = vld [vmem:[%s16862_s4 + $0x6e4] ss:$16 sps:$4 sm:$0xff]  }
 0x312   :  { %3903 = vmatprep.subr.bf16.mxu0 %v11867_v0 }
 0x314   :  { %v1637_v21 = vpop.f32.mrb[32].mxu1  ;;  %3841 = vmatmul.mubr.bf16.gmra.mrb[16].mxu0 %v14038_v50  ;;  %v11877_v50 = vld [vmem:[%s16862_s4 + $0x600] ss:$16 sps:$4 sm:$0xff]  }
 0x315   :  { %v1639_v6 = vpop.f32.mrb[33].mxu1  ;;  %3850 = vmatprep.mubr.bf16.mxu0 %v14075_v10  ;;  %3904 = vmatpush1.bf16.msra.mxu0 %v11865_v34  ;;  %v11874_v10 = vld [vmem:[%s16862_s4 + $0x508] ss:$16 sps:$4 sm:$0xff]  }
 0x316   :  { %v1641_v25 = vpop.f32.mrb[34].mxu1  ;;  %3905 = vmatprep.subr.bf16.mxu0 %v11873_v42  ;;  %v11907_v34 = vld [vmem:[%s16862_s4 + $0x5e8] ss:$16 sps:$4 sm:$0xff]   ;;  %v11919_v42 = vld [vmem:[%s16862_s4 + $0x6e0] ss:$16 sps:$4 sm:$0xff]  }
 0x317   :  { %v14320_v32 = vpack.c.bf16 %v1641_v25, %v1637_v21  ;;  %v1643_v31 = vpop.f32.mrb[35].mxu1 }
 0x318   :  { %v14322_v20 = vpack.c.bf16 %v1643_v31, %v1639_v6  ;;  %v11924_v6 = vld [vmem:[%s16862_s4 + $0x60c] ss:$16 sps:$4 sm:$0xff]  }
 0x319   :  { %3906 = vmatpush1.bf16.msra.mxu0 %v11871_v36 }
 0x31a   :  { %3471 = vmatprep.mubr.bf16.mxu1 %v14322_v20  ;;  %3907 = vmatprep.subr.bf16.mxu0 %v11876_v11 }
 0x31b   :  { %3472 = vmatmul.mubr.bf16.vlgmr.msra.gmra.mrb[64].mxu1 %v14320_v32 }
 0x31c   :  { %v1647_v29 = vpop.f32.mrb[36].mxu1  ;;  %3851 = vmatmul.mubr.bf16.gmra.mrb[20].mxu0 %v14070_v8  ;;  %3553 = vmatpush1.bf16.msra.mxu1 %v11877_v50  ;;  %v11885_v8 = vld [vmem:[%s16862_s4 + $0x54c] ss:$16 sps:$4 sm:$0xff]  }
 0x31d   :  { %v1649_v33 = vpop.f32.mrb[37].mxu1  ;;  %3860 = vmatprep.mubr.bf16.mxu0 %v14107_v5  ;;  %3908 = vmatpush1.bf16.msra.mxu0 %v11874_v10  ;;  %v11927_v50 = vld [vmem:[%s16862_s4 + $0x62c] ss:$16 sps:$4 sm:$0xff]  }
 0x31e   :  { %v1651_v53 = vpop.f32.mrb[38].mxu1  ;;  %3909 = vmatprep.subr.bf16.mxu0 %v11882_v14  ;;  %3554 = vmatprep.subr.bf16.mxu1 %v11888_v22  ;;  %v11925_v22 = vld [vmem:[%s16862_s4 + $0x628] ss:$16 sps:$4 sm:$0xff]  }
 0x31f   :  { %v14352_v26 = vpack.c.bf16 %v1651_v53, %v1647_v29  ;;  %v1653_v19 = vpop.f32.mrb[39].mxu1  ;;  %v11933_v53 = vld [vmem:[%s16862_s4 + $0x66c] ss:$16 sps:$4 sm:$0xff]  }
 0x320   :  { %v14354_v5 = vpack.c.bf16 %v1653_v19, %v1649_v33  ;;  %3555 = vmatpush1.bf16.msra.mxu1 %v11886_v55  ;;  %v11930_v55 = vld [vmem:[%s16862_s4 + $0x64c] ss:$16 sps:$4 sm:$0xff]  }
 0x321   :  { %3910 = vmatpush1.bf16.msra.mxu0 %v11880_v58  ;;  %3556 = vmatprep.subr.bf16.mxu1 %v11897_v35 }
 0x322   :  { %3481 = vmatprep.mubr.bf16.mxu1 %v14354_v5  ;;  %3911 = vmatprep.subr.bf16.mxu0 %v11885_v8 }
 0x323   :  { %3482 = vmatmul.mubr.bf16.gmra.mrb[68].mxu1 %v14352_v26 }
 0x324   :  { %v1657_v61 = vpop.f32.mrb[40].mxu1  ;;  %3861 = vmatmul.mubr.bf16.gmra.mrb[24].mxu0 %v14102_v28  ;;  %3557 = vmatpush1.bf16.msra.mxu1 %v11895_v23  ;;  %v11894_v28 = vld [vmem:[%s16862_s4 + $0x58c] ss:$16 sps:$4 sm:$0xff]  }
 0x325   :  { %v1659_v9 = vpop.f32.mrb[41].mxu1  ;;  %3870 = vmatprep.mubr.bf16.mxu0 %v14139_v38  ;;  %3912 = vmatpush1.bf16.msra.mxu0 %v11883_v39  ;;  %v11936_v39 = vld [vmem:[%s16862_s4 + $0x68c] ss:$16 sps:$4 sm:$0xff]  }
 0x326   :  { %v1661_v45 = vpop.f32.mrb[42].mxu1  ;;  %3913 = vmatprep.subr.bf16.mxu0 %v11891_v52  ;;  %3558 = vmatprep.subr.bf16.mxu1 %v11906_v24 }
 0x327   :  { %v14384_v4 = vpack.c.bf16 %v1661_v45, %v1657_v61  ;;  %v1663_v46 = vpop.f32.mrb[43].mxu1 }
 0x328   :  { %v14386_v38 = vpack.c.bf16 %v1663_v46, %v1659_v9  ;;  %3559 = vmatpush1.bf16.msra.mxu1 %v11904_v60  ;;  %v11939_v60 = vld [vmem:[%s16862_s4 + $0x6ac] ss:$16 sps:$4 sm:$0xff]  }
 0x329   :  { %3914 = vmatpush1.bf16.msra.mxu0 %v11889_v40  ;;  %3560 = vmatprep.subr.bf16.mxu1 %v11912_v18  ;;  %v11937_v18 = vld [vmem:[%s16862_s4 + $0x6a8] ss:$16 sps:$4 sm:$0xff]  }
 0x32a   :  { %3491 = vmatprep.mubr.bf16.mxu1 %v14386_v38  ;;  %3915 = vmatprep.subr.bf16.mxu0 %v11894_v28  ;;  %v11942_v28 = vld [vmem:[%s16862_s4 + $0x6cc] ss:$16 sps:$4 sm:$0xff]  }
 0x32b   :  { %3492 = vmatmul.mubr.bf16.gmra.mrb[72].mxu1 %v14384_v4 }
 0x32c   :  { %v1667_v49 = vpop.f32.mrb[44].mxu1  ;;  %3871 = vmatmul.mubr.bf16.gmra.mrb[28].mxu0 %v14134_v48  ;;  %3561 = vmatpush1.bf16.msra.mxu1 %v11910_v47  ;;  %v11903_v48 = vld [vmem:[%s16862_s4 + $0x5cc] ss:$16 sps:$4 sm:$0xff]  }
 0x32d   :  { %v1669_v54 = vpop.f32.mrb[45].mxu1  ;;  %3880 = vmatprep.mubr.bf16.mxu0 %v14171_v30  ;;  %3916 = vmatpush1.bf16.msra.mxu0 %v11892_v2 }
 0x32e   :  { %v1671_v15 = vpop.f32.mrb[46].mxu1  ;;  %3917 = vmatprep.subr.bf16.mxu0 %v11900_v62  ;;  %3562 = vmatprep.subr.bf16.mxu1 %v11915_v43  ;;  %v11940_v43 = vld [vmem:[%s16862_s4 + $0x6c8] ss:$16 sps:$4 sm:$0xff]  }
 0x32f   :  { %v14416_v16 = vpack.c.bf16 %v1671_v15, %v1667_v49  ;;  %v1673_v44 = vpop.f32.mrb[47].mxu1 }
 0x330   :  { %v14418_v30 = vpack.c.bf16 %v1673_v44, %v1669_v54  ;;  %3563 = vmatpush1.bf16.msra.mxu1 %v11913_v12  ;;  %v11945_v54 = vld [vmem:[%s16862_s4 + $0x6ec] ss:$16 sps:$4 sm:$0xff]  }
 0x331   :  { %3918 = vmatpush1.bf16.msra.mxu0 %v11898_v41  ;;  %3564 = vmatprep.subr.bf16.mxu1 %v11918_v27  ;;  %v11943_v41 = vld [vmem:[%s16862_s4 + $0x6e8] ss:$16 sps:$4 sm:$0xff]   ;;  %v11951_v27 = vld [vmem:[%s16863_s5 + $0xc] ss:$16 sps:$4 sm:$0xff]  }
 0x332   :  { %3501 = vmatprep.mubr.bf16.mxu1 %v14418_v30  ;;  %3919 = vmatprep.subr.bf16.mxu0 %v11903_v48 }
 0x333   :  { %3502 = vmatmul.mubr.bf16.gmra.mrb[76].mxu1 %v14416_v16 }
 0x334   :  { %v1677_v0 = vpop.f32.mrb[48].mxu1  ;;  %3881 = vmatmul.mubr.bf16.gmra.mrb[32].mxu0 %v14166_v7  ;;  %3565 = vmatpush1.bf16.msra.mxu1 %v11916_v51  ;;  %v11948_v7 = vld [vmem:[%s16863_s5 + $0x4] ss:$16 sps:$4 sm:$0xff]  }
 0x335   :  { %v1679_v21 = vpop.f32.mrb[49].mxu1  ;;  %3920 = vmatpush1.bf16.msra.mxu0 %v11901_v37  ;;  %3923 = vmatprep.mubr.bf16.mxu0 %v14322_v20  ;;  %v11922_v20 = vld [vmem:[%s16862_s4 + $0x608] ss:$16 sps:$4 sm:$0xff]   ;;  %v11954_v37 = vld [vmem:[%s16863_s5 + $0x24] ss:$16 sps:$4 sm:$0xff]  }
 0x336   :  { %v1681_v36 = vpop.f32.mrb[50].mxu1  ;;  %3921 = vmatprep.subr.bf16.mxu0 %v11909_v3  ;;  %3566 = vmatprep.subr.bf16.mxu1 %v11921_v63  ;;  %v11952_v3 = vld [vmem:[%s16863_s5 + $0x20] ss:$16 sps:$4 sm:$0xff]   ;;  %v11960_v63 = vld [vmem:[%s16863_s5 + $0x44] ss:$16 sps:$4 sm:$0xff]  }
 0x337   :  { %v14448_v25 = vpack.c.bf16 %v1681_v36, %v1677_v0  ;;  %v1683_v11 = vpop.f32.mrb[51].mxu1 }
 0x338   :  { %v14450_v31 = vpack.c.bf16 %v1683_v11, %v1679_v21  ;;  %3567 = vmatpush1.bf16.msra.mxu1 %v11919_v42  ;;  %v11966_v21 = vld [vmem:[%s16863_s5 + $0x64] ss:$16 sps:$4 sm:$0xff]  }
 0x339   :  { %3922 = vmatpush1.bf16.msra.mxu0 %v11907_v34  ;;  %6503 = vmatprep.subr.bf16.mxu1 %v11948_v7  ;;  %v11958_v34 = vld [vmem:[%s16863_s5 + $0x40] ss:$16 sps:$4 sm:$0xff]   ;;  %v11972_v11 = vld [vmem:[%s16863_s5 + $0x84] ss:$16 sps:$4 sm:$0xff]  }
 0x33a   :  { %3511 = vmatprep.mubr.bf16.mxu1 %v14450_v31  ;;  %4004 = vmatprep.subr.bf16.mxu0 %v11924_v6 }
 0x33b   :  { %3512 = vmatmul.mubr.bf16.gmra.mrb[80].mxu1 %v14448_v25 }
 0x33c   :  { %v1687_v10 = vpop.f32.mrb[52].mxu1  ;;  %3924 = vmatmul.mubr.bf16.vlgmr.msra.gmra.mrb[4].mxu0 %v14320_v32  ;;  %v11928_v32 = vld [vmem:[%s16862_s4 + $0x648] ss:$16 sps:$4 sm:$0xff]  }
 0x33d   :  { %v1689_v14 = vpop.f32.mrb[53].mxu1  ;;  %3933 = vmatprep.mubr.bf16.mxu0 %v14354_v5  ;;  %4005 = vmatpush1.bf16.msra.mxu0 %v11922_v20  ;;  %v11931_v5 = vld [vmem:[%s16862_s4 + $0x668] ss:$16 sps:$4 sm:$0xff]   ;;  %v11970_v20 = vld [vmem:[%s16863_s5 + $0x80] ss:$16 sps:$4 sm:$0xff]  }
 0x33e   :  { %v1691_v29 = vpop.f32.mrb[54].mxu1  ;;  %4006 = vmatprep.subr.bf16.mxu0 %v11927_v50 }
 0x33f   :  { %v14468_v33 = vpack.c.bf16 %v1691_v29, %v1687_v10  ;;  %v1693_v58 = vpop.f32.mrb[55].mxu1  ;;  %v11978_v10 = vld [vmem:[%s16863_s5 + $0xa4] ss:$16 sps:$4 sm:$0xff]  }
 0x340   :  { %v14470_v35 = vpack.c.bf16 %v1693_v58, %v1689_v14 }
 0x341   :  { %4007 = vmatpush1.bf16.msra.mxu0 %v11925_v22 }
 0x342   :  { %3521 = vmatprep.mubr.bf16.mxu1 %v14470_v35  ;;  %4008 = vmatprep.subr.bf16.mxu0 %v11930_v55  ;;  %v11976_v55 = vld [vmem:[%s16863_s5 + $0xa0] ss:$16 sps:$4 sm:$0xff]  }
 0x343   :  { %3522 = vmatmul.mubr.bf16.gmra.mrb[84].mxu1 %v14468_v33 }
 0x344   :  { %v1697_v8 = vpop.f32.mrb[56].mxu1  ;;  %3934 = vmatmul.mubr.bf16.gmra.mrb[8].mxu0 %v14352_v26  ;;  %v11934_v26 = vld [vmem:[%s16862_s4 + $0x688] ss:$16 sps:$4 sm:$0xff]  }
 0x345   :  { %v1699_v19 = vpop.f32.mrb[57].mxu1  ;;  %3943 = vmatprep.mubr.bf16.mxu0 %v14386_v38  ;;  %4009 = vmatpush1.bf16.msra.mxu0 %v11928_v32 }
 0x346   :  { %v1701_v23 = vpop.f32.mrb[58].mxu1  ;;  %4010 = vmatprep.subr.bf16.mxu0 %v11933_v53  ;;  %v11990_v53 = vld [vmem:[%s16863_s5 + $0xe4] ss:$16 sps:$4 sm:$0xff]  }
 0x347   :  { %v14488_v52 = vpack.c.bf16 %v1701_v23, %v1697_v8  ;;  %v1703_v24 = vpop.f32.mrb[59].mxu1  ;;  %v11988_v23 = vld [vmem:[%s16863_s5 + $0xe0] ss:$16 sps:$4 sm:$0xff]  }
 0x348   :  { %v14490_v61 = vpack.c.bf16 %v1703_v24, %v1699_v19  ;;  %v11949_v24 = vld [vmem:[%s16863_s5 + $0x8] ss:$16 sps:$4 sm:$0xff]  }
 0x349   :  { %4011 = vmatpush1.bf16.msra.mxu0 %v11931_v5 }
 0x34a   :  { %3531 = vmatprep.mubr.bf16.mxu1 %v14490_v61  ;;  %4012 = vmatprep.subr.bf16.mxu0 %v11936_v39  ;;  %v11996_v39 = vld [vmem:[%s16863_s5 + $0x104] ss:$16 sps:$4 sm:$0xff]  }
 0x34b   :  { %3532 = vmatmul.mubr.bf16.gmra.mrb[88].mxu1 %v14488_v52 }
 0x34c   :  { %v1707_v9 = vpop.f32.mrb[60].mxu1  ;;  %3944 = vmatmul.mubr.bf16.gmra.mrb[12].mxu0 %v14384_v4 }
 0x34d   :  { %v1709_v40 = vpop.f32.mrb[61].mxu1  ;;  %3953 = vmatprep.mubr.bf16.mxu0 %v14418_v30  ;;  %4013 = vmatpush1.bf16.msra.mxu0 %v11934_v26  ;;  %v11957_v26 = vld [vmem:[%s16863_s5 + $0x2c] ss:$16 sps:$4 sm:$0xff]  }
 0x34e   :  { %v1711_v45 = vpop.f32.mrb[62].mxu1  ;;  %4014 = vmatprep.subr.bf16.mxu0 %v11939_v60  ;;  %v11994_v60 = vld [vmem:[%s16863_s5 + $0x100] ss:$16 sps:$4 sm:$0xff]  }
 0x34f   :  { %v14508_v46 = vpack.c.bf16 %v1711_v45, %v1707_v9  ;;  %v1713_v38 = vpop.f32.mrb[63].mxu1  ;;  %v1750_v47 = vpop.f32.mrb[228].mxu0 }
 0x350   :  { %v14510_v2 = vpack.c.bf16 %v1713_v38, %v1709_v40  ;;  %v1752_v4 = vpop.f32.mrb[229].mxu0  ;;  %v12002_v40 = vld [vmem:[%s16863_s5 + $0x124] ss:$16 sps:$4 sm:$0xff]   ;;  %v12000_v38 = vld [vmem:[%s16863_s5 + $0x120] ss:$16 sps:$4 sm:$0xff]  }
 0x351   :  { %v1753_v62 = vpop.f32.mrb[230].mxu0  ;;  %4015 = vmatpush1.bf16.msra.mxu0 %v11937_v18  ;;  %v11961_v4 = vld [vmem:[%s16863_s5 + $0x48] ss:$16 sps:$4 sm:$0xff]  }
 0x352   :  { %3541 = vmatprep.mubr.bf16.mxu1 %v14510_v2  ;;  %v14516_v49 = vpack.c.bf16 %v1753_v62, %v1750_v47  ;;  %v1755_v12 = vpop.f32.mrb[231].mxu0  ;;  %4016 = vmatprep.subr.bf16.mxu0 %v11942_v28  ;;  %v11955_v28 = vld [vmem:[%s16863_s5 + $0x28] ss:$16 sps:$4 sm:$0xff]   ;;  %v12008_v47 = vld [vmem:[%s16863_s5 + $0x144] ss:$16 sps:$4 sm:$0xff]  }
 0x353   :  { %3542 = vmatmul.mubr.bf16.gmra.mrb[92].mxu1 %v14508_v46 }
 0x354   :  { %3954 = vmatmul.mubr.bf16.gmra.mrb[16].mxu0 %v14416_v16  ;;  %3584 = vmatprep.mubr.bf16.mxu1 %v16876_v1  ;;  %v11946_v16 = vld [vmem:[%s16863_s5] ss:$16 sps:$4 sm:$0xff]  }
 0x355   :  { %3963 = vmatprep.mubr.bf16.mxu0 %v14450_v31  ;;  %4017 = vmatpush1.bf16.msra.mxu0 %v11940_v43  ;;  %v11969_v43 = vld [vmem:[%s16863_s5 + $0x6c] ss:$16 sps:$4 sm:$0xff]  }
 0x356   :  { %4018 = vmatprep.subr.bf16.mxu0 %v11945_v54  ;;  %v12014_v54 = vld [vmem:[%s16863_s5 + $0x164] ss:$16 sps:$4 sm:$0xff]  }
 0x357   :  { %v1758_v15 = vpop.f32.mrb[232].mxu0 }
 0x358   :  { %v1760_v48 = vpop.f32.mrb[233].mxu0 }
 0x359   :  { %v1761_v44 = vpop.f32.mrb[234].mxu0  ;;  %4019 = vmatpush1.bf16.msra.mxu0 %v11943_v41  ;;  %v11975_v48 = vld [vmem:[%s16863_s5 + $0x8c] ss:$16 sps:$4 sm:$0xff]  }
 0x35a   :  { %v14534_v30 = vpack.c.bf16 %v1761_v44, %v1758_v15  ;;  %v1763_v51 = vpop.f32.mrb[235].mxu0  ;;  %7121 = vmatprep.subr.bf16.mxu0 %v11951_v27  ;;  %v11967_v15 = vld [vmem:[%s16863_s5 + $0x68] ss:$16 sps:$4 sm:$0xff]   ;;  %v12012_v44 = vld [vmem:[%s16863_s5 + $0x160] ss:$16 sps:$4 sm:$0xff]  }
 0x35b   :  { %3585 = vmatmul.mubr.bf16.vlgmr.msra.gmra.mrb[64].mxu1 %v14516_v49  ;;  %v11973_v51 = vld [vmem:[%s16863_s5 + $0x88] ss:$16 sps:$4 sm:$0xff]  }
 0x35c   :  { %3964 = vmatmul.mubr.bf16.gmra.mrb[20].mxu0 %v14448_v25  ;;  %3594 = vmatprep.mubr.bf16.mxu1 %v16876_v1  ;;  %v11964_v25 = vld [vmem:[%s16863_s5 + $0x60] ss:$16 sps:$4 sm:$0xff]  }
 0x35d   :  { %3973 = vmatprep.mubr.bf16.mxu0 %v14470_v35  ;;  %6504 = vmatpush1.bf16.msra.mxu1 %v11946_v16  ;;  %v11982_v35 = vld [vmem:[%s16863_s5 + $0xc0] ss:$16 sps:$4 sm:$0xff]   ;;  %v12020_v16 = vld [vmem:[%s16863_s5 + $0x184] ss:$16 sps:$4 sm:$0xff]  }
 0x35e   :  { %6505 = vmatprep.subr.bf16.mxu1 %v11954_v37 }
 0x35f   :  { %v1766_v0 = vpop.f32.mrb[236].mxu0 }
 0x360   :  { %v1768_v42 = vpop.f32.mrb[237].mxu0 }
 0x361   :  { %v1769_v6 = vpop.f32.mrb[238].mxu0  ;;  %6506 = vmatpush1.bf16.msra.mxu1 %v11952_v3  ;;  %v11981_v3 = vld [vmem:[%s16863_s5 + $0xac] ss:$16 sps:$4 sm:$0xff]  }
 0x362   :  { %v14555_v36 = vpack.c.bf16 %v1769_v6, %v1766_v0  ;;  %v1771_v7 = vpop.f32.mrb[239].mxu0  ;;  %6507 = vmatprep.subr.bf16.mxu1 %v11960_v63  ;;  %v12018_v63 = vld [vmem:[%s16863_s5 + $0x180] ss:$16 sps:$4 sm:$0xff]   ;;  %v11979_v6 = vld [vmem:[%s16863_s5 + $0xa8] ss:$16 sps:$4 sm:$0xff]  }
 0x363   :  { %3595 = vmatmul.mubr.bf16.gmra.mrb[68].mxu1 %v14534_v30  ;;  %v11987_v7 = vld [vmem:[%s16863_s5 + $0xcc] ss:$16 sps:$4 sm:$0xff]  }
 0x364   :  { %3974 = vmatmul.mubr.bf16.gmra.mrb[24].mxu0 %v14468_v33  ;;  %3604 = vmatprep.mubr.bf16.mxu1 %v16876_v1  ;;  %v11984_v33 = vld [vmem:[%s16863_s5 + $0xc4] ss:$16 sps:$4 sm:$0xff]  }
 0x365   :  { %3983 = vmatprep.mubr.bf16.mxu0 %v14490_v61  ;;  %6508 = vmatpush1.bf16.msra.mxu1 %v11958_v34  ;;  %v12026_v34 = vld [vmem:[%s16863_s5 + $0x1a4] ss:$16 sps:$4 sm:$0xff]  }
 0x366   :  { %6509 = vmatprep.subr.bf16.mxu1 %v11966_v21 }
 0x367   :  { %v1774_v31 = vpop.f32.mrb[240].mxu0 }
 0x368   :  { %v1776_v50 = vpop.f32.mrb[241].mxu0 }
 0x369   :  { %v1777_v14 = vpop.f32.mrb[242].mxu0  ;;  %6510 = vmatpush1.bf16.msra.mxu1 %v11964_v25  ;;  %v12024_v25 = vld [vmem:[%s16863_s5 + $0x1a0] ss:$16 sps:$4 sm:$0xff]   ;;  %v11991_v50 = vld [vmem:[%s16863_s5 + $0xe8] ss:$16 sps:$4 sm:$0xff]  }
 0x36a   :  { %v14573_v22 = vpack.c.bf16 %v1777_v14, %v1774_v31  ;;  %v1779_v29 = vpop.f32.mrb[243].mxu0  ;;  %6511 = vmatprep.subr.bf16.mxu1 %v11972_v11  ;;  %v12032_v11 = vld [vmem:[%s16863_s5 + $0x1c4] ss:$16 sps:$4 sm:$0xff]   ;;  %v11993_v31 = vld [vmem:[%s16863_s5 + $0xec] ss:$16 sps:$4 sm:$0xff]  }
 0x36b   :  { %3605 = vmatmul.mubr.bf16.gmra.mrb[72].mxu1 %v14555_v36  ;;  %v11997_v14 = vld [vmem:[%s16863_s5 + $0x108] ss:$16 sps:$4 sm:$0xff]   ;;  %v12005_v29 = vld [vmem:[%s16863_s5 + $0x12c] ss:$16 sps:$4 sm:$0xff]  }
 0x36c   :  { %3984 = vmatmul.mubr.bf16.gmra.mrb[28].mxu0 %v14488_v52  ;;  %3614 = vmatprep.mubr.bf16.mxu1 %v16876_v1 }
 0x36d   :  { %3993 = vmatprep.mubr.bf16.mxu0 %v14510_v2  ;;  %6512 = vmatpush1.bf16.msra.mxu1 %v11970_v20  ;;  %v12030_v20 = vld [vmem:[%s16863_s5 + $0x1c0] ss:$16 sps:$4 sm:$0xff]  }
 0x36e   :  { %6513 = vmatprep.subr.bf16.mxu1 %v11978_v10  ;;  %v11999_v10 = vld [vmem:[%s16863_s5 + $0x10c] ss:$16 sps:$4 sm:$0xff]  }
 0x36f   :  { %v1782_v58 = vpop.f32.mrb[244].mxu0 }
 0x370   :  { %v1784_v32 = vpop.f32.mrb[245].mxu0 }
 0x371   :  { %v1785_v8 = vpop.f32.mrb[246].mxu0  ;;  %6514 = vmatpush1.bf16.msra.mxu1 %v11976_v55  ;;  %v12011_v55 = vld [vmem:[%s16863_s5 + $0x14c] ss:$16 sps:$4 sm:$0xff]  }
 0x372   :  { %v14591_v19 = vpack.c.bf16 %v1785_v8, %v1782_v58  ;;  %v1787_v5 = vpop.f32.mrb[247].mxu0  ;;  %6515 = vmatprep.subr.bf16.mxu1 %v11984_v33  ;;  %v12009_v33 = vld [vmem:[%s16863_s5 + $0x148] ss:$16 sps:$4 sm:$0xff]   ;;  %v12017_v58 = vld [vmem:[%s16863_s5 + $0x16c] ss:$16 sps:$4 sm:$0xff]  }
 0x373   :  { %3615 = vmatmul.mubr.bf16.gmra.mrb[76].mxu1 %v14573_v22  ;;  %v12023_v32 = vld [vmem:[%s16863_s5 + $0x18c] ss:$16 sps:$4 sm:$0xff]  }
 0x374   :  { %3994 = vmatmul.mubr.bf16.gmra.mrb[32].mxu0 %v14508_v46  ;;  %3624 = vmatprep.mubr.bf16.mxu1 %v16876_v1  ;;  %v11963_v46 = vld [vmem:[%s16863_s5 + $0x4c] ss:$16 sps:$4 sm:$0xff]  }
 0x375   :  { %4036 = vmatprep.mubr.bf16.mxu0 %v16876_v1  ;;  %6516 = vmatpush1.bf16.msra.mxu1 %v11982_v35  ;;  %v12015_v35 = vld [vmem:[%s16863_s5 + $0x168] ss:$16 sps:$4 sm:$0xff]   ;;  %v12029_v8 = vld [vmem:[%s16863_s5 + $0x1ac] ss:$16 sps:$4 sm:$0xff]  }
 0x376   :  { %6517 = vmatprep.subr.bf16.mxu1 %v11990_v53  ;;  %v12021_v53 = vld [vmem:[%s16863_s5 + $0x188] ss:$16 sps:$4 sm:$0xff]   ;;  %v12035_v5 = vld [vmem:[%s16863_s5 + $0x1cc] ss:$16 sps:$4 sm:$0xff]  }
 0x377   :  { %v1790_v52 = vpop.f32.mrb[248].mxu0 }
 0x378   :  { %v1792_v61 = vpop.f32.mrb[249].mxu0 }
 0x379   :  { %v1793_v9 = vpop.f32.mrb[250].mxu0  ;;  %6518 = vmatpush1.bf16.msra.mxu1 %v11988_v23  ;;  %v12033_v23 = vld [vmem:[%s16863_s5 + $0x1c8] ss:$16 sps:$4 sm:$0xff]   ;;  %v12044_v61 = vld [vmem:[%s16863_s5 + $0x204] ss:$16 sps:$4 sm:$0xff]  }
 0x37a   :  { %v14615_v18 = vpack.c.bf16 %v1793_v9, %v1790_v52  ;;  %v1795_v45 = vpop.f32.mrb[251].mxu0  ;;  %6519 = vmatprep.subr.bf16.mxu1 %v11996_v39  ;;  %v12038_v39 = vld [vmem:[%s16863_s5 + $0x1e4] ss:$16 sps:$4 sm:$0xff]   ;;  %v12036_v52 = vld [vmem:[%s16863_s5 + $0x1e0] ss:$16 sps:$4 sm:$0xff]  }
 0x37b   :  { %3625 = vmatmul.mubr.bf16.gmra.mrb[80].mxu1 %v14591_v19 }
 0x37c   :  { %4037 = vmatmul.mubr.bf16.vlgmr.msra.gmra.mrb[4].mxu0 %v14516_v49  ;;  %3634 = vmatprep.mubr.bf16.mxu1 %v16876_v1  ;;  %v12006_v49 = vld [vmem:[%s16863_s5 + $0x140] ss:$16 sps:$4 sm:$0xff]  }
 0x37d   :  { %4046 = vmatprep.mubr.bf16.mxu0 %v16876_v1  ;;  %7122 = vmatpush1.bf16.msra.mxu0 %v11949_v24  ;;  %v12041_v24 = vld [vmem:[%s16863_s5 + $0x1ec] ss:$16 sps:$4 sm:$0xff]  }
 0x37e   :  { %7123 = vmatprep.subr.bf16.mxu0 %v11957_v26  ;;  %6520 = vmatpush1.bf16.msra.mxu1 %v11994_v60  ;;  %v12039_v26 = vld [vmem:[%s16863_s5 + $0x1e8] ss:$16 sps:$4 sm:$0xff]   ;;  %v12047_v60 = vld [vmem:[%s16863_s5 + $0x20c] ss:$16 sps:$4 sm:$0xff]  }
 0x37f   :  { %v1798_v2 = vpop.f32.mrb[252].mxu0  ;;  %6521 = vmatprep.subr.bf16.mxu1 %v12002_v40 }
 0x380   :  { %v1800_v62 = vpop.f32.mrb[253].mxu0 }
 0x381   :  { %v1801_v12 = vpop.f32.mrb[254].mxu0  ;;  %7124 = vmatpush1.bf16.msra.mxu0 %v11955_v28 }
 0x382   :  { %v14645_v41 = vpack.c.bf16 %v1801_v12, %v1798_v2  ;;  %v1803_v27 = vpop.f32.mrb[255].mxu0  ;;  %7125 = vmatprep.subr.bf16.mxu0 %v11963_v46  ;;  %6522 = vmatpush1.bf16.msra.mxu1 %v12000_v38  ;;  %v12042_v38 = vld [vmem:[%s16863_s5 + $0x200] ss:$16 sps:$4 sm:$0xff]   ;;  %v12050_v2 = vld [vmem:[%s16863_s5 + $0x224] ss:$16 sps:$4 sm:$0xff]  }
 0x383   :  { %3635 = vmatmul.mubr.bf16.gmra.mrb[84].mxu1 %v14615_v18  ;;  %6523 = vmatprep.subr.bf16.mxu1 %v12008_v47  ;;  %v12045_v47 = vld [vmem:[%s16863_s5 + $0x208] ss:$16 sps:$4 sm:$0xff]   ;;  %v12059_v27 = vld [vmem:[%s16863_s5 + $0x24c] ss:$16 sps:$4 sm:$0xff]  }
 0x384   :  { %4047 = vmatmul.mubr.bf16.gmra.mrb[8].mxu0 %v14534_v30  ;;  %3644 = vmatprep.mubr.bf16.mxu1 %v16876_v1 }
 0x385   :  { %4056 = vmatprep.mubr.bf16.mxu0 %v16876_v1  ;;  %7126 = vmatpush1.bf16.msra.mxu0 %v11961_v4  ;;  %v12053_v4 = vld [vmem:[%s16863_s5 + $0x22c] ss:$16 sps:$4 sm:$0xff]  }
 0x386   :  { %7127 = vmatprep.subr.bf16.mxu0 %v11969_v43  ;;  %6524 = vmatpush1.bf16.msra.mxu1 %v12006_v49  ;;  %v12048_v43 = vld [vmem:[%s16863_s5 + $0x220] ss:$16 sps:$4 sm:$0xff]   ;;  %v12051_v49 = vld [vmem:[%s16863_s5 + $0x228] ss:$16 sps:$4 sm:$0xff]  }
 0x387   :  { %v1806_v30 = vpop.f32.mrb[0].mxu0  ;;  %6525 = vmatprep.subr.bf16.mxu1 %v12014_v54 }
 0x388   :  { %v1808_v37 = vpop.f32.mrb[1].mxu0 }
 0x389   :  { %v1809_v0 = vpop.f32.mrb[2].mxu0  ;;  %7128 = vmatpush1.bf16.msra.mxu0 %v11967_v15  ;;  %v12057_v37 = vld [vmem:[%s16863_s5 + $0x248] ss:$16 sps:$4 sm:$0xff]  }
 0x38a   :  { %v14675_v42 = vpack.c.bf16 %v1809_v0, %v1806_v30  ;;  %v1811_v21 = vpop.f32.mrb[3].mxu0  ;;  %7129 = vmatprep.subr.bf16.mxu0 %v11975_v48  ;;  %6526 = vmatpush1.bf16.msra.mxu1 %v12012_v44 }
 0x38b   :  { %3645 = vmatmul.mubr.bf16.gmra.mrb[88].mxu1 %v14645_v41  ;;  %6527 = vmatprep.subr.bf16.mxu1 %v12020_v16 }
 0x38c   :  { %4057 = vmatmul.mubr.bf16.gmra.mrb[12].mxu0 %v14555_v36  ;;  %3654 = vmatprep.mubr.bf16.mxu1 %v16876_v1  ;;  %v11985_v36 = vld [vmem:[%s16863_s5 + $0xc8] ss:$16 sps:$4 sm:$0xff]  }
 0x38d   :  { %4066 = vmatprep.mubr.bf16.mxu0 %v16876_v1  ;;  %7130 = vmatpush1.bf16.msra.mxu0 %v11973_v51  ;;  %v12054_v51 = vld [vmem:[%s16863_s5 + $0x240] ss:$16 sps:$4 sm:$0xff]  }
 0x38e   :  { %7131 = vmatprep.subr.bf16.mxu0 %v11981_v3  ;;  %6528 = vmatpush1.bf16.msra.mxu1 %v12018_v63  ;;  %v12062_v3 = vld [vmem:[%s16863_s5 + $0x264] ss:$16 sps:$4 sm:$0xff]   ;;  %v12065_v63 = vld [vmem:[%s16863_s5 + $0x26c] ss:$16 sps:$4 sm:$0xff]  }
 0x38f   :  { %6529 = vmatprep.subr.bf16.mxu1 %v12026_v34  ;;  %v12060_v34 = vld [vmem:[%s16863_s5 + $0x260] ss:$16 sps:$4 sm:$0xff]  }
 0x391   :  { %7132 = vmatpush1.bf16.msra.mxu0 %v11979_v6 }
 0x392   :  { %7133 = vmatprep.subr.bf16.mxu0 %v11987_v7  ;;  %6530 = vmatpush1.bf16.msra.mxu1 %v12024_v25  ;;  %v12068_v7 = vld [vmem:[%s16863_s5 + $0x284] ss:$16 sps:$4 sm:$0xff]   ;;  %v12071_v25 = vld [vmem:[%s16863_s5 + $0x28c] ss:$16 sps:$4 sm:$0xff]  }
 0x393   :  { %3655 = vmatmul.mubr.bf16.gmra.mrb[92].mxu1 %v14675_v42  ;;  %6531 = vmatprep.subr.bf16.mxu1 %v12032_v11 }
 0x394   :  { %4067 = vmatmul.mubr.bf16.gmra.mrb[16].mxu0 %v14573_v22  ;;  %v12003_v22 = vld [vmem:[%s16863_s5 + $0x128] ss:$16 sps:$4 sm:$0xff]  }
 0x395   :  { %4076 = vmatprep.mubr.bf16.mxu0 %v16876_v1  ;;  %7134 = vmatpush1.bf16.msra.mxu0 %v11985_v36 }
 0x396   :  { %7135 = vmatprep.subr.bf16.mxu0 %v11993_v31  ;;  %6532 = vmatpush1.bf16.msra.mxu1 %v12030_v20 }
 0x397   :  { %6533 = vmatprep.subr.bf16.mxu1 %v12038_v39 }
 0x399   :  { %7136 = vmatpush1.bf16.msra.mxu0 %v11991_v50 }
 0x39a   :  { %7137 = vmatprep.subr.bf16.mxu0 %v11999_v10  ;;  %6534 = vmatpush1.bf16.msra.mxu1 %v12036_v52  ;;  %v12066_v10 = vld [vmem:[%s16863_s5 + $0x280] ss:$16 sps:$4 sm:$0xff]  }
 0x39b   :  { %6606 = vmatprep.subr.bf16.mxu1 %v12044_v61  ;;  %v12081_v61 = vld [vmem:[%s16863_s5 + $0x2c8] ss:$16 sps:$4 sm:$0xff]  }
 0x39c   :  { %4077 = vmatmul.mubr.bf16.gmra.mrb[20].mxu0 %v14591_v19  ;;  %v12027_v19 = vld [vmem:[%s16863_s5 + $0x1a8] ss:$16 sps:$4 sm:$0xff]  }
 0x39d   :  { %4086 = vmatprep.mubr.bf16.mxu0 %v16876_v1  ;;  %7138 = vmatpush1.bf16.msra.mxu0 %v11997_v14  ;;  %v12069_v14 = vld [vmem:[%s16863_s5 + $0x288] ss:$16 sps:$4 sm:$0xff]  }
 0x39e   :  { %7139 = vmatprep.subr.bf16.mxu0 %v12005_v29  ;;  %v12074_v29 = vld [vmem:[%s16863_s5 + $0x2a4] ss:$16 sps:$4 sm:$0xff]  }
 0x3a1   :  { %7140 = vmatpush1.bf16.msra.mxu0 %v12003_v22  ;;  %v12077_v22 = vld [vmem:[%s16863_s5 + $0x2ac] ss:$16 sps:$4 sm:$0xff]  }
 0x3a2   :  { %7141 = vmatprep.subr.bf16.mxu0 %v12011_v55 }
 0x3a4   :  { %4087 = vmatmul.mubr.bf16.gmra.mrb[24].mxu0 %v14615_v18 }
 0x3a5   :  { %4096 = vmatprep.mubr.bf16.mxu0 %v16876_v1  ;;  %7142 = vmatpush1.bf16.msra.mxu0 %v12009_v33  ;;  %v12072_v33 = vld [vmem:[%s16863_s5 + $0x2a0] ss:$16 sps:$4 sm:$0xff]  }
 0x3a6   :  { %7143 = vmatprep.subr.bf16.mxu0 %v12017_v58  ;;  %v12075_v58 = vld [vmem:[%s16863_s5 + $0x2a8] ss:$16 sps:$4 sm:$0xff]  }
 0x3a9   :  { %7144 = vmatpush1.bf16.msra.mxu0 %v12015_v35 }
 0x3aa   :  { %7145 = vmatprep.subr.bf16.mxu0 %v12023_v32 }
 0x3ac   :  { %4097 = vmatmul.mubr.bf16.gmra.mrb[28].mxu0 %v14645_v41  ;;  %v12056_v41 = vld [vmem:[%s16863_s5 + $0x244] ss:$16 sps:$4 sm:$0xff]  }
 0x3ad   :  { %4106 = vmatprep.mubr.bf16.mxu0 %v16876_v1  ;;  %7146 = vmatpush1.bf16.msra.mxu0 %v12021_v53  ;;  %v12080_v53 = vld [vmem:[%s16863_s5 + $0x2c4] ss:$16 sps:$4 sm:$0xff]  }
 0x3ae   :  { %7147 = vmatprep.subr.bf16.mxu0 %v12029_v8  ;;  %v12083_v8 = vld [vmem:[%s16863_s5 + $0x2cc] ss:$16 sps:$4 sm:$0xff]  }
 0x3b1   :  { %7148 = vmatpush1.bf16.msra.mxu0 %v12027_v19 }
 0x3b2   :  { %7149 = vmatprep.subr.bf16.mxu0 %v12035_v5 }
 0x3b4   :  { %4107 = vmatmul.mubr.bf16.gmra.mrb[32].mxu0 %v14675_v42  ;;  %v12063_v42 = vld [vmem:[%s16863_s5 + $0x268] ss:$16 sps:$4 sm:$0xff]  }
 0x3b5   :  { %7150 = vmatpush1.bf16.msra.mxu0 %v12033_v23 }
 0x3b6   :  { %7151 = vmatprep.subr.bf16.mxu0 %v12041_v24  ;;  %v12078_v24 = vld [vmem:[%s16863_s5 + $0x2c0] ss:$16 sps:$4 sm:$0xff]  }
 0x3b9   :  { %7152 = vmatpush1.bf16.msra.mxu0 %v12039_v26  ;;  %v12086_v26 = vld [vmem:[%s16863_s5 + $0x2e4] ss:$16 sps:$4 sm:$0xff]  }
 0x3ba   :  { %7224 = vmatprep.subr.bf16.mxu0 %v12047_v60  ;;  %v12089_v60 = vld [vmem:[%s16863_s5 + $0x2ec] ss:$16 sps:$4 sm:$0xff]  }
 0x42e   :  { %v3586_v9 = vpop.f32.mrb[64].mxu1 }
 0x42f   :  { %v3588_v40 = vpop.f32.mrb[65].mxu1 }
 0x430   :  { %v3590_v18 = vpop.f32.mrb[66].mxu1 }
 0x431   :  { %v4117_v45 = vpack.c.bf16 %v3590_v18, %v3586_v9  ;;  %v3592_v28 = vpop.f32.mrb[67].mxu1 }
 0x432   :  { %v4118_v46 = vpack.c.bf16 %v3592_v28, %v3588_v40  ;;  %v12084_v40 = vld [vmem:[%s16863_s5 + $0x2e0] ss:$16 sps:$4 sm:$0xff]  }
 0x434   :  { %6535 = vmatprep.mubr.bf16.mxu1 %v4118_v46  ;;  %7153 = vmatprep.mubr.bf16.mxu0 %v4118_v46 }
 0x435   :  { %6536 = vmatmul.mubr.bf16.vlgmr.msra.gmra.mrb[96].mxu1 %v4117_v45  ;;  %7154 = vmatmul.mubr.bf16.vlgmr.msra.gmra.mrb[36].mxu0 %v4117_v45 }
 0x436   :  { %6607 = vmatpush1.bf16.msra.mxu1 %v12042_v38  ;;  %7225 = vmatpush1.bf16.msra.mxu0 %v12045_v47  ;;  %v3596_v62 = vpop.f32.mrb[68].mxu1  ;;  %v12092_v38 = vld [vmem:[%s16863_s5 + $0x304] ss:$16 sps:$4 sm:$0xff]   ;;  %v12095_v47 = vld [vmem:[%s16863_s5 + $0x30c] ss:$16 sps:$4 sm:$0xff]  }
 0x437   :  { %v14793_v12 = vpack.c.bf16 %v3596_v62, %v3590_v18  ;;  %v3598_v54 = vpop.f32.mrb[69].mxu1  ;;  %6608 = vmatprep.subr.bf16.mxu1 %v12050_v2  ;;  %7226 = vmatprep.subr.bf16.mxu0 %v12053_v4  ;;  %v12087_v18 = vld [vmem:[%s16863_s5 + $0x2e8] ss:$16 sps:$4 sm:$0xff]  }
 0x438   :  { %v14801_v15 = vpack.c.bf16 %v3598_v54, %v3592_v28  ;;  %v3600_v48 = vpop.f32.mrb[70].mxu1 }
 0x439   :  { %v14803_v44 = vpack.c.bf16 %v3600_v48, %v3596_v62  ;;  %v3602_v16 = vpop.f32.mrb[71].mxu1 }
 0x43a   :  { %v14805_v30 = vpack.c.bf16 %v3602_v16, %v3598_v54  ;;  %6609 = vmatpush1.bf16.msra.mxu1 %v12048_v43  ;;  %7227 = vmatpush1.bf16.msra.mxu0 %v12051_v49 }
 0x43b   :  { %6610 = vmatprep.subr.bf16.mxu1 %v12056_v41  ;;  %7228 = vmatprep.subr.bf16.mxu0 %v12059_v27 }
 0x43c   :  { %6545 = vmatprep.mubr.bf16.mxu1 %v14805_v30  ;;  %7163 = vmatprep.mubr.bf16.mxu0 %v14805_v30 }
 0x43d   :  { %6546 = vmatmul.mubr.bf16.gmra.mrb[100].mxu1 %v14803_v44  ;;  %7164 = vmatmul.mubr.bf16.gmra.mrb[40].mxu0 %v14803_v44 }
 0x43e   :  { %6611 = vmatpush1.bf16.msra.mxu1 %v12054_v51  ;;  %7229 = vmatpush1.bf16.msra.mxu0 %v12057_v37  ;;  %v3606_v0 = vpop.f32.mrb[72].mxu1  ;;  %v12093_v51 = vld [vmem:[%s16863_s5 + $0x308] ss:$16 sps:$4 sm:$0xff]  }
 0x43f   :  { %v14829_v21 = vpack.c.bf16 %v3606_v0, %v3600_v48  ;;  %v3608_v6 = vpop.f32.mrb[73].mxu1  ;;  %6612 = vmatprep.subr.bf16.mxu1 %v12062_v3  ;;  %7230 = vmatprep.subr.bf16.mxu0 %v12065_v63  ;;  %v12098_v3 = vld [vmem:[%s16863_s5 + $0x324] ss:$16 sps:$4 sm:$0xff]   ;;  %v12101_v63 = vld [vmem:[%s16863_s5 + $0x32c] ss:$16 sps:$4 sm:$0xff]  }
 0x440   :  { %v14837_v11 = vpack.c.bf16 %v3608_v6, %v3602_v16  ;;  %v3610_v36 = vpop.f32.mrb[74].mxu1  ;;  %v12090_v16 = vld [vmem:[%s16863_s5 + $0x300] ss:$16 sps:$4 sm:$0xff]  }
 0x441   :  { %v14839_v31 = vpack.c.bf16 %v3610_v36, %v3606_v0  ;;  %v3612_v20 = vpop.f32.mrb[75].mxu1 }
 0x442   :  { %v14841_v50 = vpack.c.bf16 %v3612_v20, %v3608_v6  ;;  %6613 = vmatpush1.bf16.msra.mxu1 %v12060_v34  ;;  %7231 = vmatpush1.bf16.msra.mxu0 %v12063_v42  ;;  %v12096_v34 = vld [vmem:[%s16863_s5 + $0x320] ss:$16 sps:$4 sm:$0xff]   ;;  %v12099_v42 = vld [vmem:[%s16863_s5 + $0x328] ss:$16 sps:$4 sm:$0xff]  }
 0x443   :  { %6614 = vmatprep.subr.bf16.mxu1 %v12068_v7  ;;  %7232 = vmatprep.subr.bf16.mxu0 %v12071_v25 }
 0x444   :  { %6555 = vmatprep.mubr.bf16.mxu1 %v14841_v50  ;;  %7173 = vmatprep.mubr.bf16.mxu0 %v14841_v50 }
 0x445   :  { %6556 = vmatmul.mubr.bf16.gmra.mrb[104].mxu1 %v14839_v31  ;;  %7174 = vmatmul.mubr.bf16.gmra.mrb[44].mxu0 %v14839_v31 }
 0x446   :  { %6615 = vmatpush1.bf16.msra.mxu1 %v12066_v10  ;;  %7233 = vmatpush1.bf16.msra.mxu0 %v12069_v14  ;;  %v3616_v55 = vpop.f32.mrb[76].mxu1 }
 0x447   :  { %v14865_v35 = vpack.c.bf16 %v3616_v55, %v3610_v36  ;;  %v3618_v32 = vpop.f32.mrb[77].mxu1  ;;  %6616 = vmatprep.subr.bf16.mxu1 %v12074_v29  ;;  %7234 = vmatprep.subr.bf16.mxu0 %v12077_v22  ;;  %v12104_v36 = vld [vmem:[%s16863_s5 + $0x344] ss:$16 sps:$4 sm:$0xff]  }
 0x448   :  { %v14873_v19 = vpack.c.bf16 %v3618_v32, %v3612_v20  ;;  %v3620_v5 = vpop.f32.mrb[78].mxu1  ;;  %v12107_v20 = vld [vmem:[%s16863_s5 + $0x34c] ss:$16 sps:$4 sm:$0xff]  }
 0x449   :  { %v14875_v23 = vpack.c.bf16 %v3620_v5, %v3616_v55  ;;  %v3622_v39 = vpop.f32.mrb[79].mxu1 }
 0x44a   :  { %v14877_v52 = vpack.c.bf16 %v3622_v39, %v3618_v32  ;;  %6617 = vmatpush1.bf16.msra.mxu1 %v12072_v33  ;;  %7235 = vmatpush1.bf16.msra.mxu0 %v12075_v58 }
 0x44b   :  { %6618 = vmatprep.subr.bf16.mxu1 %v12080_v53  ;;  %7236 = vmatprep.subr.bf16.mxu0 %v12083_v8 }
 0x44c   :  { %6565 = vmatprep.mubr.bf16.mxu1 %v14877_v52  ;;  %7183 = vmatprep.mubr.bf16.mxu0 %v14877_v52 }
 0x44d   :  { %6566 = vmatmul.mubr.bf16.gmra.mrb[108].mxu1 %v14875_v23  ;;  %7184 = vmatmul.mubr.bf16.gmra.mrb[48].mxu0 %v14875_v23 }
 0x44e   :  { %6619 = vmatpush1.bf16.msra.mxu1 %v12078_v24  ;;  %7237 = vmatpush1.bf16.msra.mxu0 %v12081_v61  ;;  %v3626_v9 = vpop.f32.mrb[80].mxu1  ;;  %v12105_v24 = vld [vmem:[%s16863_s5 + $0x348] ss:$16 sps:$4 sm:$0xff]  }
 0x44f   :  { %v14901_v45 = vpack.c.bf16 %v3626_v9, %v3620_v5  ;;  %v3628_v28 = vpop.f32.mrb[81].mxu1  ;;  %v4038_v46 = vpop.f32.mrb[4].mxu0  ;;  %6620 = vmatprep.subr.bf16.mxu1 %v12086_v26  ;;  %7238 = vmatprep.subr.bf16.mxu0 %v12089_v60  ;;  %v12110_v26 = vld [vmem:[%s16863_s5 + $0x364] ss:$16 sps:$4 sm:$0xff]   ;;  %v12113_v60 = vld [vmem:[%s16863_s5 + $0x36c] ss:$16 sps:$4 sm:$0xff]  }
 0x450   :  { %v14909_v2 = vpack.c.bf16 %v3628_v28, %v3622_v39  ;;  %v3630_v4 = vpop.f32.mrb[82].mxu1  ;;  %v4040_v62 = vpop.f32.mrb[5].mxu0  ;;  %v12102_v39 = vld [vmem:[%s16863_s5 + $0x340] ss:$16 sps:$4 sm:$0xff]  }
 0x451   :  { %v14911_v43 = vpack.c.bf16 %v3630_v4, %v3626_v9  ;;  %v3632_v49 = vpop.f32.mrb[83].mxu1  ;;  %v4042_v54 = vpop.f32.mrb[6].mxu0 }
 0x452   :  { %v14913_v41 = vpack.c.bf16 %v3632_v49, %v3628_v28  ;;  %v14915_v27 = vpack.c.bf16 %v4042_v54, %v4038_v46  ;;  %6621 = vmatpush1.bf16.msra.mxu1 %v12084_v40  ;;  %7239 = vmatpush1.bf16.msra.mxu0 %v12087_v18  ;;  %v4044_v48 = vpop.f32.mrb[7].mxu0  ;;  %v12108_v40 = vld [vmem:[%s16863_s5 + $0x360] ss:$16 sps:$4 sm:$0xff]   ;;  %v12111_v18 = vld [vmem:[%s16863_s5 + $0x368] ss:$16 sps:$4 sm:$0xff]  }
 0x453   :  { %v14923_v37 = vpack.c.bf16 %v4044_v48, %v4040_v62  ;;  %6622 = vmatprep.subr.bf16.mxu1 %v12092_v38  ;;  %7240 = vmatprep.subr.bf16.mxu0 %v12095_v47  ;;  %v12116_v47 = vld [vmem:[%s16863_s5 + $0x384] ss:$16 sps:$4 sm:$0xff]  }
 0x454   :  { %6575 = vmatprep.mubr.bf16.mxu1 %v14913_v41  ;;  %7193 = vmatprep.mubr.bf16.mxu0 %v14913_v41 }
 0x455   :  { %6576 = vmatmul.mubr.bf16.gmra.mrb[112].mxu1 %v14911_v43  ;;  %7194 = vmatmul.mubr.bf16.gmra.mrb[52].mxu0 %v14911_v43 }
 0x456   :  { %6623 = vmatpush1.bf16.msra.mxu1 %v12090_v16  ;;  %7241 = vmatpush1.bf16.msra.mxu0 %v12093_v51  ;;  %v3636_v0 = vpop.f32.mrb[84].mxu1 }
 0x457   :  { %v14941_v6 = vpack.c.bf16 %v3636_v0, %v3630_v4  ;;  %v3638_v7 = vpop.f32.mrb[85].mxu1  ;;  %v4048_v25 = vpop.f32.mrb[8].mxu0  ;;  %6624 = vmatprep.subr.bf16.mxu1 %v12098_v3  ;;  %7242 = vmatprep.subr.bf16.mxu0 %v12101_v63  ;;  %v12119_v4 = vld [vmem:[%s16863_s5 + $0x38c] ss:$16 sps:$4 sm:$0xff]  }
 0x458   :  { %v14949_v10 = vpack.c.bf16 %v3638_v7, %v3632_v49  ;;  %v14951_v14 = vpack.c.bf16 %v4048_v25, %v4042_v54  ;;  %v3640_v29 = vpop.f32.mrb[86].mxu1  ;;  %v4050_v22 = vpop.f32.mrb[9].mxu0 }
 0x459   :  { %v14953_v55 = vpack.c.bf16 %v3640_v29, %v3636_v0  ;;  %v14955_v33 = vpack.c.bf16 %v4050_v22, %v4044_v48  ;;  %v3642_v58 = vpop.f32.mrb[87].mxu1  ;;  %v4052_v32 = vpop.f32.mrb[10].mxu0 }
 0x45a   :  { %v14957_v53 = vpack.c.bf16 %v3642_v58, %v3638_v7  ;;  %v14959_v8 = vpack.c.bf16 %v4052_v32, %v4048_v25  ;;  %6625 = vmatpush1.bf16.msra.mxu1 %v12096_v34  ;;  %7243 = vmatpush1.bf16.msra.mxu0 %v12099_v42  ;;  %v4054_v5 = vpop.f32.mrb[11].mxu0  ;;  %v12114_v7 = vld [vmem:[%s16863_s5 + $0x380] ss:$16 sps:$4 sm:$0xff]   ;;  %v12117_v25 = vld [vmem:[%s16863_s5 + $0x388] ss:$16 sps:$4 sm:$0xff]  }
 0x45b   :  { %v14967_v61 = vpack.c.bf16 %v4054_v5, %v4050_v22  ;;  %6626 = vmatprep.subr.bf16.mxu1 %v12104_v36  ;;  %7244 = vmatprep.subr.bf16.mxu0 %v12107_v20  ;;  %v12122_v20 = vld [vmem:[%s16863_s5 + $0x3a4] ss:$16 sps:$4 sm:$0xff]  }
 0x45c   :  { %16889 = vst [vmem:[#allocation3_spill] sm:$0xff] %v14959_v8  ;;  %6585 = vmatprep.mubr.bf16.mxu1 %v14957_v53  ;;  %7203 = vmatprep.mubr.bf16.mxu0 %v14957_v53 }
 0x45d   :  { %6586 = vmatmul.mubr.bf16.gmra.mrb[116].mxu1 %v14953_v55  ;;  %7204 = vmatmul.mubr.bf16.gmra.mrb[56].mxu0 %v14953_v55 }
 0x45e   :  { %6627 = vmatpush1.bf16.msra.mxu1 %v12102_v39  ;;  %7245 = vmatpush1.bf16.msra.mxu0 %v12105_v24  ;;  %v3646_v9 = vpop.f32.mrb[88].mxu1 }
 0x45f   :  { %v14985_v28 = vpack.c.bf16 %v3646_v9, %v3640_v29  ;;  %v3648_v46 = vpop.f32.mrb[89].mxu1  ;;  %v4058_v38 = vpop.f32.mrb[12].mxu0  ;;  %6628 = vmatprep.subr.bf16.mxu1 %v12110_v26  ;;  %7246 = vmatprep.subr.bf16.mxu0 %v12113_v60  ;;  %v12125_v29 = vld [vmem:[%s16863_s5 + $0x3ac] ss:$16 sps:$4 sm:$0xff]   ;;  %v12128_v26 = vld [vmem:[%s16863_s5 + $0x3c4] ss:$16 sps:$4 sm:$0xff]  }
 0x460   :  { %v14993_v62 = vpack.c.bf16 %v3648_v46, %v3642_v58  ;;  %v14995_v49 = vpack.c.bf16 %v4058_v38, %v4052_v32  ;;  %v3650_v54 = vpop.f32.mrb[90].mxu1  ;;  %v4060_v48 = vpop.f32.mrb[13].mxu0  ;;  %v12120_v58 = vld [vmem:[%s16863_s5 + $0x3a0] ss:$16 sps:$4 sm:$0xff]   ;;  %v12123_v32 = vld [vmem:[%s16863_s5 + $0x3a8] ss:$16 sps:$4 sm:$0xff]  }
 0x461   :  { %v14997_v16 = vpack.c.bf16 %v3650_v54, %v3646_v9  ;;  %v14999_v51 = vpack.c.bf16 %v4060_v48, %v4054_v5  ;;  %v3652_v3 = vpop.f32.mrb[91].mxu1  ;;  %v4062_v63 = vpop.f32.mrb[14].mxu0  ;;  %v12131_v60 = vld [vmem:[%s16863_s5 + $0x3cc] ss:$16 sps:$4 sm:$0xff]  }
 0x462   :  { %v15001_v0 = vpack.c.bf16 %v3652_v3, %v3648_v46  ;;  %v15003_v34 = vpack.c.bf16 %v4062_v63, %v4058_v38  ;;  %6629 = vmatpush1.bf16.msra.mxu1 %v12108_v40  ;;  %7247 = vmatpush1.bf16.msra.mxu0 %v12111_v18  ;;  %v4064_v42 = vpop.f32.mrb[15].mxu0 }
 0x463   :  { %v15011_v36 = vpack.c.bf16 %v4064_v42, %v4060_v48  ;;  %6630 = vmatprep.subr.bf16.mxu1 %v12116_v47  ;;  %7248 = vmatprep.subr.bf16.mxu0 %v12119_v4 }
 0x464   :  { %16890 = vst [vmem:[#allocation4_spill] sm:$0xff] %v15003_v34  ;;  %6595 = vmatprep.mubr.bf16.mxu1 %v15001_v0  ;;  %7213 = vmatprep.mubr.bf16.mxu0 %v15001_v0 }
 0x465   :  { %16891 = vst [vmem:[#allocation5_spill] sm:$0xff] %v15011_v36  ;;  %6596 = vmatmul.mubr.bf16.gmra.mrb[120].mxu1 %v14997_v16  ;;  %7214 = vmatmul.mubr.bf16.gmra.mrb[60].mxu0 %v14997_v16 }
 0x466   :  { %6631 = vmatpush1.bf16.msra.mxu1 %v12114_v7  ;;  %7249 = vmatpush1.bf16.msra.mxu0 %v12117_v25  ;;  %v3656_v22 = vpop.f32.mrb[92].mxu1  ;;  %v12129_v7 = vld [vmem:[%s16863_s5 + $0x3c8] ss:$16 sps:$4 sm:$0xff]  }
 0x467   :  { %v15029_v5 = vpack.c.bf16 %v3656_v22, %v3650_v54  ;;  %6638 = vmatprep.mubr.bf16.mxu1 %v14923_v37  ;;  %7256 = vmatprep.mubr.bf16.mxu0 %v14923_v37  ;;  %v3658_v39 = vpop.f32.mrb[93].mxu1  ;;  %v4068_v24 = vpop.f32.mrb[16].mxu0 }
 0x468   :  { %v15039_v9 = vpack.c.bf16 %v3658_v39, %v3652_v3  ;;  %v15041_v40 = vpack.c.bf16 %v4068_v24, %v4062_v63  ;;  %v3660_v18 = vpop.f32.mrb[94].mxu1  ;;  %v4070_v46 = vpop.f32.mrb[17].mxu0  ;;  %6632 = vmatprep.subr.bf16.mxu1 %v12122_v20  ;;  %7250 = vmatprep.subr.bf16.mxu0 %v12125_v29  ;;  %v12126_v63 = vld [vmem:[%s16863_s5 + $0x3c0] ss:$16 sps:$4 sm:$0xff]   ;;  %v12137_v20 = vld [vmem:[%s16863_s5 + $0x3ec] ss:$16 sps:$4 sm:$0xff]  }
 0x469   :  { %v15043_v38 = vpack.c.bf16 %v3660_v18, %v3656_v22  ;;  %v15045_v37 = vpack.c.bf16 %v4070_v46, %v4064_v42  ;;  %v3662_v47 = vpop.f32.mrb[95].mxu1  ;;  %v4072_v4 = vpop.f32.mrb[18].mxu0  ;;  %v12134_v42 = vld [vmem:[%s16863_s5 + $0x3e4] ss:$16 sps:$4 sm:$0xff]   ;;  %v12132_v29 = vld [vmem:[%s16863_s5 + $0x3e0] ss:$16 sps:$4 sm:$0xff]  }
 0x46a   :  { %v15047_v54 = vpack.c.bf16 %v3662_v47, %v3658_v39  ;;  %v15049_v48 = vpack.c.bf16 %v4072_v4, %v4068_v24  ;;  %6633 = vmatpush1.bf16.msra.mxu1 %v12120_v58  ;;  %7251 = vmatpush1.bf16.msra.mxu0 %v12123_v32  ;;  %v4074_v3 = vpop.f32.mrb[19].mxu0  ;;  %v12135_v22 = vld [vmem:[%s16863_s5 + $0x3e8] ss:$16 sps:$4 sm:$0xff]   ;;  %v12140_v32 = vld [vmem:[%s16863_s5 + $0x404] ss:$16 sps:$4 sm:$0xff]  }
 0x46b   :  { %v15057_v25 = vpack.c.bf16 %v4074_v3, %v4070_v46  ;;  %6634 = vmatprep.subr.bf16.mxu1 %v12128_v26  ;;  %7252 = vmatprep.subr.bf16.mxu0 %v12131_v60  ;;  %v12143_v39 = vld [vmem:[%s16863_s5 + $0x40c] ss:$16 sps:$4 sm:$0xff]  }
 0x46d   :  { %16892 = vst [vmem:[#allocation6_spill] sm:$0xff] %v15057_v25 }
 0x46e   :  { %6635 = vmatpush1.bf16.msra.mxu1 %v12126_v63  ;;  %7253 = vmatpush1.bf16.msra.mxu0 %v12129_v7  ;;  %v12138_v63 = vld [vmem:[%s16863_s5 + $0x400] ss:$16 sps:$4 sm:$0xff]  }
 0x46f   :  { %v4078_v58 = vpop.f32.mrb[20].mxu0  ;;  %6636 = vmatprep.subr.bf16.mxu1 %v12134_v42  ;;  %7254 = vmatprep.subr.bf16.mxu0 %v12137_v20  ;;  %v12149_v42 = vld [vmem:[%s16863_s5 + $0x42c] ss:$16 sps:$4 sm:$0xff]   ;;  %v12144_v20 = vld [vmem:[%s16863_s5 + $0x420] ss:$16 sps:$4 sm:$0xff]  }
 0x470   :  { %v15077_v24 = vpack.c.bf16 %v4078_v58, %v4072_v4  ;;  %v4080_v26 = vpop.f32.mrb[21].mxu0  ;;  %v12141_v4 = vld [vmem:[%s16863_s5 + $0x408] ss:$16 sps:$4 sm:$0xff]  }
 0x471   :  { %v15079_v60 = vpack.c.bf16 %v4080_v26, %v4074_v3  ;;  %v4082_v18 = vpop.f32.mrb[22].mxu0  ;;  %v12146_v3 = vld [vmem:[%s16863_s5 + $0x424] ss:$16 sps:$4 sm:$0xff]  }
 0x472   :  { %v15081_v46 = vpack.c.bf16 %v4082_v18, %v4078_v58  ;;  %6637 = vmatpush1.bf16.msra.mxu1 %v12132_v29  ;;  %7255 = vmatpush1.bf16.msra.mxu0 %v12135_v22  ;;  %v4084_v47 = vpop.f32.mrb[23].mxu0  ;;  %v12147_v22 = vld [vmem:[%s16863_s5 + $0x428] ss:$16 sps:$4 sm:$0xff]   ;;  %v12152_v58 = vld [vmem:[%s16863_s5 + $0x444] ss:$16 sps:$4 sm:$0xff]  }
 0x473   :  { %v15086_v7 = vpack.c.bf16 %v4084_v47, %v4080_v26  ;;  %6709 = vmatprep.subr.bf16.mxu1 %v12140_v32  ;;  %7327 = vmatprep.subr.bf16.mxu0 %v12143_v39  ;;  %v12155_v39 = vld [vmem:[%s16863_s5 + $0x44c] ss:$16 sps:$4 sm:$0xff]  }
 0x475   :  { %6639 = vmatmul.mubr.bf16.vlgmr.msra.gmra.mrb[96].mxu1 %v14915_v27  ;;  %7257 = vmatmul.mubr.bf16.vlgmr.msra.gmra.mrb[36].mxu0 %v14915_v27 }
 0x476   :  { %6648 = vmatprep.mubr.bf16.mxu1 %v14967_v61  ;;  %6710 = vmatpush1.bf16.msra.mxu1 %v12138_v63 }
 0x477   :  { %7266 = vmatprep.mubr.bf16.mxu0 %v14967_v61  ;;  %7328 = vmatpush1.bf16.msra.mxu0 %v12141_v4  ;;  %v4088_v29 = vpop.f32.mrb[24].mxu0 }
 0x478   :  { %v15110_v27 = vpack.c.bf16 %v4088_v29, %v4082_v18  ;;  %v4090_v32 = vpop.f32.mrb[25].mxu0  ;;  %6711 = vmatprep.subr.bf16.mxu1 %v12146_v3  ;;  %7329 = vmatprep.subr.bf16.mxu0 %v12149_v42  ;;  %v12153_v3 = vld [vmem:[%s16863_s5 + $0x448] ss:$16 sps:$4 sm:$0xff]   ;;  %v12161_v42 = vld [vmem:[%s16863_s5 + $0x46c] ss:$16 sps:$4 sm:$0xff]  }
 0x479   :  { %v15115_v26 = vpack.c.bf16 %v4090_v32, %v4084_v47  ;;  %v4092_v63 = vpop.f32.mrb[26].mxu0  ;;  %v12158_v47 = vld [vmem:[%s16863_s5 + $0x464] ss:$16 sps:$4 sm:$0xff]  }
 0x47a   :  { %v15117_v4 = vpack.c.bf16 %v4092_v63, %v4088_v29  ;;  %6712 = vmatpush1.bf16.msra.mxu1 %v12144_v20  ;;  %v4094_v17 = vpop.f32.mrb[27].mxu0  ;;  %v12156_v20 = vld [vmem:[%s16863_s5 + $0x460] ss:$16 sps:$4 sm:$0xff]  }
 0x47b   :  { %7330 = vmatpush1.bf16.msra.mxu0 %v12147_v22  ;;  %v15122_v18 = vpack.c.bf16 %v4094_v17, %v4090_v32  ;;  %6713 = vmatprep.subr.bf16.mxu1 %v12152_v58  ;;  %v12159_v22 = vld [vmem:[%s16863_s5 + $0x468] ss:$16 sps:$4 sm:$0xff]   ;;  %v12164_v58 = vld [vmem:[%s16863_s5 + $0x484] ss:$16 sps:$4 sm:$0xff]  }
 0x47c   :  { %7331 = vmatprep.subr.bf16.mxu0 %v12155_v39 }
 0x47d   :  { %6649 = vmatmul.mubr.bf16.gmra.mrb[100].mxu1 %v14959_v8  ;;  %7267 = vmatmul.mubr.bf16.gmra.mrb[40].mxu0 %v14959_v8  ;;  %v12174_v8 = vld [vmem:[%s16863_s5 + $0x4c0] ss:$16 sps:$4 sm:$0xff]  }
 0x47e   :  { %6658 = vmatprep.mubr.bf16.mxu1 %v15011_v36  ;;  %6714 = vmatpush1.bf16.msra.mxu1 %v12150_v59  ;;  %v12167_v59 = vld [vmem:[%s16863_s5 + $0x48c] ss:$16 sps:$4 sm:$0xff]  }
 0x47f   :  { %7276 = vmatprep.mubr.bf16.mxu0 %v15011_v36  ;;  %7332 = vmatpush1.bf16.msra.mxu0 %v12153_v3  ;;  %v4098_v29 = vpop.f32.mrb[28].mxu0 }
 0x480   :  { %v15146_v32 = vpack.c.bf16 %v4098_v29, %v4092_v63  ;;  %v4100_v39 = vpop.f32.mrb[29].mxu0  ;;  %6715 = vmatprep.subr.bf16.mxu1 %v12158_v47  ;;  %7333 = vmatprep.subr.bf16.mxu0 %v12161_v42  ;;  %v12165_v47 = vld [vmem:[%s16863_s5 + $0x488] ss:$16 sps:$4 sm:$0xff]   ;;  %v12173_v42 = vld [vmem:[%s16863_s5 + $0x4ac] ss:$16 sps:$4 sm:$0xff]  }
 0x481   :  { %v15151_v13 = vpack.c.bf16 %v4100_v39, %v4094_v17  ;;  %v4102_v3 = vpop.f32.mrb[30].mxu0  ;;  %v12170_v17 = vld [vmem:[%s16863_s5 + $0x4a4] ss:$16 sps:$4 sm:$0xff]  }
 0x482   :  { %v15153_v57 = vpack.c.bf16 %v4102_v3, %v4098_v29  ;;  %6716 = vmatpush1.bf16.msra.mxu1 %v12156_v20  ;;  %v4104_v1 = vpop.f32.mrb[31].mxu0  ;;  %v12168_v20 = vld [vmem:[%s16863_s5 + $0x4a0] ss:$16 sps:$4 sm:$0xff]  }
 0x483   :  { %7334 = vmatpush1.bf16.msra.mxu0 %v12159_v22  ;;  %v15158_v63 = vpack.c.bf16 %v4104_v1, %v4100_v39  ;;  %6717 = vmatprep.subr.bf16.mxu1 %v12164_v58  ;;  %v12171_v22 = vld [vmem:[%s16863_s5 + $0x4a8] ss:$16 sps:$4 sm:$0xff]   ;;  %v12176_v58 = vld [vmem:[%s16863_s5 + $0x4c4] ss:$16 sps:$4 sm:$0xff]  }
 0x484   :  { %7335 = vmatprep.subr.bf16.mxu0 %v12167_v59 }
 0x485   :  { %6659 = vmatmul.mubr.bf16.gmra.mrb[104].mxu1 %v15003_v34  ;;  %7277 = vmatmul.mubr.bf16.gmra.mrb[44].mxu0 %v15003_v34 }
 0x486   :  { %6668 = vmatprep.mubr.bf16.mxu1 %v15057_v25  ;;  %6718 = vmatpush1.bf16.msra.mxu1 %v12162_v56  ;;  %v12179_v56 = vld [vmem:[%s16863_s5 + $0x4cc] ss:$16 sps:$4 sm:$0xff]  }
 0x487   :  { %7286 = vmatprep.mubr.bf16.mxu0 %v15057_v25  ;;  %7336 = vmatpush1.bf16.msra.mxu0 %v12165_v47  ;;  %v4108_v29 = vpop.f32.mrb[32].mxu0 }
 0x488   :  { %v15182_v39 = vpack.c.bf16 %v4108_v29, %v4102_v3  ;;  %v4110_v59 = vpop.f32.mrb[33].mxu0  ;;  %6719 = vmatprep.subr.bf16.mxu1 %v12170_v17  ;;  %7337 = vmatprep.subr.bf16.mxu0 %v12173_v42  ;;  %v12177_v17 = vld [vmem:[%s16863_s5 + $0x4c8] ss:$16 sps:$4 sm:$0xff]   ;;  %v12185_v42 = vld [vmem:[%s16863_s5 + $0x4ec] ss:$16 sps:$4 sm:$0xff]  }
 0x489   :  { %v15187_v25 = vpack.c.bf16 %v4110_v59, %v4104_v1  ;;  %v4112_v47 = vpop.f32.mrb[34].mxu0  ;;  %v12182_v1 = vld [vmem:[%s16863_s5 + $0x4e4] ss:$16 sps:$4 sm:$0xff]  }
 0x48a   :  { %v15189_v34 = vpack.c.bf16 %v4112_v47, %v4108_v29  ;;  %6720 = vmatpush1.bf16.msra.mxu1 %v12168_v20  ;;  %v4114_v36 = vpop.f32.mrb[35].mxu0  ;;  %v12183_v20 = vld [vmem:[%s16863_s5 + $0x4e8] ss:$16 sps:$4 sm:$0xff]   ;;  %v12188_v29 = vld [vmem:[%s16863_s5 + $0x504] ss:$16 sps:$4 sm:$0xff]  }
 0x48b   :  { %7338 = vmatpush1.bf16.msra.mxu0 %v12171_v22  ;;  %v15194_v3 = vpack.c.bf16 %v4114_v36, %v4110_v59  ;;  %6721 = vmatprep.subr.bf16.mxu1 %v12176_v58  ;;  %v12180_v36 = vld [vmem:[%s16863_s5 + $0x4e0] ss:$16 sps:$4 sm:$0xff]   ;;  %v12189_v58 = vld [vmem:[%s16863_s5 + $0x508] ss:$16 sps:$4 sm:$0xff]   ;;  %v12194_v59 = vld [vmem:[%s16863_s5 + $0x524] ss:$16 sps:$4 sm:$0xff]  }
 0x48c   :  { %7339 = vmatprep.subr.bf16.mxu0 %v12179_v56  ;;  %v12186_v22 = vld [vmem:[%s16863_s5 + $0x500] ss:$16 sps:$4 sm:$0xff]   ;;  %v12197_v56 = vld [vmem:[%s16863_s5 + $0x52c] ss:$16 sps:$4 sm:$0xff]  }
 0x48d   :  { %6669 = vmatmul.mubr.bf16.gmra.mrb[108].mxu1 %v15049_v48  ;;  %7287 = vmatmul.mubr.bf16.gmra.mrb[48].mxu0 %v15049_v48  ;;  %v12192_v47 = vld [vmem:[%s16863_s5 + $0x520] ss:$16 sps:$4 sm:$0xff]  }
 0x48e   :  { %6678 = vmatprep.mubr.bf16.mxu1 %v15086_v7  ;;  %6722 = vmatpush1.bf16.msra.mxu1 %v12174_v8  ;;  %v12191_v8 = vld [vmem:[%s16863_s5 + $0x50c] ss:$16 sps:$4 sm:$0xff]  }
 0x48f   :  { %7296 = vmatprep.mubr.bf16.mxu0 %v15086_v7  ;;  %7340 = vmatpush1.bf16.msra.mxu0 %v12177_v17  ;;  %v12195_v17 = vld [vmem:[%s16863_s5 + $0x528] ss:$16 sps:$4 sm:$0xff]  }
 0x490   :  { %6723 = vmatprep.subr.bf16.mxu1 %v12182_v1  ;;  %7341 = vmatprep.subr.bf16.mxu0 %v12185_v42  ;;  %v12200_v1 = vld [vmem:[%s16863_s5 + $0x544] ss:$16 sps:$4 sm:$0xff]   ;;  %v12203_v42 = vld [vmem:[%s16863_s5 + $0x54c] ss:$16 sps:$4 sm:$0xff]  }
 0x492   :  { %6724 = vmatpush1.bf16.msra.mxu1 %v12180_v36  ;;  %v12198_v36 = vld [vmem:[%s16863_s5 + $0x540] ss:$16 sps:$4 sm:$0xff]  }
 0x493   :  { %7342 = vmatpush1.bf16.msra.mxu0 %v12183_v20  ;;  %6725 = vmatprep.subr.bf16.mxu1 %v12188_v29  ;;  %v12201_v20 = vld [vmem:[%s16863_s5 + $0x548] ss:$16 sps:$4 sm:$0xff]   ;;  %v12206_v29 = vld [vmem:[%s16863_s5 + $0x564] ss:$16 sps:$4 sm:$0xff]  }
 0x494   :  { %7343 = vmatprep.subr.bf16.mxu0 %v12191_v8  ;;  %v12209_v8 = vld [vmem:[%s16863_s5 + $0x56c] ss:$16 sps:$4 sm:$0xff]  }
 0x495   :  { %6679 = vmatmul.mubr.bf16.gmra.mrb[112].mxu1 %v15081_v46  ;;  %7297 = vmatmul.mubr.bf16.gmra.mrb[52].mxu0 %v15081_v46 }
 0x496   :  { %6688 = vmatprep.mubr.bf16.mxu1 %v15122_v18  ;;  %6726 = vmatpush1.bf16.msra.mxu1 %v12186_v22  ;;  %v12204_v22 = vld [vmem:[%s16863_s5 + $0x560] ss:$16 sps:$4 sm:$0xff]  }
 0x497   :  { %7306 = vmatprep.mubr.bf16.mxu0 %v15122_v18  ;;  %7344 = vmatpush1.bf16.msra.mxu0 %v12189_v58  ;;  %v12207_v58 = vld [vmem:[%s16863_s5 + $0x568] ss:$16 sps:$4 sm:$0xff]  }
 0x498   :  { %6727 = vmatprep.subr.bf16.mxu1 %v12194_v59  ;;  %7345 = vmatprep.subr.bf16.mxu0 %v12197_v56  ;;  %v12212_v59 = vld [vmem:[%s16863_s5 + $0x584] ss:$16 sps:$4 sm:$0xff]   ;;  %v12215_v56 = vld [vmem:[%s16863_s5 + $0x58c] ss:$16 sps:$4 sm:$0xff]  }
 0x49a   :  { %6728 = vmatpush1.bf16.msra.mxu1 %v12192_v47  ;;  %v12210_v47 = vld [vmem:[%s16863_s5 + $0x580] ss:$16 sps:$4 sm:$0xff]  }
 0x49b   :  { %7346 = vmatpush1.bf16.msra.mxu0 %v12195_v17  ;;  %6729 = vmatprep.subr.bf16.mxu1 %v12200_v1  ;;  %v12213_v17 = vld [vmem:[%s16863_s5 + $0x588] ss:$16 sps:$4 sm:$0xff]   ;;  %v12218_v1 = vld [vmem:[%s16863_s5 + $0x5a4] ss:$16 sps:$4 sm:$0xff]  }
 0x49c   :  { %7347 = vmatprep.subr.bf16.mxu0 %v12203_v42  ;;  %v12221_v42 = vld [vmem:[%s16863_s5 + $0x5ac] ss:$16 sps:$4 sm:$0xff]  }
 0x49d   :  { %6689 = vmatmul.mubr.bf16.gmra.mrb[116].mxu1 %v15117_v4  ;;  %7307 = vmatmul.mubr.bf16.gmra.mrb[56].mxu0 %v15117_v4 }
 0x49e   :  { %6698 = vmatprep.mubr.bf16.mxu1 %v15158_v63  ;;  %6730 = vmatpush1.bf16.msra.mxu1 %v12198_v36  ;;  %v12216_v36 = vld [vmem:[%s16863_s5 + $0x5a0] ss:$16 sps:$4 sm:$0xff]  }
 0x49f   :  { %7316 = vmatprep.mubr.bf16.mxu0 %v15158_v63  ;;  %7348 = vmatpush1.bf16.msra.mxu0 %v12201_v20  ;;  %v12219_v20 = vld [vmem:[%s16863_s5 + $0x5a8] ss:$16 sps:$4 sm:$0xff]  }
 0x4a0   :  { %6731 = vmatprep.subr.bf16.mxu1 %v12206_v29  ;;  %7349 = vmatprep.subr.bf16.mxu0 %v12209_v8  ;;  %v12224_v29 = vld [vmem:[%s16863_s5 + $0x5c4] ss:$16 sps:$4 sm:$0xff]   ;;  %v12227_v8 = vld [vmem:[%s16863_s5 + $0x5cc] ss:$16 sps:$4 sm:$0xff]  }
 0x4a2   :  { %6732 = vmatpush1.bf16.msra.mxu1 %v12204_v22  ;;  %v12222_v22 = vld [vmem:[%s16863_s5 + $0x5c0] ss:$16 sps:$4 sm:$0xff]  }
 0x4a3   :  { %7350 = vmatpush1.bf16.msra.mxu0 %v12207_v58  ;;  %6733 = vmatprep.subr.bf16.mxu1 %v12212_v59  ;;  %v12230_v58 = vld [vmem:[%s16863_s5 + $0x5e4] ss:$16 sps:$4 sm:$0xff]   ;;  %v12233_v59 = vld [vmem:[%s16863_s5 + $0x5ec] ss:$16 sps:$4 sm:$0xff]  }
 0x4a4   :  { %7351 = vmatprep.subr.bf16.mxu0 %v12215_v56  ;;  %v12228_v56 = vld [vmem:[%s16863_s5 + $0x5e0] ss:$16 sps:$4 sm:$0xff]  }
 0x4a5   :  { %6699 = vmatmul.mubr.bf16.gmra.mrb[120].mxu1 %v15153_v57  ;;  %7317 = vmatmul.mubr.bf16.gmra.mrb[60].mxu0 %v15153_v57 }
 0x4a6   :  { %6734 = vmatpush1.bf16.msra.mxu1 %v12210_v47  ;;  %6741 = vmatprep.mubr.bf16.mxu1 %v14801_v15  ;;  %v12231_v47 = vld [vmem:[%s16863_s5 + $0x5e8] ss:$16 sps:$4 sm:$0xff]  }
 0x4a7   :  { %7352 = vmatpush1.bf16.msra.mxu0 %v12213_v17  ;;  %7359 = vmatprep.mubr.bf16.mxu0 %v14801_v15  ;;  %v12225_v15 = vld [vmem:[%s16863_s5 + $0x5c8] ss:$16 sps:$4 sm:$0xff]   ;;  %v12236_v17 = vld [vmem:[%s16863_s5 + $0x604] ss:$16 sps:$4 sm:$0xff]  }
 0x4a8   :  { %6735 = vmatprep.subr.bf16.mxu1 %v12218_v1  ;;  %7353 = vmatprep.subr.bf16.mxu0 %v12221_v42  ;;  %v12239_v1 = vld [vmem:[%s16863_s5 + $0x60c] ss:$16 sps:$4 sm:$0xff]   ;;  %v12234_v42 = vld [vmem:[%s16863_s5 + $0x600] ss:$16 sps:$4 sm:$0xff]  }
 0x4aa   :  { %6736 = vmatpush1.bf16.msra.mxu1 %v12216_v36  ;;  %v12237_v36 = vld [vmem:[%s16863_s5 + $0x608] ss:$16 sps:$4 sm:$0xff]  }
 0x4ab   :  { %7354 = vmatpush1.bf16.msra.mxu0 %v12219_v20  ;;  %6737 = vmatprep.subr.bf16.mxu1 %v12224_v29  ;;  %v12242_v20 = vld [vmem:[%s16863_s5 + $0x624] ss:$16 sps:$4 sm:$0xff]   ;;  %v12245_v29 = vld [vmem:[%s16863_s5 + $0x62c] ss:$16 sps:$4 sm:$0xff]  }
 0x4ac   :  { %7355 = vmatprep.subr.bf16.mxu0 %v12227_v8  ;;  %v12240_v8 = vld [vmem:[%s16863_s5 + $0x620] ss:$16 sps:$4 sm:$0xff]  }
 0x4ae   :  { %6738 = vmatpush1.bf16.msra.mxu1 %v12222_v22  ;;  %v12243_v22 = vld [vmem:[%s16863_s5 + $0x628] ss:$16 sps:$4 sm:$0xff]  }
 0x4af   :  { %7356 = vmatpush1.bf16.msra.mxu0 %v12225_v15  ;;  %6739 = vmatprep.subr.bf16.mxu1 %v12230_v58  ;;  %v12248_v15 = vld [vmem:[%s16863_s5 + $0x644] ss:$16 sps:$4 sm:$0xff]   ;;  %v12249_v58 = vld [vmem:[%s16863_s5 + $0x648] ss:$16 sps:$4 sm:$0xff]  }
 0x4b0   :  { %7357 = vmatprep.subr.bf16.mxu0 %v12233_v59  ;;  %v12254_v59 = vld [vmem:[%s16863_s5 + $0x664] ss:$16 sps:$4 sm:$0xff]  }
 0x4b2   :  { %6740 = vmatpush1.bf16.msra.mxu1 %v12228_v56  ;;  %v12257_v56 = vld [vmem:[%s16863_s5 + $0x66c] ss:$16 sps:$4 sm:$0xff]  }
 0x4b3   :  { %7358 = vmatpush1.bf16.msra.mxu0 %v12231_v47  ;;  %6812 = vmatprep.subr.bf16.mxu1 %v12236_v17  ;;  %v12252_v47 = vld [vmem:[%s16863_s5 + $0x660] ss:$16 sps:$4 sm:$0xff]   ;;  %v12255_v17 = vld [vmem:[%s16863_s5 + $0x668] ss:$16 sps:$4 sm:$0xff]  }
 0x4b4   :  { %7430 = vmatprep.subr.bf16.mxu0 %v12239_v1  ;;  %v12260_v1 = vld [vmem:[%s16863_s5 + $0x684] ss:$16 sps:$4 sm:$0xff]  }
 0x4b5   :  { %6742 = vmatmul.mubr.bf16.vlgmr.msra.gmra.mrb[96].mxu1 %v14793_v12 }
 0x4b6   :  { %7360 = vmatmul.mubr.bf16.vlgmr.msra.gmra.mrb[36].mxu0 %v14793_v12  ;;  %6751 = vmatprep.mubr.bf16.mxu1 %v14837_v11  ;;  %v12251_v12 = vld [vmem:[%s16863_s5 + $0x64c] ss:$16 sps:$4 sm:$0xff]  }
 0x4b7   :  { %6813 = vmatpush1.bf16.msra.mxu1 %v12234_v42  ;;  %7369 = vmatprep.mubr.bf16.mxu0 %v14837_v11  ;;  %v12246_v11 = vld [vmem:[%s16863_s5 + $0x640] ss:$16 sps:$4 sm:$0xff]   ;;  %v12261_v42 = vld [vmem:[%s16863_s5 + $0x688] ss:$16 sps:$4 sm:$0xff]  }
 0x4b8   :  { %7431 = vmatpush1.bf16.msra.mxu0 %v12237_v36  ;;  %6814 = vmatprep.subr.bf16.mxu1 %v12242_v20  ;;  %v12266_v36 = vld [vmem:[%s16863_s5 + $0x6a4] ss:$16 sps:$4 sm:$0xff]   ;;  %v12269_v20 = vld [vmem:[%s16863_s5 + $0x6ac] ss:$16 sps:$4 sm:$0xff]  }
 0x4b9   :  { %7432 = vmatprep.subr.bf16.mxu0 %v12245_v29  ;;  %v12264_v29 = vld [vmem:[%s16863_s5 + $0x6a0] ss:$16 sps:$4 sm:$0xff]  }
 0x4bb   :  { %6815 = vmatpush1.bf16.msra.mxu1 %v12240_v8  ;;  %v12267_v8 = vld [vmem:[%s16863_s5 + $0x6a8] ss:$16 sps:$4 sm:$0xff]  }
 0x4bc   :  { %7433 = vmatpush1.bf16.msra.mxu0 %v12243_v22  ;;  %6816 = vmatprep.subr.bf16.mxu1 %v12248_v15  ;;  %v12272_v22 = vld [vmem:[%s16863_s5 + $0x6c4] ss:$16 sps:$4 sm:$0xff]   ;;  %v12273_v15 = vld [vmem:[%s16863_s5 + $0x6c8] ss:$16 sps:$4 sm:$0xff]  }
 0x4bd   :  { %6752 = vmatmul.mubr.bf16.gmra.mrb[100].mxu1 %v14829_v21  ;;  %7434 = vmatprep.subr.bf16.mxu0 %v12251_v12  ;;  %v12278_v12 = vld [vmem:[%s16863_s5 + $0x6e4] ss:$16 sps:$4 sm:$0xff]  }
 0x4be   :  { %7370 = vmatmul.mubr.bf16.gmra.mrb[40].mxu0 %v14829_v21  ;;  %6761 = vmatprep.mubr.bf16.mxu1 %v14873_v19  ;;  %v12263_v21 = vld [vmem:[%s16863_s5 + $0x68c] ss:$16 sps:$4 sm:$0xff]  }
 0x4bf   :  { %6817 = vmatpush1.bf16.msra.mxu1 %v12246_v11  ;;  %7379 = vmatprep.mubr.bf16.mxu0 %v14873_v19  ;;  %v12258_v19 = vld [vmem:[%s16863_s5 + $0x680] ss:$16 sps:$4 sm:$0xff]   ;;  %v12281_v11 = vld [vmem:[%s16863_s5 + $0x6ec] ss:$16 sps:$4 sm:$0xff]  }
 0x4c0   :  { %7435 = vmatpush1.bf16.msra.mxu0 %v12249_v58  ;;  %6818 = vmatprep.subr.bf16.mxu1 %v12254_v59  ;;  %v12276_v58 = vld [vmem:[%s16863_s5 + $0x6e0] ss:$16 sps:$4 sm:$0xff]   ;;  %v12279_v59 = vld [vmem:[%s16863_s5 + $0x6e8] ss:$16 sps:$4 sm:$0xff]  }
 0x4c1   :  { %7436 = vmatprep.subr.bf16.mxu0 %v12257_v56  ;;  %v12284_v56 = vld [vmem:[%s16863_s5 + $0x704] ss:$16 sps:$4 sm:$0xff]  }
 0x4c3   :  { %6819 = vmatpush1.bf16.msra.mxu1 %v12252_v47  ;;  %v12285_v47 = vld [vmem:[%s16863_s5 + $0x708] ss:$16 sps:$4 sm:$0xff]  }
 0x4c4   :  { %7437 = vmatpush1.bf16.msra.mxu0 %v12255_v17  ;;  %6820 = vmatprep.subr.bf16.mxu1 %v12260_v1  ;;  %v12290_v17 = vld [vmem:[%s16863_s5 + $0x724] ss:$16 sps:$4 sm:$0xff]   ;;  %v12293_v1 = vld [vmem:[%s16863_s5 + $0x72c] ss:$16 sps:$4 sm:$0xff]  }
 0x4c5   :  { %6762 = vmatmul.mubr.bf16.gmra.mrb[104].mxu1 %v14865_v35  ;;  %7438 = vmatprep.subr.bf16.mxu0 %v12263_v21  ;;  %v12288_v21 = vld [vmem:[%s16863_s5 + $0x720] ss:$16 sps:$4 sm:$0xff]  }
 0x4c6   :  { %7380 = vmatmul.mubr.bf16.gmra.mrb[44].mxu0 %v14865_v35  ;;  %6771 = vmatprep.mubr.bf16.mxu1 %v14909_v2  ;;  %v12275_v35 = vld [vmem:[%s16863_s5 + $0x6cc] ss:$16 sps:$4 sm:$0xff]  }
 0x4c7   :  { %6821 = vmatpush1.bf16.msra.mxu1 %v12258_v19  ;;  %7389 = vmatprep.mubr.bf16.mxu0 %v14909_v2  ;;  %v12270_v2 = vld [vmem:[%s16863_s5 + $0x6c0] ss:$16 sps:$4 sm:$0xff]   ;;  %v12291_v19 = vld [vmem:[%s16863_s5 + $0x728] ss:$16 sps:$4 sm:$0xff]  }
 0x4c8   :  { %7439 = vmatpush1.bf16.msra.mxu0 %v12261_v42  ;;  %6822 = vmatprep.subr.bf16.mxu1 %v12266_v36  ;;  %v12296_v42 = vld [vmem:[%s16863_s5 + $0x744] ss:$16 sps:$4 sm:$0xff]   ;;  %v12297_v36 = vld [vmem:[%s16863_s5 + $0x748] ss:$16 sps:$4 sm:$0xff]  }
 0x4c9   :  { %7440 = vmatprep.subr.bf16.mxu0 %v12269_v20  ;;  %v12302_v20 = vld [vmem:[%s16863_s5 + $0x764] ss:$16 sps:$4 sm:$0xff]  }
 0x4cb   :  { %6823 = vmatpush1.bf16.msra.mxu1 %v12264_v29  ;;  %v12305_v29 = vld [vmem:[%s16863_s5 + $0x76c] ss:$16 sps:$4 sm:$0xff]  }
 0x4cc   :  { %7441 = vmatpush1.bf16.msra.mxu0 %v12267_v8  ;;  %6824 = vmatprep.subr.bf16.mxu1 %v12272_v22  ;;  %v12300_v8 = vld [vmem:[%s16863_s5 + $0x760] ss:$16 sps:$4 sm:$0xff]   ;;  %v12303_v22 = vld [vmem:[%s16863_s5 + $0x768] ss:$16 sps:$4 sm:$0xff]  }
 0x4cd   :  { %6772 = vmatmul.mubr.bf16.gmra.mrb[108].mxu1 %v14901_v45  ;;  %7442 = vmatprep.subr.bf16.mxu0 %v12275_v35  ;;  %v12308_v35 = vld [vmem:[%s16863_s5 + $0x784] ss:$16 sps:$4 sm:$0xff]  }
 0x4ce   :  { %7390 = vmatmul.mubr.bf16.gmra.mrb[48].mxu0 %v14901_v45  ;;  %6781 = vmatprep.mubr.bf16.mxu1 %v14949_v10  ;;  %v12287_v45 = vld [vmem:[%s16863_s5 + $0x70c] ss:$16 sps:$4 sm:$0xff]  }
 0x4cf   :  { %6825 = vmatpush1.bf16.msra.mxu1 %v12270_v2  ;;  %7399 = vmatprep.mubr.bf16.mxu0 %v14949_v10  ;;  %v12282_v10 = vld [vmem:[%s16863_s5 + $0x700] ss:$16 sps:$4 sm:$0xff]   ;;  %v12309_v2 = vld [vmem:[%s16863_s5 + $0x788] ss:$16 sps:$4 sm:$0xff]  }
 0x4d0   :  { %7443 = vmatpush1.bf16.msra.mxu0 %v12273_v15  ;;  %6826 = vmatprep.subr.bf16.mxu1 %v12278_v12  ;;  %v12314_v15 = vld [vmem:[%s16863_s5 + $0x7a4] ss:$16 sps:$4 sm:$0xff]   ;;  %v12317_v12 = vld [vmem:[%s16863_s5 + $0x7ac] ss:$16 sps:$4 sm:$0xff]  }
 0x4d1   :  { %7444 = vmatprep.subr.bf16.mxu0 %v12281_v11  ;;  %v12312_v11 = vld [vmem:[%s16863_s5 + $0x7a0] ss:$16 sps:$4 sm:$0xff]  }
 0x4d3   :  { %6827 = vmatpush1.bf16.msra.mxu1 %v12276_v58  ;;  %v12315_v58 = vld [vmem:[%s16863_s5 + $0x7a8] ss:$16 sps:$4 sm:$0xff]  }
 0x4d4   :  { %7445 = vmatpush1.bf16.msra.mxu0 %v12279_v59  ;;  %6828 = vmatprep.subr.bf16.mxu1 %v12284_v56  ;;  %v12320_v59 = vld [vmem:[%s16863_s5 + $0x7c4] ss:$16 sps:$4 sm:$0xff]   ;;  %v12321_v56 = vld [vmem:[%s16863_s5 + $0x7c8] ss:$16 sps:$4 sm:$0xff]  }
 0x4d5   :  { %6782 = vmatmul.mubr.bf16.gmra.mrb[112].mxu1 %v14941_v6  ;;  %7446 = vmatprep.subr.bf16.mxu0 %v12287_v45  ;;  %v12326_v45 = vld [vmem:[%s16863_s5 + $0x7e4] ss:$16 sps:$4 sm:$0xff]  }
 0x4d6   :  { %7400 = vmatmul.mubr.bf16.gmra.mrb[52].mxu0 %v14941_v6  ;;  %6791 = vmatprep.mubr.bf16.mxu1 %v14993_v62  ;;  %v12299_v6 = vld [vmem:[%s16863_s5 + $0x74c] ss:$16 sps:$4 sm:$0xff]  }
 0x4d7   :  { %6829 = vmatpush1.bf16.msra.mxu1 %v12282_v10  ;;  %7409 = vmatprep.mubr.bf16.mxu0 %v14993_v62  ;;  %v12294_v62 = vld [vmem:[%s16863_s5 + $0x740] ss:$16 sps:$4 sm:$0xff]   ;;  %v12329_v10 = vld [vmem:[%s16863_s5 + $0x7ec] ss:$16 sps:$4 sm:$0xff]  }
 0x4d8   :  { %7447 = vmatpush1.bf16.msra.mxu0 %v12285_v47  ;;  %6830 = vmatprep.subr.bf16.mxu1 %v12290_v17  ;;  %v12324_v47 = vld [vmem:[%s16863_s5 + $0x7e0] ss:$16 sps:$4 sm:$0xff]   ;;  %v12327_v17 = vld [vmem:[%s16863_s5 + $0x7e8] ss:$16 sps:$4 sm:$0xff]  }
 0x4d9   :  { %7448 = vmatprep.subr.bf16.mxu0 %v12293_v1  ;;  %v12332_v1 = vld [vmem:[%s16863_s5 + $0x804] ss:$16 sps:$4 sm:$0xff]  }
 0x4db   :  { %6831 = vmatpush1.bf16.msra.mxu1 %v12288_v21  ;;  %v12335_v21 = vld [vmem:[%s16863_s5 + $0x80c] ss:$16 sps:$4 sm:$0xff]  }
 0x4dc   :  { %7449 = vmatpush1.bf16.msra.mxu0 %v12291_v19  ;;  %6832 = vmatprep.subr.bf16.mxu1 %v12296_v42  ;;  %v12330_v19 = vld [vmem:[%s16863_s5 + $0x800] ss:$16 sps:$4 sm:$0xff]   ;;  %v12333_v42 = vld [vmem:[%s16863_s5 + $0x808] ss:$16 sps:$4 sm:$0xff]  }
 0x4dd   :  { %6792 = vmatmul.mubr.bf16.gmra.mrb[116].mxu1 %v14985_v28  ;;  %7450 = vmatprep.subr.bf16.mxu0 %v12299_v6  ;;  %v12338_v6 = vld [vmem:[%s16863_s5 + $0x824] ss:$16 sps:$4 sm:$0xff]  }
 0x4de   :  { %7410 = vmatmul.mubr.bf16.gmra.mrb[56].mxu0 %v14985_v28  ;;  %6801 = vmatprep.mubr.bf16.mxu1 %v15039_v9  ;;  %v12311_v28 = vld [vmem:[%s16863_s5 + $0x78c] ss:$16 sps:$4 sm:$0xff]  }
 0x4df   :  { %6833 = vmatpush1.bf16.msra.mxu1 %v12294_v62  ;;  %7419 = vmatprep.mubr.bf16.mxu0 %v15039_v9  ;;  %v12306_v9 = vld [vmem:[%s16863_s5 + $0x780] ss:$16 sps:$4 sm:$0xff]   ;;  %v12341_v62 = vld [vmem:[%s16863_s5 + $0x82c] ss:$16 sps:$4 sm:$0xff]  }
 0x4e0   :  { %7451 = vmatpush1.bf16.msra.mxu0 %v12297_v36  ;;  %6834 = vmatprep.subr.bf16.mxu1 %v12302_v20  ;;  %v12336_v36 = vld [vmem:[%s16863_s5 + $0x820] ss:$16 sps:$4 sm:$0xff]   ;;  %v12339_v20 = vld [vmem:[%s16863_s5 + $0x828] ss:$16 sps:$4 sm:$0xff]  }
 0x4e1   :  { %7452 = vmatprep.subr.bf16.mxu0 %v12305_v29  ;;  %v12344_v29 = vld [vmem:[%s16863_s5 + $0x844] ss:$16 sps:$4 sm:$0xff]  }
 0x4e3   :  { %6835 = vmatpush1.bf16.msra.mxu1 %v12300_v8  ;;  %v12345_v8 = vld [vmem:[%s16863_s5 + $0x848] ss:$16 sps:$4 sm:$0xff]  }
 0x4e4   :  { %7453 = vmatpush1.bf16.msra.mxu0 %v12303_v22  ;;  %6836 = vmatprep.subr.bf16.mxu1 %v12308_v35  ;;  %v12350_v22 = vld [vmem:[%s16863_s5 + $0x864] ss:$16 sps:$4 sm:$0xff]   ;;  %v12353_v35 = vld [vmem:[%s16863_s5 + $0x86c] ss:$16 sps:$4 sm:$0xff]  }
 0x4e5   :  { %6802 = vmatmul.mubr.bf16.gmra.mrb[120].mxu1 %v15029_v5  ;;  %7454 = vmatprep.subr.bf16.mxu0 %v12311_v28  ;;  %v12348_v28 = vld [vmem:[%s16863_s5 + $0x860] ss:$16 sps:$4 sm:$0xff]  }
 0x4e6   :  { %7420 = vmatmul.mubr.bf16.gmra.mrb[60].mxu0 %v15029_v5  ;;  %6844 = vmatprep.mubr.bf16.mxu1 %v14955_v33  ;;  %v12323_v5 = vld [vmem:[%s16863_s5 + $0x7cc] ss:$16 sps:$4 sm:$0xff]  }
 0x4e7   :  { %6837 = vmatpush1.bf16.msra.mxu1 %v12306_v9  ;;  %7462 = vmatprep.mubr.bf16.mxu0 %v14955_v33  ;;  %v12318_v33 = vld [vmem:[%s16863_s5 + $0x7c0] ss:$16 sps:$4 sm:$0xff]   ;;  %v12351_v9 = vld [vmem:[%s16863_s5 + $0x868] ss:$16 sps:$4 sm:$0xff]  }
 0x4e8   :  { %7455 = vmatpush1.bf16.msra.mxu0 %v12309_v2  ;;  %6838 = vmatprep.subr.bf16.mxu1 %v12314_v15  ;;  %v12356_v2 = vld [vmem:[%s16863_s5 + $0x884] ss:$16 sps:$4 sm:$0xff]   ;;  %v12357_v15 = vld [vmem:[%s16863_s5 + $0x888] ss:$16 sps:$4 sm:$0xff]  }
 0x4e9   :  { %7456 = vmatprep.subr.bf16.mxu0 %v12317_v12  ;;  %v12362_v12 = vld [vmem:[%s16863_s5 + $0x8a4] ss:$16 sps:$4 sm:$0xff]  }
 0x4eb   :  { %6839 = vmatpush1.bf16.msra.mxu1 %v12312_v11  ;;  %v12365_v11 = vld [vmem:[%s16863_s5 + $0x8ac] ss:$16 sps:$4 sm:$0xff]  }
 0x4ec   :  { %7457 = vmatpush1.bf16.msra.mxu0 %v12315_v58  ;;  %6840 = vmatprep.subr.bf16.mxu1 %v12320_v59  ;;  %v12360_v58 = vld [vmem:[%s16863_s5 + $0x8a0] ss:$16 sps:$4 sm:$0xff]   ;;  %v12363_v59 = vld [vmem:[%s16863_s5 + $0x8a8] ss:$16 sps:$4 sm:$0xff]  }
 0x4ed   :  { %7458 = vmatprep.subr.bf16.mxu0 %v12323_v5  ;;  %v12368_v5 = vld [vmem:[%s16863_s5 + $0x8c4] ss:$16 sps:$4 sm:$0xff]  }
 0x4ef   :  { %6841 = vmatpush1.bf16.msra.mxu1 %v12318_v33  ;;  %v12369_v33 = vld [vmem:[%s16863_s5 + $0x8c8] ss:$16 sps:$4 sm:$0xff]  }
 0x4f0   :  { %7459 = vmatpush1.bf16.msra.mxu0 %v12321_v56  ;;  %6842 = vmatprep.subr.bf16.mxu1 %v12326_v45  ;;  %v12374_v56 = vld [vmem:[%s16863_s5 + $0x8e4] ss:$16 sps:$4 sm:$0xff]   ;;  %v12377_v45 = vld [vmem:[%s16863_s5 + $0x8ec] ss:$16 sps:$4 sm:$0xff]  }
 0x4f1   :  { %7460 = vmatprep.subr.bf16.mxu0 %v12329_v10  ;;  %v12372_v10 = vld [vmem:[%s16863_s5 + $0x8e0] ss:$16 sps:$4 sm:$0xff]  }
 0x4f3   :  { %6843 = vmatpush1.bf16.msra.mxu1 %v12324_v47  ;;  %v12375_v47 = vld [vmem:[%s16863_s5 + $0x8e8] ss:$16 sps:$4 sm:$0xff]  }
 0x4f4   :  { %7461 = vmatpush1.bf16.msra.mxu0 %v12327_v17  ;;  %6915 = vmatprep.subr.bf16.mxu1 %v12332_v1  ;;  %v12380_v17 = vld [vmem:[%s16863_s5 + $0x904] ss:$16 sps:$4 sm:$0xff]   ;;  %v12381_v1 = vld [vmem:[%s16863_s5 + $0x908] ss:$16 sps:$4 sm:$0xff]  }
 0x4f5   :  { %7533 = vmatprep.subr.bf16.mxu0 %v12335_v21  ;;  %v12386_v21 = vld [vmem:[%s16863_s5 + $0x924] ss:$16 sps:$4 sm:$0xff]  }
 0x4f6   :  { %6845 = vmatmul.mubr.bf16.vlgmr.msra.gmra.mrb[96].mxu1 %v14951_v14 }
 0x4f7   :  { %7463 = vmatmul.mubr.bf16.vlgmr.msra.gmra.mrb[36].mxu0 %v14951_v14  ;;  %6854 = vmatprep.mubr.bf16.mxu1 %v14999_v51  ;;  %v12347_v14 = vld [vmem:[%s16863_s5 + $0x84c] ss:$16 sps:$4 sm:$0xff]  }
 0x4f8   :  { %6916 = vmatpush1.bf16.msra.mxu1 %v12330_v19  ;;  %7472 = vmatprep.mubr.bf16.mxu0 %v14999_v51  ;;  %v12342_v51 = vld [vmem:[%s16863_s5 + $0x840] ss:$16 sps:$4 sm:$0xff]   ;;  %v12389_v19 = vld [vmem:[%s16863_s5 + $0x92c] ss:$16 sps:$4 sm:$0xff]  }
 0x4f9   :  { %7534 = vmatpush1.bf16.msra.mxu0 %v12333_v42  ;;  %6917 = vmatprep.subr.bf16.mxu1 %v12338_v6  ;;  %v12384_v42 = vld [vmem:[%s16863_s5 + $0x920] ss:$16 sps:$4 sm:$0xff]   ;;  %v12387_v6 = vld [vmem:[%s16863_s5 + $0x928] ss:$16 sps:$4 sm:$0xff]  }
 0x4fa   :  { %7535 = vmatprep.subr.bf16.mxu0 %v12341_v62  ;;  %v12392_v62 = vld [vmem:[%s16863_s5 + $0x944] ss:$16 sps:$4 sm:$0xff]  }
 0x4fc   :  { %6918 = vmatpush1.bf16.msra.mxu1 %v12336_v36  ;;  %v12393_v36 = vld [vmem:[%s16863_s5 + $0x948] ss:$16 sps:$4 sm:$0xff]  }
 0x4fd   :  { %7536 = vmatpush1.bf16.msra.mxu0 %v12339_v20  ;;  %6919 = vmatprep.subr.bf16.mxu1 %v12344_v29  ;;  %v12398_v20 = vld [vmem:[%s16863_s5 + $0x964] ss:$16 sps:$4 sm:$0xff]   ;;  %v12401_v29 = vld [vmem:[%s16863_s5 + $0x96c] ss:$16 sps:$4 sm:$0xff]  }
 0x4fe   :  { %6855 = vmatmul.mubr.bf16.gmra.mrb[100].mxu1 %v14995_v49  ;;  %7537 = vmatprep.subr.bf16.mxu0 %v12347_v14  ;;  %v12396_v14 = vld [vmem:[%s16863_s5 + $0x960] ss:$16 sps:$4 sm:$0xff]  }
 0x4ff   :  { %7473 = vmatmul.mubr.bf16.gmra.mrb[40].mxu0 %v14995_v49  ;;  %6864 = vmatprep.mubr.bf16.mxu1 %v15045_v37  ;;  %v12359_v49 = vld [vmem:[%s16863_s5 + $0x88c] ss:$16 sps:$4 sm:$0xff]  }
 0x500   :  { %6920 = vmatpush1.bf16.msra.mxu1 %v12342_v51  ;;  %7482 = vmatprep.mubr.bf16.mxu0 %v15045_v37  ;;  %v12354_v37 = vld [vmem:[%s16863_s5 + $0x880] ss:$16 sps:$4 sm:$0xff]   ;;  %v12399_v51 = vld [vmem:[%s16863_s5 + $0x968] ss:$16 sps:$4 sm:$0xff]  }
 0x501   :  { %7538 = vmatpush1.bf16.msra.mxu0 %v12345_v8  ;;  %6921 = vmatprep.subr.bf16.mxu1 %v12350_v22  ;;  %v12404_v8 = vld [vmem:[%s16863_s5 + $0x984] ss:$16 sps:$4 sm:$0xff]   ;;  %v12405_v22 = vld [vmem:[%s16863_s5 + $0x988] ss:$16 sps:$4 sm:$0xff]  }
 0x502   :  { %7539 = vmatprep.subr.bf16.mxu0 %v12353_v35  ;;  %v12410_v35 = vld [vmem:[%s16863_s5 + $0x9a4] ss:$16 sps:$4 sm:$0xff]  }
 0x504   :  { %6922 = vmatpush1.bf16.msra.mxu1 %v12348_v28  ;;  %v12413_v28 = vld [vmem:[%s16863_s5 + $0x9ac] ss:$16 sps:$4 sm:$0xff]  }
 0x505   :  { %7540 = vmatpush1.bf16.msra.mxu0 %v12351_v9  ;;  %6923 = vmatprep.subr.bf16.mxu1 %v12356_v2  ;;  %v12408_v9 = vld [vmem:[%s16863_s5 + $0x9a0] ss:$16 sps:$4 sm:$0xff]   ;;  %v12411_v2 = vld [vmem:[%s16863_s5 + $0x9a8] ss:$16 sps:$4 sm:$0xff]  }
 0x506   :  { %6865 = vmatmul.mubr.bf16.gmra.mrb[104].mxu1 %v15041_v40  ;;  %7541 = vmatprep.subr.bf16.mxu0 %v12359_v49  ;;  %v12416_v49 = vld [vmem:[%s16863_s5 + $0x9c4] ss:$16 sps:$4 sm:$0xff]  }
 0x507   :  { %7483 = vmatmul.mubr.bf16.gmra.mrb[44].mxu0 %v15041_v40  ;;  %6874 = vmatprep.mubr.bf16.mxu1 %v15079_v60  ;;  %v12371_v40 = vld [vmem:[%s16863_s5 + $0x8cc] ss:$16 sps:$4 sm:$0xff]  }
 0x508   :  { %6924 = vmatpush1.bf16.msra.mxu1 %v12354_v37  ;;  %7492 = vmatprep.mubr.bf16.mxu0 %v15079_v60  ;;  %v12366_v60 = vld [vmem:[%s16863_s5 + $0x8c0] ss:$16 sps:$4 sm:$0xff]   ;;  %v12417_v37 = vld [vmem:[%s16863_s5 + $0x9c8] ss:$16 sps:$4 sm:$0xff]  }
 0x509   :  { %7542 = vmatpush1.bf16.msra.mxu0 %v12357_v15  ;;  %6925 = vmatprep.subr.bf16.mxu1 %v12362_v12  ;;  %v12422_v15 = vld [vmem:[%s16863_s5 + $0x9e4] ss:$16 sps:$4 sm:$0xff]   ;;  %v12425_v12 = vld [vmem:[%s16863_s5 + $0x9ec] ss:$16 sps:$4 sm:$0xff]  }
 0x50a   :  { %7543 = vmatprep.subr.bf16.mxu0 %v12365_v11  ;;  %v12420_v11 = vld [vmem:[%s16863_s5 + $0x9e0] ss:$16 sps:$4 sm:$0xff]  }
 0x50c   :  { %6926 = vmatpush1.bf16.msra.mxu1 %v12360_v58  ;;  %v12423_v58 = vld [vmem:[%s16863_s5 + $0x9e8] ss:$16 sps:$4 sm:$0xff]  }
 0x50d   :  { %7544 = vmatpush1.bf16.msra.mxu0 %v12363_v59  ;;  %6927 = vmatprep.subr.bf16.mxu1 %v12368_v5  ;;  %v12428_v59 = vld [vmem:[%s16863_s5 + $0xa04] ss:$16 sps:$4 sm:$0xff]   ;;  %v12431_v5 = vld [vmem:[%s16863_s5 + $0xa0c] ss:$16 sps:$4 sm:$0xff]  }
 0x50e   :  { %6875 = vmatmul.mubr.bf16.gmra.mrb[108].mxu1 %v15077_v24  ;;  %7545 = vmatprep.subr.bf16.mxu0 %v12371_v40  ;;  %v12426_v40 = vld [vmem:[%s16863_s5 + $0xa00] ss:$16 sps:$4 sm:$0xff]  }
 0x50f   :  { %7493 = vmatmul.mubr.bf16.gmra.mrb[48].mxu0 %v15077_v24  ;;  %6884 = vmatprep.mubr.bf16.mxu1 %v15115_v26  ;;  %v12383_v24 = vld [vmem:[%s16863_s5 + $0x90c] ss:$16 sps:$4 sm:$0xff]  }
 0x510   :  { %6928 = vmatpush1.bf16.msra.mxu1 %v12366_v60  ;;  %7502 = vmatprep.mubr.bf16.mxu0 %v15115_v26  ;;  %v12378_v26 = vld [vmem:[%s16863_s5 + $0x900] ss:$16 sps:$4 sm:$0xff]   ;;  %v12429_v60 = vld [vmem:[%s16863_s5 + $0xa08] ss:$16 sps:$4 sm:$0xff]  }
 0x511   :  { %7546 = vmatpush1.bf16.msra.mxu0 %v12369_v33  ;;  %6929 = vmatprep.subr.bf16.mxu1 %v12374_v56  ;;  %v12434_v33 = vld [vmem:[%s16863_s5 + $0xa24] ss:$16 sps:$4 sm:$0xff]   ;;  %v12437_v56 = vld [vmem:[%s16863_s5 + $0xa2c] ss:$16 sps:$4 sm:$0xff]  }
 0x512   :  { %7547 = vmatprep.subr.bf16.mxu0 %v12377_v45  ;;  %v12432_v45 = vld [vmem:[%s16863_s5 + $0xa20] ss:$16 sps:$4 sm:$0xff]  }
 0x514   :  { %6930 = vmatpush1.bf16.msra.mxu1 %v12372_v10  ;;  %v12435_v10 = vld [vmem:[%s16863_s5 + $0xa28] ss:$16 sps:$4 sm:$0xff]  }
 0x515   :  { %7548 = vmatpush1.bf16.msra.mxu0 %v12375_v47  ;;  %6931 = vmatprep.subr.bf16.mxu1 %v12380_v17  ;;  %v12440_v47 = vld [vmem:[%s16863_s5 + $0xa44] ss:$16 sps:$4 sm:$0xff]   ;;  %v12441_v17 = vld [vmem:[%s16863_s5 + $0xa48] ss:$16 sps:$4 sm:$0xff]  }
 0x516   :  { %6885 = vmatmul.mubr.bf16.gmra.mrb[112].mxu1 %v15110_v27  ;;  %7549 = vmatprep.subr.bf16.mxu0 %v12383_v24  ;;  %v12446_v24 = vld [vmem:[%s16863_s5 + $0xa64] ss:$16 sps:$4 sm:$0xff]  }
 0x517   :  { %7503 = vmatmul.mubr.bf16.gmra.mrb[52].mxu0 %v15110_v27  ;;  %6894 = vmatprep.mubr.bf16.mxu1 %v15151_v13  ;;  %v12395_v27 = vld [vmem:[%s16863_s5 + $0x94c] ss:$16 sps:$4 sm:$0xff]  }
 0x518   :  { %6932 = vmatpush1.bf16.msra.mxu1 %v12378_v26  ;;  %7512 = vmatprep.mubr.bf16.mxu0 %v15151_v13  ;;  %v12390_v13 = vld [vmem:[%s16863_s5 + $0x940] ss:$16 sps:$4 sm:$0xff]   ;;  %v12449_v26 = vld [vmem:[%s16863_s5 + $0xa6c] ss:$16 sps:$4 sm:$0xff]  }
 0x519   :  { %7550 = vmatpush1.bf16.msra.mxu0 %v12381_v1  ;;  %6933 = vmatprep.subr.bf16.mxu1 %v12386_v21  ;;  %v12444_v1 = vld [vmem:[%s16863_s5 + $0xa60] ss:$16 sps:$4 sm:$0xff]   ;;  %v12447_v21 = vld [vmem:[%s16863_s5 + $0xa68] ss:$16 sps:$4 sm:$0xff]  }
 0x51a   :  { %7551 = vmatprep.subr.bf16.mxu0 %v12389_v19  ;;  %v12452_v19 = vld [vmem:[%s16863_s5 + $0xa84] ss:$16 sps:$4 sm:$0xff]  }
 0x51c   :  { %6934 = vmatpush1.bf16.msra.mxu1 %v12384_v42  ;;  %v12453_v42 = vld [vmem:[%s16863_s5 + $0xa88] ss:$16 sps:$4 sm:$0xff]  }
 0x51d   :  { %7552 = vmatpush1.bf16.msra.mxu0 %v12387_v6  ;;  %6935 = vmatprep.subr.bf16.mxu1 %v12392_v62  ;;  %v12458_v6 = vld [vmem:[%s16863_s5 + $0xaa4] ss:$16 sps:$4 sm:$0xff]   ;;  %v12461_v62 = vld [vmem:[%s16863_s5 + $0xaac] ss:$16 sps:$4 sm:$0xff]  }
 0x51e   :  { %6895 = vmatmul.mubr.bf16.gmra.mrb[116].mxu1 %v15146_v32  ;;  %7553 = vmatprep.subr.bf16.mxu0 %v12395_v27  ;;  %v12456_v27 = vld [vmem:[%s16863_s5 + $0xaa0] ss:$16 sps:$4 sm:$0xff]  }
 0x51f   :  { %7513 = vmatmul.mubr.bf16.gmra.mrb[56].mxu0 %v15146_v32  ;;  %6904 = vmatprep.mubr.bf16.mxu1 %v15187_v25  ;;  %v12407_v32 = vld [vmem:[%s16863_s5 + $0x98c] ss:$16 sps:$4 sm:$0xff]  }
 0x520   :  { %6936 = vmatpush1.bf16.msra.mxu1 %v12390_v13  ;;  %7522 = vmatprep.mubr.bf16.mxu0 %v15187_v25  ;;  %v12402_v25 = vld [vmem:[%s16863_s5 + $0x980] ss:$16 sps:$4 sm:$0xff]   ;;  %v12459_v13 = vld [vmem:[%s16863_s5 + $0xaa8] ss:$16 sps:$4 sm:$0xff]  }
 0x521   :  { %7554 = vmatpush1.bf16.msra.mxu0 %v12393_v36  ;;  %6937 = vmatprep.subr.bf16.mxu1 %v12398_v20  ;;  %v12464_v36 = vld [vmem:[%s16863_s5 + $0xac4] ss:$16 sps:$4 sm:$0xff]   ;;  %v12465_v20 = vld [vmem:[%s16863_s5 + $0xac8] ss:$16 sps:$4 sm:$0xff]  }
 0x522   :  { %7555 = vmatprep.subr.bf16.mxu0 %v12401_v29  ;;  %v12470_v29 = vld [vmem:[%s16863_s5 + $0xae4] ss:$16 sps:$4 sm:$0xff]  }
 0x524   :  { %6938 = vmatpush1.bf16.msra.mxu1 %v12396_v14  ;;  %v12473_v14 = vld [vmem:[%s16863_s5 + $0xaec] ss:$16 sps:$4 sm:$0xff]  }
 0x525   :  { %7556 = vmatpush1.bf16.msra.mxu0 %v12399_v51  ;;  %6939 = vmatprep.subr.bf16.mxu1 %v12404_v8  ;;  %v12468_v51 = vld [vmem:[%s16863_s5 + $0xae0] ss:$16 sps:$4 sm:$0xff]   ;;  %v12471_v8 = vld [vmem:[%s16863_s5 + $0xae8] ss:$16 sps:$4 sm:$0xff]  }
 0x526   :  { %6905 = vmatmul.mubr.bf16.gmra.mrb[120].mxu1 %v15182_v39  ;;  %7557 = vmatprep.subr.bf16.mxu0 %v12407_v32  ;;  %v12476_v32 = vld [vmem:[%s16863_s5 + $0xb04] ss:$16 sps:$4 sm:$0xff]  }
 0x527   :  { %7523 = vmatmul.mubr.bf16.gmra.mrb[60].mxu0 %v15182_v39  ;;  %6947 = vmatprep.mubr.bf16.mxu1 %v14805_v30  ;;  %v12419_v39 = vld [vmem:[%s16863_s5 + $0x9cc] ss:$16 sps:$4 sm:$0xff]  }
 0x528   :  { %6940 = vmatpush1.bf16.msra.mxu1 %v12402_v25  ;;  %7565 = vmatprep.mubr.bf16.mxu0 %v14805_v30  ;;  %v12414_v30 = vld [vmem:[%s16863_s5 + $0x9c0] ss:$16 sps:$4 sm:$0xff]   ;;  %v12477_v25 = vld [vmem:[%s16863_s5 + $0xb08] ss:$16 sps:$4 sm:$0xff]  }
 0x529   :  { %7558 = vmatpush1.bf16.msra.mxu0 %v12405_v22  ;;  %6941 = vmatprep.subr.bf16.mxu1 %v12410_v35  ;;  %v12482_v22 = vld [vmem:[%s16863_s5 + $0xb24] ss:$16 sps:$4 sm:$0xff]   ;;  %v12485_v35 = vld [vmem:[%s16863_s5 + $0xb2c] ss:$16 sps:$4 sm:$0xff]  }
 0x52a   :  { %7559 = vmatprep.subr.bf16.mxu0 %v12413_v28  ;;  %v12480_v28 = vld [vmem:[%s16863_s5 + $0xb20] ss:$16 sps:$4 sm:$0xff]  }
 0x52c   :  { %6942 = vmatpush1.bf16.msra.mxu1 %v12408_v9  ;;  %v12483_v9 = vld [vmem:[%s16863_s5 + $0xb28] ss:$16 sps:$4 sm:$0xff]  }
 0x52d   :  { %7560 = vmatpush1.bf16.msra.mxu0 %v12411_v2  ;;  %6943 = vmatprep.subr.bf16.mxu1 %v12416_v49  ;;  %v12488_v2 = vld [vmem:[%s16863_s5 + $0xb44] ss:$16 sps:$4 sm:$0xff]   ;;  %v12489_v49 = vld [vmem:[%s16863_s5 + $0xb48] ss:$16 sps:$4 sm:$0xff]  }
 0x52e   :  { %7561 = vmatprep.subr.bf16.mxu0 %v12419_v39  ;;  %v12494_v39 = vld [vmem:[%s16863_s5 + $0xb64] ss:$16 sps:$4 sm:$0xff]  }
 0x530   :  { %6944 = vmatpush1.bf16.msra.mxu1 %v12414_v30  ;;  %v12497_v30 = vld [vmem:[%s16863_s5 + $0xb6c] ss:$16 sps:$4 sm:$0xff]  }
 0x531   :  { %7562 = vmatpush1.bf16.msra.mxu0 %v12417_v37  ;;  %6945 = vmatprep.subr.bf16.mxu1 %v12422_v15  ;;  %v12492_v37 = vld [vmem:[%s16863_s5 + $0xb60] ss:$16 sps:$4 sm:$0xff]   ;;  %v12495_v15 = vld [vmem:[%s16863_s5 + $0xb68] ss:$16 sps:$4 sm:$0xff]  }
 0x532   :  { %7563 = vmatprep.subr.bf16.mxu0 %v12425_v12  ;;  %v12500_v12 = vld [vmem:[%s16863_s5 + $0xb84] ss:$16 sps:$4 sm:$0xff]  }
 0x534   :  { %6946 = vmatpush1.bf16.msra.mxu1 %v12420_v11  ;;  %v12501_v11 = vld [vmem:[%s16863_s5 + $0xb88] ss:$16 sps:$4 sm:$0xff]  }
 0x535   :  { %7564 = vmatpush1.bf16.msra.mxu0 %v12423_v58  ;;  %7018 = vmatprep.subr.bf16.mxu1 %v12428_v59  ;;  %v12506_v58 = vld [vmem:[%s16863_s5 + $0xba4] ss:$16 sps:$4 sm:$0xff]   ;;  %v12509_v59 = vld [vmem:[%s16863_s5 + $0xbac] ss:$16 sps:$4 sm:$0xff]  }
 0x536   :  { %7636 = vmatprep.subr.bf16.mxu0 %v12431_v5  ;;  %v12504_v5 = vld [vmem:[%s16863_s5 + $0xba0] ss:$16 sps:$4 sm:$0xff]  }
 0x537   :  { %6948 = vmatmul.mubr.bf16.vlgmr.msra.gmra.mrb[96].mxu1 %v14803_v44 }
 0x538   :  { %7566 = vmatmul.mubr.bf16.vlgmr.msra.gmra.mrb[36].mxu0 %v14803_v44  ;;  %6957 = vmatprep.mubr.bf16.mxu1 %v14841_v50  ;;  %v12443_v44 = vld [vmem:[%s16863_s5 + $0xa4c] ss:$16 sps:$4 sm:$0xff]  }
 0x539   :  { %7019 = vmatpush1.bf16.msra.mxu1 %v12426_v40  ;;  %7575 = vmatprep.mubr.bf16.mxu0 %v14841_v50  ;;  %v12438_v50 = vld [vmem:[%s16863_s5 + $0xa40] ss:$16 sps:$4 sm:$0xff]   ;;  %v12507_v40 = vld [vmem:[%s16863_s5 + $0xba8] ss:$16 sps:$4 sm:$0xff]  }
 0x53a   :  { %7637 = vmatpush1.bf16.msra.mxu0 %v12429_v60  ;;  %7020 = vmatprep.subr.bf16.mxu1 %v12434_v33  ;;  %v12512_v60 = vld [vmem:[%s16863_s5 + $0xbc4] ss:$16 sps:$4 sm:$0xff]   ;;  %v12513_v33 = vld [vmem:[%s16863_s5 + $0xbc8] ss:$16 sps:$4 sm:$0xff]  }
 0x53b   :  { %7638 = vmatprep.subr.bf16.mxu0 %v12437_v56  ;;  %v12518_v56 = vld [vmem:[%s16863_s5 + $0xbe4] ss:$16 sps:$4 sm:$0xff]  }
 0x53d   :  { %7021 = vmatpush1.bf16.msra.mxu1 %v12432_v45  ;;  %v12521_v45 = vld [vmem:[%s16863_s5 + $0xbec] ss:$16 sps:$4 sm:$0xff]  }
 0x53e   :  { %7639 = vmatpush1.bf16.msra.mxu0 %v12435_v10  ;;  %7022 = vmatprep.subr.bf16.mxu1 %v12440_v47  ;;  %v12516_v10 = vld [vmem:[%s16863_s5 + $0xbe0] ss:$16 sps:$4 sm:$0xff]   ;;  %v12519_v47 = vld [vmem:[%s16863_s5 + $0xbe8] ss:$16 sps:$4 sm:$0xff]  }
 0x53f   :  { %6958 = vmatmul.mubr.bf16.gmra.mrb[100].mxu1 %v14839_v31  ;;  %7640 = vmatprep.subr.bf16.mxu0 %v12443_v44  ;;  %v16893_v44 = vld [vmem:[#allocation3_spill] sm:$0xff] }
 0x540   :  { %7576 = vmatmul.mubr.bf16.gmra.mrb[40].mxu0 %v14839_v31  ;;  %6967 = vmatprep.mubr.bf16.mxu1 %v14877_v52  ;;  %v12455_v31 = vld [vmem:[%s16863_s5 + $0xa8c] ss:$16 sps:$4 sm:$0xff]  }
 0x541   :  { %7023 = vmatpush1.bf16.msra.mxu1 %v12438_v50  ;;  %7585 = vmatprep.mubr.bf16.mxu0 %v14877_v52  ;;  %v12450_v52 = vld [vmem:[%s16863_s5 + $0xa80] ss:$16 sps:$4 sm:$0xff]   ;;  %v16894_v50 = vld [vmem:[#allocation5_spill] sm:$0xff] }
 0x542   :  { %7641 = vmatpush1.bf16.msra.mxu0 %v12441_v17  ;;  %7024 = vmatprep.subr.bf16.mxu1 %v12446_v24  ;;  %v16895_v17 = vld [vmem:[#allocation4_spill] sm:$0xff]  ;;  %v16896_v24 = vld [vmem:[#allocation6_spill] sm:$0xff] }
 0x543   :  { %7642 = vmatprep.subr.bf16.mxu0 %v12449_v26  ;;  %v16898_v26 = vld [vmem:[#allocation2_spill] sm:$0xff] }
 0x545   :  { %7025 = vmatpush1.bf16.msra.mxu1 %v12444_v1  ;;  %v16899_v1 = vsub.s32 0, %v16898_v26 }
 0x546   :  { %7643 = vmatpush1.bf16.msra.mxu0 %v12447_v21  ;;  %7026 = vmatprep.subr.bf16.mxu1 %v12452_v19 }
 0x547   :  { %6968 = vmatmul.mubr.bf16.gmra.mrb[104].mxu1 %v14875_v23  ;;  %7644 = vmatprep.subr.bf16.mxu0 %v12455_v31  ;;  %v16900_v31 = vsub.s32 2, %v16898_v26 }
 0x548   :  { %7586 = vmatmul.mubr.bf16.gmra.mrb[44].mxu0 %v14875_v23  ;;  %6977 = vmatprep.mubr.bf16.mxu1 %v14913_v41  ;;  %v12467_v23 = vld [vmem:[%s16863_s5 + $0xacc] ss:$16 sps:$4 sm:$0xff]  }
 0x549   :  { %7027 = vmatpush1.bf16.msra.mxu1 %v12450_v52  ;;  %7595 = vmatprep.mubr.bf16.mxu0 %v14913_v41  ;;  %v12462_v41 = vld [vmem:[%s16863_s5 + $0xac0] ss:$16 sps:$4 sm:$0xff]  }
 0x54a   :  { %7645 = vmatpush1.bf16.msra.mxu0 %v12453_v42  ;;  %7028 = vmatprep.subr.bf16.mxu1 %v12458_v6  ;;  %v16901_v42 = vsub.s32 1, %v16898_v26 }
 0x54b   :  { %7646 = vmatprep.subr.bf16.mxu0 %v12461_v62 }
 0x54d   :  { %7029 = vmatpush1.bf16.msra.mxu1 %v12456_v27 }
 0x54e   :  { %7647 = vmatpush1.bf16.msra.mxu0 %v12459_v13  ;;  %7030 = vmatprep.subr.bf16.mxu1 %v12464_v36  ;;  %v16902_v13 = vsub.s32 3, %v16898_v26  ;;  %v12552_v26 = vld [vmem:[%s16865_s8 + $0x84] ss:$8 sps:$4 sm:$0xff]  }
 0x54f   :  { %6978 = vmatmul.mubr.bf16.gmra.mrb[108].mxu1 %v14911_v43  ;;  %7648 = vmatprep.subr.bf16.mxu0 %v12467_v23  ;;  %v12535_v23 = vld [vmem:[%s16865_s8 + $0x30] ss:$8 sps:$4 sm:$0xff]  }
 0x550   :  { %7596 = vmatmul.mubr.bf16.gmra.mrb[48].mxu0 %v14911_v43  ;;  %6987 = vmatprep.mubr.bf16.mxu1 %v14957_v53  ;;  %v12479_v43 = vld [vmem:[%s16863_s5 + $0xb0c] ss:$16 sps:$4 sm:$0xff]  }
 0x551   :  { %7031 = vmatpush1.bf16.msra.mxu1 %v12462_v41  ;;  %7605 = vmatprep.mubr.bf16.mxu0 %v14957_v53  ;;  %v12474_v53 = vld [vmem:[%s16863_s5 + $0xb00] ss:$16 sps:$4 sm:$0xff]  }
 0x552   :  { %7649 = vmatpush1.bf16.msra.mxu0 %v12465_v20  ;;  %7032 = vmatprep.subr.bf16.mxu1 %v12470_v29  ;;  %v12540_v29 = vld [vmem:[%s16865_s8 + $0x44] ss:$8 sps:$4 sm:$0xff]  }
 0x553   :  { %7650 = vmatprep.subr.bf16.mxu0 %v12473_v14 }
 0x555   :  { %7033 = vmatpush1.bf16.msra.mxu1 %v12468_v51 }
 0x556   :  { %7651 = vmatpush1.bf16.msra.mxu0 %v12471_v8  ;;  %7034 = vmatprep.subr.bf16.mxu1 %v12476_v32 }
 0x557   :  { %6988 = vmatmul.mubr.bf16.gmra.mrb[112].mxu1 %v14953_v55  ;;  %7652 = vmatprep.subr.bf16.mxu0 %v12479_v43 }
 0x558   :  { %7606 = vmatmul.mubr.bf16.gmra.mrb[52].mxu0 %v14953_v55  ;;  %6997 = vmatprep.mubr.bf16.mxu1 %v15001_v0  ;;  %v12491_v55 = vld [vmem:[%s16863_s5 + $0xb4c] ss:$16 sps:$4 sm:$0xff]  }
 0x559   :  { %7035 = vmatpush1.bf16.msra.mxu1 %v12474_v53  ;;  %7615 = vmatprep.mubr.bf16.mxu0 %v15001_v0  ;;  %v12486_v0 = vld [vmem:[%s16863_s5 + $0xb40] ss:$16 sps:$4 sm:$0xff]  }
 0x55a   :  { %7653 = vmatpush1.bf16.msra.mxu0 %v12477_v25  ;;  %7036 = vmatprep.subr.bf16.mxu1 %v12482_v22 }
 0x55b   :  { %7654 = vmatprep.subr.bf16.mxu0 %v12485_v35 }
 0x55d   :  { %7037 = vmatpush1.bf16.msra.mxu1 %v12480_v28 }
 0x55e   :  { %7655 = vmatpush1.bf16.msra.mxu0 %v12483_v9  ;;  %7038 = vmatprep.subr.bf16.mxu1 %v12488_v2 }
 0x55f   :  { %6998 = vmatmul.mubr.bf16.gmra.mrb[116].mxu1 %v14997_v16  ;;  %7656 = vmatprep.subr.bf16.mxu0 %v12491_v55  ;;  %v12538_v55 = vld [vmem:[%s16865_s8 + $0x40] ss:$8 sps:$4 sm:$0xff]  }
 0x560   :  { %7616 = vmatmul.mubr.bf16.gmra.mrb[56].mxu0 %v14997_v16  ;;  %7007 = vmatprep.mubr.bf16.mxu1 %v15047_v54  ;;  %v12503_v16 = vld [vmem:[%s16863_s5 + $0xb8c] ss:$16 sps:$4 sm:$0xff]  }
 0x561   :  { %7039 = vmatpush1.bf16.msra.mxu1 %v12486_v0  ;;  %7625 = vmatprep.mubr.bf16.mxu0 %v15047_v54  ;;  %v12498_v54 = vld [vmem:[%s16863_s5 + $0xb80] ss:$16 sps:$4 sm:$0xff]  }
 0x562   :  { %7657 = vmatpush1.bf16.msra.mxu0 %v12489_v49  ;;  %7040 = vmatprep.subr.bf16.mxu1 %v12494_v39  ;;  %v12543_v39 = vld [vmem:[%s16865_s8 + $0x54] ss:$8 sps:$4 sm:$0xff]  }
 0x563   :  { %7658 = vmatprep.subr.bf16.mxu0 %v12497_v30 }
 0x565   :  { %7041 = vmatpush1.bf16.msra.mxu1 %v12492_v37 }
 0x566   :  { %7659 = vmatpush1.bf16.msra.mxu0 %v12495_v15  ;;  %7042 = vmatprep.subr.bf16.mxu1 %v12500_v12  ;;  %v12541_v15 = vld [vmem:[%s16865_s8 + $0x50] ss:$8 sps:$4 sm:$0xff]  }
 0x567   :  { %7008 = vmatmul.mubr.bf16.gmra.mrb[120].mxu1 %v15043_v38  ;;  %7660 = vmatprep.subr.bf16.mxu0 %v12503_v16 }
 0x568   :  { %7626 = vmatmul.mubr.bf16.gmra.mrb[60].mxu0 %v15043_v38  ;;  %7050 = vmatprep.mubr.bf16.mxu1 %v14967_v61  ;;  %v12515_v38 = vld [vmem:[%s16863_s5 + $0xbcc] ss:$16 sps:$4 sm:$0xff]  }
 0x569   :  { %7043 = vmatpush1.bf16.msra.mxu1 %v12498_v54  ;;  %7668 = vmatprep.mubr.bf16.mxu0 %v14967_v61  ;;  %v12510_v61 = vld [vmem:[%s16863_s5 + $0xbc0] ss:$16 sps:$4 sm:$0xff]   ;;  %v12546_v54 = vld [vmem:[%s16865_s8 + $0x64] ss:$8 sps:$4 sm:$0xff]  }
 0x56a   :  { %7661 = vmatpush1.bf16.msra.mxu0 %v12501_v11  ;;  %7044 = vmatprep.subr.bf16.mxu1 %v12506_v58 }
 0x56b   :  { %7662 = vmatprep.subr.bf16.mxu0 %v12509_v59 }
 0x56d   :  { %7045 = vmatpush1.bf16.msra.mxu1 %v12504_v5 }
 0x56e   :  { %7663 = vmatpush1.bf16.msra.mxu0 %v12507_v40  ;;  %7046 = vmatprep.subr.bf16.mxu1 %v12512_v60 }
 0x56f   :  { %7664 = vmatprep.subr.bf16.mxu0 %v12515_v38  ;;  %v12544_v38 = vld [vmem:[%s16865_s8 + $0x60] ss:$8 sps:$4 sm:$0xff]  }
 0x571   :  { %7047 = vmatpush1.bf16.msra.mxu1 %v12510_v61 }
 0x572   :  { %7665 = vmatpush1.bf16.msra.mxu0 %v12513_v33  ;;  %7048 = vmatprep.subr.bf16.mxu1 %v12518_v56 }
 0x573   :  { %7666 = vmatprep.subr.bf16.mxu0 %v12521_v45 }
 0x575   :  { %7049 = vmatpush1.bf16.msra.mxu1 %v12516_v10 }
 0x576   :  { %7667 = vmatpush1.bf16.msra.mxu0 %v12519_v47  ;;  %v12549_v47 = vld [vmem:[%s16865_s8 + $0x74] ss:$8 sps:$4 sm:$0xff]  }
 0x578   :  { %7051 = vmatmul.mubr.bf16.vlgmr.msra.gmra.mrb[96].mxu1 %v16893_v44 }
 0x579   :  { %7669 = vmatmul.mubr.bf16.vlgmr.msra.gmra.mrb[36].mxu0 %v16893_v44  ;;  %7060 = vmatprep.mubr.bf16.mxu1 %v16894_v50 }
 0x57a   :  { %7678 = vmatprep.mubr.bf16.mxu0 %v16894_v50 }
 0x580   :  { %7061 = vmatmul.mubr.bf16.gmra.mrb[100].mxu1 %v16895_v17 }
 0x581   :  { %7679 = vmatmul.mubr.bf16.gmra.mrb[40].mxu0 %v16895_v17  ;;  %7070 = vmatprep.mubr.bf16.mxu1 %v16896_v24 }
 0x582   :  { %7688 = vmatprep.mubr.bf16.mxu0 %v16896_v24 }
 0x588   :  { %7071 = vmatmul.mubr.bf16.gmra.mrb[104].mxu1 %v15049_v48 }
 0x589   :  { %7689 = vmatmul.mubr.bf16.gmra.mrb[44].mxu0 %v15049_v48  ;;  %7080 = vmatprep.mubr.bf16.mxu1 %v15086_v7  ;;  %v16897_v48 = vmov 0  }
 0x58a   :  { %7698 = vmatprep.mubr.bf16.mxu0 %v15086_v7  ;;  %v12528_v7 = vld [vmem:[%s16865_s8 + $0x4] ss:$8 sps:$4 sm:$0xff]  }
 0x58b   :  { %8312 = vmatprep.subr.bf16.mxu0 %v12528_v7 }
 0x590   :  { %7081 = vmatmul.mubr.bf16.gmra.mrb[108].mxu1 %v15081_v46 }
 0x591   :  { %7699 = vmatmul.mubr.bf16.gmra.mrb[48].mxu0 %v15081_v46  ;;  %7090 = vmatprep.mubr.bf16.mxu1 %v15122_v18  ;;  %v12526_v46 = vld [vmem:[%s16865_s8] ss:$8 sps:$4 sm:$0xff]  }
 0x592   :  { %7708 = vmatprep.mubr.bf16.mxu0 %v15122_v18  ;;  %8313 = vmatpush1.bf16.msra.mxu0 %v12526_v46  ;;  %v4561_v18 = vld [vmem:[%s16866_s6] sm:$0xf] }
 0x593   :  { %v16036_v21 = vrot.slane %v4561_v18, %v16899_v1  ;;  %v16040_v52 = vrot.slane %v4561_v18, %v16900_v31  ;;  %v16044_v6 = vrot.slane %v4561_v18, %v16901_v42  ;;  %v16048_v36 = vrot.slane %v4561_v18, %v16902_v13 }
 0x598   :  { %7091 = vmatmul.mubr.bf16.gmra.mrb[112].mxu1 %v15117_v4 }
 0x599   :  { %7709 = vmatmul.mubr.bf16.gmra.mrb[52].mxu0 %v15117_v4  ;;  %7100 = vmatprep.mubr.bf16.mxu1 %v15158_v63  ;;  %v12534_v4 = vld [vmem:[%s16865_s8 + $0x24] ss:$8 sps:$4 sm:$0xff]  }
 0x59a   :  { %7718 = vmatprep.mubr.bf16.mxu0 %v15158_v63  ;;  %v12532_v63 = vld [vmem:[%s16865_s8 + $0x20] ss:$8 sps:$4 sm:$0xff]  }
 0x5a0   :  { %7101 = vmatmul.mubr.bf16.gmra.mrb[116].mxu1 %v15153_v57 }
 0x5a1   :  { %7719 = vmatmul.mubr.bf16.gmra.mrb[56].mxu0 %v15153_v57  ;;  %7110 = vmatprep.mubr.bf16.mxu1 %v15194_v3  ;;  %v12531_v57 = vld [vmem:[%s16865_s8 + $0x14] ss:$8 sps:$4 sm:$0xff]  }
 0x5a2   :  { %7728 = vmatprep.mubr.bf16.mxu0 %v15194_v3  ;;  %8314 = vmatprep.subr.bf16.mxu0 %v12531_v57  ;;  %v12537_v3 = vld [vmem:[%s16865_s8 + $0x34] ss:$8 sps:$4 sm:$0xff]   ;;  %v12547_v57 = vld [vmem:[%s16865_s8 + $0x70] ss:$8 sps:$4 sm:$0xff]  }
 0x5a8   :  { %7111 = vmatmul.mubr.bf16.gmra.mrb[120].mxu1 %v15189_v34 }
 0x5a9   :  { %7729 = vmatmul.mubr.bf16.gmra.mrb[60].mxu0 %v15189_v34  ;;  %7837 = vmatprep.mubr.bf16.mxu1 %v16897_v48  ;;  %v12529_v34 = vld [vmem:[%s16865_s8 + $0x10] ss:$8 sps:$4 sm:$0xff]  }
 0x5aa   :  { %8315 = vmatpush1.bf16.msra.mxu0 %v12529_v34 }
 0x5ab   :  { %8316 = vmatprep.subr.bf16.mxu0 %v12534_v4 }
 0x5ae   :  { %8317 = vmatpush1.bf16.msra.mxu0 %v12532_v63 }
 0x5af   :  { %8318 = vmatprep.subr.bf16.mxu0 %v12537_v3 }
 0x5b2   :  { %8319 = vmatpush1.bf16.msra.mxu0 %v12535_v23 }
 0x5b3   :  { %8320 = vmatprep.subr.bf16.mxu0 %v12540_v29 }
 0x5b6   :  { %8321 = vmatpush1.bf16.msra.mxu0 %v12538_v55 }
 0x5b7   :  { %8322 = vmatprep.subr.bf16.mxu0 %v12543_v39 }
 0x5ba   :  { %8323 = vmatpush1.bf16.msra.mxu0 %v12541_v15  ;;  %v12558_v15 = vld [vmem:[%s16865_s8 + $0xa4] ss:$8 sps:$4 sm:$0xff]  }
 0x5bb   :  { %8324 = vmatprep.subr.bf16.mxu0 %v12546_v54 }
 0x5be   :  { %8325 = vmatpush1.bf16.msra.mxu0 %v12544_v38 }
 0x5bf   :  { %8326 = vmatprep.subr.bf16.mxu0 %v12549_v47 }
 0x5c2   :  { %8327 = vmatpush1.bf16.msra.mxu0 %v12547_v57 }
 0x5c3   :  { %8328 = vmatprep.subr.bf16.mxu0 %v12552_v26 }
 0x64b   :  { %v7052_v19 = vpop.f32.mrb[96].mxu1 }
 0x64c   :  { %v7670_v62 = vpop.f32.mrb[36].mxu0  ;;  %v7054_v27 = vpop.f32.mrb[97].mxu1  ;;  %v10938_v14 = vadd.f32 %v7052_v19, %v16036_v21 }
 0x64d   :  { %v7672_v41 = vpop.f32.mrb[37].mxu0  ;;  %v7056_v20 = vpop.f32.mrb[98].mxu1  ;;  %v16059_v43 = vadd.f32 %v7670_v62, %v16040_v52  ;;  %v10939_v53 = vadd.f32 %v7054_v27, %v16044_v6 }
 0x64e   :  { %v10940_v51 = vadd.f32 %v7056_v20, %v16036_v21  ;;  %v7674_v8 = vpop.f32.mrb[38].mxu0  ;;  %v7058_v32 = vpop.f32.mrb[99].mxu1  ;;  %v16067_v28 = vadd.f32 %v7672_v41, %v16048_v36 }
 0x64f   :  { %v16063_v25 = vadd.f32 %v7674_v8, %v16040_v52  ;;  %v10941_v22 = vadd.f32 %v7058_v32, %v16044_v6  ;;  %v7676_v35 = vpop.f32.mrb[39].mxu0 }
 0x650   :  { %v7739_v9 = vpack.c.bf16 %v10940_v51, %v10938_v14  ;;  %v16070_v2 = vadd.f32 %v7676_v35, %v16048_v36  ;;  %v12550_v51 = vld [vmem:[%s16865_s8 + $0x80] ss:$8 sps:$4 sm:$0xff]  }
 0x651   :  { %v7741_v0 = vpack.c.bf16 %v16063_v25, %v16059_v43  ;;  %v7740_v49 = vpack.c.bf16 %v10941_v22, %v10939_v53  ;;  %v12555_v53 = vld [vmem:[%s16865_s8 + $0x94] ss:$8 sps:$4 sm:$0xff]   ;;  %8329 = vmatpush1.bf16.msra.mxu0 %v12550_v51  ;;  %v12571_v25 = vld [vmem:[%s16865_s8 + $0xf0] ss:$8 sps:$4 sm:$0xff]  }
 0x652   :  { %v7742_v30 = vpack.c.bf16 %v16070_v2, %v16067_v28  ;;  %8330 = vmatprep.subr.bf16.mxu0 %v12555_v53  ;;  %v12573_v43 = vld [vmem:[%s16865_s8 + $0xf4] ss:$8 sps:$4 sm:$0xff]   ;;  %v12576_v28 = vld [vmem:[%s16865_s8 + $0x104] ss:$8 sps:$4 sm:$0xff]  }
 0x653   :  { %v7062_v37 = vpop.f32.mrb[100].mxu1  ;;  %7805 = vmatprep.subr.bf16.mxu1 %v7740_v49  ;;  %v12553_v49 = vld [vmem:[%s16865_s8 + $0x90] ss:$8 sps:$4 sm:$0xff]   ;;  %v12610_v2 = vld [vmem:[%s16867_s9] sm:$0xff]  }
 0x654   :  { %v7680_v12 = vpop.f32.mrb[40].mxu0  ;;  %v7064_v16 = vpop.f32.mrb[101].mxu1  ;;  %7806 = vmatpush1.bf16.msra.mxu1 %v7739_v9  ;;  %v10942_v59 = vadd.f32 %v7062_v37, %v16036_v21 }
 0x655   :  { %v7682_v11 = vpop.f32.mrb[41].mxu0  ;;  %v7066_v58 = vpop.f32.mrb[102].mxu1  ;;  %v16094_v61 = vadd.f32 %v7680_v12, %v16040_v52  ;;  %v10943_v33 = vadd.f32 %v7064_v16, %v16044_v6  ;;  %8331 = vmatpush1.bf16.msra.mxu0 %v12553_v49 }
 0x656   :  { %v10944_v5 = vadd.f32 %v7066_v58, %v16036_v21  ;;  %v7684_v40 = vpop.f32.mrb[42].mxu0  ;;  %v7068_v60 = vpop.f32.mrb[103].mxu1  ;;  %v16105_v44 = vadd.f32 %v7682_v11, %v16048_v36  ;;  %8332 = vmatprep.subr.bf16.mxu0 %v12558_v15 }
 0x657   :  { %v16098_v56 = vadd.f32 %v7684_v40, %v16040_v52  ;;  %v10945_v45 = vadd.f32 %v7068_v60, %v16044_v6  ;;  %v7686_v10 = vpop.f32.mrb[43].mxu0 }
 0x658   :  { %v7743_v50 = vpack.c.bf16 %v10944_v5, %v10942_v59  ;;  %v16108_v17 = vadd.f32 %v7686_v10, %v16048_v36  ;;  %v12556_v10 = vld [vmem:[%s16865_s8 + $0xa0] ss:$8 sps:$4 sm:$0xff]  }
 0x659   :  { %v7745_v24 = vpack.c.bf16 %v16098_v56, %v16094_v61  ;;  %v7744_v46 = vpack.c.bf16 %v10945_v45, %v10943_v33  ;;  %8333 = vmatpush1.bf16.msra.mxu0 %v12556_v10  ;;  %v12613_v61 = vld [vmem:[%s16867_s9 + $0x18] sm:$0xff]   ;;  %v12614_v56 = vld [vmem:[%s16867_s9 + $0x20] sm:$0xff]  }
 0x65a   :  { %v7746_v7 = vpack.c.bf16 %v16108_v17, %v16105_v44  ;;  %v12615_v44 = vld [vmem:[%s16867_s9 + $0x28] sm:$0xff]   ;;  %v12616_v17 = vld [vmem:[%s16867_s9 + $0x30] sm:$0xff]  }
 0x65b   :  { %v7072_v34 = vpop.f32.mrb[104].mxu1  ;;  %7807 = vmatprep.subr.bf16.mxu1 %v7744_v46  ;;  %v12561_v46 = vld [vmem:[%s16865_s8 + $0xb4] ss:$8 sps:$4 sm:$0xff]  }
 0x65c   :  { %v7690_v4 = vpop.f32.mrb[44].mxu0  ;;  %v7074_v18 = vpop.f32.mrb[105].mxu1  ;;  %7808 = vmatpush1.bf16.msra.mxu1 %v7743_v50  ;;  %v10946_v1 = vadd.f32 %v7072_v34, %v16036_v21  ;;  %8334 = vmatprep.subr.bf16.mxu0 %v12561_v46 }
 0x65d   :  { %v7692_v63 = vpop.f32.mrb[45].mxu0  ;;  %v7076_v3 = vpop.f32.mrb[106].mxu1  ;;  %v16123_v62 = vadd.f32 %v7690_v4, %v16040_v52  ;;  %v10947_v27 = vadd.f32 %v7074_v18, %v16044_v6 }
 0x65e   :  { %v10948_v19 = vadd.f32 %v7076_v3, %v16036_v21  ;;  %v7694_v31 = vpop.f32.mrb[46].mxu0  ;;  %v7078_v42 = vpop.f32.mrb[107].mxu1  ;;  %v16131_v20 = vadd.f32 %v7692_v63, %v16048_v36  ;;  %v12559_v63 = vld [vmem:[%s16865_s8 + $0xb0] ss:$8 sps:$4 sm:$0xff]  }
 0x65f   :  { %v16127_v13 = vadd.f32 %v7694_v31, %v16040_v52  ;;  %v10949_v23 = vadd.f32 %v7078_v42, %v16044_v6  ;;  %v7696_v41 = vpop.f32.mrb[47].mxu0  ;;  %8335 = vmatpush1.bf16.msra.mxu0 %v12559_v63 }
 0x660   :  { %v7747_v29 = vpack.c.bf16 %v10948_v19, %v10946_v1  ;;  %v16134_v14 = vadd.f32 %v7696_v41, %v16048_v36  ;;  %v12564_v1 = vld [vmem:[%s16865_s8 + $0xc4] ss:$8 sps:$4 sm:$0xff]  }
 0x661   :  { %v7749_v8 = vpack.c.bf16 %v16127_v13, %v16123_v62  ;;  %v7748_v32 = vpack.c.bf16 %v10949_v23, %v10947_v27  ;;  %8336 = vmatprep.subr.bf16.mxu0 %v12564_v1  ;;  %v12619_v62 = vld [vmem:[%s16867_s9 + $0x48] sm:$0xff]   ;;  %v12620_v13 = vld [vmem:[%s16867_s9 + $0x50] sm:$0xff]  }
 0x662   :  { %v7750_v22 = vpack.c.bf16 %v16134_v14, %v16131_v20  ;;  %v12621_v20 = vld [vmem:[%s16867_s9 + $0x58] sm:$0xff]   ;;  %v12622_v14 = vld [vmem:[%s16867_s9 + $0x60] sm:$0xff]  }
 0x663   :  { %v7082_v35 = vpop.f32.mrb[108].mxu1  ;;  %7809 = vmatprep.subr.bf16.mxu1 %v7748_v32 }
 0x664   :  { %v7700_v9 = vpop.f32.mrb[48].mxu0  ;;  %v7084_v55 = vpop.f32.mrb[109].mxu1  ;;  %7810 = vmatpush1.bf16.msra.mxu1 %v7747_v29  ;;  %v10950_v12 = vadd.f32 %v7082_v35, %v16036_v21 }
 0x665   :  { %v7702_v39 = vpop.f32.mrb[49].mxu0  ;;  %v7086_v37 = vpop.f32.mrb[110].mxu1  ;;  %v16155_v58 = vadd.f32 %v7700_v9, %v16040_v52  ;;  %v10951_v59 = vadd.f32 %v7084_v55, %v16044_v6  ;;  %v12562_v55 = vld [vmem:[%s16865_s8 + $0xc0] ss:$8 sps:$4 sm:$0xff]  }
 0x666   :  { %v10952_v16 = vadd.f32 %v7086_v37, %v16036_v21  ;;  %v7704_v54 = vpop.f32.mrb[50].mxu0  ;;  %v7088_v11 = vpop.f32.mrb[111].mxu1  ;;  %v16163_v38 = vadd.f32 %v7702_v39, %v16048_v36  ;;  %v12567_v37 = vld [vmem:[%s16865_s8 + $0xd4] ss:$8 sps:$4 sm:$0xff]   ;;  %8337 = vmatpush1.bf16.msra.mxu0 %v12562_v55 }
 0x667   :  { %v16159_v5 = vadd.f32 %v7704_v54, %v16040_v52  ;;  %v10953_v40 = vadd.f32 %v7088_v11, %v16044_v6  ;;  %v7706_v60 = vpop.f32.mrb[51].mxu0  ;;  %v12565_v11 = vld [vmem:[%s16865_s8 + $0xd0] ss:$8 sps:$4 sm:$0xff]   ;;  %8338 = vmatprep.subr.bf16.mxu0 %v12567_v37 }
 0x668   :  { %v7751_v33 = vpack.c.bf16 %v10952_v16, %v10950_v12  ;;  %v16166_v45 = vadd.f32 %v7706_v60, %v16048_v36  ;;  %v12570_v60 = vld [vmem:[%s16865_s8 + $0xe4] ss:$8 sps:$4 sm:$0xff]  }
 0x669   :  { %v7753_v47 = vpack.c.bf16 %v16159_v5, %v16155_v58  ;;  %v7752_v50 = vpack.c.bf16 %v10953_v40, %v10951_v59  ;;  %v12574_v5 = vld [vmem:[%s16865_s8 + $0x100] ss:$8 sps:$4 sm:$0xff]  }
 0x66a   :  { %v7754_v57 = vpack.c.bf16 %v16166_v45, %v16163_v38  ;;  %8339 = vmatpush1.bf16.msra.mxu0 %v12565_v11 }
 0x66b   :  { %v7092_v34 = vpop.f32.mrb[112].mxu1  ;;  %7811 = vmatprep.subr.bf16.mxu1 %v7752_v50  ;;  %8340 = vmatprep.subr.bf16.mxu0 %v12570_v60 }
 0x66c   :  { %v7710_v4 = vpop.f32.mrb[52].mxu0  ;;  %v7094_v18 = vpop.f32.mrb[113].mxu1  ;;  %7812 = vmatpush1.bf16.msra.mxu1 %v7751_v33  ;;  %v10954_v19 = vadd.f32 %v7092_v34, %v16036_v21 }
 0x66d   :  { %v7712_v3 = vpop.f32.mrb[53].mxu0  ;;  %v7096_v26 = vpop.f32.mrb[114].mxu1  ;;  %v16187_v23 = vadd.f32 %v7710_v4, %v16040_v52  ;;  %v10955_v41 = vadd.f32 %v7094_v18, %v16044_v6 }
 0x66e   :  { %v10956_v31 = vadd.f32 %v7096_v26, %v16036_v21  ;;  %v7714_v42 = vpop.f32.mrb[54].mxu0  ;;  %v7098_v27 = vpop.f32.mrb[115].mxu1  ;;  %v16195_v53 = vadd.f32 %v7712_v3, %v16048_v36 }
 0x66f   :  { %v16191_v29 = vadd.f32 %v7714_v42, %v16040_v52  ;;  %v10957_v51 = vadd.f32 %v7098_v27, %v16044_v6  ;;  %v7716_v32 = vpop.f32.mrb[55].mxu0 }
 0x670   :  { %v7755_v35 = vpack.c.bf16 %v10956_v31, %v10954_v19  ;;  %v16198_v9 = vadd.f32 %v7716_v32, %v16048_v36  ;;  %v12568_v31 = vld [vmem:[%s16865_s8 + $0xe0] ss:$8 sps:$4 sm:$0xff]  }
 0x671   :  { %v7757_v49 = vpack.c.bf16 %v16191_v29, %v16187_v23  ;;  %v7756_v39 = vpack.c.bf16 %v10957_v51, %v10955_v41  ;;  %8341 = vmatpush1.bf16.msra.mxu0 %v12568_v31  ;;  %v12577_v23 = vld [vmem:[%s16865_s8 + $0x110] ss:$8 sps:$4 sm:$0xff]   ;;  %v12582_v29 = vld [vmem:[%s16865_s8 + $0x124] ss:$8 sps:$4 sm:$0xff]  }
 0x672   :  { %v7758_v15 = vpack.c.bf16 %v16198_v9, %v16195_v53  ;;  %8342 = vmatprep.subr.bf16.mxu0 %v12573_v43  ;;  %v12588_v31 = vld [vmem:[%s16865_s8 + $0x144] ss:$8 sps:$4 sm:$0xff]   ;;  %v12603_v43 = vld [vmem:[%s16865_s8 + $0x194] ss:$8 sps:$4 sm:$0xff]  }
 0x673   :  { %v7102_v12 = vpop.f32.mrb[116].mxu1  ;;  %7813 = vmatprep.subr.bf16.mxu1 %v7756_v39 }
 0x674   :  { %v7720_v16 = vpop.f32.mrb[56].mxu0  ;;  %v7104_v54 = vpop.f32.mrb[117].mxu1  ;;  %7814 = vmatpush1.bf16.msra.mxu1 %v7755_v35  ;;  %v10958_v33 = vadd.f32 %v7102_v12, %v16036_v21 }
 0x675   :  { %v7722_v59 = vpop.f32.mrb[57].mxu0  ;;  %v7106_v40 = vpop.f32.mrb[118].mxu1  ;;  %v10986_v34 = vadd.f32 %v7720_v16, %v16040_v52  ;;  %v10959_v4 = vadd.f32 %v7104_v54, %v16044_v6  ;;  %8343 = vmatpush1.bf16.msra.mxu0 %v12571_v25  ;;  %v12601_v25 = vld [vmem:[%s16865_s8 + $0x190] ss:$8 sps:$4 sm:$0xff]  }
 0x676   :  { %v10960_v10 = vadd.f32 %v7106_v40, %v16036_v21  ;;  %v7724_v50 = vpop.f32.mrb[58].mxu0  ;;  %v7108_v46 = vpop.f32.mrb[119].mxu1  ;;  %v10987_v26 = vadd.f32 %v7722_v59, %v16048_v36  ;;  %8383 = vmatprep.subr.bf16.mxu0 %v12576_v28 }
 0x677   :  { %v10988_v18 = vadd.f32 %v7724_v50, %v16040_v52  ;;  %v10961_v63 = vadd.f32 %v7108_v46, %v16044_v6  ;;  %v7726_v3 = vpop.f32.mrb[59].mxu0 }
 0x678   :  { %v7759_v1 = vpack.c.bf16 %v10960_v10, %v10958_v33  ;;  %v10989_v19 = vadd.f32 %v7726_v3, %v16048_v36 }
 0x679   :  { %v7761_v42 = vpack.c.bf16 %v10988_v18, %v10986_v34  ;;  %v7760_v27 = vpack.c.bf16 %v10961_v63, %v10959_v4  ;;  %v12585_v63 = vld [vmem:[%s16865_s8 + $0x134] ss:$8 sps:$4 sm:$0xff]  }
 0x67a   :  { %v7762_v41 = vpack.c.bf16 %v10989_v19, %v10987_v26  ;;  %v12583_v19 = vld [vmem:[%s16865_s8 + $0x130] ss:$8 sps:$4 sm:$0xff]  }
 0x67b   :  { %v7112_v51 = vpop.f32.mrb[120].mxu1  ;;  %7815 = vmatprep.subr.bf16.mxu1 %v7760_v27 }
 0x67c   :  { %v7730_v32 = vpop.f32.mrb[60].mxu0  ;;  %v7114_v35 = vpop.f32.mrb[121].mxu1  ;;  %7816 = vmatpush1.bf16.msra.mxu1 %v7759_v1  ;;  %v10962_v37 = vadd.f32 %v7112_v51, %v16036_v21 }
 0x67d   :  { %v7732_v55 = vpop.f32.mrb[61].mxu0  ;;  %v7116_v39 = vpop.f32.mrb[122].mxu1  ;;  %v10990_v11 = vadd.f32 %v7730_v32, %v16040_v52  ;;  %v10963_v59 = vadd.f32 %v7114_v35, %v16044_v6  ;;  %v12591_v32 = vld [vmem:[%s16865_s8 + $0x154] ss:$8 sps:$4 sm:$0xff]  }
 0x67e   :  { %v10964_v12 = vadd.f32 %v7116_v39, %v16036_v21  ;;  %v7734_v16 = vpop.f32.mrb[62].mxu0  ;;  %v7118_v54 = vpop.f32.mrb[123].mxu1  ;;  %v10991_v10 = vadd.f32 %v7732_v55, %v16048_v36  ;;  %v12522_v21 = vld [vmem:[%s16864_s7] sm:$0xff]  }
 0x67f   :  { %v10992_v40 = vadd.f32 %v7734_v16, %v16040_v52  ;;  %v10965_v60 = vadd.f32 %v7118_v54, %v16044_v6  ;;  %v7736_v33 = vpop.f32.mrb[63].mxu0  ;;  %v12523_v52 = vld [vmem:[%s16864_s7 + $0x8] sm:$0xff]   ;;  %v12524_v6 = vld [vmem:[%s16864_s7 + $0x10] sm:$0xff]  }
 0x680   :  { %v7763_v50 = vpack.c.bf16 %v10964_v12, %v10962_v37  ;;  %v10993_v46 = vadd.f32 %v7736_v33, %v16048_v36  ;;  %v12525_v36 = vld [vmem:[%s16864_s7 + $0x18] ss:$0 sps:$4 sm:$0xff]   ;;  %v12594_v12 = vld [vmem:[%s16865_s8 + $0x164] ss:$8 sps:$4 sm:$0xff]   ;;  %v12592_v33 = vld [vmem:[%s16865_s8 + $0x160] ss:$8 sps:$4 sm:$0xff]  }
 0x681   :  { %v7765_v34 = vpack.c.bf16 %v10992_v40, %v10990_v11  ;;  %v7764_v4 = vpack.c.bf16 %v10965_v60, %v10963_v59  ;;  %v12589_v37 = vld [vmem:[%s16865_s8 + $0x150] ss:$8 sps:$4 sm:$0xff]  }
 0x682   :  { %v7766_v18 = vpack.c.bf16 %v10993_v46, %v10991_v10  ;;  %v12597_v10 = vld [vmem:[%s16865_s8 + $0x174] ss:$8 sps:$4 sm:$0xff]  }
 0x683   :  { %7817 = vmatprep.subr.bf16.mxu1 %v7764_v4 }
 0x684   :  { %7818 = vmatpush1.bf16.msra.mxu1 %v7763_v50  ;;  %v12595_v50 = vld [vmem:[%s16865_s8 + $0x170] ss:$8 sps:$4 sm:$0xff]  }
 0x685   :  { %7876 = vmatprep.subr.bf16.mxu1 %v7742_v30  ;;  %v12612_v30 = vld [vmem:[%s16867_s9 + $0x10] sm:$0xff]  }
 0x687   :  { %10459 = vmatmul.mubr.msk.bf16.vlgmr.msra.gmra.mrb[124].mxu1 %vm7792_vm3, %v12522_v21 }
 0x688   :  { %7877 = vmatpush1.bf16.msra.mxu1 %v7741_v0  ;;  %7847 = vmatprep.mubr.bf16.mxu1 %v16897_v48  ;;  %v12611_v0 = vld [vmem:[%s16867_s9 + $0x8] sm:$0xff]  }
 0x689   :  { %7878 = vmatprep.subr.bf16.mxu1 %v7746_v7  ;;  %v12618_v7 = vld [vmem:[%s16867_s9 + $0x40] sm:$0xff]  }
 0x68c   :  { %7879 = vmatpush1.bf16.msra.mxu1 %v7745_v24  ;;  %v12617_v24 = vld [vmem:[%s16867_s9 + $0x38] sm:$0xff]  }
 0x68d   :  { %7880 = vmatprep.subr.bf16.mxu1 %v7750_v22 }
 0x68f   :  { %10460 = vmatmul.mubr.msk.bf16.gmra.mrb[128].mxu1 %vm7792_vm3, %v12523_v52 }
 0x690   :  { %7881 = vmatpush1.bf16.msra.mxu1 %v7749_v8  ;;  %7857 = vmatprep.mubr.bf16.mxu1 %v16897_v48 }
 0x691   :  { %7882 = vmatprep.subr.bf16.mxu1 %v7754_v57 }
 0x694   :  { %7883 = vmatpush1.bf16.msra.mxu1 %v7753_v47  ;;  %v12579_v47 = vld [vmem:[%s16865_s8 + $0x114] ss:$8 sps:$4 sm:$0xff]  }
 0x695   :  { %7884 = vmatprep.subr.bf16.mxu1 %v7758_v15 }
 0x697   :  { %10461 = vmatmul.mubr.msk.bf16.gmra.mrb[132].mxu1 %vm7792_vm3, %v12524_v6 }
 0x698   :  { %7885 = vmatpush1.bf16.msra.mxu1 %v7757_v49  ;;  %7867 = vmatprep.mubr.bf16.mxu1 %v16897_v48  ;;  %v12580_v49 = vld [vmem:[%s16865_s8 + $0x120] ss:$8 sps:$4 sm:$0xff]  }
 0x699   :  { %7886 = vmatprep.subr.bf16.mxu1 %v7762_v41  ;;  %v12586_v41 = vld [vmem:[%s16865_s8 + $0x140] ss:$8 sps:$4 sm:$0xff]  }
 0x69c   :  { %7887 = vmatpush1.bf16.msra.mxu1 %v7761_v42 }
 0x69d   :  { %7888 = vmatprep.subr.bf16.mxu1 %v7766_v18 }
 0x69f   :  { %10462 = vmatmul.mubr.msk.bf16.gmra.mrb[136].mxu1 %vm7792_vm3, %v12525_v36 }
 0x6a0   :  { %7889 = vmatpush1.bf16.msra.mxu1 %v7765_v34  ;;  %7908 = vmatprep.mubr.bf16.mxu1 %v16897_v48  ;;  %v12600_v34 = vld [vmem:[%s16865_s8 + $0x184] ss:$8 sps:$4 sm:$0xff]  }
 0x6a1   :  { %8578 = vmatprep.subr.bf16.mxu1 %v16897_v48 }
 0x6a7   :  { %10463 = vmatmul.mubr.msk.bf16.vlgmr.msra.gmra.mrb[140].mxu1 %vm7792_vm3, %v12522_v21 }
 0x6a8   :  { %7918 = vmatprep.mubr.bf16.mxu1 %v16897_v48  ;;  %8579 = vmatpush1.bf16.msra.mxu1 %v12610_v2  ;;  %v12606_v2 = vld [vmem:[%s16865_s8 + $0x1a4] ss:$8 sps:$4 sm:$0xff]  }
 0x6a9   :  { %8580 = vmatprep.subr.bf16.mxu1 %v16897_v48 }
 0x6ac   :  { %8581 = vmatpush1.bf16.msra.mxu1 %v12611_v0 }
 0x6ad   :  { %8582 = vmatprep.subr.bf16.mxu1 %v16897_v48 }
 0x6af   :  { %10464 = vmatmul.mubr.msk.bf16.gmra.mrb[144].mxu1 %vm7792_vm3, %v12523_v52 }
 0x6b0   :  { %7928 = vmatprep.mubr.bf16.mxu1 %v16897_v48  ;;  %8583 = vmatpush1.bf16.msra.mxu1 %v12612_v30 }
 0x6b1   :  { %8584 = vmatprep.subr.bf16.mxu1 %v16897_v48 }
 0x6b4   :  { %8585 = vmatpush1.bf16.msra.mxu1 %v12613_v61 }
 0x6b5   :  { %8586 = vmatprep.subr.bf16.mxu1 %v16897_v48 }
 0x6b7   :  { %10465 = vmatmul.mubr.msk.bf16.gmra.mrb[148].mxu1 %vm7792_vm3, %v12524_v6  ;;  %v12598_v6 = vld [vmem:[%s16865_s8 + $0x180] ss:$8 sps:$4 sm:$0xff]  }
 0x6b8   :  { %7938 = vmatprep.mubr.bf16.mxu1 %v16897_v48  ;;  %8587 = vmatpush1.bf16.msra.mxu1 %v12614_v56 }
 0x6b9   :  { %8588 = vmatprep.subr.bf16.mxu1 %v16897_v48 }
 0x6bc   :  { %8589 = vmatpush1.bf16.msra.mxu1 %v12615_v44  ;;  %v12604_v44 = vld [vmem:[%s16865_s8 + $0x1a0] ss:$8 sps:$4 sm:$0xff]  }
 0x6bd   :  { %8590 = vmatprep.subr.bf16.mxu1 %v16897_v48 }
 0x6bf   :  { %10466 = vmatmul.mubr.msk.bf16.gmra.mrb[152].mxu1 %vm7792_vm3, %v12525_v36 }
 0x6c0   :  { %8591 = vmatpush1.bf16.msra.mxu1 %v12616_v17 }
 0x6c1   :  { %8592 = vmatprep.subr.bf16.mxu1 %v16897_v48 }
 0x6c4   :  { %8593 = vmatpush1.bf16.msra.mxu1 %v12617_v24  ;;  %v12609_v24 = vld [vmem:[%s16865_s8 + $0x1b4] ss:$8 sps:$4 sm:$0xff]  }
 0x6c5   :  { %8594 = vmatprep.subr.bf16.mxu1 %v16897_v48 }
 0x6c8   :  { %8595 = vmatpush1.bf16.msra.mxu1 %v12618_v7  ;;  %v12607_v7 = vld [vmem:[%s16865_s8 + $0x1b0] ss:$8 sps:$4 sm:$0xff]  }
 0x6c9   :  { %8596 = vmatprep.subr.bf16.mxu1 %v16897_v48 }
 0x6cc   :  { %8597 = vmatpush1.bf16.msra.mxu1 %v12619_v62 }
 0x6cd   :  { %8598 = vmatprep.subr.bf16.mxu1 %v16897_v48 }
 0x6d0   :  { %8599 = vmatpush1.bf16.msra.mxu1 %v12620_v13 }
 0x6d1   :  { %8600 = vmatprep.subr.bf16.mxu1 %v16897_v48 }
 0x6d4   :  { %8601 = vmatpush1.bf16.msra.mxu1 %v12621_v20 }
 0x6d5   :  { %8602 = vmatprep.subr.bf16.mxu1 %v16897_v48 }
 0x6d8   :  { %8603 = vmatpush1.bf16.msra.mxu1 %v12622_v14 }
 0x6d9   :  { %8604 = vmatprep.subr.bf16.mxu1 %v16897_v48 }
 0x75a   :  { %v7839_v8 = vpop.f32.mrb[124].mxu1 }
 0x75b   :  { %v7841_v22 = vpop.f32.mrb[125].mxu1 }
 0x75c   :  { %v7843_v58 = vpop.f32.mrb[126].mxu1 }
 0x75d   :  { %v7947_v38 = vpack.c.bf16 %v7843_v58, %v7839_v8  ;;  %v7845_v45 = vpop.f32.mrb[127].mxu1 }
 0x75e   :  { %v7948_v57 = vpack.c.bf16 %v7845_v45, %v7841_v22 }
 0x760   :  { %8344 = vmatprep.mubr.bf16.mxu0 %v7948_v57 }
 0x761   :  { %8345 = vmatmul.mubr.bf16.vlgmr.msra.gmra.mrb[64].mxu0 %v7947_v38 }
 0x762   :  { %8384 = vmatpush1.bf16.msra.mxu0 %v12574_v5  ;;  %v7849_v53 = vpop.f32.mrb[128].mxu1 }
 0x763   :  { %8385 = vmatprep.subr.bf16.mxu0 %v12579_v47  ;;  %v7851_v9 = vpop.f32.mrb[129].mxu1 }
 0x764   :  { %v7853_v15 = vpop.f32.mrb[130].mxu1 }
 0x765   :  { %v7951_v3 = vpack.c.bf16 %v7853_v15, %v7849_v53  ;;  %v7855_v26 = vpop.f32.mrb[131].mxu1 }
 0x766   :  { %8386 = vmatpush1.bf16.msra.mxu0 %v12577_v23  ;;  %v7952_v1 = vpack.c.bf16 %v7855_v26, %v7851_v9  ;;  %v12623_v23 = vld [vmem:[%s16867_s9 + $0x68] sm:$0xff]  }
 0x767   :  { %8387 = vmatprep.subr.bf16.mxu0 %v12582_v29  ;;  %8605 = vmatpush1.bf16.msra.mxu1 %v12623_v23  ;;  %v12661_v23 = vld [vmem:[%s16867_s9 + $0x198] sm:$0xff]  }
 0x768   :  { %8354 = vmatprep.mubr.bf16.mxu0 %v7952_v1  ;;  %8746 = vmatprep.subr.bf16.mxu1 %v16897_v48 }
 0x769   :  { %8355 = vmatmul.mubr.bf16.gmra.mrb[68].mxu0 %v7951_v3  ;;  %v12624_v3 = vld [vmem:[%s16867_s9 + $0x70] sm:$0xff]  }
 0x76a   :  { %8388 = vmatpush1.bf16.msra.mxu0 %v12580_v49  ;;  %v7859_v42 = vpop.f32.mrb[132].mxu1 }
 0x76b   :  { %8389 = vmatprep.subr.bf16.mxu0 %v12585_v63  ;;  %v7861_v27 = vpop.f32.mrb[133].mxu1 }
 0x76c   :  { %v7863_v51 = vpop.f32.mrb[134].mxu1 }
 0x76d   :  { %v7955_v35 = vpack.c.bf16 %v7863_v51, %v7859_v42  ;;  %v7865_v55 = vpop.f32.mrb[135].mxu1 }
 0x76e   :  { %8390 = vmatpush1.bf16.msra.mxu0 %v12583_v19  ;;  %v7956_v39 = vpack.c.bf16 %v7865_v55, %v7861_v27  ;;  %v12625_v19 = vld [vmem:[%s16867_s9 + $0x78] sm:$0xff]   ;;  %v12627_v55 = vld [vmem:[%s16867_s9 + $0x88] sm:$0xff]  }
 0x76f   :  { %8391 = vmatprep.subr.bf16.mxu0 %v12588_v31 }
 0x770   :  { %8364 = vmatprep.mubr.bf16.mxu0 %v7956_v39 }
 0x771   :  { %8365 = vmatmul.mubr.bf16.gmra.mrb[72].mxu0 %v7955_v35 }
 0x772   :  { %8392 = vmatpush1.bf16.msra.mxu0 %v12586_v41  ;;  %v7869_v16 = vpop.f32.mrb[136].mxu1 }
 0x773   :  { %8393 = vmatprep.subr.bf16.mxu0 %v12591_v32  ;;  %v7871_v54 = vpop.f32.mrb[137].mxu1  ;;  %v7959_v40 = vpack.c.bf16 %v7869_v16, %v7869_v16  ;;  %v12626_v32 = vld [vmem:[%s16867_s9 + $0x80] sm:$0xff]  }
 0x774   :  { %v7960_v11 = vpack.c.bf16 %v7871_v54, %v7871_v54  ;;  %v7873_v59 = vpop.f32.mrb[138].mxu1 }
 0x775   :  { %v7874_v60 = vpop.f32.mrb[139].mxu1 }
 0x776   :  { %8394 = vmatpush1.bf16.msra.mxu0 %v12589_v37  ;;  %8374 = vmatprep.mubr.bf16.mxu0 %v7960_v11  ;;  %v12628_v11 = vld [vmem:[%s16867_s9 + $0x90] sm:$0xff]  }
 0x777   :  { %8395 = vmatprep.subr.bf16.mxu0 %v12594_v12 }
 0x779   :  { %8375 = vmatmul.mubr.bf16.gmra.mrb[76].mxu0 %v7959_v40  ;;  %v12629_v40 = vld [vmem:[%s16867_s9 + $0x98] sm:$0xff]  }
 0x77a   :  { %8396 = vmatpush1.bf16.msra.mxu0 %v12592_v33  ;;  %v7910_v46 = vpop.f32.mrb[140].mxu1 }
 0x77b   :  { %8397 = vmatprep.subr.bf16.mxu0 %v12597_v10  ;;  %v7912_v4 = vpop.f32.mrb[141].mxu1 }
 0x77c   :  { %v7914_v18 = vpop.f32.mrb[142].mxu1 }
 0x77d   :  { %v7949_v21 = vpack.c.bf16 %v7914_v18, %v7910_v46  ;;  %v7916_v52 = vpop.f32.mrb[143].mxu1  ;;  %v12631_v46 = vld [vmem:[%s16867_s9 + $0xa8] sm:$0xff]   ;;  %v12634_v18 = vld [vmem:[%s16867_s9 + $0xc0] sm:$0xff]  }
 0x77e   :  { %8398 = vmatpush1.bf16.msra.mxu0 %v12595_v50  ;;  %v7950_v36 = vpack.c.bf16 %v7916_v52, %v7912_v4  ;;  %v12630_v50 = vld [vmem:[%s16867_s9 + $0xa0] sm:$0xff]   ;;  %v12633_v4 = vld [vmem:[%s16867_s9 + $0xb8] sm:$0xff]   ;;  %v12636_v52 = vld [vmem:[%s16867_s9 + $0xd0] sm:$0xff]  }
 0x77f   :  { %8399 = vmatprep.subr.bf16.mxu0 %v12600_v34  ;;  %v12632_v34 = vld [vmem:[%s16867_s9 + $0xb0] sm:$0xff]  }
 0x780   :  { %10523 = vmatprep.mubr.msk.bf16.mxu0 %vm8299_vm4, %v7950_v36  ;;  %v12638_v36 = vld [vmem:[%s16867_s9 + $0xe0] sm:$0xff]  }
 0x782   :  { %8400 = vmatpush1.bf16.msra.mxu0 %v12598_v6  ;;  %v7920_v28 = vpop.f32.mrb[144].mxu1  ;;  %v12637_v6 = vld [vmem:[%s16867_s9 + $0xd8] sm:$0xff]  }
 0x783   :  { %8401 = vmatprep.subr.bf16.mxu0 %v12603_v43  ;;  %v7922_v0 = vpop.f32.mrb[145].mxu1 }
 0x784   :  { %v7924_v30 = vpop.f32.mrb[146].mxu1 }
 0x785   :  { %v7953_v61 = vpack.c.bf16 %v7924_v30, %v7920_v28  ;;  %v7926_v56 = vpop.f32.mrb[147].mxu1  ;;  %v12640_v28 = vld [vmem:[%s16867_s9 + $0xf0] sm:$0xff]   ;;  %v12643_v30 = vld [vmem:[%s16867_s9 + $0x108] sm:$0xff]  }
 0x786   :  { %8402 = vmatpush1.bf16.msra.mxu0 %v12601_v25  ;;  %v7954_v17 = vpack.c.bf16 %v7926_v56, %v7922_v0  ;;  %v12639_v25 = vld [vmem:[%s16867_s9 + $0xe8] sm:$0xff]   ;;  %v12642_v0 = vld [vmem:[%s16867_s9 + $0x100] sm:$0xff]   ;;  %v12645_v56 = vld [vmem:[%s16867_s9 + $0x118] sm:$0xff]  }
 0x787   :  { %8403 = vmatprep.subr.bf16.mxu0 %v12606_v2  ;;  %v12641_v2 = vld [vmem:[%s16867_s9 + $0xf8] sm:$0xff]  }
 0x78a   :  { %8404 = vmatpush1.bf16.msra.mxu0 %v12604_v44  ;;  %v7930_v62 = vpop.f32.mrb[148].mxu1  ;;  %v12646_v44 = vld [vmem:[%s16867_s9 + $0x120] sm:$0xff]  }
 0x78b   :  { %8405 = vmatprep.subr.bf16.mxu0 %v12609_v24  ;;  %v7932_v13 = vpop.f32.mrb[149].mxu1  ;;  %v12648_v24 = vld [vmem:[%s16867_s9 + $0x130] sm:$0xff]  }
 0x78c   :  { %v7934_v20 = vpop.f32.mrb[150].mxu1 }
 0x78d   :  { %v7957_v14 = vpack.c.bf16 %v7934_v20, %v7930_v62  ;;  %v7936_v8 = vpop.f32.mrb[151].mxu1  ;;  %v12650_v62 = vld [vmem:[%s16867_s9 + $0x140] sm:$0xff]   ;;  %v12652_v20 = vld [vmem:[%s16867_s9 + $0x150] sm:$0xff]  }
 0x78e   :  { %8406 = vmatpush1.bf16.msra.mxu0 %v12607_v7  ;;  %v7958_v22 = vpack.c.bf16 %v7936_v8, %v7932_v13  ;;  %v12649_v7 = vld [vmem:[%s16867_s9 + $0x138] sm:$0xff]   ;;  %v12651_v13 = vld [vmem:[%s16867_s9 + $0x148] sm:$0xff]  }
 0x78f   :  { %v12653_v8 = vld [vmem:[%s16867_s9 + $0x158] sm:$0xff]  }
 0x791   :  { %8416 = vmatmul.mubr.bf16.vlgmr.msra.gmra.mrb[64].mxu0 %v7949_v21  ;;  %v12635_v21 = vld [vmem:[%s16867_s9 + $0xc8] sm:$0xff]  }
 0x792   :  { %10524 = vmatprep.mubr.msk.bf16.mxu0 %vm8299_vm4, %v7954_v17  ;;  %v7940_v58 = vpop.f32.mrb[152].mxu1  ;;  %v12647_v17 = vld [vmem:[%s16867_s9 + $0x128] sm:$0xff]  }
 0x793   :  { %v7942_v5 = vpop.f32.mrb[153].mxu1  ;;  %v7961_v57 = vpack.c.bf16 %v7940_v58, %v7940_v58  ;;  %v12655_v58 = vld [vmem:[%s16867_s9 + $0x168] sm:$0xff]  }
 0x794   :  { %v7944_v38 = vpop.f32.mrb[154].mxu1  ;;  %v7962_v47 = vpack.c.bf16 %v7942_v5, %v7942_v5  ;;  %v12656_v5 = vld [vmem:[%s16867_s9 + $0x170] sm:$0xff]  }
 0x795   :  { %v7945_v45 = vpop.f32.mrb[155].mxu1  ;;  %v12657_v38 = vld [vmem:[%s16867_s9 + $0x178] sm:$0xff]  }
 0x796   :  { %v12658_v45 = vld [vmem:[%s16867_s9 + $0x180] sm:$0xff]  }
 0x799   :  { %8426 = vmatmul.mubr.bf16.gmra.mrb[68].mxu0 %v7953_v61  ;;  %v12644_v61 = vld [vmem:[%s16867_s9 + $0x110] sm:$0xff]  }
 0x79a   :  { %10525 = vmatprep.mubr.msk.bf16.mxu0 %vm8299_vm4, %v7958_v22  ;;  %v12654_v22 = vld [vmem:[%s16867_s9 + $0x160] sm:$0xff]  }
 0x7a1   :  { %8436 = vmatmul.mubr.bf16.gmra.mrb[72].mxu0 %v7957_v14 }
 0x7a2   :  { %10526 = vmatprep.mubr.msk.bf16.mxu0 %vm8299_vm4, %v7962_v47  ;;  %v12659_v47 = vld [vmem:[%s16867_s9 + $0x188] sm:$0xff]  }
 0x7a9   :  { %8446 = vmatmul.mubr.bf16.gmra.mrb[76].mxu0 %v7961_v57  ;;  %v12660_v57 = vld [vmem:[%s16867_s9 + $0x190] sm:$0xff]  }
 0x864   :  { %v8417_v29 = vpop.f32.mrb[64].mxu0 }
 0x865   :  { %v8419_v53 = vpop.f32.mrb[65].mxu0 }
 0x866   :  { %v8421_v9 = vpop.f32.mrb[66].mxu0 }
 0x867   :  { %v16431_v49 = vpack.c.bf16 %v8421_v9, %v8417_v29  ;;  %v8423_v15 = vpop.f32.mrb[67].mxu0  ;;  %v12662_v29 = vld [vmem:[%s16867_s9 + $0x1a0] sm:$0xff]   ;;  %v12664_v9 = vld [vmem:[%s16867_s9 + $0x1b0] sm:$0xff]  }
 0x868   :  { %v8455_v63 = vpack.c.bf16 %v8423_v15, %v8419_v53  ;;  %v12663_v53 = vld [vmem:[%s16867_s9 + $0x1a8] sm:$0xff]   ;;  %v12666_v15 = vld [vmem:[%s16867_s9 + $0x1c0] sm:$0xff]  }
 0x869   :  { %v8656_v43 = vrot.slane %v16431_v49, 4 }
 0x86a   :  { %v8657_v26 = vrot.slane %v8455_v63, 4  ;;  %10541 = vmatprep.mubr.msk.bf16.mxu1 %vm1352_vm2, %v8455_v63 }
 0x86b   :  { %8611 = vmatmul.mubr.bf16.vlgmr.msra.gmra.mrb[156].mxu1 %v16431_v49  ;;  %v12665_v49 = vld [vmem:[%s16867_s9 + $0x1b8] sm:$0xff]  }
 0x86c   :  { %8747 = vmatpush1.bf16.msra.mxu1 %v12624_v3  ;;  %v8427_v1 = vpop.f32.mrb[68].mxu0  ;;  %10585 = vmatprep.mubr.msk.bf16.mxu1 %vm1352_vm2, %v8657_v26  ;;  %v12667_v3 = vld [vmem:[%s16867_s9 + $0x1c8] sm:$0xff]   ;;  %v12668_v26 = vld [vmem:[%s16867_s9 + $0x1d0] sm:$0xff]  }
 0x86d   :  { %v8429_v31 = vpop.f32.mrb[69].mxu0  ;;  %8748 = vmatprep.subr.bf16.mxu1 %v16897_v48 }
 0x86e   :  { %v8431_v42 = vpop.f32.mrb[70].mxu0 }
 0x86f   :  { %v16443_v27 = vpack.c.bf16 %v8431_v42, %v8427_v1  ;;  %v8433_v41 = vpop.f32.mrb[71].mxu0  ;;  %v12669_v1 = vld [vmem:[%s16867_s9 + $0x1d8] sm:$0xff]   ;;  %v12672_v42 = vld [vmem:[%s16867_s9 + $0x1f0] sm:$0xff]  }
 0x870   :  { %v16445_v51 = vpack.c.bf16 %v8433_v41, %v8429_v31  ;;  %8749 = vmatpush1.bf16.msra.mxu1 %v12625_v19  ;;  %v12670_v19 = vld [vmem:[%s16867_s9 + $0x1e0] sm:$0xff]   ;;  %v12671_v31 = vld [vmem:[%s16867_s9 + $0x1e8] sm:$0xff]  }
 0x871   :  { %8750 = vmatprep.subr.bf16.mxu1 %v16897_v48  ;;  %v8975_v63 = vrot.slane %v16443_v27, 4  ;;  %v12674_v41 = vld [vmem:[%s16867_s9 + $0x200] sm:$0xff]  }
 0x872   :  { %v8976_v14 = vrot.slane %v16445_v51, 4 }
 0x874   :  { %8751 = vmatpush1.bf16.msra.mxu1 %v12626_v32  ;;  %v8437_v35 = vpop.f32.mrb[72].mxu0  ;;  %v12676_v32 = vld [vmem:[%s16867_s9 + $0x210] sm:$0xff]  }
 0x875   :  { %v8439_v39 = vpop.f32.mrb[73].mxu0  ;;  %8752 = vmatprep.subr.bf16.mxu1 %v16897_v48 }
 0x876   :  { %v8441_v37 = vpop.f32.mrb[74].mxu0 }
 0x877   :  { %v16455_v12 = vpack.c.bf16 %v8441_v37, %v8437_v35  ;;  %v8443_v16 = vpop.f32.mrb[75].mxu0  ;;  %v12677_v35 = vld [vmem:[%s16867_s9 + $0x218] sm:$0xff]   ;;  %v9583_v37 = vld [vmem:[%s16868_s11 + $0x8] sm:$0xff] }
 0x878   :  { %v16457_v54 = vpack.c.bf16 %v8443_v16, %v8439_v39  ;;  %8753 = vmatpush1.bf16.msra.mxu1 %v12627_v55  ;;  %v12726_v55 = vmov 0.0|0.0   ;;  %v9582_v39 = vld [vmem:[%s16868_s11] sm:$0xff]  ;;  %v9584_v16 = vld [vmem:[%s16868_s11 + $0x10] sm:$0xff] }
 0x879   :  { %8754 = vmatprep.subr.bf16.mxu1 %v16897_v48  ;;  %10914 = vmatprep.subr.bf16.mxu0 %v12726_v55 }
 0x87c   :  { %8755 = vmatpush1.bf16.msra.mxu1 %v12628_v11  ;;  %v16463_v59 = vpop.f32.mrb[76].mxu0  ;;  %v10915_v11 = vpack.c.bf16 %v9583_v37, %v9582_v39  ;;  %v10801_v37 = vld [vmem:[%s16870_s12] ss:$0 sm:$0xff] }
 0x87d   :  { %v16468_v60 = vpop.f32.mrb[77].mxu0  ;;  %8756 = vmatprep.subr.bf16.mxu1 %v16897_v48 }
 0x87e   :  { %v8451_v33 = vpop.f32.mrb[78].mxu0  ;;  %10916 = vmatpush3.bf16.msra.mxu0 %v10915_v11 }
 0x87f   :  { %v8452_v10 = vpop.f32.mrb[79].mxu0  ;;  %10917 = vmatprep.subr.bf16.mxu0 %v12726_v55 }
 0x880   :  { %8757 = vmatpush1.bf16.msra.mxu1 %v12629_v40  ;;  %v9585_v40 = vld [vmem:[%s16868_s11 + $0x18] sm:$0xff]  ;;  %v12678_v10 = vld [vmem:[%s16867_s9 + $0x220] sm:$0xff]  }
 0x881   :  { %8758 = vmatprep.subr.bf16.mxu1 %v16897_v48  ;;  %v10918_v33 = vpack.c.bf16 %v9585_v40, %v9584_v16 }
 0x883   :  { %10919 = vmatpush3.bf16.msra.mxu0 %v10918_v33 }
 0x884   :  { %8759 = vmatpush1.bf16.msra.mxu1 %v12630_v50  ;;  %v9586_v50 = vld [vmem:[%s16868_s11 + $0x20] sm:$0xff]  ;;  %10920 = vmatprep.subr.bf16.mxu0 %v12726_v55 }
 0x885   :  { %8760 = vmatprep.subr.bf16.mxu1 %v16897_v48 }
 0x888   :  { %8761 = vmatpush1.bf16.msra.mxu1 %v12631_v46  ;;  %v9587_v46 = vld [vmem:[%s16868_s11 + $0x28] sm:$0xff] }
 0x889   :  { %8762 = vmatprep.subr.bf16.mxu1 %v16897_v48 }
 0x88c   :  { %8763 = vmatpush1.bf16.msra.mxu1 %v12632_v34  ;;  %v10921_v34 = vpack.c.bf16 %v9587_v46, %v9586_v50 }
 0x88d   :  { %8764 = vmatprep.subr.bf16.mxu1 %v16897_v48 }
 0x88e   :  { %10922 = vmatpush3.bf16.msra.mxu0 %v10921_v34 }
 0x88f   :  { %10923 = vmatprep.subr.bf16.mxu0 %v12726_v55 }
 0x890   :  { %8765 = vmatpush1.bf16.msra.mxu1 %v12633_v4  ;;  %v12679_v4 = vld [vmem:[%s16867_s9 + $0x228] sm:$0xff]  }
 0x891   :  { %8766 = vmatprep.subr.bf16.mxu1 %v16897_v48 }
 0x894   :  { %8767 = vmatpush1.bf16.msra.mxu1 %v12634_v18  ;;  %v9588_v18 = vld [vmem:[%s16868_s11 + $0x30] sm:$0xff] }
 0x895   :  { %8768 = vmatprep.subr.bf16.mxu1 %v16897_v48 }
 0x898   :  { %8769 = vmatpush1.bf16.msra.mxu1 %v12635_v21  ;;  %v9589_v21 = vld [vmem:[%s16868_s11 + $0x38] sm:$0xff] }
 0x899   :  { %8770 = vmatprep.subr.bf16.mxu1 %v16897_v48 }
 0x89c   :  { %8771 = vmatpush1.bf16.msra.mxu1 %v12636_v52  ;;  %v10924_v52 = vpack.c.bf16 %v9589_v21, %v9588_v18 }
 0x89d   :  { %8772 = vmatprep.subr.bf16.mxu1 %v16897_v48 }
 0x89e   :  { %10925 = vmatpush3.bf16.msra.mxu0 %v10924_v52 }
 0x89f   :  { %10926 = vmatprep.subr.bf16.mxu0 %v12726_v55 }
 0x8a0   :  { %8773 = vmatpush1.bf16.msra.mxu1 %v12637_v6  ;;  %v12680_v6 = vld [vmem:[%s16867_s9 + $0x230] sm:$0xff]  }
 0x8a1   :  { %8903 = vmatprep.subr.bf16.mxu1 %v16897_v48 }
 0x8a3   :  { %8779 = vmatmul.mubr.bf16.vlgmr.msra.gmra.mrb[156].mxu1 %v8656_v43  ;;  %v9591_v43 = vld [vmem:[%s16868_s11 + $0x48] sm:$0xff] }
 0x8a4   :  { %8904 = vmatpush1.bf16.msra.mxu1 %v12638_v36  ;;  %10628 = vmatprep.mubr.msk.bf16.mxu1 %vm1352_vm2, %v16445_v51  ;;  %v12675_v51 = vld [vmem:[%s16867_s9 + $0x208] sm:$0xff]   ;;  %v9590_v36 = vld [vmem:[%s16868_s11 + $0x40] sm:$0xff] }
 0x8a5   :  { %8905 = vmatprep.subr.bf16.mxu1 %v16897_v48 }
 0x8a8   :  { %8906 = vmatpush1.bf16.msra.mxu1 %v12639_v25  ;;  %v9295_v25 = vrot.slane %v16457_v54, 4 }
 0x8a9   :  { %8907 = vmatprep.subr.bf16.mxu1 %v16897_v48 }
 0x8ac   :  { %8908 = vmatpush1.bf16.msra.mxu1 %v12640_v28  ;;  %v10927_v28 = vpack.c.bf16 %v9591_v43, %v9590_v36 }
 0x8ad   :  { %8909 = vmatprep.subr.bf16.mxu1 %v16897_v48 }
 0x8ae   :  { %10928 = vmatpush3.bf16.msra.mxu0 %v10927_v28 }
 0x8af   :  { %10929 = vmatprep.subr.bf16.mxu0 %v12726_v55 }
 0x8b0   :  { %8910 = vmatpush1.bf16.msra.mxu1 %v12641_v2  ;;  %v12681_v2 = vld [vmem:[%s16867_s9 + $0x238] sm:$0xff]  }
 0x8b1   :  { %8911 = vmatprep.subr.bf16.mxu1 %v16897_v48 }
 0x8b4   :  { %8912 = vmatpush1.bf16.msra.mxu1 %v12642_v0  ;;  %v9592_v0 = vld [vmem:[%s16868_s11 + $0x50] sm:$0xff] }
 0x8b5   :  { %8913 = vmatprep.subr.bf16.mxu1 %v16897_v48 }
 0x8b8   :  { %8914 = vmatpush1.bf16.msra.mxu1 %v12643_v30  ;;  %v9593_v30 = vld [vmem:[%s16868_s11 + $0x58] sm:$0xff] }
 0x8b9   :  { %8915 = vmatprep.subr.bf16.mxu1 %v16897_v48 }
 0x8bc   :  { %8916 = vmatpush1.bf16.msra.mxu1 %v12644_v61  ;;  %v12682_v61 = vld [vmem:[%s16867_s9 + $0x240] sm:$0xff]  }
 0x8bd   :  { %8917 = vmatprep.subr.bf16.mxu1 %v16897_v48 }
 0x8c0   :  { %8918 = vmatpush1.bf16.msra.mxu1 %v12645_v56  ;;  %v9594_v56 = vld [vmem:[%s16868_s11 + $0x60] sm:$0xff] }
 0x8c1   :  { %8919 = vmatprep.subr.bf16.mxu1 %v16897_v48 }
 0x8c4   :  { %8920 = vmatpush1.bf16.msra.mxu1 %v12646_v44  ;;  %v9595_v44 = vld [vmem:[%s16868_s11 + $0x68] sm:$0xff] }
 0x8c5   :  { %8921 = vmatprep.subr.bf16.mxu1 %v16897_v48 }
 0x8c8   :  { %8922 = vmatpush1.bf16.msra.mxu1 %v12647_v17  ;;  %v10933_v17 = vpack.c.bf16 %v9595_v44, %v9594_v56 }
 0x8c9   :  { %8923 = vmatprep.subr.bf16.mxu1 %v16897_v48 }
 0x8cc   :  { %8924 = vmatpush1.bf16.msra.mxu1 %v12648_v24  ;;  %v12683_v24 = vld [vmem:[%s16867_s9 + $0x248] sm:$0xff]  }
 0x8cd   :  { %8925 = vmatprep.subr.bf16.mxu1 %v16897_v48 }
 0x8d0   :  { %8926 = vmatpush1.bf16.msra.mxu1 %v12649_v7  ;;  %v12684_v7 = vld [vmem:[%s16867_s9 + $0x250] sm:$0xff]  }
 0x8d1   :  { %8927 = vmatprep.subr.bf16.mxu1 %v16897_v48 }
 0x8d4   :  { %8928 = vmatpush1.bf16.msra.mxu1 %v12650_v62  ;;  %v12685_v62 = vld [vmem:[%s16867_s9 + $0x258] sm:$0xff]  }
 0x8d5   :  { %8929 = vmatprep.subr.bf16.mxu1 %v16897_v48 }
 0x8d8   :  { %8930 = vmatpush1.bf16.msra.mxu1 %v12651_v13  ;;  %v12686_v13 = vld [vmem:[%s16867_s9 + $0x260] sm:$0xff]  }
 0x8d9   :  { %9065 = vmatprep.subr.bf16.mxu1 %v16897_v48 }
 0x8db   :  { %8936 = vmatmul.mubr.bf16.vlgmr.msra.gmra.mrb[156].mxu1 %v16443_v27  ;;  %v12673_v27 = vld [vmem:[%s16867_s9 + $0x1f8] sm:$0xff]  }
 0x8dc   :  { %9066 = vmatpush1.bf16.msra.mxu1 %v12652_v20  ;;  %10671 = vmatprep.mubr.msk.bf16.mxu1 %vm1352_vm2, %v8976_v14  ;;  %v12687_v20 = vld [vmem:[%s16867_s9 + $0x268] sm:$0xff]   ;;  %v12688_v14 = vld [vmem:[%s16867_s9 + $0x270] sm:$0xff]  }
 0x8dd   :  { %9067 = vmatprep.subr.bf16.mxu1 %v16897_v48 }
 0x8e0   :  { %9068 = vmatpush1.bf16.msra.mxu1 %v12653_v8  ;;  %v12689_v8 = vld [vmem:[%s16867_s9 + $0x278] sm:$0xff]  }
 0x8e1   :  { %9069 = vmatprep.subr.bf16.mxu1 %v16897_v48 }
 0x8e4   :  { %9070 = vmatpush1.bf16.msra.mxu1 %v12654_v22  ;;  %v12690_v22 = vld [vmem:[%s16867_s9 + $0x280] sm:$0xff]  }
 0x8e5   :  { %9071 = vmatprep.subr.bf16.mxu1 %v16897_v48 }
 0x8e8   :  { %9072 = vmatpush1.bf16.msra.mxu1 %v12655_v58  ;;  %v12691_v58 = vld [vmem:[%s16867_s9 + $0x288] sm:$0xff]  }
 0x8e9   :  { %9073 = vmatprep.subr.bf16.mxu1 %v16897_v48 }
 0x8ec   :  { %9074 = vmatpush1.bf16.msra.mxu1 %v12656_v5  ;;  %v12692_v5 = vld [vmem:[%s16867_s9 + $0x290] sm:$0xff]  }
 0x8ed   :  { %9075 = vmatprep.subr.bf16.mxu1 %v16897_v48 }
 0x8f0   :  { %9076 = vmatpush1.bf16.msra.mxu1 %v12657_v38  ;;  %v12693_v38 = vld [vmem:[%s16867_s9 + $0x298] sm:$0xff]  }
 0x8f1   :  { %9077 = vmatprep.subr.bf16.mxu1 %v16897_v48 }
 0x8f4   :  { %9078 = vmatpush1.bf16.msra.mxu1 %v12658_v45  ;;  %v12694_v45 = vld [vmem:[%s16867_s9 + $0x2a0] sm:$0xff]  }
 0x8f5   :  { %9079 = vmatprep.subr.bf16.mxu1 %v16897_v48 }
 0x8f8   :  { %9080 = vmatpush1.bf16.msra.mxu1 %v12659_v47  ;;  %v9294_v47 = vrot.slane %v16455_v12, 4 }
 0x8f9   :  { %9081 = vmatprep.subr.bf16.mxu1 %v16897_v48 }
 0x8fc   :  { %9082 = vmatpush1.bf16.msra.mxu1 %v12660_v57  ;;  %v8461_v57 = vpack.c.bf16 %v16468_v60, %v16468_v60  ;;  %v12697_v60 = vld [vmem:[%s16867_s9 + $0x2b8] sm:$0xff]  }
 0x8fd   :  { %9083 = vmatprep.subr.bf16.mxu1 %v16897_v48 }
 0x900   :  { %9084 = vmatpush1.bf16.msra.mxu1 %v12661_v23  ;;  %v12695_v23 = vld [vmem:[%s16867_s9 + $0x2a8] sm:$0xff]  }
 0x901   :  { %9085 = vmatprep.subr.bf16.mxu1 %v16897_v48 }
 0x904   :  { %9086 = vmatpush1.bf16.msra.mxu1 %v12662_v29  ;;  %v12698_v29 = vld [vmem:[%s16867_s9 + $0x2c0] sm:$0xff]  }
 0x905   :  { %9087 = vmatprep.subr.bf16.mxu1 %v16897_v48 }
 0x908   :  { %9088 = vmatpush1.bf16.msra.mxu1 %v12663_v53  ;;  %v12699_v53 = vld [vmem:[%s16867_s9 + $0x2c8] sm:$0xff]  }
 0x909   :  { %9089 = vmatprep.subr.bf16.mxu1 %v16897_v48 }
 0x90c   :  { %9090 = vmatpush1.bf16.msra.mxu1 %v12664_v9  ;;  %v12700_v9 = vld [vmem:[%s16867_s9 + $0x2d0] sm:$0xff]  }
 0x90d   :  { %9091 = vmatprep.subr.bf16.mxu1 %v16897_v48 }
 0x910   :  { %9092 = vmatpush1.bf16.msra.mxu1 %v12665_v49  ;;  %v12701_v49 = vld [vmem:[%s16867_s9 + $0x2d8] sm:$0xff]  }
 0x911   :  { %9222 = vmatprep.subr.bf16.mxu1 %v16897_v48 }
 0x913   :  { %9098 = vmatmul.mubr.bf16.vlgmr.msra.gmra.mrb[156].mxu1 %v8975_v63  ;;  %v12703_v63 = vld [vmem:[%s16867_s9 + $0x2e8] sm:$0xff]  }
 0x914   :  { %9223 = vmatpush1.bf16.msra.mxu1 %v12666_v15  ;;  %10714 = vmatprep.mubr.msk.bf16.mxu1 %vm1352_vm2, %v16457_v54  ;;  %v10930_v54 = vpack.c.bf16 %v9593_v30, %v9592_v0  ;;  %v12702_v15 = vld [vmem:[%s16867_s9 + $0x2e0] sm:$0xff]  }
 0x915   :  { %9224 = vmatprep.subr.bf16.mxu1 %v16897_v48 }
 0x916   :  { %10931 = vmatpush3.bf16.msra.mxu0 %v10930_v54 }
 0x917   :  { %10932 = vmatprep.subr.bf16.mxu0 %v12726_v55 }
 0x918   :  { %9225 = vmatpush1.bf16.msra.mxu1 %v12667_v3  ;;  %v12704_v3 = vld [vmem:[%s16867_s9 + $0x2f0] sm:$0xff]  }
 0x919   :  { %9226 = vmatprep.subr.bf16.mxu1 %v16897_v48 }
 0x91a   :  { %10934 = vmatpush3.bf16.msra.mxu0 %v10933_v17 }
 0x91b   :  { %10935 = vmatprep.subr.bf16.mxu0 %v12726_v55 }
 0x91c   :  { %9227 = vmatpush1.bf16.msra.mxu1 %v12668_v26  ;;  %v12705_v26 = vld [vmem:[%s16867_s9 + $0x2f8] sm:$0xff]  }
 0x91d   :  { %9228 = vmatprep.subr.bf16.mxu1 %v16897_v48 }
 0x920   :  { %9229 = vmatpush1.bf16.msra.mxu1 %v12669_v1  ;;  %v12706_v1 = vld [vmem:[%s16867_s9 + $0x300] sm:$0xff]  }
 0x921   :  { %9230 = vmatprep.subr.bf16.mxu1 %v16897_v48 }
 0x924   :  { %9231 = vmatpush1.bf16.msra.mxu1 %v12670_v19  ;;  %v12707_v19 = vld [vmem:[%s16867_s9 + $0x308] sm:$0xff]  }
 0x925   :  { %9232 = vmatprep.subr.bf16.mxu1 %v16897_v48 }
 0x928   :  { %9233 = vmatpush1.bf16.msra.mxu1 %v12671_v31  ;;  %v8460_v31 = vpack.c.bf16 %v16463_v59, %v16463_v59 }
 0x929   :  { %9234 = vmatprep.subr.bf16.mxu1 %v16897_v48 }
 0x92c   :  { %9235 = vmatpush1.bf16.msra.mxu1 %v12672_v42  ;;  %v9596_v42 = vld [vmem:[%s16868_s11 + $0x70] sm:$0xff] }
 0x92d   :  { %9236 = vmatprep.subr.bf16.mxu1 %v16897_v48 }
 0x930   :  { %9237 = vmatpush1.bf16.msra.mxu1 %v12673_v27  ;;  %v9597_v27 = vld [vmem:[%s16868_s11 + $0x78] sm:$0xff] }
 0x931   :  { %9238 = vmatprep.subr.bf16.mxu1 %v16897_v48 }
 0x934   :  { %9239 = vmatpush1.bf16.msra.mxu1 %v12674_v41  ;;  %v10936_v41 = vpack.c.bf16 %v9597_v27, %v9596_v42 }
 0x935   :  { %9240 = vmatprep.subr.bf16.mxu1 %v16897_v48 }
 0x936   :  { %10937 = vmatpush3.bf16.msra.mxu0 %v10936_v41 }
 0x938   :  { %9241 = vmatpush1.bf16.msra.mxu1 %v12675_v51  ;;  %v12728_v51 = vmov 0.0  }
 0x939   :  { %9242 = vmatprep.subr.bf16.mxu1 %v16897_v48  ;;  %10911 = vmatprep.mubr.msk.f32.mxu0 %vm12727_vm5, %v12728_v51 }
 0x93c   :  { %9243 = vmatpush1.bf16.msra.mxu1 %v12676_v32 }
 0x93d   :  { %9244 = vmatprep.subr.bf16.mxu1 %v16897_v48 }
 0x940   :  { %9245 = vmatpush1.bf16.msra.mxu1 %v12677_v35 }
 0x941   :  { %9246 = vmatprep.subr.bf16.mxu1 %v16897_v48 }
 0x944   :  { %9247 = vmatpush1.bf16.msra.mxu1 %v12678_v10 }
 0x945   :  { %9248 = vmatprep.subr.bf16.mxu1 %v16897_v48 }
 0x948   :  { %9249 = vmatpush1.bf16.msra.mxu1 %v12679_v4 }
 0x949   :  { %9384 = vmatprep.subr.bf16.mxu1 %v16897_v48 }
 0x94b   :  { %9255 = vmatmul.mubr.bf16.vlgmr.msra.gmra.mrb[156].mxu1 %v16455_v12  ;;  %v12696_v12 = vld [vmem:[%s16867_s9 + $0x2b0] sm:$0xff]  }
 0x94c   :  { %9385 = vmatpush1.bf16.msra.mxu1 %v12680_v6  ;;  %10757 = vmatprep.mubr.msk.bf16.mxu1 %vm1352_vm2, %v9295_v25 }
 0x94d   :  { %9386 = vmatprep.subr.bf16.mxu1 %v16897_v48 }
 0x950   :  { %9387 = vmatpush1.bf16.msra.mxu1 %v12681_v2 }
 0x951   :  { %9388 = vmatprep.subr.bf16.mxu1 %v16897_v48 }
 0x954   :  { %9389 = vmatpush1.bf16.msra.mxu1 %v12682_v61 }
 0x955   :  { %9390 = vmatprep.subr.bf16.mxu1 %v16897_v48 }
 0x958   :  { %9391 = vmatpush1.bf16.msra.mxu1 %v12683_v24 }
 0x959   :  { %9392 = vmatprep.subr.bf16.mxu1 %v16897_v48 }
 0x95c   :  { %9393 = vmatpush1.bf16.msra.mxu1 %v12684_v7 }
 0x95d   :  { %9394 = vmatprep.subr.bf16.mxu1 %v16897_v48 }
 0x960   :  { %9395 = vmatpush1.bf16.msra.mxu1 %v12685_v62 }
 0x961   :  { %9396 = vmatprep.subr.bf16.mxu1 %v16897_v48 }
 0x964   :  { %9397 = vmatpush1.bf16.msra.mxu1 %v12686_v13 }
 0x965   :  { %9398 = vmatprep.subr.bf16.mxu1 %v16897_v48 }
 0x968   :  { %9399 = vmatpush1.bf16.msra.mxu1 %v12687_v20 }
 0x969   :  { %9400 = vmatprep.subr.bf16.mxu1 %v16897_v48 }
 0x96c   :  { %9401 = vmatpush1.bf16.msra.mxu1 %v12688_v14 }
 0x96d   :  { %9402 = vmatprep.subr.bf16.mxu1 %v16897_v48 }
 0x970   :  { %9403 = vmatpush1.bf16.msra.mxu1 %v12689_v8 }
 0x971   :  { %9404 = vmatprep.subr.bf16.mxu1 %v16897_v48 }
 0x974   :  { %9405 = vmatpush1.bf16.msra.mxu1 %v12690_v22 }
 0x975   :  { %9406 = vmatprep.subr.bf16.mxu1 %v16897_v48 }
 0x978   :  { %9407 = vmatpush1.bf16.msra.mxu1 %v12691_v58 }
 0x979   :  { %9408 = vmatprep.subr.bf16.mxu1 %v16897_v48 }
 0x97c   :  { %9409 = vmatpush1.bf16.msra.mxu1 %v12692_v5 }
 0x97d   :  { %9410 = vmatprep.subr.bf16.mxu1 %v16897_v48 }
 0x980   :  { %9411 = vmatpush1.bf16.msra.mxu1 %v12693_v38 }
 0x981   :  { %9541 = vmatprep.subr.bf16.mxu1 %v16897_v48 }
 0x983   :  { %9417 = vmatmul.mubr.bf16.vlgmr.msra.gmra.mrb[156].mxu1 %v9294_v47 }
 0x984   :  { %9542 = vmatpush1.bf16.msra.mxu1 %v12694_v45  ;;  %10800 = vmatprep.mubr.msk.bf16.mxu1 %vm1352_vm2, %v8461_v57 }
 0x985   :  { %9543 = vmatprep.subr.bf16.mxu1 %v16897_v48 }
 0x988   :  { %9544 = vmatpush1.bf16.msra.mxu1 %v12695_v23 }
 0x989   :  { %9545 = vmatprep.subr.bf16.mxu1 %v16897_v48 }
 0x98c   :  { %9546 = vmatpush1.bf16.msra.mxu1 %v12696_v12 }
 0x98d   :  { %9547 = vmatprep.subr.bf16.mxu1 %v16897_v48 }
 0x990   :  { %9548 = vmatpush1.bf16.msra.mxu1 %v12697_v60 }
 0x991   :  { %9549 = vmatprep.subr.bf16.mxu1 %v16897_v48 }
 0x994   :  { %9550 = vmatpush1.bf16.msra.mxu1 %v12698_v29 }
 0x995   :  { %9551 = vmatprep.subr.bf16.mxu1 %v16897_v48 }
 0x998   :  { %9552 = vmatpush1.bf16.msra.mxu1 %v12699_v53 }
 0x999   :  { %9553 = vmatprep.subr.bf16.mxu1 %v16897_v48 }
 0x99c   :  { %9554 = vmatpush1.bf16.msra.mxu1 %v12700_v9 }
 0x99d   :  { %9555 = vmatprep.subr.bf16.mxu1 %v16897_v48 }
 0x9a0   :  { %9556 = vmatpush1.bf16.msra.mxu1 %v12701_v49 }
 0x9a1   :  { %9557 = vmatprep.subr.bf16.mxu1 %v16897_v48 }
 0x9a4   :  { %9558 = vmatpush1.bf16.msra.mxu1 %v12702_v15 }
 0x9a5   :  { %9559 = vmatprep.subr.bf16.mxu1 %v16897_v48 }
 0x9a8   :  { %9560 = vmatpush1.bf16.msra.mxu1 %v12703_v63 }
 0x9a9   :  { %9561 = vmatprep.subr.bf16.mxu1 %v16897_v48 }
 0x9ac   :  { %9562 = vmatpush1.bf16.msra.mxu1 %v12704_v3 }
 0x9ad   :  { %9563 = vmatprep.subr.bf16.mxu1 %v16897_v48 }
 0x9b0   :  { %9564 = vmatpush1.bf16.msra.mxu1 %v12705_v26 }
 0x9b1   :  { %9565 = vmatprep.subr.bf16.mxu1 %v16897_v48 }
 0x9b4   :  { %9566 = vmatpush1.bf16.msra.mxu1 %v12706_v1 }
 0x9b5   :  { %9567 = vmatprep.subr.bf16.mxu1 %v16897_v48  ;;  %v10542_v48 = vld [vmem:[%s16869_s10] ss:$0 sm:$0xff] }
 0x9b8   :  { %9568 = vmatpush1.bf16.msra.mxu1 %v12707_v19 }
 0x9bb   :  { %9574 = vmatmul.mubr.bf16.vlgmr.msra.gmra.mrb[156].mxu1 %v8460_v31 }
 0xa8e   :  { %v9575_v32 = vpop.f32.mrb[156].mxu1 }
 0xa8f   :  { %v10994_v59 = vadd.f32 %v10542_v48, %v9575_v32  ;;  %v9577_v35 = vpop.f32.mrb[157].mxu1 }
 0xa90   :  { %v9578_v55 = vpop.f32.mrb[158].mxu1 }
 0xa91   :  { %v9579_v39 = vpop.f32.mrb[159].mxu1  ;;  %10912 = vmatmul.mubr.f32.vlgmr.msra.gmra.mrb[80].mxu0 %v10994_v59 }
 0xb64   :  { %v9671_v16 = vpop.f32.mrb[80].mxu0 }
 0xb65   :  { %v9672_v11 = vadd.f32 %v10801_v37, %v9671_v16  ;;  %v10913_v40 = vpop.f32.mrb[81].mxu0 }
 0xb67   :  { %v9675_v33 = vmul.f32 0.5, %v9672_v11 }
 0xb69   :  { %vm9677_vm6 = vcmp.ge.f32.partialorder %v9675_v33, 1.0 }
 0xb6a   :  { %v9678_v10 = vsel %vm9677_vm6, 1.0, %v12728_v51 }
 0xb6b   :  { %9679 = vst [vmem:[%s16871_s13] sm:$0xff] %v9678_v10 }

</bundles_post_ra>
